<compile_context>
chip_gen: v7x
topology: tpu7x:2x2x1
jax: 0.10.0
libtpu: 0.0.40
codegen_flags: <defaults>
</compile_context>

<pallas_src>
import jax
import jax.numpy as jnp
from jax import lax
from jax.experimental import pallas as pl
from jax.experimental.pallas import tpu as pltpu

NUM_LAYERS = 2


def decoder_kernel(pre0_ref, h0_ref, c0_ref, ctx_ref,
                   whh0_ref, wih1_ref, whh1_ref, b1_ref,
                   wio_ref, bio_ref, woutc_ref, sbias_ref,
                   out_ref, attn_ref, hT_ref, cT_ref):
    T = pre0_ref.shape[0]
    H = pre0_ref.shape[2] // 4
    outp = woutc_ref.shape[1]          # lane-padded output width (multiple of 128)

    # Load constants once; everything is resident in VMEM for the whole decode.
    ctx = ctx_ref[...]                 # [B, L_pad, H] bf16 (zero padded along L)
    whh0 = whh0_ref[...]               # [H, 4H]  bf16
    wih1 = wih1_ref[...]               # [H, 4H]  bf16
    whh1 = whh1_ref[...]               # [H, 4H]  bf16
    b1 = b1_ref[...]                   # [B, 4H]  f32  (pre-broadcast in wrapper)
    wio = wio_ref[...]                 # [H, outp + H] bf16 = [wouthT(padded) | winT]
    bio = bio_ref[...]                 # [B, outp + H] f32  = [bout(padded)   | b_in]
    woutc = woutc_ref[...]             # [H, outp] bf16 (lane padded with zeros)
    sbias = sbias_ref[...]             # [B, L_pad] f32 (0 for real positions, -1e30 pad)
    wdt = whh0.dtype                   # bf16 compute dtype for MXU operands

    def lstm_elementwise(gates, c_prev):
        # One full-vreg sigmoid + one full-vreg tanh (2 EUP pushes), then lane-slice.
        sig = jax.nn.sigmoid(gates)                  # [B, 4H]
        th = jnp.tanh(gates)                         # [B, 4H]
        i_g = sig[:, 0:H]
        f_g = sig[:, H:2 * H]
        g_g = th[:, 2 * H:3 * H]
        o_g = sig[:, 3 * H:4 * H]
        c_new = f_g * c_prev + i_g * g_g
        h_new = (o_g * jnp.tanh(c_new)).astype(wdt)  # h carried in bf16 (perf rec)
        return h_new, c_new

    # Initial carry: recurrent contributions r0/r1 precomputed; h in bf16, c in f32.
    h0b = h0_ref[0].astype(wdt)
    h1b = h0_ref[1].astype(wdt)
    r0_init = jnp.dot(h0b, whh0, preferred_element_type=jnp.float32)
    r1_init = jnp.dot(h1b, whh1, preferred_element_type=jnp.float32) + b1
    init = (h0b, c0_ref[0], h1b, c0_ref[1], r0_init, r1_init)

    def step(t, carry):
        h0c, c0, h1c, c1, r0, r1 = carry

        # ---- layer 0: non-recurrent input projection was hoisted out (pre0) ----
        g0 = pre0_ref[t] + r0                                              # [B, 4H]
        h0n, c0n = lstm_elementwise(g0, c0)

        # ---- layer 1 (inter-layer dropout is identity at inference) ----
        # Mathematically the fused [h0n | h1] @ [wih1 ; whh1] + b1; the h1-dependent
        # half (r1) was computed off the critical path at the end of the previous step.
        g1 = jnp.dot(h0n, wih1, preferred_element_type=jnp.float32) + r1   # [B, 4H]
        h1n, c1n = lstm_elementwise(g1, c1)

        # Recurrent contributions for the NEXT step; independent of the attention tail
        # below, so the unrolled scheduler overlaps them with it.
        r0n = jnp.dot(h0n, whh0, preferred_element_type=jnp.float32)
        r1n = jnp.dot(h1n, whh1, preferred_element_type=jnp.float32) + b1

        # ---- fused linear_in + hidden half of linear_out (one matmul, lane padded) ----
        fused = jnp.dot(h1n, wio, preferred_element_type=jnp.float32) + bio  # [B, outp+H]
        x_out = fused[:, 0:outp]                # x @ wouthT + bout (zeros in padded lanes)
        gamma = fused[:, outp:outp + H]         # x @ winT + b_in

        # ---- Luong attention: both contractions on the MXU (flash-style batched) ----
        gamma3 = gamma.astype(wdt)[:, None, :]                              # [B, 1, H]
        scores = jnp.sum(
            jnp.einsum('bqh,blh->bql', gamma3, ctx,
                       preferred_element_type=jnp.float32), axis=1) + sbias  # [B, L_pad]
        scores = scores - jnp.max(scores, axis=1, keepdims=True)
        e = jnp.exp(scores)
        w = e * pl.reciprocal(jnp.sum(e, axis=1, keepdims=True), approx=True)

        w3 = w.astype(wdt)[:, None, :]                                       # [B, 1, L_pad]
        c_t = jnp.sum(
            jnp.einsum('bql,blh->bqh', w3, ctx,
                       preferred_element_type=jnp.float32), axis=1)          # [B, H]

        out = jnp.tanh(jnp.dot(c_t.astype(wdt), woutc,
                               preferred_element_type=jnp.float32) + x_out)  # [B, outp]

        # Lane-dense (multiple-of-128) full-vreg stores.
        out_ref[t] = out
        attn_ref[t] = w
        return h0n, c0n, h1n, c1n, r0n, r1n

    h0f, c0f, h1f, c1f, _, _ = lax.fori_loop(0, T, step, init, unroll=True)

    hT_ref[0] = h0f.astype(jnp.float32)
    hT_ref[1] = h1f.astype(jnp.float32)
    cT_ref[0] = c0f
    cT_ref[1] = c1f


def rnn_decoder_forward(inputs, init_state, contexts, params,
                        compute_dtype=jnp.bfloat16):
    """Pallas implementation of rnn_decoder.forward (global_emb=False path)."""
    emb_w = params["embedding"]                        # [vocab, E]
    embs = jnp.take(emb_w, inputs, axis=0)             # [T, B, E]  (glue: gather)
    T, B, E = embs.shape
    h0, c0 = init_state
    L_num, _, H = h0.shape
    L_enc = contexts.shape[1]
    assert L_num == NUM_LAYERS
    cd = compute_dtype

    OUT_PAD = ((H + 127) // 128) * 128                 # lane-dense output width
    L_PAD = ((L_enc + 127) // 128) * 128               # lane-dense attention width

    # Hoisted non-recurrent layer-0 input projection, in bf16 (b0 folds b_ih + b_hh).
    pre0 = (jnp.einsum("tbe,eg->tbg", embs.astype(cd), params["wih0T"].astype(cd),
                       preferred_element_type=jnp.float32)
            + params["b0"]).astype(jnp.float32)        # [T, B, 4H]

    # Single context layout, zero padded along L; padded positions are masked out of the
    # softmax with a large negative score bias.
    ctx = jnp.pad(contexts, ((0, 0), (0, L_PAD - L_enc), (0, 0))).astype(cd)  # [B,L_PAD,H]
    score_bias = jnp.broadcast_to(
        jnp.where(jnp.arange(L_PAD)[None, :] < L_enc, 0.0, -1e30).astype(jnp.float32),
        (B, L_PAD))

    # Fused attention projections: [wouthT (lane padded to OUT_PAD) | winT], biases folded.
    wouth_pad = jnp.zeros((H, OUT_PAD), jnp.float32).at[:, :H].set(params["wouthT"])
    bout_pad = jnp.zeros((1, OUT_PAD), jnp.float32).at[:, :H].set(params["bout"])
    w_io = jnp.concatenate([wouth_pad, params["winT"]], axis=1).astype(cd)   # [H, OUT_PAD+H]
    b_io = jnp.broadcast_to(jnp.concatenate([bout_pad, params["bin"]], axis=1),
                            (B, OUT_PAD + H))
    woutc_pad = jnp.zeros((H, OUT_PAD), jnp.float32).at[:, :H].set(
        params["woutcT"]).astype(cd)
    b1b = jnp.broadcast_to(params["b1"], (B, 4 * H))   # bias broadcasts hoisted to wrapper

    args = (pre0, h0, c0, ctx,
            params["whh0T"].astype(cd),
            params["wih1T"].astype(cd), params["whh1T"].astype(cd), b1b,
            w_io, b_io, woutc_pad, score_bias)

    vmem = pl.BlockSpec(memory_space=pltpu.MemorySpace.VMEM)
    out_shapes = [
        jax.ShapeDtypeStruct((T, B, OUT_PAD), jnp.float32),   # attention outputs (padded)
        jax.ShapeDtypeStruct((T, B, L_PAD), jnp.float32),     # attention weights (padded)
        jax.ShapeDtypeStruct((L_num, B, H), jnp.float32),     # final h
        jax.ShapeDtypeStruct((L_num, B, H), jnp.float32),     # final c
    ]

    out_p, attn_p, hT, cT = pl.pallas_call(
        decoder_kernel,
        out_shape=out_shapes,
        in_specs=[vmem] * len(args),
        out_specs=[vmem] * len(out_shapes),
    )(*args)
    return out_p[:, :, :H], (hT, cT), attn_p[:, :, :L_enc]


def reference_forward(inputs, init_state, contexts, params):
    """Pure-JAX reference mirroring the PyTorch forward (for correctness check)."""
    embs = jnp.take(params["embedding"], inputs, axis=0)
    h, c = init_state
    T = embs.shape[0]
    H = h.shape[-1]
    outs, attns = [], []
    for t in range(T):
        x = embs[t]
        new_h, new_c = [], []
        for l in range(NUM_LAYERS):
            wih = params["wih0T"] if l == 0 else params["wih1T"]
            whh = params["whh0T"] if l == 0 else params["whh1T"]
            b = params["b0"] if l == 0 else params["b1"]
            gates = x @ wih + h[l] @ whh + b[0]
            i_g = jax.nn.sigmoid(gates[:, :H])
            f_g = jax.nn.sigmoid(gates[:, H:2 * H])
            g_g = jnp.tanh(gates[:, 2 * H:3 * H])
            o_g = jax.nn.sigmoid(gates[:, 3 * H:])
            cn = f_g * c[l] + i_g * g_g
            hn = o_g * jnp.tanh(cn)
            new_h.append(hn)
            new_c.append(cn)
            x = hn
        h = jnp.stack(new_h)
        c = jnp.stack(new_c)
        gamma = x @ params["winT"] + params["bin"][0]
        scores = jnp.einsum("blh,bh->bl", contexts, gamma)
        w = jax.nn.softmax(scores, axis=1)
        c_t = jnp.einsum("bl,blh->bh", w, contexts)
        out = jnp.tanh(c_t @ params["woutcT"] + x @ params["wouthT"] + params["bout"][0])
        outs.append(out)
        attns.append(w)
    return jnp.stack(outs), (h, c), jnp.stack(attns)


def init_params(key, vocab_size, emb_size, hidden_size):
    ks = jax.random.split(key, 16)
    s = 0.1
    p = {
        "embedding": jax.random.normal(ks[0], (vocab_size, emb_size), jnp.float32) * s,
        # LSTMCell layer 0 (input = emb_size): weights pre-transposed to right-multiply form.
        "wih0T": jax.random.normal(ks[1], (emb_size, 4 * hidden_size), jnp.float32) * s,
        "whh0T": jax.random.normal(ks[2], (hidden_size, 4 * hidden_size), jnp.float32) * s,
        "b0": jax.random.normal(ks[3], (1, 4 * hidden_size), jnp.float32) * s,  # b_ih + b_hh folded
        # LSTMCell layer 1 (input = hidden_size)
        "wih1T": jax.random.normal(ks[4], (hidden_size, 4 * hidden_size), jnp.float32) * s,
        "whh1T": jax.random.normal(ks[5], (hidden_size, 4 * hidden_size), jnp.float32) * s,
        "b1": jax.random.normal(ks[6], (1, 4 * hidden_size), jnp.float32) * s,
        # global_attention: linear_in [H->H], linear_out [2H->H] split into (context, hidden) halves
        "winT": jax.random.normal(ks[7], (hidden_size, hidden_size), jnp.float32) * s,
        "bin": jax.random.normal(ks[8], (1, hidden_size), jnp.float32) * s,
        "woutcT": jax.random.normal(ks[9], (hidden_size, hidden_size), jnp.float32) * s,
        "wouthT": jax.random.normal(ks[10], (hidden_size, hidden_size), jnp.float32) * s,
        "bout": jax.random.normal(ks[11], (1, hidden_size), jnp.float32) * s,
    }
    return p


if __name__ == "__main__":
    # small config: emb_size=32, decoder_hidden_size=32, num_layers=2, vocab=50
    T, B, E, H, L_ENC, VOCAB = 6, 8, 32, 32, 12, 50

    key = jax.random.PRNGKey(0)
    k_tok, k_h, k_c, k_ctx, k_par = jax.random.split(key, 5)

    inputs = jax.random.randint(k_tok, (T, B), 0, VOCAB, dtype=jnp.int32)      # [maxlen, batch]
    h0 = jax.random.normal(k_h, (NUM_LAYERS, B, H), jnp.float32) * 0.1
    c0 = jax.random.normal(k_c, (NUM_LAYERS, B, H), jnp.float32) * 0.1
    contexts = jax.random.normal(k_ctx, (B, L_ENC, H), jnp.float32) * 0.5
    params = init_params(k_par, VOCAB, E, H)

    outputs, (hT, cT), attns = rnn_decoder_forward(inputs, (h0, c0), contexts, params)
    jax.block_until_ready(outputs)

    ref_out, (ref_h, ref_c), ref_attn = reference_forward(inputs, (h0, c0), contexts, params)

    assert outputs.shape == (T, B, H)
    assert attns.shape == (T, B, L_ENC)
    assert hT.shape == (NUM_LAYERS, B, H) and cT.shape == (NUM_LAYERS, B, H)
    assert jnp.allclose(outputs, ref_out, rtol=2e-2, atol=2e-2)
    assert jnp.allclose(attns, ref_attn, rtol=2e-2, atol=2e-2)
    assert jnp.allclose(hT, ref_h, rtol=2e-2, atol=2e-2)
    assert jnp.allclose(cT, ref_c, rtol=2e-2, atol=2e-2)

    print("KERNEL_OK")
</pallas_src>

<mosaic_0001>
module attributes {stable_mosaic.version = 11 : i64} {
  func.func @decoder_kernel(%arg0: memref<6x8x128xf32, #tpu.memory_space<vmem>>, %arg1: memref<2x8x32xf32, #tpu.memory_space<vmem>>, %arg2: memref<2x8x32xf32, #tpu.memory_space<vmem>>, %arg3: memref<8x128x32xbf16, #tpu.memory_space<vmem>>, %arg4: memref<32x128xbf16, #tpu.memory_space<vmem>>, %arg5: memref<32x128xbf16, #tpu.memory_space<vmem>>, %arg6: memref<32x128xbf16, #tpu.memory_space<vmem>>, %arg7: memref<8x128xf32, #tpu.memory_space<vmem>>, %arg8: memref<32x160xbf16, #tpu.memory_space<vmem>>, %arg9: memref<8x160xf32, #tpu.memory_space<vmem>>, %arg10: memref<32x128xbf16, #tpu.memory_space<vmem>>, %arg11: memref<8x128xf32, #tpu.memory_space<vmem>>, %arg12: memref<6x8x128xf32, #tpu.memory_space<vmem>>, %arg13: memref<6x8x128xf32, #tpu.memory_space<vmem>>, %arg14: memref<2x8x32xf32, #tpu.memory_space<vmem>>, %arg15: memref<2x8x32xf32, #tpu.memory_space<vmem>>) attributes {dimension_semantics = [], scalar_prefetch = 0 : i64, scratch_operands = 0 : i64, tpu.core_type = #tpu.core_type<tc>} {
    %c0 = arith.constant 0 : index
    %c0_0 = arith.constant 0 : index
    %c0_1 = arith.constant 0 : index
    %0 = vector.load %arg3[%c0, %c0_0, %c0_1] : memref<8x128x32xbf16, #tpu.memory_space<vmem>>, vector<8x128x32xbf16>
    %c0_2 = arith.constant 0 : index
    %c0_3 = arith.constant 0 : index
    %1 = vector.load %arg4[%c0_2, %c0_3] : memref<32x128xbf16, #tpu.memory_space<vmem>>, vector<32x128xbf16>
    %c0_4 = arith.constant 0 : index
    %c0_5 = arith.constant 0 : index
    %2 = vector.load %arg5[%c0_4, %c0_5] : memref<32x128xbf16, #tpu.memory_space<vmem>>, vector<32x128xbf16>
    %c0_6 = arith.constant 0 : index
    %c0_7 = arith.constant 0 : index
    %3 = vector.load %arg6[%c0_6, %c0_7] : memref<32x128xbf16, #tpu.memory_space<vmem>>, vector<32x128xbf16>
    %c0_8 = arith.constant 0 : index
    %c0_9 = arith.constant 0 : index
    %4 = vector.load %arg7[%c0_8, %c0_9] : memref<8x128xf32, #tpu.memory_space<vmem>>, vector<8x128xf32>
    %c0_10 = arith.constant 0 : index
    %c0_11 = arith.constant 0 : index
    %5 = vector.load %arg8[%c0_10, %c0_11] : memref<32x160xbf16, #tpu.memory_space<vmem>>, vector<32x160xbf16>
    %c0_12 = arith.constant 0 : index
    %c0_13 = arith.constant 0 : index
    %6 = vector.load %arg9[%c0_12, %c0_13] : memref<8x160xf32, #tpu.memory_space<vmem>>, vector<8x160xf32>
    %c0_14 = arith.constant 0 : index
    %c0_15 = arith.constant 0 : index
    %7 = vector.load %arg10[%c0_14, %c0_15] : memref<32x128xbf16, #tpu.memory_space<vmem>>, vector<32x128xbf16>
    %c0_16 = arith.constant 0 : index
    %c0_17 = arith.constant 0 : index
    %8 = vector.load %arg11[%c0_16, %c0_17] : memref<8x128xf32, #tpu.memory_space<vmem>>, vector<8x128xf32>
    %c0_18 = arith.constant 0 : index
    %c0_19 = arith.constant 0 : index
    %c0_20 = arith.constant 0 : index
    %9 = vector.load %arg1[%c0_18, %c0_19, %c0_20] : memref<2x8x32xf32, #tpu.memory_space<vmem>>, vector<1x8x32xf32>
    %10 = vector.shape_cast %9 : vector<1x8x32xf32> to vector<8x32xf32>
    %11 = arith.truncf %10 : vector<8x32xf32> to vector<8x32xbf16>
    %c1 = arith.constant 1 : index
    %c0_21 = arith.constant 0 : index
    %c0_22 = arith.constant 0 : index
    %12 = vector.load %arg1[%c1, %c0_21, %c0_22] : memref<2x8x32xf32, #tpu.memory_space<vmem>>, vector<1x8x32xf32>
    %13 = vector.shape_cast %12 : vector<1x8x32xf32> to vector<8x32xf32>
    %14 = arith.truncf %13 : vector<8x32xf32> to vector<8x32xbf16>
    %cst = arith.constant dense<0.000000e+00> : vector<8x128xf32>
    %15 = tpu.matmul %11, %1, %cst {dimension_numbers = #tpu.dot_dimension_numbers<[1], [0], [0], [1], [0, 0, 1, 1], [], []>} : vector<8x32xbf16>, vector<32x128xbf16>, vector<8x128xf32> -> vector<8x128xf32>
    %cst_23 = arith.constant dense<0.000000e+00> : vector<8x128xf32>
    %16 = tpu.matmul %14, %3, %cst_23 {dimension_numbers = #tpu.dot_dimension_numbers<[1], [0], [0], [1], [0, 0, 1, 1], [], []>} : vector<8x32xbf16>, vector<32x128xbf16>, vector<8x128xf32> -> vector<8x128xf32>
    %17 = arith.addf %16, %4 : vector<8x128xf32>
    %c0_24 = arith.constant 0 : index
    %c0_25 = arith.constant 0 : index
    %c0_26 = arith.constant 0 : index
    %18 = vector.load %arg2[%c0_24, %c0_25, %c0_26] : memref<2x8x32xf32, #tpu.memory_space<vmem>>, vector<1x8x32xf32>
    %19 = vector.shape_cast %18 : vector<1x8x32xf32> to vector<8x32xf32>
    %c1_27 = arith.constant 1 : index
    %c0_28 = arith.constant 0 : index
    %c0_29 = arith.constant 0 : index
    %20 = vector.load %arg2[%c1_27, %c0_28, %c0_29] : memref<2x8x32xf32, #tpu.memory_space<vmem>>, vector<1x8x32xf32>
    %21 = vector.shape_cast %20 : vector<1x8x32xf32> to vector<8x32xf32>
    %c0_i32 = arith.constant 0 : i32
    %22 = arith.index_cast %c0_i32 : i32 to index
    %c0_30 = arith.constant 0 : index
    %c0_31 = arith.constant 0 : index
    %23 = vector.load %arg0[%22, %c0_30, %c0_31] : memref<6x8x128xf32, #tpu.memory_space<vmem>>, vector<1x8x128xf32>
    %24 = vector.shape_cast %23 : vector<1x8x128xf32> to vector<8x128xf32>
    %25 = arith.addf %24, %15 : vector<8x128xf32>
    %26 = arith.negf %25 : vector<8x128xf32>
    %27 = math.exp %26 : vector<8x128xf32>
    %cst_32 = arith.constant 1.000000e+00 : f32
    %28 = vector.broadcast %cst_32 : f32 to vector<8x128xf32>
    %29 = arith.addf %28, %27 : vector<8x128xf32>
    %30 = arith.divf %28, %29 : vector<8x128xf32>
    %31 = math.tanh %25 : vector<8x128xf32>
    %32 = vector.extract_strided_slice %30 {offsets = [0, 0], sizes = [8, 32], strides = [1, 1]} : vector<8x128xf32> to vector<8x32xf32>
    %33 = vector.extract_strided_slice %30 {offsets = [0, 32], sizes = [8, 32], strides = [1, 1]} : vector<8x128xf32> to vector<8x32xf32>
    %34 = vector.extract_strided_slice %31 {offsets = [0, 64], sizes = [8, 32], strides = [1, 1]} : vector<8x128xf32> to vector<8x32xf32>
    %35 = vector.extract_strided_slice %30 {offsets = [0, 96], sizes = [8, 32], strides = [1, 1]} : vector<8x128xf32> to vector<8x32xf32>
    %36 = arith.mulf %33, %19 : vector<8x32xf32>
    %37 = arith.mulf %32, %34 : vector<8x32xf32>
    %38 = arith.addf %36, %37 : vector<8x32xf32>
    %39 = math.tanh %38 : vector<8x32xf32>
    %40 = arith.mulf %35, %39 : vector<8x32xf32>
    %41 = arith.truncf %40 : vector<8x32xf32> to vector<8x32xbf16>
    %cst_33 = arith.constant dense<0.000000e+00> : vector<8x128xf32>
    %42 = tpu.matmul %41, %2, %cst_33 {dimension_numbers = #tpu.dot_dimension_numbers<[1], [0], [0], [1], [0, 0, 1, 1], [], []>} : vector<8x32xbf16>, vector<32x128xbf16>, vector<8x128xf32> -> vector<8x128xf32>
    %43 = arith.addf %42, %17 : vector<8x128xf32>
    %44 = arith.negf %43 : vector<8x128xf32>
    %45 = math.exp %44 : vector<8x128xf32>
    %cst_34 = arith.constant 1.000000e+00 : f32
    %46 = vector.broadcast %cst_34 : f32 to vector<8x128xf32>
    %47 = arith.addf %46, %45 : vector<8x128xf32>
    %48 = arith.divf %46, %47 : vector<8x128xf32>
    %49 = math.tanh %43 : vector<8x128xf32>
    %50 = vector.extract_strided_slice %48 {offsets = [0, 0], sizes = [8, 32], strides = [1, 1]} : vector<8x128xf32> to vector<8x32xf32>
    %51 = vector.extract_strided_slice %48 {offsets = [0, 32], sizes = [8, 32], strides = [1, 1]} : vector<8x128xf32> to vector<8x32xf32>
    %52 = vector.extract_strided_slice %49 {offsets = [0, 64], sizes = [8, 32], strides = [1, 1]} : vector<8x128xf32> to vector<8x32xf32>
    %53 = vector.extract_strided_slice %48 {offsets = [0, 96], sizes = [8, 32], strides = [1, 1]} : vector<8x128xf32> to vector<8x32xf32>
    %54 = arith.mulf %51, %21 : vector<8x32xf32>
    %55 = arith.mulf %50, %52 : vector<8x32xf32>
    %56 = arith.addf %54, %55 : vector<8x32xf32>
    %57 = math.tanh %56 : vector<8x32xf32>
    %58 = arith.mulf %53, %57 : vector<8x32xf32>
    %59 = arith.truncf %58 : vector<8x32xf32> to vector<8x32xbf16>
    %cst_35 = arith.constant dense<0.000000e+00> : vector<8x128xf32>
    %60 = tpu.matmul %41, %1, %cst_35 {dimension_numbers = #tpu.dot_dimension_numbers<[1], [0], [0], [1], [0, 0, 1, 1], [], []>} : vector<8x32xbf16>, vector<32x128xbf16>, vector<8x128xf32> -> vector<8x128xf32>
    %cst_36 = arith.constant dense<0.000000e+00> : vector<8x128xf32>
    %61 = tpu.matmul %59, %3, %cst_36 {dimension_numbers = #tpu.dot_dimension_numbers<[1], [0], [0], [1], [0, 0, 1, 1], [], []>} : vector<8x32xbf16>, vector<32x128xbf16>, vector<8x128xf32> -> vector<8x128xf32>
    %62 = arith.addf %61, %4 : vector<8x128xf32>
    %cst_37 = arith.constant dense<0.000000e+00> : vector<8x160xf32>
    %63 = tpu.matmul %59, %5, %cst_37 {dimension_numbers = #tpu.dot_dimension_numbers<[1], [0], [0], [1], [0, 0, 1, 1], [], []>} : vector<8x32xbf16>, vector<32x160xbf16>, vector<8x160xf32> -> vector<8x160xf32>
    %64 = arith.addf %63, %6 : vector<8x160xf32>
    %65 = vector.extract_strided_slice %64 {offsets = [0, 0], sizes = [8, 128], strides = [1, 1]} : vector<8x160xf32> to vector<8x128xf32>
    %66 = vector.extract_strided_slice %64 {offsets = [0, 128], sizes = [8, 32], strides = [1, 1]} : vector<8x160xf32> to vector<8x32xf32>
    %67 = arith.truncf %66 : vector<8x32xf32> to vector<8x32xbf16>
    %68 = vector.shape_cast %67 : vector<8x32xbf16> to vector<8x1x32xbf16>
    "tpu.trace_start"() <{level = 10 : i32, message = "bqh,blh->bql"}> : () -> ()
    %cst_38 = arith.constant dense<0.000000e+00> : vector<8x1x128xf32>
    %69 = tpu.matmul %68, %0, %cst_38 {dimension_numbers = #tpu.dot_dimension_numbers<[2], [2], [1], [1], [0, 0, 0, 1, 1, 1], [0], [0]>} : vector<8x1x32xbf16>, vector<8x128x32xbf16>, vector<8x1x128xf32> -> vector<8x1x128xf32>
    "tpu.trace_stop"() : () -> ()
    %cst_39 = arith.constant dense<0.000000e+00> : vector<8x128xf32>
    %70 = vector.multi_reduction <add>, %69, %cst_39 [1] : vector<8x1x128xf32> to vector<8x128xf32>
    %71 = arith.addf %70, %8 : vector<8x128xf32>
    %cst_40 = arith.constant dense<0xFF800000> : vector<8xf32>
    %72 = vector.multi_reduction <maximumf>, %71, %cst_40 [1] : vector<8x128xf32> to vector<8xf32>
    %73 = vector.shape_cast %72 : vector<8xf32> to vector<8x1xf32>
    %74 = vector.broadcast %73 : vector<8x1xf32> to vector<8x128xf32>
    %75 = arith.subf %71, %74 : vector<8x128xf32>
    %76 = math.exp %75 : vector<8x128xf32>
    %cst_41 = arith.constant dense<0.000000e+00> : vector<8xf32>
    %77 = vector.multi_reduction <add>, %76, %cst_41 [1] : vector<8x128xf32> to vector<8xf32>
    %78 = vector.shape_cast %77 : vector<8xf32> to vector<8x1xf32>
    %79 = tpu.reciprocal %78 {approx = true} : vector<8x1xf32> -> vector<8x1xf32>
    %80 = vector.broadcast %79 : vector<8x1xf32> to vector<8x128xf32>
    %81 = arith.mulf %76, %80 : vector<8x128xf32>
    %82 = arith.truncf %81 : vector<8x128xf32> to vector<8x128xbf16>
    %83 = vector.shape_cast %82 : vector<8x128xbf16> to vector<8x1x128xbf16>
    "tpu.trace_start"() <{level = 10 : i32, message = "bql,blh->bqh"}> : () -> ()
    %cst_42 = arith.constant dense<0.000000e+00> : vector<8x1x32xf32>
    %84 = tpu.matmul %83, %0, %cst_42 {dimension_numbers = #tpu.dot_dimension_numbers<[2], [1], [1], [2], [0, 0, 0, 1, 1, 2], [0], [0]>} : vector<8x1x128xbf16>, vector<8x128x32xbf16>, vector<8x1x32xf32> -> vector<8x1x32xf32>
    "tpu.trace_stop"() : () -> ()
    %cst_43 = arith.constant dense<0.000000e+00> : vector<8x32xf32>
    %85 = vector.multi_reduction <add>, %84, %cst_43 [1] : vector<8x1x32xf32> to vector<8x32xf32>
    %86 = arith.truncf %85 : vector<8x32xf32> to vector<8x32xbf16>
    %cst_44 = arith.constant dense<0.000000e+00> : vector<8x128xf32>
    %87 = tpu.matmul %86, %7, %cst_44 {dimension_numbers = #tpu.dot_dimension_numbers<[1], [0], [0], [1], [0, 0, 1, 1], [], []>} : vector<8x32xbf16>, vector<32x128xbf16>, vector<8x128xf32> -> vector<8x128xf32>
    %88 = arith.addf %87, %65 : vector<8x128xf32>
    %89 = math.tanh %88 : vector<8x128xf32>
    %90 = arith.index_cast %c0_i32 : i32 to index
    %c0_45 = arith.constant 0 : index
    %c0_46 = arith.constant 0 : index
    %91 = vector.load %arg12[%90, %c0_45, %c0_46] : memref<6x8x128xf32, #tpu.memory_space<vmem>>, vector<1x8x128xf32>
    %92 = vector.shape_cast %91 : vector<1x8x128xf32> to vector<8x128xf32>
    %93 = vector.shape_cast %89 : vector<8x128xf32> to vector<1x8x128xf32>
    tpu.vector_store %arg12[%90, %c0_45, %c0_46], %93 {strides = array<i32>} : memref<6x8x128xf32, #tpu.memory_space<vmem>>, vector<1x8x128xf32>,
    %94 = arith.index_cast %c0_i32 : i32 to index
    %c0_47 = arith.constant 0 : index
    %c0_48 = arith.constant 0 : index
    %95 = vector.load %arg13[%94, %c0_47, %c0_48] : memref<6x8x128xf32, #tpu.memory_space<vmem>>, vector<1x8x128xf32>
    %96 = vector.shape_cast %95 : vector<1x8x128xf32> to vector<8x128xf32>
    %97 = vector.shape_cast %81 : vector<8x128xf32> to vector<1x8x128xf32>
    tpu.vector_store %arg13[%94, %c0_47, %c0_48], %97 {strides = array<i32>} : memref<6x8x128xf32, #tpu.memory_space<vmem>>, vector<1x8x128xf32>,
    %c1_i32 = arith.constant 1 : i32
    %98 = arith.index_cast %c1_i32 : i32 to index
    %c0_49 = arith.constant 0 : index
    %c0_50 = arith.constant 0 : index
    %99 = vector.load %arg0[%98, %c0_49, %c0_50] : memref<6x8x128xf32, #tpu.memory_space<vmem>>, vector<1x8x128xf32>
    %100 = vector.shape_cast %99 : vector<1x8x128xf32> to vector<8x128xf32>
    %101 = arith.addf %100, %60 : vector<8x128xf32>
    %102 = arith.negf %101 : vector<8x128xf32>
    %103 = math.exp %102 : vector<8x128xf32>
    %cst_51 = arith.constant 1.000000e+00 : f32
    %104 = vector.broadcast %cst_51 : f32 to vector<8x128xf32>
    %105 = arith.addf %104, %103 : vector<8x128xf32>
    %106 = arith.divf %104, %105 : vector<8x128xf32>
    %107 = math.tanh %101 : vector<8x128xf32>
    %108 = vector.extract_strided_slice %106 {offsets = [0, 0], sizes = [8, 32], strides = [1, 1]} : vector<8x128xf32> to vector<8x32xf32>
    %109 = vector.extract_strided_slice %106 {offsets = [0, 32], sizes = [8, 32], strides = [1, 1]} : vector<8x128xf32> to vector<8x32xf32>
    %110 = vector.extract_strided_slice %107 {offsets = [0, 64], sizes = [8, 32], strides = [1, 1]} : vector<8x128xf32> to vector<8x32xf32>
    %111 = vector.extract_strided_slice %106 {offsets = [0, 96], sizes = [8, 32], strides = [1, 1]} : vector<8x128xf32> to vector<8x32xf32>
    %112 = arith.mulf %109, %38 : vector<8x32xf32>
    %113 = arith.mulf %108, %110 : vector<8x32xf32>
    %114 = arith.addf %112, %113 : vector<8x32xf32>
    %115 = math.tanh %114 : vector<8x32xf32>
    %116 = arith.mulf %111, %115 : vector<8x32xf32>
    %117 = arith.truncf %116 : vector<8x32xf32> to vector<8x32xbf16>
    %cst_52 = arith.constant dense<0.000000e+00> : vector<8x128xf32>
    %118 = tpu.matmul %117, %2, %cst_52 {dimension_numbers = #tpu.dot_dimension_numbers<[1], [0], [0], [1], [0, 0, 1, 1], [], []>} : vector<8x32xbf16>, vector<32x128xbf16>, vector<8x128xf32> -> vector<8x128xf32>
    %119 = arith.addf %118, %62 : vector<8x128xf32>
    %120 = arith.negf %119 : vector<8x128xf32>
    %121 = math.exp %120 : vector<8x128xf32>
    %cst_53 = arith.constant 1.000000e+00 : f32
    %122 = vector.broadcast %cst_53 : f32 to vector<8x128xf32>
    %123 = arith.addf %122, %121 : vector<8x128xf32>
    %124 = arith.divf %122, %123 : vector<8x128xf32>
    %125 = math.tanh %119 : vector<8x128xf32>
    %126 = vector.extract_strided_slice %124 {offsets = [0, 0], sizes = [8, 32], strides = [1, 1]} : vector<8x128xf32> to vector<8x32xf32>
    %127 = vector.extract_strided_slice %124 {offsets = [0, 32], sizes = [8, 32], strides = [1, 1]} : vector<8x128xf32> to vector<8x32xf32>
    %128 = vector.extract_strided_slice %125 {offsets = [0, 64], sizes = [8, 32], strides = [1, 1]} : vector<8x128xf32> to vector<8x32xf32>
    %129 = vector.extract_strided_slice %124 {offsets = [0, 96], sizes = [8, 32], strides = [1, 1]} : vector<8x128xf32> to vector<8x32xf32>
    %130 = arith.mulf %127, %56 : vector<8x32xf32>
    %131 = arith.mulf %126, %128 : vector<8x32xf32>
    %132 = arith.addf %130, %131 : vector<8x32xf32>
    %133 = math.tanh %132 : vector<8x32xf32>
    %134 = arith.mulf %129, %133 : vector<8x32xf32>
    %135 = arith.truncf %134 : vector<8x32xf32> to vector<8x32xbf16>
    %cst_54 = arith.constant dense<0.000000e+00> : vector<8x128xf32>
    %136 = tpu.matmul %117, %1, %cst_54 {dimension_numbers = #tpu.dot_dimension_numbers<[1], [0], [0], [1], [0, 0, 1, 1], [], []>} : vector<8x32xbf16>, vector<32x128xbf16>, vector<8x128xf32> -> vector<8x128xf32>
    %cst_55 = arith.constant dense<0.000000e+00> : vector<8x128xf32>
    %137 = tpu.matmul %135, %3, %cst_55 {dimension_numbers = #tpu.dot_dimension_numbers<[1], [0], [0], [1], [0, 0, 1, 1], [], []>} : vector<8x32xbf16>, vector<32x128xbf16>, vector<8x128xf32> -> vector<8x128xf32>
    %138 = arith.addf %137, %4 : vector<8x128xf32>
    %cst_56 = arith.constant dense<0.000000e+00> : vector<8x160xf32>
    %139 = tpu.matmul %135, %5, %cst_56 {dimension_numbers = #tpu.dot_dimension_numbers<[1], [0], [0], [1], [0, 0, 1, 1], [], []>} : vector<8x32xbf16>, vector<32x160xbf16>, vector<8x160xf32> -> vector<8x160xf32>
    %140 = arith.addf %139, %6 : vector<8x160xf32>
    %141 = vector.extract_strided_slice %140 {offsets = [0, 0], sizes = [8, 128], strides = [1, 1]} : vector<8x160xf32> to vector<8x128xf32>
    %142 = vector.extract_strided_slice %140 {offsets = [0, 128], sizes = [8, 32], strides = [1, 1]} : vector<8x160xf32> to vector<8x32xf32>
    %143 = arith.truncf %142 : vector<8x32xf32> to vector<8x32xbf16>
    %144 = vector.shape_cast %143 : vector<8x32xbf16> to vector<8x1x32xbf16>
    "tpu.trace_start"() <{level = 10 : i32, message = "bqh,blh->bql"}> : () -> ()
    %cst_57 = arith.constant dense<0.000000e+00> : vector<8x1x128xf32>
    %145 = tpu.matmul %144, %0, %cst_57 {dimension_numbers = #tpu.dot_dimension_numbers<[2], [2], [1], [1], [0, 0, 0, 1, 1, 1], [0], [0]>} : vector<8x1x32xbf16>, vector<8x128x32xbf16>, vector<8x1x128xf32> -> vector<8x1x128xf32>
    "tpu.trace_stop"() : () -> ()
    %cst_58 = arith.constant dense<0.000000e+00> : vector<8x128xf32>
    %146 = vector.multi_reduction <add>, %145, %cst_58 [1] : vector<8x1x128xf32> to vector<8x128xf32>
    %147 = arith.addf %146, %8 : vector<8x128xf32>
    %cst_59 = arith.constant dense<0xFF800000> : vector<8xf32>
    %148 = vector.multi_reduction <maximumf>, %147, %cst_59 [1] : vector<8x128xf32> to vector<8xf32>
    %149 = vector.shape_cast %148 : vector<8xf32> to vector<8x1xf32>
    %150 = vector.broadcast %149 : vector<8x1xf32> to vector<8x128xf32>
    %151 = arith.subf %147, %150 : vector<8x128xf32>
    %152 = math.exp %151 : vector<8x128xf32>
    %cst_60 = arith.constant dense<0.000000e+00> : vector<8xf32>
    %153 = vector.multi_reduction <add>, %152, %cst_60 [1] : vector<8x128xf32> to vector<8xf32>
    %154 = vector.shape_cast %153 : vector<8xf32> to vector<8x1xf32>
    %155 = tpu.reciprocal %154 {approx = true} : vector<8x1xf32> -> vector<8x1xf32>
    %156 = vector.broadcast %155 : vector<8x1xf32> to vector<8x128xf32>
    %157 = arith.mulf %152, %156 : vector<8x128xf32>
    %158 = arith.truncf %157 : vector<8x128xf32> to vector<8x128xbf16>
    %159 = vector.shape_cast %158 : vector<8x128xbf16> to vector<8x1x128xbf16>
    "tpu.trace_start"() <{level = 10 : i32, message = "bql,blh->bqh"}> : () -> ()
    %cst_61 = arith.constant dense<0.000000e+00> : vector<8x1x32xf32>
    %160 = tpu.matmul %159, %0, %cst_61 {dimension_numbers = #tpu.dot_dimension_numbers<[2], [1], [1], [2], [0, 0, 0, 1, 1, 2], [0], [0]>} : vector<8x1x128xbf16>, vector<8x128x32xbf16>, vector<8x1x32xf32> -> vector<8x1x32xf32>
    "tpu.trace_stop"() : () -> ()
    %cst_62 = arith.constant dense<0.000000e+00> : vector<8x32xf32>
    %161 = vector.multi_reduction <add>, %160, %cst_62 [1] : vector<8x1x32xf32> to vector<8x32xf32>
    %162 = arith.truncf %161 : vector<8x32xf32> to vector<8x32xbf16>
    %cst_63 = arith.constant dense<0.000000e+00> : vector<8x128xf32>
    %163 = tpu.matmul %162, %7, %cst_63 {dimension_numbers = #tpu.dot_dimension_numbers<[1], [0], [0], [1], [0, 0, 1, 1], [], []>} : vector<8x32xbf16>, vector<32x128xbf16>, vector<8x128xf32> -> vector<8x128xf32>
    %164 = arith.addf %163, %141 : vector<8x128xf32>
    %165 = math.tanh %164 : vector<8x128xf32>
    %166 = arith.index_cast %c1_i32 : i32 to index
    %c0_64 = arith.constant 0 : index
    %c0_65 = arith.constant 0 : index
    %167 = vector.load %arg12[%166, %c0_64, %c0_65] : memref<6x8x128xf32, #tpu.memory_space<vmem>>, vector<1x8x128xf32>
    %168 = vector.shape_cast %167 : vector<1x8x128xf32> to vector<8x128xf32>
    %169 = vector.shape_cast %165 : vector<8x128xf32> to vector<1x8x128xf32>
    tpu.vector_store %arg12[%166, %c0_64, %c0_65], %169 {strides = array<i32>} : memref<6x8x128xf32, #tpu.memory_space<vmem>>, vector<1x8x128xf32>,
    %170 = arith.index_cast %c1_i32 : i32 to index
    %c0_66 = arith.constant 0 : index
    %c0_67 = arith.constant 0 : index
    %171 = vector.load %arg13[%170, %c0_66, %c0_67] : memref<6x8x128xf32, #tpu.memory_space<vmem>>, vector<1x8x128xf32>
    %172 = vector.shape_cast %171 : vector<1x8x128xf32> to vector<8x128xf32>
    %173 = vector.shape_cast %157 : vector<8x128xf32> to vector<1x8x128xf32>
    tpu.vector_store %arg13[%170, %c0_66, %c0_67], %173 {strides = array<i32>} : memref<6x8x128xf32, #tpu.memory_space<vmem>>, vector<1x8x128xf32>,
    %c2_i32 = arith.constant 2 : i32
    %174 = arith.index_cast %c2_i32 : i32 to index
    %c0_68 = arith.constant 0 : index
    %c0_69 = arith.constant 0 : index
    %175 = vector.load %arg0[%174, %c0_68, %c0_69] : memref<6x8x128xf32, #tpu.memory_space<vmem>>, vector<1x8x128xf32>
    %176 = vector.shape_cast %175 : vector<1x8x128xf32> to vector<8x128xf32>
    %177 = arith.addf %176, %136 : vector<8x128xf32>
    %178 = arith.negf %177 : vector<8x128xf32>
    %179 = math.exp %178 : vector<8x128xf32>
    %cst_70 = arith.constant 1.000000e+00 : f32
    %180 = vector.broadcast %cst_70 : f32 to vector<8x128xf32>
    %181 = arith.addf %180, %179 : vector<8x128xf32>
    %182 = arith.divf %180, %181 : vector<8x128xf32>
    %183 = math.tanh %177 : vector<8x128xf32>
    %184 = vector.extract_strided_slice %182 {offsets = [0, 0], sizes = [8, 32], strides = [1, 1]} : vector<8x128xf32> to vector<8x32xf32>
    %185 = vector.extract_strided_slice %182 {offsets = [0, 32], sizes = [8, 32], strides = [1, 1]} : vector<8x128xf32> to vector<8x32xf32>
    %186 = vector.extract_strided_slice %183 {offsets = [0, 64], sizes = [8, 32], strides = [1, 1]} : vector<8x128xf32> to vector<8x32xf32>
    %187 = vector.extract_strided_slice %182 {offsets = [0, 96], sizes = [8, 32], strides = [1, 1]} : vector<8x128xf32> to vector<8x32xf32>
    %188 = arith.mulf %185, %114 : vector<8x32xf32>
    %189 = arith.mulf %184, %186 : vector<8x32xf32>
    %190 = arith.addf %188, %189 : vector<8x32xf32>
    %191 = math.tanh %190 : vector<8x32xf32>
    %192 = arith.mulf %187, %191 : vector<8x32xf32>
    %193 = arith.truncf %192 : vector<8x32xf32> to vector<8x32xbf16>
    %cst_71 = arith.constant dense<0.000000e+00> : vector<8x128xf32>
    %194 = tpu.matmul %193, %2, %cst_71 {dimension_numbers = #tpu.dot_dimension_numbers<[1], [0], [0], [1], [0, 0, 1, 1], [], []>} : vector<8x32xbf16>, vector<32x128xbf16>, vector<8x128xf32> -> vector<8x128xf32>
    %195 = arith.addf %194, %138 : vector<8x128xf32>
    %196 = arith.negf %195 : vector<8x128xf32>
    %197 = math.exp %196 : vector<8x128xf32>
    %cst_72 = arith.constant 1.000000e+00 : f32
    %198 = vector.broadcast %cst_72 : f32 to vector<8x128xf32>
    %199 = arith.addf %198, %197 : vector<8x128xf32>
    %200 = arith.divf %198, %199 : vector<8x128xf32>
    %201 = math.tanh %195 : vector<8x128xf32>
    %202 = vector.extract_strided_slice %200 {offsets = [0, 0], sizes = [8, 32], strides = [1, 1]} : vector<8x128xf32> to vector<8x32xf32>
    %203 = vector.extract_strided_slice %200 {offsets = [0, 32], sizes = [8, 32], strides = [1, 1]} : vector<8x128xf32> to vector<8x32xf32>
    %204 = vector.extract_strided_slice %201 {offsets = [0, 64], sizes = [8, 32], strides = [1, 1]} : vector<8x128xf32> to vector<8x32xf32>
    %205 = vector.extract_strided_slice %200 {offsets = [0, 96], sizes = [8, 32], strides = [1, 1]} : vector<8x128xf32> to vector<8x32xf32>
    %206 = arith.mulf %203, %132 : vector<8x32xf32>
    %207 = arith.mulf %202, %204 : vector<8x32xf32>
    %208 = arith.addf %206, %207 : vector<8x32xf32>
    %209 = math.tanh %208 : vector<8x32xf32>
    %210 = arith.mulf %205, %209 : vector<8x32xf32>
    %211 = arith.truncf %210 : vector<8x32xf32> to vector<8x32xbf16>
    %cst_73 = arith.constant dense<0.000000e+00> : vector<8x128xf32>
    %212 = tpu.matmul %193, %1, %cst_73 {dimension_numbers = #tpu.dot_dimension_numbers<[1], [0], [0], [1], [0, 0, 1, 1], [], []>} : vector<8x32xbf16>, vector<32x128xbf16>, vector<8x128xf32> -> vector<8x128xf32>
    %cst_74 = arith.constant dense<0.000000e+00> : vector<8x128xf32>
    %213 = tpu.matmul %211, %3, %cst_74 {dimension_numbers = #tpu.dot_dimension_numbers<[1], [0], [0], [1], [0, 0, 1, 1], [], []>} : vector<8x32xbf16>, vector<32x128xbf16>, vector<8x128xf32> -> vector<8x128xf32>
    %214 = arith.addf %213, %4 : vector<8x128xf32>
    %cst_75 = arith.constant dense<0.000000e+00> : vector<8x160xf32>
    %215 = tpu.matmul %211, %5, %cst_75 {dimension_numbers = #tpu.dot_dimension_numbers<[1], [0], [0], [1], [0, 0, 1, 1], [], []>} : vector<8x32xbf16>, vector<32x160xbf16>, vector<8x160xf32> -> vector<8x160xf32>
    %216 = arith.addf %215, %6 : vector<8x160xf32>
    %217 = vector.extract_strided_slice %216 {offsets = [0, 0], sizes = [8, 128], strides = [1, 1]} : vector<8x160xf32> to vector<8x128xf32>
    %218 = vector.extract_strided_slice %216 {offsets = [0, 128], sizes = [8, 32], strides = [1, 1]} : vector<8x160xf32> to vector<8x32xf32>
    %219 = arith.truncf %218 : vector<8x32xf32> to vector<8x32xbf16>
    %220 = vector.shape_cast %219 : vector<8x32xbf16> to vector<8x1x32xbf16>
    "tpu.trace_start"() <{level = 10 : i32, message = "bqh,blh->bql"}> : () -> ()
    %cst_76 = arith.constant dense<0.000000e+00> : vector<8x1x128xf32>
    %221 = tpu.matmul %220, %0, %cst_76 {dimension_numbers = #tpu.dot_dimension_numbers<[2], [2], [1], [1], [0, 0, 0, 1, 1, 1], [0], [0]>} : vector<8x1x32xbf16>, vector<8x128x32xbf16>, vector<8x1x128xf32> -> vector<8x1x128xf32>
    "tpu.trace_stop"() : () -> ()
    %cst_77 = arith.constant dense<0.000000e+00> : vector<8x128xf32>
    %222 = vector.multi_reduction <add>, %221, %cst_77 [1] : vector<8x1x128xf32> to vector<8x128xf32>
    %223 = arith.addf %222, %8 : vector<8x128xf32>
    %cst_78 = arith.constant dense<0xFF800000> : vector<8xf32>
    %224 = vector.multi_reduction <maximumf>, %223, %cst_78 [1] : vector<8x128xf32> to vector<8xf32>
    %225 = vector.shape_cast %224 : vector<8xf32> to vector<8x1xf32>
    %226 = vector.broadcast %225 : vector<8x1xf32> to vector<8x128xf32>
    %227 = arith.subf %223, %226 : vector<8x128xf32>
    %228 = math.exp %227 : vector<8x128xf32>
    %cst_79 = arith.constant dense<0.000000e+00> : vector<8xf32>
    %229 = vector.multi_reduction <add>, %228, %cst_79 [1] : vector<8x128xf32> to vector<8xf32>
    %230 = vector.shape_cast %229 : vector<8xf32> to vector<8x1xf32>
    %231 = tpu.reciprocal %230 {approx = true} : vector<8x1xf32> -> vector<8x1xf32>
    %232 = vector.broadcast %231 : vector<8x1xf32> to vector<8x128xf32>
    %233 = arith.mulf %228, %232 : vector<8x128xf32>
    %234 = arith.truncf %233 : vector<8x128xf32> to vector<8x128xbf16>
    %235 = vector.shape_cast %234 : vector<8x128xbf16> to vector<8x1x128xbf16>
    "tpu.trace_start"() <{level = 10 : i32, message = "bql,blh->bqh"}> : () -> ()
    %cst_80 = arith.constant dense<0.000000e+00> : vector<8x1x32xf32>
    %236 = tpu.matmul %235, %0, %cst_80 {dimension_numbers = #tpu.dot_dimension_numbers<[2], [1], [1], [2], [0, 0, 0, 1, 1, 2], [0], [0]>} : vector<8x1x128xbf16>, vector<8x128x32xbf16>, vector<8x1x32xf32> -> vector<8x1x32xf32>
    "tpu.trace_stop"() : () -> ()
    %cst_81 = arith.constant dense<0.000000e+00> : vector<8x32xf32>
    %237 = vector.multi_reduction <add>, %236, %cst_81 [1] : vector<8x1x32xf32> to vector<8x32xf32>
    %238 = arith.truncf %237 : vector<8x32xf32> to vector<8x32xbf16>
    %cst_82 = arith.constant dense<0.000000e+00> : vector<8x128xf32>
    %239 = tpu.matmul %238, %7, %cst_82 {dimension_numbers = #tpu.dot_dimension_numbers<[1], [0], [0], [1], [0, 0, 1, 1], [], []>} : vector<8x32xbf16>, vector<32x128xbf16>, vector<8x128xf32> -> vector<8x128xf32>
    %240 = arith.addf %239, %217 : vector<8x128xf32>
    %241 = math.tanh %240 : vector<8x128xf32>
    %242 = arith.index_cast %c2_i32 : i32 to index
    %c0_83 = arith.constant 0 : index
    %c0_84 = arith.constant 0 : index
    %243 = vector.load %arg12[%242, %c0_83, %c0_84] : memref<6x8x128xf32, #tpu.memory_space<vmem>>, vector<1x8x128xf32>
    %244 = vector.shape_cast %243 : vector<1x8x128xf32> to vector<8x128xf32>
    %245 = vector.shape_cast %241 : vector<8x128xf32> to vector<1x8x128xf32>
    tpu.vector_store %arg12[%242, %c0_83, %c0_84], %245 {strides = array<i32>} : memref<6x8x128xf32, #tpu.memory_space<vmem>>, vector<1x8x128xf32>,
    %246 = arith.index_cast %c2_i32 : i32 to index
    %c0_85 = arith.constant 0 : index
    %c0_86 = arith.constant 0 : index
    %247 = vector.load %arg13[%246, %c0_85, %c0_86] : memref<6x8x128xf32, #tpu.memory_space<vmem>>, vector<1x8x128xf32>
    %248 = vector.shape_cast %247 : vector<1x8x128xf32> to vector<8x128xf32>
    %249 = vector.shape_cast %233 : vector<8x128xf32> to vector<1x8x128xf32>
    tpu.vector_store %arg13[%246, %c0_85, %c0_86], %249 {strides = array<i32>} : memref<6x8x128xf32, #tpu.memory_space<vmem>>, vector<1x8x128xf32>,
    %c3_i32 = arith.constant 3 : i32
    %250 = arith.index_cast %c3_i32 : i32 to index
    %c0_87 = arith.constant 0 : index
    %c0_88 = arith.constant 0 : index
    %251 = vector.load %arg0[%250, %c0_87, %c0_88] : memref<6x8x128xf32, #tpu.memory_space<vmem>>, vector<1x8x128xf32>
    %252 = vector.shape_cast %251 : vector<1x8x128xf32> to vector<8x128xf32>
    %253 = arith.addf %252, %212 : vector<8x128xf32>
    %254 = arith.negf %253 : vector<8x128xf32>
    %255 = math.exp %254 : vector<8x128xf32>
    %cst_89 = arith.constant 1.000000e+00 : f32
    %256 = vector.broadcast %cst_89 : f32 to vector<8x128xf32>
    %257 = arith.addf %256, %255 : vector<8x128xf32>
    %258 = arith.divf %256, %257 : vector<8x128xf32>
    %259 = math.tanh %253 : vector<8x128xf32>
    %260 = vector.extract_strided_slice %258 {offsets = [0, 0], sizes = [8, 32], strides = [1, 1]} : vector<8x128xf32> to vector<8x32xf32>
    %261 = vector.extract_strided_slice %258 {offsets = [0, 32], sizes = [8, 32], strides = [1, 1]} : vector<8x128xf32> to vector<8x32xf32>
    %262 = vector.extract_strided_slice %259 {offsets = [0, 64], sizes = [8, 32], strides = [1, 1]} : vector<8x128xf32> to vector<8x32xf32>
    %263 = vector.extract_strided_slice %258 {offsets = [0, 96], sizes = [8, 32], strides = [1, 1]} : vector<8x128xf32> to vector<8x32xf32>
    %264 = arith.mulf %261, %190 : vector<8x32xf32>
    %265 = arith.mulf %260, %262 : vector<8x32xf32>
    %266 = arith.addf %264, %265 : vector<8x32xf32>
    %267 = math.tanh %266 : vector<8x32xf32>
    %268 = arith.mulf %263, %267 : vector<8x32xf32>
    %269 = arith.truncf %268 : vector<8x32xf32> to vector<8x32xbf16>
    %cst_90 = arith.constant dense<0.000000e+00> : vector<8x128xf32>
    %270 = tpu.matmul %269, %2, %cst_90 {dimension_numbers = #tpu.dot_dimension_numbers<[1], [0], [0], [1], [0, 0, 1, 1], [], []>} : vector<8x32xbf16>, vector<32x128xbf16>, vector<8x128xf32> -> vector<8x128xf32>
    %271 = arith.addf %270, %214 : vector<8x128xf32>
    %272 = arith.negf %271 : vector<8x128xf32>
    %273 = math.exp %272 : vector<8x128xf32>
    %cst_91 = arith.constant 1.000000e+00 : f32
    %274 = vector.broadcast %cst_91 : f32 to vector<8x128xf32>
    %275 = arith.addf %274, %273 : vector<8x128xf32>
    %276 = arith.divf %274, %275 : vector<8x128xf32>
    %277 = math.tanh %271 : vector<8x128xf32>
    %278 = vector.extract_strided_slice %276 {offsets = [0, 0], sizes = [8, 32], strides = [1, 1]} : vector<8x128xf32> to vector<8x32xf32>
    %279 = vector.extract_strided_slice %276 {offsets = [0, 32], sizes = [8, 32], strides = [1, 1]} : vector<8x128xf32> to vector<8x32xf32>
    %280 = vector.extract_strided_slice %277 {offsets = [0, 64], sizes = [8, 32], strides = [1, 1]} : vector<8x128xf32> to vector<8x32xf32>
    %281 = vector.extract_strided_slice %276 {offsets = [0, 96], sizes = [8, 32], strides = [1, 1]} : vector<8x128xf32> to vector<8x32xf32>
    %282 = arith.mulf %279, %208 : vector<8x32xf32>
    %283 = arith.mulf %278, %280 : vector<8x32xf32>
    %284 = arith.addf %282, %283 : vector<8x32xf32>
    %285 = math.tanh %284 : vector<8x32xf32>
    %286 = arith.mulf %281, %285 : vector<8x32xf32>
    %287 = arith.truncf %286 : vector<8x32xf32> to vector<8x32xbf16>
    %cst_92 = arith.constant dense<0.000000e+00> : vector<8x128xf32>
    %288 = tpu.matmul %269, %1, %cst_92 {dimension_numbers = #tpu.dot_dimension_numbers<[1], [0], [0], [1], [0, 0, 1, 1], [], []>} : vector<8x32xbf16>, vector<32x128xbf16>, vector<8x128xf32> -> vector<8x128xf32>
    %cst_93 = arith.constant dense<0.000000e+00> : vector<8x128xf32>
    %289 = tpu.matmul %287, %3, %cst_93 {dimension_numbers = #tpu.dot_dimension_numbers<[1], [0], [0], [1], [0, 0, 1, 1], [], []>} : vector<8x32xbf16>, vector<32x128xbf16>, vector<8x128xf32> -> vector<8x128xf32>
    %290 = arith.addf %289, %4 : vector<8x128xf32>
    %cst_94 = arith.constant dense<0.000000e+00> : vector<8x160xf32>
    %291 = tpu.matmul %287, %5, %cst_94 {dimension_numbers = #tpu.dot_dimension_numbers<[1], [0], [0], [1], [0, 0, 1, 1], [], []>} : vector<8x32xbf16>, vector<32x160xbf16>, vector<8x160xf32> -> vector<8x160xf32>
    %292 = arith.addf %291, %6 : vector<8x160xf32>
    %293 = vector.extract_strided_slice %292 {offsets = [0, 0], sizes = [8, 128], strides = [1, 1]} : vector<8x160xf32> to vector<8x128xf32>
    %294 = vector.extract_strided_slice %292 {offsets = [0, 128], sizes = [8, 32], strides = [1, 1]} : vector<8x160xf32> to vector<8x32xf32>
    %295 = arith.truncf %294 : vector<8x32xf32> to vector<8x32xbf16>
    %296 = vector.shape_cast %295 : vector<8x32xbf16> to vector<8x1x32xbf16>
    "tpu.trace_start"() <{level = 10 : i32, message = "bqh,blh->bql"}> : () -> ()
    %cst_95 = arith.constant dense<0.000000e+00> : vector<8x1x128xf32>
    %297 = tpu.matmul %296, %0, %cst_95 {dimension_numbers = #tpu.dot_dimension_numbers<[2], [2], [1], [1], [0, 0, 0, 1, 1, 1], [0], [0]>} : vector<8x1x32xbf16>, vector<8x128x32xbf16>, vector<8x1x128xf32> -> vector<8x1x128xf32>
    "tpu.trace_stop"() : () -> ()
    %cst_96 = arith.constant dense<0.000000e+00> : vector<8x128xf32>
    %298 = vector.multi_reduction <add>, %297, %cst_96 [1] : vector<8x1x128xf32> to vector<8x128xf32>
    %299 = arith.addf %298, %8 : vector<8x128xf32>
    %cst_97 = arith.constant dense<0xFF800000> : vector<8xf32>
    %300 = vector.multi_reduction <maximumf>, %299, %cst_97 [1] : vector<8x128xf32> to vector<8xf32>
    %301 = vector.shape_cast %300 : vector<8xf32> to vector<8x1xf32>
    %302 = vector.broadcast %301 : vector<8x1xf32> to vector<8x128xf32>
    %303 = arith.subf %299, %302 : vector<8x128xf32>
    %304 = math.exp %303 : vector<8x128xf32>
    %cst_98 = arith.constant dense<0.000000e+00> : vector<8xf32>
    %305 = vector.multi_reduction <add>, %304, %cst_98 [1] : vector<8x128xf32> to vector<8xf32>
    %306 = vector.shape_cast %305 : vector<8xf32> to vector<8x1xf32>
    %307 = tpu.reciprocal %306 {approx = true} : vector<8x1xf32> -> vector<8x1xf32>
    %308 = vector.broadcast %307 : vector<8x1xf32> to vector<8x128xf32>
    %309 = arith.mulf %304, %308 : vector<8x128xf32>
    %310 = arith.truncf %309 : vector<8x128xf32> to vector<8x128xbf16>
    %311 = vector.shape_cast %310 : vector<8x128xbf16> to vector<8x1x128xbf16>
    "tpu.trace_start"() <{level = 10 : i32, message = "bql,blh->bqh"}> : () -> ()
    %cst_99 = arith.constant dense<0.000000e+00> : vector<8x1x32xf32>
    %312 = tpu.matmul %311, %0, %cst_99 {dimension_numbers = #tpu.dot_dimension_numbers<[2], [1], [1], [2], [0, 0, 0, 1, 1, 2], [0], [0]>} : vector<8x1x128xbf16>, vector<8x128x32xbf16>, vector<8x1x32xf32> -> vector<8x1x32xf32>
    "tpu.trace_stop"() : () -> ()
    %cst_100 = arith.constant dense<0.000000e+00> : vector<8x32xf32>
    %313 = vector.multi_reduction <add>, %312, %cst_100 [1] : vector<8x1x32xf32> to vector<8x32xf32>
    %314 = arith.truncf %313 : vector<8x32xf32> to vector<8x32xbf16>
    %cst_101 = arith.constant dense<0.000000e+00> : vector<8x128xf32>
    %315 = tpu.matmul %314, %7, %cst_101 {dimension_numbers = #tpu.dot_dimension_numbers<[1], [0], [0], [1], [0, 0, 1, 1], [], []>} : vector<8x32xbf16>, vector<32x128xbf16>, vector<8x128xf32> -> vector<8x128xf32>
    %316 = arith.addf %315, %293 : vector<8x128xf32>
    %317 = math.tanh %316 : vector<8x128xf32>
    %318 = arith.index_cast %c3_i32 : i32 to index
    %c0_102 = arith.constant 0 : index
    %c0_103 = arith.constant 0 : index
    %319 = vector.load %arg12[%318, %c0_102, %c0_103] : memref<6x8x128xf32, #tpu.memory_space<vmem>>, vector<1x8x128xf32>
    %320 = vector.shape_cast %319 : vector<1x8x128xf32> to vector<8x128xf32>
    %321 = vector.shape_cast %317 : vector<8x128xf32> to vector<1x8x128xf32>
    tpu.vector_store %arg12[%318, %c0_102, %c0_103], %321 {strides = array<i32>} : memref<6x8x128xf32, #tpu.memory_space<vmem>>, vector<1x8x128xf32>,
    %322 = arith.index_cast %c3_i32 : i32 to index
    %c0_104 = arith.constant 0 : index
    %c0_105 = arith.constant 0 : index
    %323 = vector.load %arg13[%322, %c0_104, %c0_105] : memref<6x8x128xf32, #tpu.memory_space<vmem>>, vector<1x8x128xf32>
    %324 = vector.shape_cast %323 : vector<1x8x128xf32> to vector<8x128xf32>
    %325 = vector.shape_cast %309 : vector<8x128xf32> to vector<1x8x128xf32>
    tpu.vector_store %arg13[%322, %c0_104, %c0_105], %325 {strides = array<i32>} : memref<6x8x128xf32, #tpu.memory_space<vmem>>, vector<1x8x128xf32>,
    %c4_i32 = arith.constant 4 : i32
    %326 = arith.index_cast %c4_i32 : i32 to index
    %c0_106 = arith.constant 0 : index
    %c0_107 = arith.constant 0 : index
    %327 = vector.load %arg0[%326, %c0_106, %c0_107] : memref<6x8x128xf32, #tpu.memory_space<vmem>>, vector<1x8x128xf32>
    %328 = vector.shape_cast %327 : vector<1x8x128xf32> to vector<8x128xf32>
    %329 = arith.addf %328, %288 : vector<8x128xf32>
    %330 = arith.negf %329 : vector<8x128xf32>
    %331 = math.exp %330 : vector<8x128xf32>
    %cst_108 = arith.constant 1.000000e+00 : f32
    %332 = vector.broadcast %cst_108 : f32 to vector<8x128xf32>
    %333 = arith.addf %332, %331 : vector<8x128xf32>
    %334 = arith.divf %332, %333 : vector<8x128xf32>
    %335 = math.tanh %329 : vector<8x128xf32>
    %336 = vector.extract_strided_slice %334 {offsets = [0, 0], sizes = [8, 32], strides = [1, 1]} : vector<8x128xf32> to vector<8x32xf32>
    %337 = vector.extract_strided_slice %334 {offsets = [0, 32], sizes = [8, 32], strides = [1, 1]} : vector<8x128xf32> to vector<8x32xf32>
    %338 = vector.extract_strided_slice %335 {offsets = [0, 64], sizes = [8, 32], strides = [1, 1]} : vector<8x128xf32> to vector<8x32xf32>
    %339 = vector.extract_strided_slice %334 {offsets = [0, 96], sizes = [8, 32], strides = [1, 1]} : vector<8x128xf32> to vector<8x32xf32>
    %340 = arith.mulf %337, %266 : vector<8x32xf32>
    %341 = arith.mulf %336, %338 : vector<8x32xf32>
    %342 = arith.addf %340, %341 : vector<8x32xf32>
    %343 = math.tanh %342 : vector<8x32xf32>
    %344 = arith.mulf %339, %343 : vector<8x32xf32>
    %345 = arith.truncf %344 : vector<8x32xf32> to vector<8x32xbf16>
    %cst_109 = arith.constant dense<0.000000e+00> : vector<8x128xf32>
    %346 = tpu.matmul %345, %2, %cst_109 {dimension_numbers = #tpu.dot_dimension_numbers<[1], [0], [0], [1], [0, 0, 1, 1], [], []>} : vector<8x32xbf16>, vector<32x128xbf16>, vector<8x128xf32> -> vector<8x128xf32>
    %347 = arith.addf %346, %290 : vector<8x128xf32>
    %348 = arith.negf %347 : vector<8x128xf32>
    %349 = math.exp %348 : vector<8x128xf32>
    %cst_110 = arith.constant 1.000000e+00 : f32
    %350 = vector.broadcast %cst_110 : f32 to vector<8x128xf32>
    %351 = arith.addf %350, %349 : vector<8x128xf32>
    %352 = arith.divf %350, %351 : vector<8x128xf32>
    %353 = math.tanh %347 : vector<8x128xf32>
    %354 = vector.extract_strided_slice %352 {offsets = [0, 0], sizes = [8, 32], strides = [1, 1]} : vector<8x128xf32> to vector<8x32xf32>
    %355 = vector.extract_strided_slice %352 {offsets = [0, 32], sizes = [8, 32], strides = [1, 1]} : vector<8x128xf32> to vector<8x32xf32>
    %356 = vector.extract_strided_slice %353 {offsets = [0, 64], sizes = [8, 32], strides = [1, 1]} : vector<8x128xf32> to vector<8x32xf32>
    %357 = vector.extract_strided_slice %352 {offsets = [0, 96], sizes = [8, 32], strides = [1, 1]} : vector<8x128xf32> to vector<8x32xf32>
    %358 = arith.mulf %355, %284 : vector<8x32xf32>
    %359 = arith.mulf %354, %356 : vector<8x32xf32>
    %360 = arith.addf %358, %359 : vector<8x32xf32>
    %361 = math.tanh %360 : vector<8x32xf32>
    %362 = arith.mulf %357, %361 : vector<8x32xf32>
    %363 = arith.truncf %362 : vector<8x32xf32> to vector<8x32xbf16>
    %cst_111 = arith.constant dense<0.000000e+00> : vector<8x128xf32>
    %364 = tpu.matmul %345, %1, %cst_111 {dimension_numbers = #tpu.dot_dimension_numbers<[1], [0], [0], [1], [0, 0, 1, 1], [], []>} : vector<8x32xbf16>, vector<32x128xbf16>, vector<8x128xf32> -> vector<8x128xf32>
    %cst_112 = arith.constant dense<0.000000e+00> : vector<8x128xf32>
    %365 = tpu.matmul %363, %3, %cst_112 {dimension_numbers = #tpu.dot_dimension_numbers<[1], [0], [0], [1], [0, 0, 1, 1], [], []>} : vector<8x32xbf16>, vector<32x128xbf16>, vector<8x128xf32> -> vector<8x128xf32>
    %366 = arith.addf %365, %4 : vector<8x128xf32>
    %cst_113 = arith.constant dense<0.000000e+00> : vector<8x160xf32>
    %367 = tpu.matmul %363, %5, %cst_113 {dimension_numbers = #tpu.dot_dimension_numbers<[1], [0], [0], [1], [0, 0, 1, 1], [], []>} : vector<8x32xbf16>, vector<32x160xbf16>, vector<8x160xf32> -> vector<8x160xf32>
    %368 = arith.addf %367, %6 : vector<8x160xf32>
    %369 = vector.extract_strided_slice %368 {offsets = [0, 0], sizes = [8, 128], strides = [1, 1]} : vector<8x160xf32> to vector<8x128xf32>
    %370 = vector.extract_strided_slice %368 {offsets = [0, 128], sizes = [8, 32], strides = [1, 1]} : vector<8x160xf32> to vector<8x32xf32>
    %371 = arith.truncf %370 : vector<8x32xf32> to vector<8x32xbf16>
    %372 = vector.shape_cast %371 : vector<8x32xbf16> to vector<8x1x32xbf16>
    "tpu.trace_start"() <{level = 10 : i32, message = "bqh,blh->bql"}> : () -> ()
    %cst_114 = arith.constant dense<0.000000e+00> : vector<8x1x128xf32>
    %373 = tpu.matmul %372, %0, %cst_114 {dimension_numbers = #tpu.dot_dimension_numbers<[2], [2], [1], [1], [0, 0, 0, 1, 1, 1], [0], [0]>} : vector<8x1x32xbf16>, vector<8x128x32xbf16>, vector<8x1x128xf32> -> vector<8x1x128xf32>
    "tpu.trace_stop"() : () -> ()
    %cst_115 = arith.constant dense<0.000000e+00> : vector<8x128xf32>
    %374 = vector.multi_reduction <add>, %373, %cst_115 [1] : vector<8x1x128xf32> to vector<8x128xf32>
    %375 = arith.addf %374, %8 : vector<8x128xf32>
    %cst_116 = arith.constant dense<0xFF800000> : vector<8xf32>
    %376 = vector.multi_reduction <maximumf>, %375, %cst_116 [1] : vector<8x128xf32> to vector<8xf32>
    %377 = vector.shape_cast %376 : vector<8xf32> to vector<8x1xf32>
    %378 = vector.broadcast %377 : vector<8x1xf32> to vector<8x128xf32>
    %379 = arith.subf %375, %378 : vector<8x128xf32>
    %380 = math.exp %379 : vector<8x128xf32>
    %cst_117 = arith.constant dense<0.000000e+00> : vector<8xf32>
    %381 = vector.multi_reduction <add>, %380, %cst_117 [1] : vector<8x128xf32> to vector<8xf32>
    %382 = vector.shape_cast %381 : vector<8xf32> to vector<8x1xf32>
    %383 = tpu.reciprocal %382 {approx = true} : vector<8x1xf32> -> vector<8x1xf32>
    %384 = vector.broadcast %383 : vector<8x1xf32> to vector<8x128xf32>
    %385 = arith.mulf %380, %384 : vector<8x128xf32>
    %386 = arith.truncf %385 : vector<8x128xf32> to vector<8x128xbf16>
    %387 = vector.shape_cast %386 : vector<8x128xbf16> to vector<8x1x128xbf16>
    "tpu.trace_start"() <{level = 10 : i32, message = "bql,blh->bqh"}> : () -> ()
    %cst_118 = arith.constant dense<0.000000e+00> : vector<8x1x32xf32>
    %388 = tpu.matmul %387, %0, %cst_118 {dimension_numbers = #tpu.dot_dimension_numbers<[2], [1], [1], [2], [0, 0, 0, 1, 1, 2], [0], [0]>} : vector<8x1x128xbf16>, vector<8x128x32xbf16>, vector<8x1x32xf32> -> vector<8x1x32xf32>
    "tpu.trace_stop"() : () -> ()
    %cst_119 = arith.constant dense<0.000000e+00> : vector<8x32xf32>
    %389 = vector.multi_reduction <add>, %388, %cst_119 [1] : vector<8x1x32xf32> to vector<8x32xf32>
    %390 = arith.truncf %389 : vector<8x32xf32> to vector<8x32xbf16>
    %cst_120 = arith.constant dense<0.000000e+00> : vector<8x128xf32>
    %391 = tpu.matmul %390, %7, %cst_120 {dimension_numbers = #tpu.dot_dimension_numbers<[1], [0], [0], [1], [0, 0, 1, 1], [], []>} : vector<8x32xbf16>, vector<32x128xbf16>, vector<8x128xf32> -> vector<8x128xf32>
    %392 = arith.addf %391, %369 : vector<8x128xf32>
    %393 = math.tanh %392 : vector<8x128xf32>
    %394 = arith.index_cast %c4_i32 : i32 to index
    %c0_121 = arith.constant 0 : index
    %c0_122 = arith.constant 0 : index
    %395 = vector.load %arg12[%394, %c0_121, %c0_122] : memref<6x8x128xf32, #tpu.memory_space<vmem>>, vector<1x8x128xf32>
    %396 = vector.shape_cast %395 : vector<1x8x128xf32> to vector<8x128xf32>
    %397 = vector.shape_cast %393 : vector<8x128xf32> to vector<1x8x128xf32>
    tpu.vector_store %arg12[%394, %c0_121, %c0_122], %397 {strides = array<i32>} : memref<6x8x128xf32, #tpu.memory_space<vmem>>, vector<1x8x128xf32>,
    %398 = arith.index_cast %c4_i32 : i32 to index
    %c0_123 = arith.constant 0 : index
    %c0_124 = arith.constant 0 : index
    %399 = vector.load %arg13[%398, %c0_123, %c0_124] : memref<6x8x128xf32, #tpu.memory_space<vmem>>, vector<1x8x128xf32>
    %400 = vector.shape_cast %399 : vector<1x8x128xf32> to vector<8x128xf32>
    %401 = vector.shape_cast %385 : vector<8x128xf32> to vector<1x8x128xf32>
    tpu.vector_store %arg13[%398, %c0_123, %c0_124], %401 {strides = array<i32>} : memref<6x8x128xf32, #tpu.memory_space<vmem>>, vector<1x8x128xf32>,
    %c5_i32 = arith.constant 5 : i32
    %402 = arith.index_cast %c5_i32 : i32 to index
    %c0_125 = arith.constant 0 : index
    %c0_126 = arith.constant 0 : index
    %403 = vector.load %arg0[%402, %c0_125, %c0_126] : memref<6x8x128xf32, #tpu.memory_space<vmem>>, vector<1x8x128xf32>
    %404 = vector.shape_cast %403 : vector<1x8x128xf32> to vector<8x128xf32>
    %405 = arith.addf %404, %364 : vector<8x128xf32>
    %406 = arith.negf %405 : vector<8x128xf32>
    %407 = math.exp %406 : vector<8x128xf32>
    %cst_127 = arith.constant 1.000000e+00 : f32
    %408 = vector.broadcast %cst_127 : f32 to vector<8x128xf32>
    %409 = arith.addf %408, %407 : vector<8x128xf32>
    %410 = arith.divf %408, %409 : vector<8x128xf32>
    %411 = math.tanh %405 : vector<8x128xf32>
    %412 = vector.extract_strided_slice %410 {offsets = [0, 0], sizes = [8, 32], strides = [1, 1]} : vector<8x128xf32> to vector<8x32xf32>
    %413 = vector.extract_strided_slice %410 {offsets = [0, 32], sizes = [8, 32], strides = [1, 1]} : vector<8x128xf32> to vector<8x32xf32>
    %414 = vector.extract_strided_slice %411 {offsets = [0, 64], sizes = [8, 32], strides = [1, 1]} : vector<8x128xf32> to vector<8x32xf32>
    %415 = vector.extract_strided_slice %410 {offsets = [0, 96], sizes = [8, 32], strides = [1, 1]} : vector<8x128xf32> to vector<8x32xf32>
    %416 = arith.mulf %413, %342 : vector<8x32xf32>
    %417 = arith.mulf %412, %414 : vector<8x32xf32>
    %418 = arith.addf %416, %417 : vector<8x32xf32>
    %419 = math.tanh %418 : vector<8x32xf32>
    %420 = arith.mulf %415, %419 : vector<8x32xf32>
    %421 = arith.truncf %420 : vector<8x32xf32> to vector<8x32xbf16>
    %cst_128 = arith.constant dense<0.000000e+00> : vector<8x128xf32>
    %422 = tpu.matmul %421, %2, %cst_128 {dimension_numbers = #tpu.dot_dimension_numbers<[1], [0], [0], [1], [0, 0, 1, 1], [], []>} : vector<8x32xbf16>, vector<32x128xbf16>, vector<8x128xf32> -> vector<8x128xf32>
    %423 = arith.addf %422, %366 : vector<8x128xf32>
    %424 = arith.negf %423 : vector<8x128xf32>
    %425 = math.exp %424 : vector<8x128xf32>
    %cst_129 = arith.constant 1.000000e+00 : f32
    %426 = vector.broadcast %cst_129 : f32 to vector<8x128xf32>
    %427 = arith.addf %426, %425 : vector<8x128xf32>
    %428 = arith.divf %426, %427 : vector<8x128xf32>
    %429 = math.tanh %423 : vector<8x128xf32>
    %430 = vector.extract_strided_slice %428 {offsets = [0, 0], sizes = [8, 32], strides = [1, 1]} : vector<8x128xf32> to vector<8x32xf32>
    %431 = vector.extract_strided_slice %428 {offsets = [0, 32], sizes = [8, 32], strides = [1, 1]} : vector<8x128xf32> to vector<8x32xf32>
    %432 = vector.extract_strided_slice %429 {offsets = [0, 64], sizes = [8, 32], strides = [1, 1]} : vector<8x128xf32> to vector<8x32xf32>
    %433 = vector.extract_strided_slice %428 {offsets = [0, 96], sizes = [8, 32], strides = [1, 1]} : vector<8x128xf32> to vector<8x32xf32>
    %434 = arith.mulf %431, %360 : vector<8x32xf32>
    %435 = arith.mulf %430, %432 : vector<8x32xf32>
    %436 = arith.addf %434, %435 : vector<8x32xf32>
    %437 = math.tanh %436 : vector<8x32xf32>
    %438 = arith.mulf %433, %437 : vector<8x32xf32>
    %439 = arith.truncf %438 : vector<8x32xf32> to vector<8x32xbf16>
    %cst_130 = arith.constant dense<0.000000e+00> : vector<8x128xf32>
    %440 = tpu.matmul %421, %1, %cst_130 {dimension_numbers = #tpu.dot_dimension_numbers<[1], [0], [0], [1], [0, 0, 1, 1], [], []>} : vector<8x32xbf16>, vector<32x128xbf16>, vector<8x128xf32> -> vector<8x128xf32>
    %cst_131 = arith.constant dense<0.000000e+00> : vector<8x128xf32>
    %441 = tpu.matmul %439, %3, %cst_131 {dimension_numbers = #tpu.dot_dimension_numbers<[1], [0], [0], [1], [0, 0, 1, 1], [], []>} : vector<8x32xbf16>, vector<32x128xbf16>, vector<8x128xf32> -> vector<8x128xf32>
    %442 = arith.addf %441, %4 : vector<8x128xf32>
    %cst_132 = arith.constant dense<0.000000e+00> : vector<8x160xf32>
    %443 = tpu.matmul %439, %5, %cst_132 {dimension_numbers = #tpu.dot_dimension_numbers<[1], [0], [0], [1], [0, 0, 1, 1], [], []>} : vector<8x32xbf16>, vector<32x160xbf16>, vector<8x160xf32> -> vector<8x160xf32>
    %444 = arith.addf %443, %6 : vector<8x160xf32>
    %445 = vector.extract_strided_slice %444 {offsets = [0, 0], sizes = [8, 128], strides = [1, 1]} : vector<8x160xf32> to vector<8x128xf32>
    %446 = vector.extract_strided_slice %444 {offsets = [0, 128], sizes = [8, 32], strides = [1, 1]} : vector<8x160xf32> to vector<8x32xf32>
    %447 = arith.truncf %446 : vector<8x32xf32> to vector<8x32xbf16>
    %448 = vector.shape_cast %447 : vector<8x32xbf16> to vector<8x1x32xbf16>
    "tpu.trace_start"() <{level = 10 : i32, message = "bqh,blh->bql"}> : () -> ()
    %cst_133 = arith.constant dense<0.000000e+00> : vector<8x1x128xf32>
    %449 = tpu.matmul %448, %0, %cst_133 {dimension_numbers = #tpu.dot_dimension_numbers<[2], [2], [1], [1], [0, 0, 0, 1, 1, 1], [0], [0]>} : vector<8x1x32xbf16>, vector<8x128x32xbf16>, vector<8x1x128xf32> -> vector<8x1x128xf32>
    "tpu.trace_stop"() : () -> ()
    %cst_134 = arith.constant dense<0.000000e+00> : vector<8x128xf32>
    %450 = vector.multi_reduction <add>, %449, %cst_134 [1] : vector<8x1x128xf32> to vector<8x128xf32>
    %451 = arith.addf %450, %8 : vector<8x128xf32>
    %cst_135 = arith.constant dense<0xFF800000> : vector<8xf32>
    %452 = vector.multi_reduction <maximumf>, %451, %cst_135 [1] : vector<8x128xf32> to vector<8xf32>
    %453 = vector.shape_cast %452 : vector<8xf32> to vector<8x1xf32>
    %454 = vector.broadcast %453 : vector<8x1xf32> to vector<8x128xf32>
    %455 = arith.subf %451, %454 : vector<8x128xf32>
    %456 = math.exp %455 : vector<8x128xf32>
    %cst_136 = arith.constant dense<0.000000e+00> : vector<8xf32>
    %457 = vector.multi_reduction <add>, %456, %cst_136 [1] : vector<8x128xf32> to vector<8xf32>
    %458 = vector.shape_cast %457 : vector<8xf32> to vector<8x1xf32>
    %459 = tpu.reciprocal %458 {approx = true} : vector<8x1xf32> -> vector<8x1xf32>
    %460 = vector.broadcast %459 : vector<8x1xf32> to vector<8x128xf32>
    %461 = arith.mulf %456, %460 : vector<8x128xf32>
    %462 = arith.truncf %461 : vector<8x128xf32> to vector<8x128xbf16>
    %463 = vector.shape_cast %462 : vector<8x128xbf16> to vector<8x1x128xbf16>
    "tpu.trace_start"() <{level = 10 : i32, message = "bql,blh->bqh"}> : () -> ()
    %cst_137 = arith.constant dense<0.000000e+00> : vector<8x1x32xf32>
    %464 = tpu.matmul %463, %0, %cst_137 {dimension_numbers = #tpu.dot_dimension_numbers<[2], [1], [1], [2], [0, 0, 0, 1, 1, 2], [0], [0]>} : vector<8x1x128xbf16>, vector<8x128x32xbf16>, vector<8x1x32xf32> -> vector<8x1x32xf32>
    "tpu.trace_stop"() : () -> ()
    %cst_138 = arith.constant dense<0.000000e+00> : vector<8x32xf32>
    %465 = vector.multi_reduction <add>, %464, %cst_138 [1] : vector<8x1x32xf32> to vector<8x32xf32>
    %466 = arith.truncf %465 : vector<8x32xf32> to vector<8x32xbf16>
    %cst_139 = arith.constant dense<0.000000e+00> : vector<8x128xf32>
    %467 = tpu.matmul %466, %7, %cst_139 {dimension_numbers = #tpu.dot_dimension_numbers<[1], [0], [0], [1], [0, 0, 1, 1], [], []>} : vector<8x32xbf16>, vector<32x128xbf16>, vector<8x128xf32> -> vector<8x128xf32>
    %468 = arith.addf %467, %445 : vector<8x128xf32>
    %469 = math.tanh %468 : vector<8x128xf32>
    %470 = arith.index_cast %c5_i32 : i32 to index
    %c0_140 = arith.constant 0 : index
    %c0_141 = arith.constant 0 : index
    %471 = vector.load %arg12[%470, %c0_140, %c0_141] : memref<6x8x128xf32, #tpu.memory_space<vmem>>, vector<1x8x128xf32>
    %472 = vector.shape_cast %471 : vector<1x8x128xf32> to vector<8x128xf32>
    %473 = vector.shape_cast %469 : vector<8x128xf32> to vector<1x8x128xf32>
    tpu.vector_store %arg12[%470, %c0_140, %c0_141], %473 {strides = array<i32>} : memref<6x8x128xf32, #tpu.memory_space<vmem>>, vector<1x8x128xf32>,
    %474 = arith.index_cast %c5_i32 : i32 to index
    %c0_142 = arith.constant 0 : index
    %c0_143 = arith.constant 0 : index
    %475 = vector.load %arg13[%474, %c0_142, %c0_143] : memref<6x8x128xf32, #tpu.memory_space<vmem>>, vector<1x8x128xf32>
    %476 = vector.shape_cast %475 : vector<1x8x128xf32> to vector<8x128xf32>
    %477 = vector.shape_cast %461 : vector<8x128xf32> to vector<1x8x128xf32>
    tpu.vector_store %arg13[%474, %c0_142, %c0_143], %477 {strides = array<i32>} : memref<6x8x128xf32, #tpu.memory_space<vmem>>, vector<1x8x128xf32>,
    %c6_i32 = arith.constant 6 : i32
    %478 = arith.extf %421 : vector<8x32xbf16> to vector<8x32xf32>
    %c0_144 = arith.constant 0 : index
    %c0_145 = arith.constant 0 : index
    %c0_146 = arith.constant 0 : index
    %479 = vector.load %arg14[%c0_144, %c0_145, %c0_146] : memref<2x8x32xf32, #tpu.memory_space<vmem>>, vector<1x8x32xf32>
    %480 = vector.shape_cast %479 : vector<1x8x32xf32> to vector<8x32xf32>
    %481 = vector.shape_cast %478 : vector<8x32xf32> to vector<1x8x32xf32>
    tpu.vector_store %arg14[%c0_144, %c0_145, %c0_146], %481 {strides = array<i32>} : memref<2x8x32xf32, #tpu.memory_space<vmem>>, vector<1x8x32xf32>,
    %482 = arith.extf %439 : vector<8x32xbf16> to vector<8x32xf32>
    %c1_147 = arith.constant 1 : index
    %c0_148 = arith.constant 0 : index
    %c0_149 = arith.constant 0 : index
    %483 = vector.load %arg14[%c1_147, %c0_148, %c0_149] : memref<2x8x32xf32, #tpu.memory_space<vmem>>, vector<1x8x32xf32>
    %484 = vector.shape_cast %483 : vector<1x8x32xf32> to vector<8x32xf32>
    %485 = vector.shape_cast %482 : vector<8x32xf32> to vector<1x8x32xf32>
    tpu.vector_store %arg14[%c1_147, %c0_148, %c0_149], %485 {strides = array<i32>} : memref<2x8x32xf32, #tpu.memory_space<vmem>>, vector<1x8x32xf32>,
    %c0_150 = arith.constant 0 : index
    %c0_151 = arith.constant 0 : index
    %c0_152 = arith.constant 0 : index
    %486 = vector.load %arg15[%c0_150, %c0_151, %c0_152] : memref<2x8x32xf32, #tpu.memory_space<vmem>>, vector<1x8x32xf32>
    %487 = vector.shape_cast %486 : vector<1x8x32xf32> to vector<8x32xf32>
    %488 = vector.shape_cast %418 : vector<8x32xf32> to vector<1x8x32xf32>
    tpu.vector_store %arg15[%c0_150, %c0_151, %c0_152], %488 {strides = array<i32>} : memref<2x8x32xf32, #tpu.memory_space<vmem>>, vector<1x8x32xf32>,
    %c1_153 = arith.constant 1 : index
    %c0_154 = arith.constant 0 : index
    %c0_155 = arith.constant 0 : index
    %489 = vector.load %arg15[%c1_153, %c0_154, %c0_155] : memref<2x8x32xf32, #tpu.memory_space<vmem>>, vector<1x8x32xf32>
    %490 = vector.shape_cast %489 : vector<1x8x32xf32> to vector<8x32xf32>
    %491 = vector.shape_cast %436 : vector<8x32xf32> to vector<1x8x32xf32>
    tpu.vector_store %arg15[%c1_153, %c0_154, %c0_155], %491 {strides = array<i32>} : memref<2x8x32xf32, #tpu.memory_space<vmem>>, vector<1x8x32xf32>,
    return
  }
}

</mosaic_0001>

<bundles_post_ra>
// kernel: tpu_custom_call.1
= control target key start
LH: loop header
LB: loop body
LE: loop exit
PB: predicated region body
PF: predicated region fallthrough
CT: control target
= control target key end

     0   :  { %21 = vsyncpa [#allocation3], 0  ;;  %s16718_s0 = inlined_call_operand.vmem [shape: f32[6,8,128], index: 0, kind: input, shape index: {}]   ;;  %s16719_s1 = inlined_call_operand.vmem [shape: f32[2,8,32], index: 1, kind: input, shape index: {}]   ;;  %s16720_s2 = inlined_call_operand.vmem [shape: f32[2,8,32], index: 2, kind: input, shape index: {}]   ;;  %s16721_s3 = inlined_call_operand.vmem [shape: bf16[8,128,32], index: 3, kind: input, shape index: {}]   ;;  %s16722_s4 = inlined_call_operand.vmem [shape: bf16[32,128], index: 4, kind: input, shape index: {}]   ;;  %s16723_s5 = inlined_call_operand.vmem [shape: bf16[32,128], index: 5, kind: input, shape index: {}]   ;;  %s16724_s6 = inlined_call_operand.vmem [shape: bf16[32,128], index: 6, kind: input, shape index: {}]   ;;  %s16725_s7 = inlined_call_operand.vmem [shape: f32[8,128], index: 7, kind: input, shape index: {}]   ;;  %s16726_s8 = inlined_call_operand.vmem [shape: bf16[32,160], index: 8, kind: input, shape index: {}]   ;;  %s16727_s9 = inlined_call_operand.vmem [shape: f32[8,160], index: 9, kind: input, shape index: {}]   ;;  %s16728_s10 = inlined_call_operand.vmem [shape: bf16[32,128], index: 10, kind: input, shape index: {}]   ;;  %s16729_s11 = inlined_call_operand.vmem [shape: f32[8,128], index: 11, kind: input, shape index: {}]   ;;  %s16730_s12 = inlined_call_operand.hbm [shape: f32[6,8,128], index: 12, kind: output, shape index: {0}]   ;;  %s16731_s13 = inlined_call_operand.hbm [shape: f32[6,8,128], index: 13, kind: output, shape index: {1}]   ;;  %s16732_s14 = inlined_call_operand.hbm [shape: f32[2,8,32], index: 14, kind: output, shape index: {2}]   ;;  %s16733_s15 = inlined_call_operand.hbm [shape: f32[2,8,32], index: 15, kind: output, shape index: {3}]  }
   0x1   :  { %22 = vsyncpa [#allocation5], 0  ;;  %v11594_v0 = vld [vmem:[%s16722_s4] sm:$0xff]   ;;  %v16875_v1 = vmov 0.0   ;;  %v11595_v2 = vld [vmem:[%s16722_s4 + $0x8] sm:$0xff]   ;;  %vm12379_vm0 = vmmov 0  }
   0x2   :  { %9434 = vmatprep.subr.bf16.mxu0 %v16875_v1  ;;  %9442 = vmatprep.subr.bf16.mxu1 %v16875_v1  ;;  %v201_v3 = vld [vmem:[%s16719_s1] sm:$0xff]  ;;  %vm218_vm1 = vcmask 261120  }
   0x3   :  { %9435 = vmatpush3.bf16.msra.mxu0 %v11594_v0  ;;  %9438 = vmatprep.mubr.msk.bf16.mxu0 %vm12379_vm0, %v16875_v1  ;;  %v202_v4 = vpack.c.bf16 %v201_v3, %v201_v3 }
   0x4   :  { %9436 = vmatprep.subr.bf16.mxu0 %v16875_v1  ;;  %9446 = vmatprep.mubr.msk.bf16.mxu1 %vm12379_vm0, %v16875_v1 }
   0x7   :  { %9437 = vmatpush3.bf16.msra.mxu0 %v11595_v2 }
   0x8   :  { %9458 = vmatprep.subr.bf16.mxu0 %v16875_v1 }
   0xa   :  { %9439 = vmatmul.mubr.msk.bf16.vlgmr.msra.gmra.mrb[0].mxu0 %vm218_vm1, %v202_v4 }
   0xb   :  { %9459 = vmatpush3.bf16.msra.mxu0 %v11594_v0  ;;  %9462 = vmatprep.mubr.msk.bf16.mxu0 %vm12379_vm0, %v16875_v1 }
   0xc   :  { %9460 = vmatprep.subr.bf16.mxu0 %v16875_v1 }
   0xf   :  { %9461 = vmatpush3.bf16.msra.mxu0 %v11595_v2 }
  0x10   :  { %9466 = vmatprep.subr.bf16.mxu0 %v16875_v1 }
  0x11   :  { %23 = vsyncpa [#allocation8], 0  ;;  %v320_v5 = vld [vmem:[%s16718_s0] sm:$0xff]  ;;  %s12380_s26 = smov 64   ;;  %s12381_s29 = smov 32   ;;  %v11597_v24 = vld [vmem:[%s16724_s6 + $0x8] sm:$0xff]  }
  0x12   :  { %v317_v12 = vld [vmem:[%s16720_s2] sm:$0xff]  ;;  %v8301_v25 = vld [vmem:[%s16719_s1 + $0x8] sm:$0xff]  ;;  %v11603_v58 = vld [vmem:[%s16726_s8 + $0x14] ss:$8 sps:$4 sm:$0xff]   ;;  %v16734_v59 = vmov 0   ;;  %vm1556_vm2 = vcmask 1041409  }
  0x13   :  { %v11596_v23 = vld [vmem:[%s16724_s6] sm:$0xff]   ;;  %v205_v26 = vpack.c.bf16 %v8301_v25, %v8301_v25  ;;  %v11599_v29 = vld [vmem:[%s16723_s5 + $0x8] sm:$0xff]   ;;  %v11605_v60 = vld [vmem:[%s16726_s8 + $0x10] ss:$8 sps:$4 sm:$0xff]   ;;  %vm1559_vm3 = vcmask 1042434   ;;  %vm1562_vm4 = vcmask 1043459  }
  0x14   :  { %9443 = vmatpush3.bf16.msra.mxu1 %v11596_v23  ;;  %v11598_v27 = vld [vmem:[%s16723_s5] sm:$0xff]   ;;  %v8308_v33 = vld [vmem:[%s16720_s2 + $0x8] sm:$0xff]  ;;  %vm1565_vm5 = vcmask 1044484   ;;  %vm1568_vm6 = vcmask 1045509   ;;  %vm1571_vm7 = vcmask 1046534   ;;  %vm1574_vm8 = vcmask 1047559  }
  0x15   :  { %9444 = vmatprep.subr.bf16.mxu1 %v16875_v1  ;;  %v189_v35 = vld [vmem:[%s16725_s7] sm:$0xff]  ;;  %v12688_v25 = vld [vmem:[%s16721_s3 + $0x68] sm:$0xff]  }
  0x16   :  { %v11600_v56 = vld [vmem:[%s16726_s8 + $0x4] ss:$8 sps:$4 sm:$0xff]   ;;  %v11602_v57 = vld [vmem:[%s16726_s8] ss:$8 sps:$4 sm:$0xff]  }
  0x17   :  { %v12567_v2 = vld [vmem:[%s16721_s3] sm:$0xff]  }
  0x18   :  { %9445 = vmatpush3.bf16.msra.mxu1 %v11597_v24  ;;  %v12572_v3 = vld [vmem:[%s16721_s3 + $0x40] sm:$0xff]   ;;  %v12576_v4 = vsel %vm218_vm1, %v12567_v2, 0 }
  0x19   :  { %9450 = vmatprep.subr.bf16.mxu1 %v16875_v1  ;;  %16903 = vst [vmem:[#allocation13_spill] sm:$0xff] %v12576_v4 }
  0x1b   :  { %9447 = vmatmul.mubr.msk.bf16.vlgmr.msra.gmra.mrb[0].mxu1 %vm218_vm1, %v205_v26 }
  0x1c   :  { %9451 = vmatpush3.bf16.msra.mxu1 %v11598_v27  ;;  %9454 = vmatprep.mubr.msk.bf16.mxu1 %vm12379_vm0, %v16875_v1  ;;  %v12696_v27 = vsel %vm218_vm1, %v12688_v25, 0 }
  0x1d   :  { %9452 = vmatprep.subr.bf16.mxu1 %v16875_v1  ;;  %16914 = vst [vmem:[#allocation24_spill] sm:$0xff] %v12696_v27 }
  0x20   :  { %9453 = vmatpush3.bf16.msra.mxu1 %v11599_v29 }
  0x21   :  { %544 = vmatprep.subr.bf16.mxu1 %v11600_v56 }
  0xdd   :  { %v256_v6 = vpop.f32.mrb[0].mxu0 }
  0xde   :  { %v321_v7 = vadd.f32 %v320_v5, %v256_v6  ;;  %v9440_v8 = vpop.f32.mrb[1].mxu0  ;;  %v12580_v5 = vsel %vm218_vm1, %v12572_v3, 0 }
  0xdf   :  { %v259_v9 = vpop.f32.mrb[2].mxu0  ;;  %16904 = vst [vmem:[#allocation14_spill] sm:$0xff] %v12580_v5  ;;  %v12596_v8 = vld [vmem:[%s16721_s3 + $0x48] sm:$0xff]  }
  0xe0   :  { %11672 = vtanh.f32 %v321_v7  ;;  %v9441_v10 = vpop.f32.mrb[3].mxu0  ;;  %v8309_v13 = vmul.f32 -1.442695, %v321_v7  ;;  %v12590_v7 = vld [vmem:[%s16721_s3 + $0x8] sm:$0xff]  }
  0xe1   :  { %v12604_v9 = vsel %vm218_vm1, %v12590_v7, 0  ;;  %v12608_v10 = vsel %vm218_vm1, %v12596_v8, 0 }
  0xe2   :  { %11674 = vpow2.f32 %v8309_v13  ;;  %16905 = vst [vmem:[#allocation15_spill] sm:$0xff] %v12604_v9  ;;  %16906 = vst [vmem:[#allocation16_spill] sm:$0xff] %v12608_v10 }
  0xea   :  { %v11673_v11 = vpop.eup %11672 }
  0xeb   :  { %335 = vrot.lane.b32.xlu0 %v11673_v11, %s12380_s26  ;;  %v12616_v11 = vld [vmem:[%s16721_s3 + $0x10] sm:$0xff]  }
  0xec   :  { %v11675_v14 = vpop.eup %11674  ;;  %v12626_v13 = vsel %vm218_vm1, %v12616_v11, 0 }
  0xed   :  { %v325_v15 = vadd.f32 1.0, %v11675_v14  ;;  %16907 = vst [vmem:[#allocation17_spill] sm:$0xff] %v12626_v13 }
  0xef   :  { %330 = vrot.lane.b32.xlu0 %v317_v12, %s12381_s29  ;;  %11676 = vrcp.f32 %v325_v15  ;;  %v12622_v12 = vld [vmem:[%s16721_s3 + $0x50] sm:$0xff]   ;;  %v12638_v15 = vld [vmem:[%s16721_s3 + $0x18] sm:$0xff]  }
  0xf0   :  { %v12630_v14 = vsel %vm218_vm1, %v12622_v12, 0 }
  0xf1   :  { %16908 = vst [vmem:[#allocation18_spill] sm:$0xff] %v12630_v14 }
  0xf9   :  { %v11677_v16 = vpop.eup %11676 }
 0x15d   :  { %v336_v17 = vpop.permute.xlu0 %335 }
 0x15e   :  { %v338_v18 = vmul.f32 %v11677_v16, %v336_v17  ;;  %v12648_v17 = vsel %vm218_vm1, %v12638_v15, 0 }
 0x15f   :  { %16909 = vst [vmem:[#allocation19_spill] sm:$0xff] %v12648_v17 }
 0x160   :  { %340 = vrot.lane.b32.xlu1 %v338_v18, %s12381_s29 }
 0x161   :  { %v331_v19 = vpop.permute.xlu0 %330 }
 0x162   :  { %v333_v20 = vmul.f32 %v11677_v16, %v331_v19  ;;  %v12660_v19 = vld [vmem:[%s16721_s3 + $0x20] sm:$0xff]  }
 0x1d2   :  { %v341_v21 = vpop.permute.xlu1 %340 }
 0x1d3   :  { %v12502_v22 = vadd.f32 %v341_v21, %v333_v20  ;;  %v12666_v20 = vld [vmem:[%s16721_s3 + $0x60] sm:$0xff]   ;;  %v12670_v21 = vsel %vm218_vm1, %v12660_v19, 0 }
 0x1d4   :  { %16911 = vst [vmem:[#allocation21_spill] sm:$0xff] %v12670_v21 }
 0x1d5   :  { %11678 = vtanh.f32 %v12502_v22 }
 0x1df   :  { %v11679_v28 = vpop.eup %11678 }
 0x1e0   :  { %346 = vrot.lane.b32.xlu1 %v11679_v28, %s12380_s26  ;;  %v12704_v28 = vld [vmem:[%s16721_s3 + $0x30] sm:$0xff]  }
 0x1e1   :  { %v12709_v29 = vsel %vm218_vm1, %v12704_v28, 0 }
 0x1e2   :  { %16915 = vst [vmem:[#allocation25_spill] sm:$0xff] %v12709_v29 }
 0x252   :  { %v347_v30 = vpop.permute.xlu1 %346 }
 0x253   :  { %v349_v31 = vmul.f32 %v11677_v16, %v347_v30  ;;  %v12644_v16 = vld [vmem:[%s16721_s3 + $0x58] sm:$0xff]   ;;  %v12716_v30 = vld [vmem:[%s16721_s3 + $0x70] sm:$0xff]  }
 0x254   :  { %v12652_v18 = vsel %vm218_vm1, %v12644_v16, 0 }
 0x255   :  { %v350_v32 = vpack.c.bf16 %v349_v31, %v349_v31  ;;  %16910 = vst [vmem:[#allocation20_spill] sm:$0xff] %v12652_v18  ;;  %v12720_v31 = vsel %vm218_vm1, %v12716_v30, 0 }
 0x256   :  { %16916 = vst [vmem:[#allocation26_spill] sm:$0xff] %v12720_v31 }
 0x257   :  { %352 = vrot.lane.b32.xlu0 %v350_v32, %s12381_s29  ;;  %v12727_v32 = vld [vmem:[%s16721_s3 + $0x38] sm:$0xff]  }
 0x25b   :  { %417 = vrot.lane.b32.xlu0 %v8308_v33, %s12381_s29  ;;  %v12731_v33 = vsel %vm218_vm1, %v12727_v32, 0 }
 0x25c   :  { %16917 = vst [vmem:[#allocation27_spill] sm:$0xff] %v12731_v33 }
 0x2c9   :  { %v353_v34 = vpop.permute.xlu0 %352 }
 0x2ca   :  { %9455 = vmatmul.mubr.msk.bf16.vlgmr.msra.gmra.mrb[0].mxu1 %vm218_vm1, %v353_v34  ;;  %9463 = vmatmul.mubr.msk.bf16.vlgmr.msra.gmra.mrb[4].mxu0 %vm218_vm1, %v353_v34  ;;  %v12736_v34 = vld [vmem:[%s16721_s3 + $0x78] sm:$0xff]  }
 0x2cb   :  { %9467 = vmatpush3.bf16.msra.mxu0 %v11596_v23  ;;  %9470 = vmatprep.mubr.msk.bf16.mxu0 %vm12379_vm0, %v16875_v1  ;;  %v12674_v23 = vsel %vm218_vm1, %v12666_v20, 0 }
 0x2cc   :  { %9468 = vmatprep.subr.bf16.mxu0 %v16875_v1  ;;  %576 = vmatprep.mubr.bf16.mxu1 %v16734_v59  ;;  %16912 = vst [vmem:[#allocation22_spill] sm:$0xff] %v12674_v23 }
 0x2cd   :  { %v418_v52 = vpop.permute.xlu0 %417  ;;  %545 = vmatpush1.bf16.msra.mxu1 %v11602_v57  ;;  %v12773_v57 = vld [vmem:[%s16721_s3 + $0xc0] sm:$0xff]  }
 0x2ce   :  { %546 = vmatprep.subr.bf16.mxu1 %v11603_v58 }
 0x2cf   :  { %9469 = vmatpush3.bf16.msra.mxu0 %v11597_v24  ;;  %v12682_v24 = vld [vmem:[%s16721_s3 + $0x28] sm:$0xff]  }
 0x2d0   :  { %9474 = vmatprep.subr.bf16.mxu0 %v16875_v1  ;;  %v12692_v26 = vsel %vm218_vm1, %v12682_v24, 0 }
 0x2d1   :  { %547 = vmatpush1.bf16.msra.mxu1 %v11605_v60  ;;  %16913 = vst [vmem:[#allocation23_spill] sm:$0xff] %v12692_v26 }
 0x2d2   :  { %9494 = vmatprep.subr.bf16.mxu1 %v16875_v1 }
 0x39d   :  { %v403_v36 = vpop.f32.mrb[0].mxu1  ;;  %v12541_v37 = vpop.f32.mrb[4].mxu0 }
 0x39e   :  { %v11546_v38 = vadd.f32 %v403_v36, %v189_v35  ;;  %v9456_v39 = vpop.f32.mrb[1].mxu1  ;;  %v9464_v40 = vpop.f32.mrb[5].mxu0  ;;  %v12741_v35 = vsel %vm218_vm1, %v12736_v34, 0  ;;  %v12383_v36 = vmov 1966171168  }
 0x39f   :  { %v406_v41 = vpop.f32.mrb[2].mxu1  ;;  %v475_v42 = vpop.f32.mrb[6].mxu0  ;;  %16918 = vst [vmem:[#allocation28_spill] sm:$0xff] %v12741_v35  ;;  %v590_v39 = vlaneseq }
 0x3a0   :  { %11680 = vtanh.f32 %v11546_v38  ;;  %v9457_v43 = vpop.f32.mrb[3].mxu1  ;;  %v9465_v44 = vpop.f32.mrb[7].mxu0  ;;  %v8313_v46 = vmul.f32 -1.442695, %v11546_v38  ;;  %v588_v38 = vunpack.c.l.s4 %v12383_v36  ;;  %v195_v42 = vld [vmem:[%s16727_s9 + $0x8] sm:$0xff] }
 0x3a1   :  { %v591_v41 = vshrl.u32 %v590_v39, 7  ;;  %v12818_v39 = vld [vmem:[%s16721_s3 + $0x90] sm:$0xff]  }
 0x3a2   :  { %11682 = vpow2.f32 %v8313_v46  ;;  %v589_v40 = vunpack.c.0.s8 %v588_v38 }
 0x3a4   :  { %v12751_v46 = vsub.s32 %v589_v40, %v591_v41  ;;  %v12825_v40 = vld [vmem:[%s16721_s3 + $0xd0] sm:$0xff]  }
 0x3a6   :  { %16920 = vst [vmem:[#allocation30_spill] sm:$0xff] %v12751_v46 }
 0x3aa   :  { %v11681_v45 = vpop.eup %11680 }
 0x3ab   :  { %422 = vrot.lane.b32.xlu1 %v11681_v45, %s12380_s26 }
 0x3ac   :  { %v11683_v47 = vpop.eup %11682 }
 0x3ad   :  { %v412_v48 = vadd.f32 1.0, %v11683_v47 }
 0x3af   :  { %11684 = vrcp.f32 %v412_v48 }
 0x3b9   :  { %v11685_v49 = vpop.eup %11684 }
 0x3ba   :  { %v420_v53 = vmul.f32 %v11685_v49, %v418_v52  ;;  %v12760_v52 = vsub.s32 0, %v591_v41  ;;  %v12829_v41 = vsel %vm218_vm1, %v12818_v39, 0 }
 0x3bb   :  { %16926 = vst [vmem:[#allocation36_spill] sm:$0xff] %v12829_v41 }
 0x3bc   :  { %16921 = vst [vmem:[#allocation31_spill] sm:$0xff] %v12760_v52 }
 0x41d   :  { %v423_v50 = vpop.permute.xlu1 %422 }
 0x41e   :  { %v425_v51 = vmul.f32 %v11685_v49, %v423_v50 }
 0x420   :  { %427 = vrot.lane.b32.xlu1 %v425_v51, %s12381_s29 }
 0x492   :  { %v428_v54 = vpop.permute.xlu1 %427 }
 0x493   :  { %v12545_v55 = vadd.f32 %v428_v54, %v420_v53  ;;  %v12765_v53 = vld [vmem:[%s16721_s3 + $0x80] sm:$0xff]  }
 0x494   :  { %v12778_v60 = vsel %vm218_vm1, %v12765_v53, 0 }
 0x495   :  { %16902 = vst [vmem:[#allocation12_spill] sm:$0xff] %v12545_v55  ;;  %11686 = vtanh.f32 %v12545_v55  ;;  %16922 = vst [vmem:[#allocation32_spill] sm:$0xff] %v12778_v60  ;;  %v13225_v55 = vld [vmem:[%s16721_s3 + $0x1d8] sm:$0xff]  }
 0x496   :  { %16968 = vst [vmem:[#allocation78_spill] sm:$0xff] %v13225_v55 }
 0x49f   :  { %v11687_v61 = vpop.eup %11686 }
 0x4a0   :  { %433 = vrot.lane.b32.xlu0 %v11687_v61, %s12380_s26 }
 0x512   :  { %v434_v62 = vpop.permute.xlu0 %433 }
 0x513   :  { %v436_v63 = vmul.f32 %v11685_v49, %v434_v62 }
 0x515   :  { %v437_v0 = vpack.c.bf16 %v436_v63, %v436_v63  ;;  %v12785_v63 = vsel %vm218_vm1, %v12773_v57, 0 }
 0x516   :  { %16923 = vst [vmem:[#allocation33_spill] sm:$0xff] %v12785_v63 }
 0x517   :  { %479 = vrot.lane.b32.xlu1 %v437_v0, %s12381_s29  ;;  %v12793_v0 = vld [vmem:[%s16721_s3 + $0x88] sm:$0xff]  }
 0x518   :  { %v12807_v36 = vsel %vm218_vm1, %v12793_v0, 0 }
 0x519   :  { %16924 = vst [vmem:[#allocation34_spill] sm:$0xff] %v12807_v36 }
 0x589   :  { %v480_v6 = vpop.permute.xlu1 %479 }
 0x58a   :  { %9471 = vmatmul.mubr.msk.bf16.vlgmr.msra.gmra.mrb[8].mxu0 %vm218_vm1, %v480_v6  ;;  %8320 = vmatmul.mubr.msk.bf16.vlgmr.msra.gmra.mrb[4].mxu1 %vm218_vm1, %v480_v6  ;;  %v12803_v6 = vld [vmem:[%s16721_s3 + $0xc8] sm:$0xff]  }
 0x58b   :  { %9475 = vmatpush3.bf16.xpose.msra.mxu0 %v12576_v4  ;;  %9495 = vmatpush3.bf16.xpose.msra.mxu1 %v12580_v5  ;;  %v12812_v38 = vsel %vm218_vm1, %v12803_v6, 0 }
 0x58c   :  { %9476 = vmatprep.subr.bf16.mxu0 %v16875_v1  ;;  %9496 = vmatprep.subr.bf16.mxu1 %v16875_v1  ;;  %16925 = vst [vmem:[#allocation35_spill] sm:$0xff] %v12812_v38 }
 0x58d   :  { %9490 = vmatprep.mubr.msk.bf16.mxu0 %vm12379_vm0, %v16875_v1  ;;  %9510 = vmatprep.mubr.msk.bf16.mxu1 %vm12379_vm0, %v16875_v1 }
 0x593   :  { %9477 = vmatpush3.bf16.xpose.msra.mxu0 %v12604_v9  ;;  %9497 = vmatpush3.bf16.xpose.msra.mxu1 %v12608_v10 }
 0x594   :  { %9478 = vmatprep.subr.bf16.mxu0 %v16875_v1  ;;  %9498 = vmatprep.subr.bf16.mxu1 %v16875_v1 }
 0x59b   :  { %9479 = vmatpush3.bf16.xpose.msra.mxu0 %v12626_v13  ;;  %9499 = vmatpush3.bf16.xpose.msra.mxu1 %v12630_v14 }
 0x59c   :  { %9480 = vmatprep.subr.bf16.mxu0 %v16875_v1  ;;  %9500 = vmatprep.subr.bf16.mxu1 %v16875_v1 }
 0x5a3   :  { %9481 = vmatpush3.bf16.xpose.msra.mxu0 %v12648_v17  ;;  %9501 = vmatpush3.bf16.xpose.msra.mxu1 %v12652_v18 }
 0x5a4   :  { %9482 = vmatprep.subr.bf16.mxu0 %v16875_v1  ;;  %9502 = vmatprep.subr.bf16.mxu1 %v16875_v1 }
 0x5ab   :  { %9483 = vmatpush3.bf16.xpose.msra.mxu0 %v12670_v21  ;;  %9503 = vmatpush3.bf16.xpose.msra.mxu1 %v12674_v23  ;;  %v13105_v21 = vld [vmem:[%s16721_s3 + $0x170] sm:$0xff]  }
 0x5ac   :  { %9484 = vmatprep.subr.bf16.mxu0 %v16875_v1  ;;  %9504 = vmatprep.subr.bf16.mxu1 %v16875_v1  ;;  %v13114_v18 = vsel %vm218_vm1, %v13105_v21, 0 }
 0x5ad   :  { %16951 = vst [vmem:[#allocation61_spill] sm:$0xff] %v13114_v18 }
 0x5b3   :  { %9485 = vmatpush3.bf16.xpose.msra.mxu0 %v12692_v26  ;;  %9505 = vmatpush3.bf16.xpose.msra.mxu1 %v12696_v27  ;;  %v13083_v26 = vld [vmem:[%s16721_s3 + $0x168] sm:$0xff]  }
 0x5b4   :  { %9486 = vmatprep.subr.bf16.mxu0 %v16875_v1  ;;  %9506 = vmatprep.subr.bf16.mxu1 %v16875_v1  ;;  %v13092_v23 = vsel %vm218_vm1, %v13083_v26, 0 }
 0x5b5   :  { %16949 = vst [vmem:[#allocation59_spill] sm:$0xff] %v13092_v23 }
 0x5bb   :  { %9487 = vmatpush3.bf16.xpose.msra.mxu0 %v12709_v29  ;;  %9507 = vmatpush3.bf16.xpose.msra.mxu1 %v12720_v31  ;;  %v13061_v29 = vld [vmem:[%s16721_s3 + $0x160] sm:$0xff]  }
 0x5bc   :  { %9488 = vmatprep.subr.bf16.mxu0 %v16875_v1  ;;  %9508 = vmatprep.subr.bf16.mxu1 %v16875_v1  ;;  %v13070_v27 = vsel %vm218_vm1, %v13061_v29, 0 }
 0x5bd   :  { %16947 = vst [vmem:[#allocation57_spill] sm:$0xff] %v13070_v27 }
 0x5c3   :  { %9489 = vmatpush3.bf16.xpose.msra.mxu0 %v12731_v33  ;;  %9509 = vmatpush3.bf16.xpose.msra.mxu1 %v12741_v35  ;;  %v13039_v33 = vld [vmem:[%s16721_s3 + $0x158] sm:$0xff]  }
 0x5c4   :  { %9514 = vmatprep.subr.bf16.mxu0 %v16875_v1  ;;  %9534 = vmatprep.subr.bf16.mxu1 %v16875_v1  ;;  %v13048_v31 = vsel %vm218_vm1, %v13039_v33, 0 }
 0x5c5   :  { %16945 = vst [vmem:[#allocation55_spill] sm:$0xff] %v13048_v31 }
 0x65d   :  { %v12749_v43 = vpop.f32.mrb[4].mxu1 }
 0x65e   :  { %16919 = vst [vmem:[#allocation29_spill] sm:$0xff] %v12749_v43  ;;  %v580_v44 = vpop.f32.mrb[5].mxu1  ;;  %v13234_v43 = vsel %vm218_vm1, %v13225_v55, 0 }
 0x65f   :  { %v581_v45 = vadd.f32 %v580_v44, %v195_v42  ;;  %v582_v47 = vpop.f32.mrb[6].mxu1  ;;  %v12834_v42 = vsel %vm218_vm1, %v12825_v40, 0  ;;  %v12840_v44 = vld [vmem:[%s16721_s3 + $0x98] sm:$0xff]   ;;  %16970 = vst [vmem:[#allocation80_spill] sm:$0xff] %v13234_v43 }
 0x660   :  { %v583_v48 = vpop.f32.mrb[7].mxu1  ;;  %16927 = vst [vmem:[#allocation37_spill] sm:$0xff] %v12834_v42  ;;  %v12851_v47 = vsel %vm218_vm1, %v12840_v44, 0 }
 0x661   :  { %v585_v49 = vpack.c.bf16 %v581_v45, %v581_v45  ;;  %v12847_v45 = vld [vmem:[%s16721_s3 + $0xd8] sm:$0xff]   ;;  %16928 = vst [vmem:[#allocation38_spill] sm:$0xff] %v12851_v47 }
 0x662   :  { %v12856_v48 = vsel %vm218_vm1, %v12847_v45, 0 }
 0x663   :  { %v12754_v50 = vrot.slane %v585_v49, %v12751_v46  ;;  %16929 = vst [vmem:[#allocation39_spill] sm:$0xff] %v12856_v48  ;;  %v12862_v49 = vld [vmem:[%s16721_s3 + $0xa0] sm:$0xff]  }
 0x665   :  { %v12758_v51 = vrot.slane %v12754_v50, %v12751_v46 }
 0x667   :  { %v612_v54 = vunpack.i.h.s16 %v12758_v51  ;;  %v8321_v56 = vpack.i.b16 %v12758_v51, %v12758_v51  ;;  %v609_v17 = vcombine.high %v12758_v51, %v12758_v51  ;;  %v13144_v51 = vld [vmem:[%s16721_s3 + $0x180] sm:$0xff]  }
 0x668   :  { %16955 = vst [vmem:[#allocation65_spill] sm:$0xff] %v13144_v51 }
 0x669   :  { %v623_v58 = vrot.slane %v8321_v56, %v12760_v52  ;;  %v731_v61 = vpack.i.b16 %v612_v54, %v612_v54  ;;  %v12869_v54 = vld [vmem:[%s16721_s3 + $0xe0] sm:$0xff]   ;;  %v12873_v56 = vsel %vm218_vm1, %v12862_v49, 0  ;;  %v616_v13 = vunpack.i.h.s16 %v609_v17 }
 0x66a   :  { %16930 = vst [vmem:[#allocation40_spill] sm:$0xff] %v12873_v56  ;;  %v8359_v10 = vpack.i.b16 %v609_v17, %v609_v17  ;;  %v13156_v17 = vsel %vm218_vm1, %v13144_v51, 0 }
 0x66b   :  { %9491 = vmatmul.mubr.msk.bf16.vlgmr.msra.gmra.mrb[12].mxu0 %vm218_vm1, %v623_v58  ;;  %v735_v62 = vrot.slane %v731_v61, %v12760_v52  ;;  %v12878_v58 = vsel %vm218_vm1, %v12869_v54, 0  ;;  %v12884_v61 = vld [vmem:[%s16721_s3 + $0xa8] sm:$0xff]   ;;  %v1179_v9 = vpack.i.b16 %v616_v13, %v616_v13  ;;  %16957 = vst [vmem:[#allocation67_spill] sm:$0xff] %v13156_v17 }
 0x66c   :  { %9515 = vmatpush3.bf16.xpose.msra.mxu0 %v12778_v60  ;;  %9530 = vmatprep.mubr.msk.bf16.mxu0 %vm12379_vm0, %v16875_v1  ;;  %16931 = vst [vmem:[#allocation41_spill] sm:$0xff] %v12878_v58  ;;  %v12895_v59 = vsel %vm218_vm1, %v12884_v61, 0  ;;  %v1071_v5 = vrot.slane %v8359_v10, %v12760_v52  ;;  %v13171_v10 = vld [vmem:[%s16721_s3 + $0x188] sm:$0xff]  }
 0x66d   :  { %9516 = vmatprep.subr.bf16.mxu0 %v16875_v1  ;;  %9511 = vmatmul.mubr.msk.bf16.vlgmr.msra.gmra.mrb[8].mxu1 %vm218_vm1, %v735_v62  ;;  %v12891_v62 = vld [vmem:[%s16721_s3 + $0xe8] sm:$0xff]   ;;  %16932 = vst [vmem:[#allocation42_spill] sm:$0xff] %v12895_v59  ;;  %16959 = vst [vmem:[#allocation69_spill] sm:$0xff] %v13171_v10 }
 0x66e   :  { %9535 = vmatpush3.bf16.xpose.msra.mxu1 %v12785_v63  ;;  %9550 = vmatprep.mubr.msk.bf16.mxu1 %vm12379_vm0, %v16875_v1 }
 0x66f   :  { %9536 = vmatprep.subr.bf16.mxu1 %v16875_v1 }
 0x674   :  { %9517 = vmatpush3.bf16.xpose.msra.mxu0 %v12807_v36  ;;  %v12958_v36 = vld [vmem:[%s16721_s3 + $0x100] sm:$0xff]  }
 0x675   :  { %9518 = vmatprep.subr.bf16.mxu0 %v16875_v1 }
 0x676   :  { %9537 = vmatpush3.bf16.xpose.msra.mxu1 %v12812_v38 }
 0x677   :  { %9538 = vmatprep.subr.bf16.mxu1 %v16875_v1 }
 0x67c   :  { %9519 = vmatpush3.bf16.xpose.msra.mxu0 %v12829_v41 }
 0x67d   :  { %9520 = vmatprep.subr.bf16.mxu0 %v16875_v1 }
 0x67e   :  { %9539 = vmatpush3.bf16.xpose.msra.mxu1 %v12834_v42 }
 0x67f   :  { %9540 = vmatprep.subr.bf16.mxu1 %v16875_v1 }
 0x684   :  { %9521 = vmatpush3.bf16.xpose.msra.mxu0 %v12851_v47  ;;  %v594_v47 = vcombine.high %v12754_v50, %v12754_v50  ;;  %v12940_v50 = vld [vmem:[%s16721_s3 + $0xf8] sm:$0xff]  }
 0x685   :  { %9522 = vmatprep.subr.bf16.mxu0 %v16875_v1 }
 0x686   :  { %9541 = vmatpush3.bf16.xpose.msra.mxu1 %v12856_v48  ;;  %v12913_v48 = vld [vmem:[%s16721_s3 + $0xf0] sm:$0xff]   ;;  %v12934_v41 = vrot.slane %v594_v47, %v12751_v46  ;;  %v12970_v46 = vsel %vm218_vm1, %v12958_v36, 0 }
 0x687   :  { %9542 = vmatprep.subr.bf16.mxu1 %v16875_v1  ;;  %v12924_v42 = vsel %vm218_vm1, %v12913_v48, 0  ;;  %16938 = vst [vmem:[#allocation48_spill] sm:$0xff] %v12970_v46 }
 0x688   :  { %16935 = vst [vmem:[#allocation45_spill] sm:$0xff] %v12924_v42  ;;  %v614_v38 = vunpack.i.h.s16 %v12934_v41  ;;  %v8340_v47 = vpack.i.b16 %v12934_v41, %v12934_v41 }
 0x68a   :  { %v955_v63 = vpack.i.b16 %v614_v38, %v614_v38  ;;  %v847_v60 = vrot.slane %v8340_v47, %v12760_v52  ;;  %v12985_v47 = vld [vmem:[%s16721_s3 + $0x108] sm:$0xff]  }
 0x68c   :  { %9523 = vmatpush3.bf16.xpose.msra.mxu0 %v12873_v56  ;;  %v12900_v56 = vsel %vm218_vm1, %v12891_v62, 0 }
 0x68d   :  { %9524 = vmatprep.subr.bf16.mxu0 %v16875_v1  ;;  %16933 = vst [vmem:[#allocation43_spill] sm:$0xff] %v12900_v56 }
 0x68e   :  { %9543 = vmatpush3.bf16.xpose.msra.mxu1 %v12878_v58  ;;  %v12906_v58 = vld [vmem:[%s16721_s3 + $0xb0] sm:$0xff]  }
 0x68f   :  { %9544 = vmatprep.subr.bf16.mxu1 %v16875_v1 }
 0x694   :  { %9525 = vmatpush3.bf16.xpose.msra.mxu0 %v12895_v59  ;;  %v12917_v59 = vsel %vm218_vm1, %v12906_v58, 0 }
 0x695   :  { %9526 = vmatprep.subr.bf16.mxu0 %v16875_v1  ;;  %16934 = vst [vmem:[#allocation44_spill] sm:$0xff] %v12917_v59 }
 0x696   :  { %9545 = vmatpush3.bf16.xpose.msra.mxu1 %v12900_v56  ;;  %v12930_v56 = vld [vmem:[%s16721_s3 + $0xb8] sm:$0xff]  }
 0x697   :  { %9546 = vmatprep.subr.bf16.mxu1 %v16875_v1 }
 0x69c   :  { %9527 = vmatpush3.bf16.xpose.msra.mxu0 %v12917_v59  ;;  %v12944_v59 = vsel %vm218_vm1, %v12930_v56, 0 }
 0x69d   :  { %9528 = vmatprep.subr.bf16.mxu0 %v16875_v1  ;;  %16936 = vst [vmem:[#allocation46_spill] sm:$0xff] %v12944_v59 }
 0x69e   :  { %9547 = vmatpush3.bf16.xpose.msra.mxu1 %v12924_v42  ;;  %v12950_v42 = vsel %vm218_vm1, %v12940_v50, 0 }
 0x69f   :  { %9548 = vmatprep.subr.bf16.mxu1 %v16875_v1  ;;  %16937 = vst [vmem:[#allocation47_spill] sm:$0xff] %v12950_v42 }
 0x6a4   :  { %9529 = vmatpush3.bf16.xpose.msra.mxu0 %v12944_v59  ;;  %v12965_v59 = vld [vmem:[%s16721_s3 + $0x140] sm:$0xff]  }
 0x6a5   :  { %9554 = vmatprep.subr.bf16.mxu0 %v16875_v1  ;;  %v12977_v38 = vsel %vm218_vm1, %v12965_v59, 0 }
 0x6a6   :  { %9549 = vmatpush3.bf16.xpose.msra.mxu1 %v12950_v42  ;;  %v959_v42 = vrot.slane %v955_v63, %v12760_v52  ;;  %16939 = vst [vmem:[#allocation49_spill] sm:$0xff] %v12977_v38  ;;  %v12999_v63 = vsel %vm218_vm1, %v12985_v47, 0 }
 0x6a7   :  { %9574 = vmatprep.subr.bf16.mxu1 %v16875_v1  ;;  %16940 = vst [vmem:[#allocation50_spill] sm:$0xff] %v12999_v63 }
 0x6ab   :  { %9531 = vmatmul.mubr.msk.bf16.vlgmr.msra.gmra.mrb[16].mxu0 %vm218_vm1, %v847_v60  ;;  %v12995_v60 = vld [vmem:[%s16721_s3 + $0x148] sm:$0xff]  }
 0x6ac   :  { %9555 = vmatpush3.bf16.xpose.msra.mxu0 %v12970_v46  ;;  %9570 = vmatprep.mubr.msk.bf16.mxu0 %vm12379_vm0, %v16875_v1  ;;  %v13017_v46 = vld [vmem:[%s16721_s3 + $0x150] sm:$0xff]  }
 0x6ad   :  { %9556 = vmatprep.subr.bf16.mxu0 %v16875_v1  ;;  %9551 = vmatmul.mubr.msk.bf16.vlgmr.msra.gmra.mrb[12].mxu1 %vm218_vm1, %v959_v42  ;;  %v13004_v42 = vsel %vm218_vm1, %v12995_v60, 0  ;;  %v13026_v35 = vsel %vm218_vm1, %v13017_v46, 0 }
 0x6ae   :  { %9575 = vmatpush3.bf16.xpose.msra.mxu1 %v12977_v38  ;;  %9590 = vmatprep.mubr.msk.bf16.mxu1 %vm12379_vm0, %v16875_v1  ;;  %16941 = vst [vmem:[#allocation51_spill] sm:$0xff] %v13004_v42  ;;  %v13010_v38 = vld [vmem:[%s16721_s3 + $0x110] sm:$0xff]   ;;  %16943 = vst [vmem:[#allocation53_spill] sm:$0xff] %v13026_v35 }
 0x6af   :  { %9576 = vmatprep.subr.bf16.mxu1 %v16875_v1 }
 0x6b4   :  { %9557 = vmatpush3.bf16.xpose.msra.mxu0 %v12999_v63  ;;  %v13021_v63 = vsel %vm218_vm1, %v13010_v38, 0 }
 0x6b5   :  { %9558 = vmatprep.subr.bf16.mxu0 %v16875_v1  ;;  %16942 = vst [vmem:[#allocation52_spill] sm:$0xff] %v13021_v63 }
 0x6b6   :  { %9577 = vmatpush3.bf16.xpose.msra.mxu1 %v13004_v42  ;;  %v13032_v42 = vld [vmem:[%s16721_s3 + $0x118] sm:$0xff]  }
 0x6b7   :  { %9578 = vmatprep.subr.bf16.mxu1 %v16875_v1 }
 0x6bc   :  { %9559 = vmatpush3.bf16.xpose.msra.mxu0 %v13021_v63  ;;  %v13043_v63 = vsel %vm218_vm1, %v13032_v42, 0 }
 0x6bd   :  { %9560 = vmatprep.subr.bf16.mxu0 %v16875_v1  ;;  %16944 = vst [vmem:[#allocation54_spill] sm:$0xff] %v13043_v63 }
 0x6be   :  { %9579 = vmatpush3.bf16.xpose.msra.mxu1 %v13026_v35  ;;  %v13054_v35 = vld [vmem:[%s16721_s3 + $0x120] sm:$0xff]  }
 0x6bf   :  { %9580 = vmatprep.subr.bf16.mxu1 %v16875_v1 }
 0x6c4   :  { %9561 = vmatpush3.bf16.xpose.msra.mxu0 %v13043_v63  ;;  %v13065_v63 = vsel %vm218_vm1, %v13054_v35, 0 }
 0x6c5   :  { %9562 = vmatprep.subr.bf16.mxu0 %v16875_v1  ;;  %16946 = vst [vmem:[#allocation56_spill] sm:$0xff] %v13065_v63 }
 0x6c6   :  { %9581 = vmatpush3.bf16.xpose.msra.mxu1 %v13048_v31  ;;  %v13076_v31 = vld [vmem:[%s16721_s3 + $0x128] sm:$0xff]  }
 0x6c7   :  { %9582 = vmatprep.subr.bf16.mxu1 %v16875_v1 }
 0x6cc   :  { %9563 = vmatpush3.bf16.xpose.msra.mxu0 %v13065_v63  ;;  %v13087_v63 = vsel %vm218_vm1, %v13076_v31, 0 }
 0x6cd   :  { %9564 = vmatprep.subr.bf16.mxu0 %v16875_v1  ;;  %16948 = vst [vmem:[#allocation58_spill] sm:$0xff] %v13087_v63 }
 0x6ce   :  { %9583 = vmatpush3.bf16.xpose.msra.mxu1 %v13070_v27  ;;  %v13098_v27 = vld [vmem:[%s16721_s3 + $0x130] sm:$0xff]  }
 0x6cf   :  { %9584 = vmatprep.subr.bf16.mxu1 %v16875_v1 }
 0x6d4   :  { %9565 = vmatpush3.bf16.xpose.msra.mxu0 %v13087_v63  ;;  %v13109_v63 = vsel %vm218_vm1, %v13098_v27, 0 }
 0x6d5   :  { %9566 = vmatprep.subr.bf16.mxu0 %v16875_v1  ;;  %16950 = vst [vmem:[#allocation60_spill] sm:$0xff] %v13109_v63 }
 0x6d6   :  { %9585 = vmatpush3.bf16.xpose.msra.mxu1 %v13092_v23  ;;  %v13120_v23 = vld [vmem:[%s16721_s3 + $0x138] sm:$0xff]  }
 0x6d7   :  { %9586 = vmatprep.subr.bf16.mxu1 %v16875_v1  ;;  %v13133_v14 = vsel %vm218_vm1, %v13120_v23, 0 }
 0x6d8   :  { %16953 = vst [vmem:[#allocation63_spill] sm:$0xff] %v13133_v14 }
 0x6dc   :  { %9567 = vmatpush3.bf16.xpose.msra.mxu0 %v13109_v63  ;;  %v13129_v63 = vld [vmem:[%s16721_s3 + $0x178] sm:$0xff]  }
 0x6dd   :  { %9568 = vmatprep.subr.bf16.mxu0 %v16875_v1  ;;  %16952 = vst [vmem:[#allocation62_spill] sm:$0xff] %v13129_v63 }
 0x6de   :  { %9587 = vmatpush3.bf16.xpose.msra.mxu1 %v13114_v18  ;;  %v13138_v18 = vsel %vm218_vm1, %v13129_v63, 0 }
 0x6df   :  { %9588 = vmatprep.subr.bf16.mxu1 %v16875_v1  ;;  %16954 = vst [vmem:[#allocation64_spill] sm:$0xff] %v13138_v18 }
 0x6e4   :  { %9569 = vmatpush3.bf16.xpose.msra.mxu0 %v13133_v14  ;;  %v13151_v14 = vld [vmem:[%s16721_s3 + $0x1c0] sm:$0xff]  }
 0x6e5   :  { %9594 = vmatprep.subr.bf16.mxu0 %v16875_v1  ;;  %16956 = vst [vmem:[#allocation66_spill] sm:$0xff] %v13151_v14  ;;  %v13163_v13 = vsel %vm218_vm1, %v13151_v14, 0 }
 0x6e6   :  { %9589 = vmatpush3.bf16.xpose.msra.mxu1 %v13138_v18  ;;  %v1183_v18 = vrot.slane %v1179_v9, %v12760_v52  ;;  %16958 = vst [vmem:[#allocation68_spill] sm:$0xff] %v13163_v13  ;;  %v13185_v9 = vsel %vm218_vm1, %v13171_v10, 0 }
 0x6e7   :  { %9614 = vmatprep.subr.bf16.mxu1 %v16875_v1  ;;  %16961 = vst [vmem:[#allocation71_spill] sm:$0xff] %v13185_v9 }
 0x6eb   :  { %9571 = vmatmul.mubr.msk.bf16.vlgmr.msra.gmra.mrb[20].mxu0 %vm218_vm1, %v1071_v5  ;;  %v13181_v5 = vld [vmem:[%s16721_s3 + $0x1c8] sm:$0xff]  }
 0x6ec   :  { %9595 = vmatpush3.bf16.xpose.msra.mxu0 %v13156_v17  ;;  %9610 = vmatprep.mubr.msk.bf16.mxu0 %vm12379_vm0, %v16875_v1  ;;  %16960 = vst [vmem:[#allocation70_spill] sm:$0xff] %v13181_v5  ;;  %v13203_v17 = vld [vmem:[%s16721_s3 + $0x1d0] sm:$0xff]  }
 0x6ed   :  { %9596 = vmatprep.subr.bf16.mxu0 %v16875_v1  ;;  %9591 = vmatmul.mubr.msk.bf16.vlgmr.msra.gmra.mrb[16].mxu1 %vm218_vm1, %v1183_v18  ;;  %v13190_v18 = vsel %vm218_vm1, %v13181_v5, 0  ;;  %16964 = vst [vmem:[#allocation74_spill] sm:$0xff] %v13203_v17  ;;  %v13212_v4 = vsel %vm218_vm1, %v13203_v17, 0  ;;  %v610_v17 = vcombine.high %v12934_v41, %v12934_v41 }
 0x6ee   :  { %9615 = vmatpush3.bf16.xpose.msra.mxu1 %v13163_v13  ;;  %9630 = vmatprep.mubr.msk.bf16.mxu1 %vm12379_vm0, %v16875_v1  ;;  %16962 = vst [vmem:[#allocation72_spill] sm:$0xff] %v13190_v18  ;;  %v13196_v13 = vld [vmem:[%s16721_s3 + $0x190] sm:$0xff]   ;;  %16966 = vst [vmem:[#allocation76_spill] sm:$0xff] %v13212_v4 }
 0x6ef   :  { %9616 = vmatprep.subr.bf16.mxu1 %v16875_v1  ;;  %16963 = vst [vmem:[#allocation73_spill] sm:$0xff] %v13196_v13 }
 0x6f4   :  { %9597 = vmatpush3.bf16.xpose.msra.mxu0 %v13185_v9  ;;  %v13207_v9 = vsel %vm218_vm1, %v13196_v13, 0  ;;  %v8378_v13 = vpack.i.b16 %v610_v17, %v610_v17 }
 0x6f5   :  { %9598 = vmatprep.subr.bf16.mxu0 %v16875_v1  ;;  %16965 = vst [vmem:[#allocation75_spill] sm:$0xff] %v13207_v9 }
 0x6f6   :  { %9617 = vmatpush3.bf16.xpose.msra.mxu1 %v13190_v18  ;;  %v13218_v18 = vld [vmem:[%s16721_s3 + $0x198] sm:$0xff]   ;;  %v1295_v5 = vrot.slane %v8378_v13, %v12760_v52 }
 0x6f7   :  { %9618 = vmatprep.subr.bf16.mxu1 %v16875_v1  ;;  %16967 = vst [vmem:[#allocation77_spill] sm:$0xff] %v13218_v18 }
 0x6fc   :  { %9599 = vmatpush3.bf16.xpose.msra.mxu0 %v13207_v9  ;;  %v13229_v9 = vsel %vm218_vm1, %v13218_v18, 0  ;;  %v13247_v18 = vld [vmem:[%s16721_s3 + $0x1e0] sm:$0xff]  }
 0x6fd   :  { %9600 = vmatprep.subr.bf16.mxu0 %v16875_v1  ;;  %16969 = vst [vmem:[#allocation79_spill] sm:$0xff] %v13229_v9  ;;  %16972 = vst [vmem:[#allocation82_spill] sm:$0xff] %v13247_v18  ;;  %v13256_v55 = vsel %vm218_vm1, %v13247_v18, 0 }
 0x6fe   :  { %9619 = vmatpush3.bf16.xpose.msra.mxu1 %v13212_v4  ;;  %v13240_v4 = vld [vmem:[%s16721_s3 + $0x1a0] sm:$0xff]   ;;  %16974 = vst [vmem:[#allocation84_spill] sm:$0xff] %v13256_v55 }
 0x6ff   :  { %9620 = vmatprep.subr.bf16.mxu1 %v16875_v1  ;;  %16971 = vst [vmem:[#allocation81_spill] sm:$0xff] %v13240_v4 }
 0x704   :  { %9601 = vmatpush3.bf16.xpose.msra.mxu0 %v13229_v9  ;;  %v13251_v9 = vsel %vm218_vm1, %v13240_v4, 0  ;;  %v13269_v4 = vld [vmem:[%s16721_s3 + $0x1e8] sm:$0xff]  }
 0x705   :  { %9602 = vmatprep.subr.bf16.mxu0 %v16875_v1  ;;  %16973 = vst [vmem:[#allocation83_spill] sm:$0xff] %v13251_v9  ;;  %16976 = vst [vmem:[#allocation86_spill] sm:$0xff] %v13269_v4  ;;  %v13278_v18 = vsel %vm218_vm1, %v13269_v4, 0 }
 0x706   :  { %9621 = vmatpush3.bf16.xpose.msra.mxu1 %v13234_v43  ;;  %v13262_v43 = vld [vmem:[%s16721_s3 + $0x1a8] sm:$0xff]   ;;  %16978 = vst [vmem:[#allocation88_spill] sm:$0xff] %v13278_v18 }
 0x707   :  { %9622 = vmatprep.subr.bf16.mxu1 %v16875_v1  ;;  %16975 = vst [vmem:[#allocation85_spill] sm:$0xff] %v13262_v43 }
 0x70c   :  { %9603 = vmatpush3.bf16.xpose.msra.mxu0 %v13251_v9  ;;  %v13273_v9 = vsel %vm218_vm1, %v13262_v43, 0  ;;  %v13291_v43 = vld [vmem:[%s16721_s3 + $0x1f0] sm:$0xff]  }
 0x70d   :  { %9604 = vmatprep.subr.bf16.mxu0 %v16875_v1  ;;  %16977 = vst [vmem:[#allocation87_spill] sm:$0xff] %v13273_v9  ;;  %16980 = vst [vmem:[#allocation90_spill] sm:$0xff] %v13291_v43  ;;  %v13300_v4 = vsel %vm218_vm1, %v13291_v43, 0 }
 0x70e   :  { %9623 = vmatpush3.bf16.xpose.msra.mxu1 %v13256_v55  ;;  %v13284_v55 = vld [vmem:[%s16721_s3 + $0x1b0] sm:$0xff]   ;;  %16982 = vst [vmem:[#allocation92_spill] sm:$0xff] %v13300_v4 }
 0x70f   :  { %9624 = vmatprep.subr.bf16.mxu1 %v16875_v1  ;;  %16979 = vst [vmem:[#allocation89_spill] sm:$0xff] %v13284_v55 }
 0x714   :  { %9605 = vmatpush3.bf16.xpose.msra.mxu0 %v13273_v9  ;;  %v13295_v9 = vsel %vm218_vm1, %v13284_v55, 0  ;;  %v618_v55 = vunpack.i.h.s16 %v610_v17 }
 0x715   :  { %9606 = vmatprep.subr.bf16.mxu0 %v16875_v1  ;;  %16981 = vst [vmem:[#allocation91_spill] sm:$0xff] %v13295_v9 }
 0x716   :  { %9625 = vmatpush3.bf16.xpose.msra.mxu1 %v13278_v18  ;;  %v13306_v18 = vld [vmem:[%s16721_s3 + $0x1b8] sm:$0xff]   ;;  %v1403_v41 = vpack.i.b16 %v618_v55, %v618_v55 }
 0x717   :  { %9626 = vmatprep.subr.bf16.mxu1 %v16875_v1  ;;  %16983 = vst [vmem:[#allocation93_spill] sm:$0xff] %v13306_v18  ;;  %v13319_v43 = vsel %vm218_vm1, %v13306_v18, 0 }
 0x718   :  { %16985 = vst [vmem:[#allocation95_spill] sm:$0xff] %v13319_v43  ;;  %v1407_v18 = vrot.slane %v1403_v41, %v12760_v52 }
 0x71c   :  { %9607 = vmatpush3.bf16.xpose.msra.mxu0 %v13295_v9  ;;  %v13315_v9 = vld [vmem:[%s16721_s3 + $0x1f8] sm:$0xff]  }
 0x71d   :  { %9608 = vmatprep.subr.bf16.mxu0 %v16875_v1  ;;  %16984 = vst [vmem:[#allocation94_spill] sm:$0xff] %v13315_v9 }
 0x71e   :  { %9627 = vmatpush3.bf16.xpose.msra.mxu1 %v13300_v4  ;;  %v13324_v4 = vsel %vm218_vm1, %v13315_v9, 0 }
 0x71f   :  { %9628 = vmatprep.subr.bf16.mxu1 %v16875_v1  ;;  %16986 = vst [vmem:[#allocation96_spill] sm:$0xff] %v13324_v4 }
 0x724   :  { %9609 = vmatpush3.bf16.xpose.msra.mxu0 %v13319_v43 }
 0x725   :  { %9634 = vmatprep.subr.bf16.mxu0 %v16875_v1 }
 0x726   :  { %9629 = vmatpush3.bf16.xpose.msra.mxu1 %v13324_v4 }
 0x727   :  { %9654 = vmatprep.subr.bf16.mxu1 %v16875_v1 }
 0x72b   :  { %9611 = vmatmul.mubr.msk.bf16.vlgmr.msra.gmra.mrb[24].mxu0 %vm218_vm1, %v1295_v5 }
 0x72c   :  { %9635 = vmatpush3.bf16.msra.mxu0 %v12567_v2  ;;  %9650 = vmatprep.mubr.msk.bf16.mxu0 %vm12379_vm0, %v16875_v1 }
 0x72d   :  { %9636 = vmatprep.subr.bf16.mxu0 %v16875_v1  ;;  %9631 = vmatmul.mubr.msk.bf16.vlgmr.msra.gmra.mrb[20].mxu1 %vm218_vm1, %v1407_v18 }
 0x72e   :  { %9655 = vmatpush3.bf16.msra.mxu1 %v12572_v3  ;;  %9670 = vmatprep.mubr.msk.bf16.mxu1 %vm12379_vm0, %v16875_v1 }
 0x72f   :  { %9656 = vmatprep.subr.bf16.mxu1 %v16875_v1 }
 0x730   :  { %9637 = vmatpush3.bf16.msra.mxu0 %v12590_v7 }
 0x731   :  { %9638 = vmatprep.subr.bf16.mxu0 %v16875_v1 }
 0x732   :  { %9657 = vmatpush3.bf16.msra.mxu1 %v12596_v8 }
 0x733   :  { %9658 = vmatprep.subr.bf16.mxu1 %v16875_v1 }
 0x734   :  { %9639 = vmatpush3.bf16.msra.mxu0 %v12616_v11 }
 0x735   :  { %9640 = vmatprep.subr.bf16.mxu0 %v16875_v1 }
 0x736   :  { %9659 = vmatpush3.bf16.msra.mxu1 %v12622_v12 }
 0x737   :  { %9660 = vmatprep.subr.bf16.mxu1 %v16875_v1 }
 0x738   :  { %9641 = vmatpush3.bf16.msra.mxu0 %v12638_v15 }
 0x739   :  { %9642 = vmatprep.subr.bf16.mxu0 %v16875_v1 }
 0x73a   :  { %9661 = vmatpush3.bf16.msra.mxu1 %v12644_v16 }
 0x73b   :  { %9662 = vmatprep.subr.bf16.mxu1 %v16875_v1 }
 0x73c   :  { %9643 = vmatpush3.bf16.msra.mxu0 %v12660_v19 }
 0x73d   :  { %9644 = vmatprep.subr.bf16.mxu0 %v16875_v1 }
 0x73e   :  { %v725_v55 = vpop.f32.mrb[12].mxu0  ;;  %9663 = vmatpush3.bf16.msra.mxu1 %v12666_v20 }
 0x73f   :  { %v9492_v2 = vpop.f32.mrb[13].mxu0  ;;  %9664 = vmatprep.subr.bf16.mxu1 %v16875_v1 }
 0x740   :  { %v728_v3 = vpop.f32.mrb[14].mxu0  ;;  %9645 = vmatpush3.bf16.msra.mxu0 %v12682_v24  ;;  %v837_v7 = vpop.f32.mrb[8].mxu1 }
 0x741   :  { %v9493_v8 = vpop.f32.mrb[15].mxu0  ;;  %9646 = vmatprep.subr.bf16.mxu0 %v16875_v1  ;;  %v9512_v11 = vpop.f32.mrb[9].mxu1 }
 0x742   :  { %v840_v12 = vpop.f32.mrb[10].mxu1  ;;  %9665 = vmatpush3.bf16.msra.mxu1 %v12688_v25 }
 0x743   :  { %v9513_v15 = vpop.f32.mrb[11].mxu1  ;;  %9666 = vmatprep.subr.bf16.mxu1 %v16875_v1 }
 0x744   :  { %9647 = vmatpush3.bf16.msra.mxu0 %v12704_v28 }
 0x745   :  { %9648 = vmatprep.subr.bf16.mxu0 %v16875_v1 }
 0x746   :  { %9667 = vmatpush3.bf16.msra.mxu1 %v12716_v30 }
 0x747   :  { %9668 = vmatprep.subr.bf16.mxu1 %v16875_v1 }
 0x748   :  { %9649 = vmatpush3.bf16.msra.mxu0 %v12727_v32 }
 0x749   :  { %9674 = vmatprep.subr.bf16.mxu0 %v16875_v1 }
 0x74a   :  { %9669 = vmatpush3.bf16.msra.mxu1 %v12736_v34  ;;  %v200_v34 = vld [vmem:[%s16729_s11] sm:$0xff] }
 0x74b   :  { %9694 = vmatprep.subr.bf16.mxu1 %v16875_v1  ;;  %v13372_v11 = vrot.slane %v200_v34, 1  ;;  %v13374_v12 = vrot.slane %v200_v34, 2  ;;  %v13389_v1 = vrot.slane %v200_v34, 6 }
 0x74d   :  { %16987 = vst [vmem:[#allocation97_spill] sm:$0xff] %v13372_v11  ;;  %16988 = vst [vmem:[#allocation98_spill] sm:$0xff] %v13374_v12  ;;  %v1540_v15 = vadd.f32 %v13372_v11, %v837_v7  ;;  %v13392_v11 = vrot.slane %v200_v34, 7 }
 0x74e   :  { %16992 = vst [vmem:[#allocation102_spill] sm:$0xff] %v13389_v1 }
 0x74f   :  { %16993 = vst [vmem:[#allocation103_spill] sm:$0xff] %v13392_v11 }
 0x77e   :  { %v949_v16 = vpop.f32.mrb[16].mxu0 }
 0x77f   :  { %v9532_v19 = vpop.f32.mrb[17].mxu0 }
 0x780   :  { %v952_v20 = vpop.f32.mrb[18].mxu0  ;;  %v1061_v24 = vpop.f32.mrb[12].mxu1  ;;  %v13377_v19 = vrot.slane %v200_v34, 3 }
 0x781   :  { %v9533_v25 = vpop.f32.mrb[19].mxu0  ;;  %v9552_v28 = vpop.f32.mrb[13].mxu1  ;;  %v1541_v20 = vadd.f32 %v13374_v12, %v949_v16 }
 0x782   :  { %v1064_v17 = vpop.f32.mrb[14].mxu1  ;;  %16989 = vst [vmem:[#allocation99_spill] sm:$0xff] %v13377_v19  ;;  %v13380_v25 = vrot.slane %v200_v34, 4  ;;  %v1555_v28 = vrot.slane %v1540_v15, 7 }
 0x783   :  { %v9553_v13 = vpop.f32.mrb[15].mxu1  ;;  %v1542_v17 = vadd.f32 %v13377_v19, %v1061_v24 }
 0x784   :  { %16990 = vst [vmem:[#allocation100_spill] sm:$0xff] %v13380_v25  ;;  %v13383_v13 = vrot.slane %v200_v34, 5 }
 0x785   :  { %v1561_v7 = vrot.slane %v1542_v17, 5 }
 0x786   :  { %16991 = vst [vmem:[#allocation101_spill] sm:$0xff] %v13383_v13 }
 0x7be   :  { %v1173_v5 = vpop.f32.mrb[20].mxu0 }
 0x7bf   :  { %v9572_v30 = vpop.f32.mrb[21].mxu0 }
 0x7c0   :  { %v1176_v18 = vpop.f32.mrb[22].mxu0  ;;  %v1285_v32 = vpop.f32.mrb[16].mxu1  ;;  %v1558_v30 = vrot.slane %v1541_v20, 6 }
 0x7c1   :  { %v9573_v41 = vpop.f32.mrb[23].mxu0  ;;  %v9592_v2 = vpop.f32.mrb[17].mxu1  ;;  %v1543_v18 = vadd.f32 %v13380_v25, %v1173_v5 }
 0x7c2   :  { %v1288_v3 = vpop.f32.mrb[18].mxu1  ;;  %v1539_v41 = vadd.f32 %v725_v55, %v200_v34 }
 0x7c3   :  { %v9593_v8 = vpop.f32.mrb[19].mxu1  ;;  %v1544_v3 = vadd.f32 %v13383_v13, %v1285_v32 }
 0x7c4   :  { %v1557_v2 = vsel %vm1556_vm2, %v1555_v28, %v1539_v41  ;;  %v1564_v8 = vrot.slane %v1543_v18, 4 }
 0x7c5   :  { %v1560_v16 = vsel %vm1559_vm3, %v1558_v30, %v1557_v2  ;;  %v1567_v19 = vrot.slane %v1544_v3, 3 }
 0x7c6   :  { %v1563_v24 = vsel %vm1562_vm4, %v1561_v7, %v1560_v16 }
 0x7c7   :  { %v1566_v55 = vsel %vm1565_vm5, %v1564_v8, %v1563_v24  ;;  %v8400_v24 = vld [vmem:[%s16718_s0 + $0x8] sm:$0xff] }
 0x7c8   :  { %v1569_v7 = vsel %vm1568_vm6, %v1567_v19, %v1566_v55 }
 0x7fe   :  { %v1397_v12 = vpop.f32.mrb[24].mxu0 }
 0x7ff   :  { %v1545_v5 = vadd.f32 %v13389_v1, %v1397_v12  ;;  %v9612_v28 = vpop.f32.mrb[25].mxu0 }
 0x800   :  { %v1400_v32 = vpop.f32.mrb[26].mxu0  ;;  %v1509_v2 = vpop.f32.mrb[20].mxu1 }
 0x801   :  { %v1570_v30 = vrot.slane %v1545_v5, 2  ;;  %v9613_v13 = vpop.f32.mrb[27].mxu0  ;;  %v1546_v25 = vadd.f32 %v13392_v11, %v1509_v2  ;;  %v9632_v4 = vpop.f32.mrb[21].mxu1 }
 0x802   :  { %v1512_v16 = vpop.f32.mrb[22].mxu1  ;;  %v2191_v13 = vadd.f32 %v8400_v24, %v12541_v37 }
 0x803   :  { %v1572_v34 = vsel %vm1571_vm7, %v1570_v30, %v1569_v7  ;;  %v1573_v43 = vrot.slane %v1546_v25, 1  ;;  %v9633_v8 = vpop.f32.mrb[23].mxu1 }
 0x804   :  { %11688 = vtanh.f32 %v2191_v13 }
 0x805   :  { %v1575_v12 = vsel %vm1574_vm8, %v1573_v43, %v1572_v34 }
 0x806   :  { %1577 = vmax.xlane.f32.xlu0 %v1575_v12 }
 0x80e   :  { %v11689_v28 = vpop.eup %11688 }
 0x81c   :  { %2201 = vrot.lane.b32.xlu0 %v11689_v28, %s12380_s26 }
 0x893   :  { %v1578_v4 = vpop.xlane.xlu0 %1577 }
 0x894   :  { %v1580_v19 = vrot.slane %v1578_v4, 1  ;;  %v1581_v55 = vrot.slane %v1578_v4, 2  ;;  %v1582_v32 = vrot.slane %v1578_v4, 3  ;;  %v1583_v30 = vrot.slane %v1578_v4, 4 }
 0x895   :  { %v1584_v2 = vrot.slane %v1578_v4, 5  ;;  %v1585_v7 = vrot.slane %v1578_v4, 6  ;;  %v1595_v16 = vsub.f32 %v1539_v41, %v1578_v4  ;;  %v1586_v43 = vrot.slane %v1578_v4, 7 }
 0x896   :  { %v1596_v34 = vsub.f32 %v1540_v15, %v1580_v19  ;;  %v1597_v8 = vsub.f32 %v1541_v20, %v1581_v55  ;;  %v1598_v12 = vsub.f32 %v1542_v17, %v1582_v32  ;;  %v1599_v11 = vsub.f32 %v1543_v18, %v1583_v30 }
 0x897   :  { %v1603_v1 = vmul.f32 1.442695, %v1595_v16  ;;  %v1600_v52 = vsub.f32 %v1544_v3, %v1584_v2  ;;  %v1601_v37 = vsub.f32 %v1545_v5, %v1585_v7  ;;  %v1602_v28 = vsub.f32 %v1546_v25, %v1586_v43 }
 0x898   :  { %v1605_v24 = vmul.f32 1.442695, %v1596_v34  ;;  %v1607_v9 = vmul.f32 1.442695, %v1597_v8  ;;  %v1609_v10 = vmul.f32 1.442695, %v1598_v12  ;;  %v2202_v34 = vpop.permute.xlu0 %2201 }
 0x899   :  { %11690 = vpow2.f32 %v1603_v1  ;;  %v1611_v14 = vmul.f32 1.442695, %v1599_v11  ;;  %v1613_v51 = vmul.f32 1.442695, %v1600_v52  ;;  %v1615_v63 = vmul.f32 1.442695, %v1601_v37 }
 0x89a   :  { %11692 = vpow2.f32 %v1605_v24  ;;  %v1617_v41 = vmul.f32 1.442695, %v1602_v28  ;;  %v8401_v4 = vmul.f32 -1.442695, %v2191_v13 }
 0x89b   :  { %11694 = vpow2.f32 %v1607_v9 }
 0x89c   :  { %11696 = vpow2.f32 %v1609_v10 }
 0x89d   :  { %11698 = vpow2.f32 %v1611_v14 }
 0x89e   :  { %11700 = vpow2.f32 %v1613_v51 }
 0x89f   :  { %11702 = vpow2.f32 %v1615_v63 }
 0x8a0   :  { %11704 = vpow2.f32 %v1617_v41 }
 0x8a1   :  { %11706 = vpow2.f32 %v8401_v4 }
 0x8a3   :  { %v11691_v15 = vpop.eup %11690 }
 0x8a4   :  { %v11693_v20 = vpop.eup %11692 }
 0x8a5   :  { %v11695_v17 = vpop.eup %11694  ;;  %v1627_v18 = vrot.slane %v11693_v20, 7 }
 0x8a6   :  { %v11697_v3 = vpop.eup %11696  ;;  %v1629_v25 = vrot.slane %v11695_v17, 6 }
 0x8a7   :  { %v11699_v1 = vpop.eup %11698  ;;  %v1628_v11 = vsel %vm1556_vm2, %v1627_v18, %v11691_v15  ;;  %v1631_v52 = vrot.slane %v11697_v3, 5 }
 0x8a8   :  { %v11701_v9 = vpop.eup %11700  ;;  %v1630_v10 = vsel %vm1559_vm3, %v1629_v25, %v1628_v11  ;;  %v1633_v5 = vrot.slane %v11699_v1, 4 }
 0x8a9   :  { %v11703_v13 = vpop.eup %11702  ;;  %v1632_v14 = vsel %vm1562_vm4, %v1631_v52, %v1630_v10  ;;  %v1635_v63 = vrot.slane %v11701_v9, 3 }
 0x8aa   :  { %v11705_v51 = vpop.eup %11704  ;;  %v1634_v19 = vsel %vm1565_vm5, %v1633_v5, %v1632_v14  ;;  %v1637_v55 = vrot.slane %v11703_v13, 2 }
 0x8ab   :  { %v11707_v32 = vpop.eup %11706  ;;  %v1636_v30 = vsel %vm1568_vm6, %v1635_v63, %v1634_v19  ;;  %v1639_v2 = vrot.slane %v11705_v51, 1 }
 0x8ac   :  { %v1638_v7 = vsel %vm1571_vm7, %v1637_v55, %v1636_v30  ;;  %v2195_v43 = vadd.f32 1.0, %v11707_v32 }
 0x8ad   :  { %v1640_v16 = vsel %vm1574_vm8, %v1639_v2, %v1638_v7 }
 0x8ae   :  { %1642 = vadd.xlane.f32.xlu1 %v1640_v16  ;;  %11708 = vrcp.f32 %v2195_v43 }
 0x8b8   :  { %v13412_v8 = vpop.eup %11708 }
 0x8b9   :  { %v2204_v12 = vmul.f32 %v13412_v8, %v2202_v34  ;;  %v2199_v24 = vmul.f32 %v13412_v8, %v12502_v22  ;;  %v16994_v34 = vmov 0.0  }
 0x8bf   :  { %2206 = vrot.lane.b32.xlu1 %v2204_v12, %s12381_s29 }
 0x93b   :  { %v1643_v37 = vpop.xlane.xlu1 %1642 }
 0x93c   :  { %11710 = vrcp.f32 %v1643_v37 }
 0x93f   :  { %v2207_v28 = vpop.permute.xlu1 %2206 }
 0x940   :  { %v13418_v41 = vadd.f32 %v2207_v28, %v2199_v24 }
 0x942   :  { %11712 = vtanh.f32 %v13418_v41 }
 0x946   :  { %v11711_v4 = vpop.eup %11710 }
 0x947   :  { %v1661_v18 = vmul.f32 %v11711_v4, %v11691_v15  ;;  %v1646_v25 = vrot.slane %v11711_v4, 1  ;;  %v1647_v11 = vrot.slane %v11711_v4, 2  ;;  %v1648_v52 = vrot.slane %v11711_v4, 3 }
 0x948   :  { %v1649_v10 = vrot.slane %v11711_v4, 4  ;;  %v1650_v5 = vrot.slane %v11711_v4, 5  ;;  %v1651_v14 = vrot.slane %v11711_v4, 6  ;;  %v1652_v63 = vrot.slane %v11711_v4, 7 }
 0x949   :  { %v1669_v19 = vpack.c.bf16 %v1661_v18, %v1661_v18  ;;  %v1662_v55 = vmul.f32 %v11693_v20, %v1646_v25  ;;  %v1663_v32 = vmul.f32 %v11695_v17, %v1647_v11  ;;  %v13421_v30 = vmul.f32 %v11697_v3, %v1648_v52 }
 0x94a   :  { %v13423_v22 = vmul.f32 %v11699_v1, %v1649_v10  ;;  %v13425_v43 = vmul.f32 %v11701_v9, %v1650_v5  ;;  %v13430_v12 = vmul.f32 %v11703_v13, %v1651_v14  ;;  %v13435_v3 = vmul.f32 %v11705_v51, %v1652_v63 }
 0x94b   :  { %9651 = vmatmul.mubr.bf16.vlgmr.msra.gmra.mrb[28].mxu0 %v1669_v19  ;;  %v1670_v2 = vpack.c.bf16 %v1662_v55, %v1662_v55  ;;  %v2173_v7 = vrot.slane %v1662_v55, 7  ;;  %v2175_v16 = vrot.slane %v1663_v32, 6  ;;  %v2177_v17 = vrot.slane %v13421_v30, 5 }
 0x94c   :  { %v11713_v15 = vpop.eup %11712  ;;  %9675 = vmatpush3.bf16.msra.mxu0 %v12765_v53  ;;  %9690 = vmatprep.mubr.msk.bf16.mxu0 %vm12379_vm0, %v16994_v34  ;;  %v2179_v1 = vrot.slane %v13423_v22, 4  ;;  %v2181_v13 = vrot.slane %v13425_v43, 3  ;;  %v2185_v24 = vrot.slane %v13435_v3, 1 }
 0x94d   :  { %9671 = vmatmul.mubr.bf16.vlgmr.msra.gmra.mrb[24].mxu1 %v1670_v2  ;;  %v2174_v20 = vsel %vm1556_vm2, %v2173_v7, %v1661_v18  ;;  %2212 = vrot.lane.b32.xlu0 %v11713_v15, %s12380_s26  ;;  %v11671_v18 = vld [vmem:[%s16728_s10 + $0x8] sm:$0xff]  }
 0x94e   :  { %9695 = vmatpush3.bf16.msra.mxu1 %v12773_v57  ;;  %9676 = vmatprep.subr.bf16.mxu0 %v16994_v34  ;;  %v2176_v53 = vsel %vm1559_vm3, %v2175_v16, %v2174_v20  ;;  %v2183_v57 = vrot.slane %v13430_v12, 2  ;;  %v11890_v16 = vld [vmem:[%s16724_s6] sm:$0xff]  }
 0x94f   :  { %9696 = vmatprep.subr.bf16.mxu1 %v16994_v34  ;;  %9710 = vmatprep.mubr.msk.bf16.mxu1 %vm12379_vm0, %v16994_v34  ;;  %v2178_v9 = vsel %vm1562_vm4, %v2177_v17, %v2176_v53 }
 0x950   :  { %9677 = vmatpush3.bf16.msra.mxu0 %v12793_v0  ;;  %v2180_v51 = vsel %vm1565_vm5, %v2179_v1, %v2178_v9  ;;  %v1671_v0 = vpack.c.bf16 %v1663_v32, %v1663_v32 }
 0x951   :  { %9678 = vmatprep.subr.bf16.mxu0 %v16994_v34  ;;  %v2182_v37 = vsel %vm1568_vm6, %v2181_v13, %v2180_v51 }
 0x952   :  { %9697 = vmatpush3.bf16.msra.mxu1 %v12803_v6  ;;  %v2184_v28 = vsel %vm1571_vm7, %v2183_v57, %v2182_v37  ;;  %v1672_v6 = vpack.c.bf16 %v13421_v30, %v13421_v30 }
 0x953   :  { %9698 = vmatprep.subr.bf16.mxu1 %v16994_v34  ;;  %v2186_v4 = vsel %vm1574_vm8, %v2185_v24, %v2184_v28 }
 0x954   :  { %9679 = vmatpush3.bf16.msra.mxu0 %v12818_v39  ;;  %2188 = vst [vmem:[#allocation4] sm:$0xff] %v2186_v4  ;;  %v17004_v39 = vld [vmem:[#allocation81_spill] sm:$0xff] }
 0x955   :  { %9680 = vmatprep.subr.bf16.mxu0 %v16994_v34 }
 0x956   :  { %9699 = vmatpush3.bf16.msra.mxu1 %v12825_v40  ;;  %v17005_v40 = vld [vmem:[#allocation82_spill] sm:$0xff] }
 0x957   :  { %9700 = vmatprep.subr.bf16.mxu1 %v16994_v34 }
 0x958   :  { %9681 = vmatpush3.bf16.msra.mxu0 %v12840_v44  ;;  %v17006_v44 = vld [vmem:[#allocation85_spill] sm:$0xff] }
 0x959   :  { %9682 = vmatprep.subr.bf16.mxu0 %v16994_v34 }
 0x95a   :  { %9701 = vmatpush3.bf16.msra.mxu1 %v12847_v45  ;;  %v17007_v45 = vld [vmem:[#allocation86_spill] sm:$0xff] }
 0x95b   :  { %9702 = vmatprep.subr.bf16.mxu1 %v16994_v34 }
 0x95c   :  { %9683 = vmatpush3.bf16.msra.mxu0 %v12862_v49  ;;  %v17009_v49 = vld [vmem:[#allocation90_spill] sm:$0xff] }
 0x95d   :  { %9684 = vmatprep.subr.bf16.mxu0 %v16994_v34 }
 0x95e   :  { %9703 = vmatpush3.bf16.msra.mxu1 %v12869_v54  ;;  %v17010_v54 = vld [vmem:[#allocation93_spill] sm:$0xff] }
 0x95f   :  { %9704 = vmatprep.subr.bf16.mxu1 %v16994_v34 }
 0x960   :  { %9685 = vmatpush3.bf16.msra.mxu0 %v12884_v61  ;;  %v1676_v61 = vpack.c.bf16 %v13435_v3, %v13435_v3 }
 0x961   :  { %9686 = vmatprep.subr.bf16.mxu0 %v16994_v34 }
 0x962   :  { %9705 = vmatpush3.bf16.msra.mxu1 %v12891_v62  ;;  %v11888_v62 = vld [vmem:[%s16722_s4] sm:$0xff]  }
 0x963   :  { %9706 = vmatprep.subr.bf16.mxu1 %v16994_v34 }
 0x964   :  { %9687 = vmatpush3.bf16.msra.mxu0 %v12906_v58  ;;  %v17011_v58 = vld [vmem:[#allocation94_spill] sm:$0xff] }
 0x965   :  { %9688 = vmatprep.subr.bf16.mxu0 %v16994_v34 }
 0x966   :  { %9707 = vmatpush3.bf16.msra.mxu1 %v12913_v48  ;;  %v17008_v48 = vld [vmem:[#allocation89_spill] sm:$0xff] }
 0x967   :  { %9708 = vmatprep.subr.bf16.mxu1 %v16994_v34 }
 0x968   :  { %9689 = vmatpush3.bf16.msra.mxu0 %v12930_v56  ;;  %v1675_v56 = vpack.c.bf16 %v13430_v12, %v13430_v12 }
 0x969   :  { %9714 = vmatprep.subr.bf16.mxu0 %v16994_v34 }
 0x96a   :  { %9709 = vmatpush3.bf16.msra.mxu1 %v12940_v50  ;;  %v11889_v50 = vld [vmem:[%s16722_s4 + $0x8] sm:$0xff]  }
 0x96b   :  { %9691 = vmatmul.mubr.bf16.vlgmr.msra.gmra.mrb[32].mxu0 %v1671_v0  ;;  %9734 = vmatprep.subr.bf16.mxu1 %v16994_v34 }
 0x96c   :  { %9715 = vmatpush3.bf16.msra.mxu0 %v12958_v36  ;;  %9730 = vmatprep.mubr.msk.bf16.mxu0 %vm12379_vm0, %v16994_v34  ;;  %v17003_v36 = vld [vmem:[#allocation78_spill] sm:$0xff] }
 0x96d   :  { %9711 = vmatmul.mubr.bf16.vlgmr.msra.gmra.mrb[28].mxu1 %v1672_v6  ;;  %9716 = vmatprep.subr.bf16.mxu0 %v16994_v34 }
 0x96e   :  { %9735 = vmatpush3.bf16.msra.mxu1 %v12965_v59  ;;  %9750 = vmatprep.mubr.msk.bf16.mxu1 %vm12379_vm0, %v16994_v34  ;;  %v1673_v59 = vpack.c.bf16 %v13423_v22, %v13423_v22 }
 0x96f   :  { %9736 = vmatprep.subr.bf16.mxu1 %v16994_v34 }
 0x970   :  { %9717 = vmatpush3.bf16.msra.mxu0 %v12985_v47 }
 0x971   :  { %9718 = vmatprep.subr.bf16.mxu0 %v16994_v34 }
 0x972   :  { %9737 = vmatpush3.bf16.msra.mxu1 %v12995_v60 }
 0x973   :  { %9738 = vmatprep.subr.bf16.mxu1 %v16994_v34 }
 0x974   :  { %9719 = vmatpush3.bf16.msra.mxu0 %v13010_v38 }
 0x975   :  { %9720 = vmatprep.subr.bf16.mxu0 %v16994_v34 }
 0x976   :  { %9739 = vmatpush3.bf16.msra.mxu1 %v13017_v46  ;;  %v17002_v46 = vld [vmem:[#allocation77_spill] sm:$0xff] }
 0x977   :  { %9740 = vmatprep.subr.bf16.mxu1 %v16994_v34 }
 0x978   :  { %9721 = vmatpush3.bf16.msra.mxu0 %v13032_v42  ;;  %v11670_v42 = vld [vmem:[%s16728_s10] sm:$0xff]  }
 0x979   :  { %9722 = vmatprep.subr.bf16.mxu0 %v16994_v34 }
 0x97a   :  { %9741 = vmatpush3.bf16.msra.mxu1 %v13039_v33  ;;  %v17000_v33 = vld [vmem:[#allocation73_spill] sm:$0xff] }
 0x97b   :  { %9742 = vmatprep.subr.bf16.mxu1 %v16994_v34 }
 0x97c   :  { %9723 = vmatpush3.bf16.msra.mxu0 %v13054_v35  ;;  %v17001_v35 = vld [vmem:[#allocation74_spill] sm:$0xff] }
 0x97d   :  { %9724 = vmatprep.subr.bf16.mxu0 %v16994_v34 }
 0x97e   :  { %9743 = vmatpush3.bf16.msra.mxu1 %v13061_v29  ;;  %v16995_v29 = vld [vmem:[#allocation62_spill] sm:$0xff] }
 0x97f   :  { %9744 = vmatprep.subr.bf16.mxu1 %v16994_v34 }
 0x980   :  { %9725 = vmatpush3.bf16.msra.mxu0 %v13076_v31  ;;  %v16999_v31 = vld [vmem:[#allocation70_spill] sm:$0xff] }
 0x981   :  { %9726 = vmatprep.subr.bf16.mxu0 %v16994_v34 }
 0x982   :  { %9745 = vmatpush3.bf16.msra.mxu1 %v13083_v26  ;;  %v1674_v26 = vpack.c.bf16 %v13425_v43, %v13425_v43  ;;  %v11891_v43 = vld [vmem:[%s16724_s6 + $0x8] sm:$0xff]  }
 0x983   :  { %9746 = vmatprep.subr.bf16.mxu1 %v16994_v34 }
 0x984   :  { %9727 = vmatpush3.bf16.msra.mxu0 %v13098_v27  ;;  %v16996_v27 = vld [vmem:[#allocation65_spill] sm:$0xff] }
 0x985   :  { %9728 = vmatprep.subr.bf16.mxu0 %v16994_v34 }
 0x986   :  { %9747 = vmatpush3.bf16.msra.mxu1 %v13105_v21  ;;  %v16997_v21 = vld [vmem:[#allocation66_spill] sm:$0xff] }
 0x987   :  { %9748 = vmatprep.subr.bf16.mxu1 %v16994_v34 }
 0x988   :  { %9729 = vmatpush3.bf16.msra.mxu0 %v13120_v23  ;;  %v16998_v23 = vld [vmem:[#allocation69_spill] sm:$0xff] }
 0x989   :  { %9754 = vmatprep.subr.bf16.mxu0 %v16994_v34 }
 0x98a   :  { %9749 = vmatpush3.bf16.msra.mxu1 %v16995_v29 }
 0x98b   :  { %9731 = vmatmul.mubr.bf16.vlgmr.msra.gmra.mrb[36].mxu0 %v1673_v59  ;;  %9774 = vmatprep.subr.bf16.mxu1 %v16994_v34 }
 0x98c   :  { %9755 = vmatpush3.bf16.msra.mxu0 %v16996_v27  ;;  %9770 = vmatprep.mubr.msk.bf16.mxu0 %vm12379_vm0, %v16994_v34 }
 0x98d   :  { %9751 = vmatmul.mubr.bf16.vlgmr.msra.gmra.mrb[32].mxu1 %v1674_v26  ;;  %9756 = vmatprep.subr.bf16.mxu0 %v16994_v34 }
 0x98e   :  { %9775 = vmatpush3.bf16.msra.mxu1 %v16997_v21  ;;  %9790 = vmatprep.mubr.msk.bf16.mxu1 %vm12379_vm0, %v16994_v34 }
 0x98f   :  { %9776 = vmatprep.subr.bf16.mxu1 %v16994_v34 }
 0x990   :  { %9757 = vmatpush3.bf16.msra.mxu0 %v16998_v23 }
 0x991   :  { %9758 = vmatprep.subr.bf16.mxu0 %v16994_v34 }
 0x992   :  { %9777 = vmatpush3.bf16.msra.mxu1 %v16999_v31 }
 0x993   :  { %9778 = vmatprep.subr.bf16.mxu1 %v16994_v34 }
 0x994   :  { %9759 = vmatpush3.bf16.msra.mxu0 %v17000_v33 }
 0x995   :  { %9760 = vmatprep.subr.bf16.mxu0 %v16994_v34 }
 0x996   :  { %9779 = vmatpush3.bf16.msra.mxu1 %v17001_v35 }
 0x997   :  { %9780 = vmatprep.subr.bf16.mxu1 %v16994_v34 }
 0x998   :  { %9761 = vmatpush3.bf16.msra.mxu0 %v17002_v46 }
 0x999   :  { %9762 = vmatprep.subr.bf16.mxu0 %v16994_v34 }
 0x99a   :  { %9781 = vmatpush3.bf16.msra.mxu1 %v17003_v36 }
 0x99b   :  { %9782 = vmatprep.subr.bf16.mxu1 %v16994_v34 }
 0x99c   :  { %9763 = vmatpush3.bf16.msra.mxu0 %v17004_v39 }
 0x99d   :  { %9764 = vmatprep.subr.bf16.mxu0 %v16994_v34 }
 0x99e   :  { %9783 = vmatpush3.bf16.msra.mxu1 %v17005_v40 }
 0x99f   :  { %9784 = vmatprep.subr.bf16.mxu1 %v16994_v34 }
 0x9a0   :  { %9765 = vmatpush3.bf16.msra.mxu0 %v17006_v44 }
 0x9a1   :  { %9766 = vmatprep.subr.bf16.mxu0 %v16994_v34 }
 0x9a2   :  { %9785 = vmatpush3.bf16.msra.mxu1 %v17007_v45 }
 0x9a3   :  { %9786 = vmatprep.subr.bf16.mxu1 %v16994_v34 }
 0x9a4   :  { %9767 = vmatpush3.bf16.msra.mxu0 %v17008_v48 }
 0x9a5   :  { %9768 = vmatprep.subr.bf16.mxu0 %v16994_v34 }
 0x9a6   :  { %9787 = vmatpush3.bf16.msra.mxu1 %v17009_v49 }
 0x9a7   :  { %9788 = vmatprep.subr.bf16.mxu1 %v16994_v34 }
 0x9a8   :  { %9769 = vmatpush3.bf16.msra.mxu0 %v17010_v54 }
 0x9a9   :  { %9794 = vmatprep.subr.bf16.mxu0 %v16994_v34 }
 0x9aa   :  { %9789 = vmatpush3.bf16.msra.mxu1 %v17011_v58 }
 0x9ab   :  { %9771 = vmatmul.mubr.bf16.vlgmr.msra.gmra.mrb[40].mxu0 %v1675_v56  ;;  %9810 = vmatprep.subr.bf16.mxu1 %v16994_v34 }
 0x9ac   :  { %9798 = vmatprep.mubr.msk.bf16.mxu0 %vm12379_vm0, %v16994_v34  ;;  %9795 = vmatpush3.bf16.msra.mxu0 %v11670_v42 }
 0x9ad   :  { %9791 = vmatmul.mubr.bf16.vlgmr.msra.gmra.mrb[36].mxu1 %v1676_v61  ;;  %9796 = vmatprep.subr.bf16.mxu0 %v16994_v34 }
 0x9ae   :  { %9811 = vmatpush3.bf16.msra.mxu1 %v11888_v62  ;;  %9814 = vmatprep.mubr.msk.bf16.mxu1 %vm12379_vm0, %v16994_v34 }
 0x9af   :  { %9812 = vmatprep.subr.bf16.mxu1 %v16994_v34 }
 0x9b0   :  { %9797 = vmatpush3.bf16.msra.mxu0 %v11671_v18 }
 0x9b1   :  { %9802 = vmatprep.subr.bf16.mxu0 %v16994_v34 }
 0x9b2   :  { %9813 = vmatpush3.bf16.msra.mxu1 %v11889_v50 }
 0x9b3   :  { %9818 = vmatprep.subr.bf16.mxu1 %v16994_v34 }
 0x9bf   :  { %v2213_v38 = vpop.permute.xlu0 %2212 }
 0x9c0   :  { %v2215_v47 = vmul.f32 %v13412_v8, %v2213_v38 }
 0x9c2   :  { %v2216_v60 = vpack.c.bf16 %v2215_v47, %v2215_v47 }
 0x9c4   :  { %2218 = vrot.lane.b32.xlu1 %v2216_v60, %s12381_s29 }
 0xa1e   :  { %v1719_v25 = vpop.f32.mrb[28].mxu0 }
 0xa1f   :  { %v9652_v11 = vpop.f32.mrb[29].mxu0  ;;  %v2069_v10 = vpack.c.bf16 %v1719_v25, %v1719_v25 }
 0xa20   :  { %v1722_v8 = vpop.f32.mrb[30].mxu0  ;;  %v1767_v52 = vpop.f32.mrb[24].mxu1 }
 0xa21   :  { %v2070_v5 = vpack.c.bf16 %v1767_v52, %v1767_v52  ;;  %v9653_v14 = vpop.f32.mrb[31].mxu0  ;;  %v9672_v63 = vpop.f32.mrb[25].mxu1  ;;  %v2085_v30 = vunpack.c.l.b16 %v2069_v10  ;;  %v11892_v10 = vld [vmem:[%s16723_s5] sm:$0xff]  }
 0xa22   :  { %v1770_v19 = vpop.f32.mrb[26].mxu1  ;;  %v11894_v14 = vld [vmem:[%s16726_s8 + $0x4] ss:$8 sps:$4 sm:$0xff]   ;;  %v11895_v63 = vld [vmem:[%s16726_s8] ss:$8 sps:$4 sm:$0xff]  }
 0xa23   :  { %v2086_v55 = vunpack.c.l.b16 %v2070_v5  ;;  %v9673_v32 = vpop.f32.mrb[27].mxu1  ;;  %v11893_v5 = vld [vmem:[%s16723_s5 + $0x8] sm:$0xff]   ;;  %v17012_v19 = vmov 0  }
 0xa24   :  { %v11897_v32 = vld [vmem:[%s16726_s8 + $0x10] ss:$8 sps:$4 sm:$0xff]  }
 0xa25   :  { %v2093_v22 = vrot.slane %v2086_v55, 7  ;;  %v11896_v55 = vld [vmem:[%s16726_s8 + $0x14] ss:$8 sps:$4 sm:$0xff]  }
 0xa27   :  { %v2094_v2 = vsel %vm1556_vm2, %v2093_v22, %v2085_v30 }
 0xa36   :  { %v13585_v7 = vpop.permute.xlu1 %2218 }
 0xa37   :  { %9815 = vmatmul.mubr.msk.bf16.vlgmr.msra.gmra.mrb[40].mxu1 %vm218_vm1, %v13585_v7 }
 0xa38   :  { %9819 = vmatpush3.bf16.msra.mxu1 %v11890_v16  ;;  %9822 = vmatprep.mubr.msk.bf16.mxu1 %vm12379_vm0, %v16994_v34  ;;  %v194_v16 = vld [vmem:[%s16727_s9] sm:$0xff] }
 0xa39   :  { %9820 = vmatprep.subr.bf16.mxu1 %v16994_v34 }
 0xa3c   :  { %9821 = vmatpush3.bf16.msra.mxu1 %v11891_v43  ;;  %v17013_v43 = vld [vmem:[#allocation29_spill] sm:$0xff] }
 0xa3d   :  { %9826 = vmatprep.subr.bf16.mxu1 %v16994_v34 }
 0xa3e   :  { %v1815_v15 = vpop.f32.mrb[32].mxu0 }
 0xa3f   :  { %v2071_v12 = vpack.c.bf16 %v1815_v15, %v1815_v15  ;;  %v9692_v20 = vpop.f32.mrb[33].mxu0  ;;  %v579_v15 = vadd.f32 %v17013_v43, %v194_v16 }
 0xa40   :  { %v1818_v17 = vpop.f32.mrb[34].mxu0  ;;  %v1863_v3 = vpop.f32.mrb[28].mxu1 }
 0xa41   :  { %v2087_v53 = vunpack.c.l.b16 %v2071_v12  ;;  %v2072_v1 = vpack.c.bf16 %v1863_v3, %v1863_v3  ;;  %v9693_v9 = vpop.f32.mrb[35].mxu0  ;;  %v9712_v13 = vpop.f32.mrb[29].mxu1 }
 0xa42   :  { %v1866_v51 = vpop.f32.mrb[30].mxu1  ;;  %v11898_v9 = vld [vmem:[%s16725_s7] sm:$0xff] }
 0xa43   :  { %v2095_v57 = vrot.slane %v2087_v53, 6  ;;  %v2088_v37 = vunpack.c.l.b16 %v2072_v1  ;;  %v9713_v24 = vpop.f32.mrb[31].mxu1 }
 0xa45   :  { %v2096_v28 = vsel %vm1559_vm3, %v2095_v57, %v2094_v2  ;;  %v2097_v4 = vrot.slane %v2088_v37, 5 }
 0xa47   :  { %v2098_v0 = vsel %vm1562_vm4, %v2097_v4, %v2096_v28 }
 0xa5e   :  { %v1911_v6 = vpop.f32.mrb[36].mxu0 }
 0xa5f   :  { %v2073_v59 = vpack.c.bf16 %v1911_v6, %v1911_v6  ;;  %v9732_v29 = vpop.f32.mrb[37].mxu0 }
 0xa60   :  { %v1914_v26 = vpop.f32.mrb[38].mxu0  ;;  %v1959_v27 = vpop.f32.mrb[32].mxu1 }
 0xa61   :  { %v2089_v21 = vunpack.c.l.b16 %v2073_v59  ;;  %v2074_v23 = vpack.c.bf16 %v1959_v27, %v1959_v27  ;;  %v9733_v31 = vpop.f32.mrb[39].mxu0  ;;  %v9752_v33 = vpop.f32.mrb[33].mxu1  ;;  %v17014_v27 = vld [vmem:[#allocation12_spill] sm:$0xff] }
 0xa62   :  { %v1962_v35 = vpop.f32.mrb[34].mxu1 }
 0xa63   :  { %v2099_v46 = vrot.slane %v2089_v21, 4  ;;  %v2090_v36 = vunpack.c.l.b16 %v2074_v23  ;;  %v9753_v39 = vpop.f32.mrb[35].mxu1 }
 0xa65   :  { %v2100_v40 = vsel %vm1565_vm5, %v2099_v46, %v2098_v0  ;;  %v2101_v44 = vrot.slane %v2090_v36, 3 }
 0xa67   :  { %v2102_v45 = vsel %vm1568_vm6, %v2101_v44, %v2100_v40  ;;  %v17015_v40 = vld [vmem:[#allocation13_spill] sm:$0xff]  ;;  %v17016_v44 = vld [vmem:[#allocation14_spill] sm:$0xff] }
 0xa7e   :  { %v2007_v48 = vpop.f32.mrb[40].mxu0 }
 0xa7f   :  { %v2075_v49 = vpack.c.bf16 %v2007_v48, %v2007_v48  ;;  %v9772_v54 = vpop.f32.mrb[41].mxu0  ;;  %v17018_v48 = vld [vmem:[#allocation16_spill] sm:$0xff] }
 0xa80   :  { %v2010_v56 = vpop.f32.mrb[42].mxu0  ;;  %v2055_v58 = vpop.f32.mrb[36].mxu1  ;;  %v17020_v54 = vld [vmem:[#allocation18_spill] sm:$0xff] }
 0xa81   :  { %v2091_v61 = vunpack.c.l.b16 %v2075_v49  ;;  %v2076_v62 = vpack.c.bf16 %v2055_v58, %v2055_v58  ;;  %v9773_v50 = vpop.f32.mrb[43].mxu0  ;;  %v9792_v38 = vpop.f32.mrb[37].mxu1  ;;  %v17019_v49 = vld [vmem:[#allocation17_spill] sm:$0xff]  ;;  %v17021_v56 = vld [vmem:[#allocation19_spill] sm:$0xff]  ;;  %v17022_v58 = vld [vmem:[#allocation20_spill] sm:$0xff] }
 0xa82   :  { %v2058_v47 = vpop.f32.mrb[38].mxu1  ;;  %v17025_v50 = vld [vmem:[#allocation23_spill] sm:$0xff]  ;;  %v17026_v38 = vld [vmem:[#allocation24_spill] sm:$0xff] }
 0xa83   :  { %v2103_v60 = vrot.slane %v2091_v61, 2  ;;  %v2092_v42 = vunpack.c.l.b16 %v2076_v62  ;;  %v9793_v18 = vpop.f32.mrb[39].mxu1  ;;  %v17023_v61 = vld [vmem:[#allocation21_spill] sm:$0xff]  ;;  %v17024_v62 = vld [vmem:[#allocation22_spill] sm:$0xff] }
 0xa84   :  { %v17027_v47 = vld [vmem:[#allocation25_spill] sm:$0xff]  ;;  %v17030_v18 = vld [vmem:[#allocation28_spill] sm:$0xff] }
 0xa85   :  { %v2104_v25 = vsel %vm1571_vm7, %v2103_v60, %v2102_v45  ;;  %v2105_v11 = vrot.slane %v2092_v42, 1  ;;  %v17017_v45 = vld [vmem:[#allocation15_spill] sm:$0xff]  ;;  %v17028_v60 = vld [vmem:[#allocation26_spill] sm:$0xff] }
 0xa86   :  { %v17029_v42 = vld [vmem:[#allocation27_spill] sm:$0xff] }
 0xa87   :  { %v2106_v8 = vsel %vm1574_vm8, %v2105_v11, %v2104_v25 }
 0xa88   :  { %v2107_v52 = vpack.c.b16 %v2106_v8, %v2106_v8  ;;  %v11899_v8 = vld [vmem:[%s16727_s9 + $0x8] sm:$0xff] }
 0xa8a   :  { %9799 = vmatmul.mubr.msk.bf16.vlgmr.msra.gmra.mrb[44].mxu0 %vm218_vm1, %v2107_v52 }
 0xa8b   :  { %9803 = vmatpush3.bf16.msra.mxu0 %v11892_v10  ;;  %9806 = vmatprep.mubr.msk.bf16.mxu0 %vm12379_vm0, %v16994_v34 }
 0xa8c   :  { %9804 = vmatprep.subr.bf16.mxu0 %v16994_v34 }
 0xa8f   :  { %9805 = vmatpush3.bf16.msra.mxu0 %v11893_v5 }
 0xa90   :  { %2374 = vmatprep.subr.bf16.mxu0 %v11894_v14 }
 0xa92   :  { %9807 = vmatmul.mubr.msk.bf16.vlgmr.msra.gmra.mrb[8].mxu0 %vm218_vm1, %v13585_v7 }
 0xa93   :  { %2375 = vmatpush1.bf16.msra.mxu0 %v11895_v63  ;;  %2406 = vmatprep.mubr.bf16.mxu0 %v17012_v19  ;;  %v17031_v63 = vld [vmem:[#allocation30_spill] sm:$0xff] }
 0xa94   :  { %2376 = vmatprep.subr.bf16.mxu0 %v11896_v55 }
 0xa97   :  { %2377 = vmatpush1.bf16.msra.mxu0 %v11897_v32 }
 0xa98   :  { %9846 = vmatprep.subr.bf16.mxu0 %v16994_v34 }
 0xb0a   :  { %v13631_v30 = vpop.f32.mrb[40].mxu1 }
 0xb0b   :  { %v9816_v22 = vpop.f32.mrb[41].mxu1 }
 0xb0c   :  { %v2325_v2 = vpop.f32.mrb[42].mxu1 }
 0xb0d   :  { %v9817_v7 = vpop.f32.mrb[43].mxu1 }
 0xb0e   :  { %v17032_v7 = vld [vmem:[#allocation31_spill] sm:$0xff] }
 0xb5d   :  { %v2157_v12 = vpop.f32.mrb[44].mxu0 }
 0xb5e   :  { %v2158_v20 = vadd.f32 %v2157_v12, %v579_v15  ;;  %v9800_v17 = vpop.f32.mrb[45].mxu0  ;;  %v17033_v15 = vld [vmem:[#allocation32_spill] sm:$0xff] }
 0xb5f   :  { %v2160_v3 = vpop.f32.mrb[46].mxu0  ;;  %v17035_v17 = vld [vmem:[#allocation34_spill] sm:$0xff] }
 0xb60   :  { %11714 = vtanh.f32 %v2158_v20  ;;  %v9801_v53 = vpop.f32.mrb[47].mxu0  ;;  %v17034_v20 = vld [vmem:[#allocation33_spill] sm:$0xff]  ;;  %v17036_v3 = vld [vmem:[#allocation35_spill] sm:$0xff] }
 0xb61   :  { %v17037_v53 = vld [vmem:[#allocation36_spill] sm:$0xff] }
 0xb65   :  { %v2257_v1 = vpop.f32.mrb[8].mxu0 }
 0xb66   :  { %v11547_v13 = vadd.f32 %v11898_v9, %v2257_v1  ;;  %v9808_v51 = vpop.f32.mrb[9].mxu0  ;;  %v17038_v1 = vld [vmem:[#allocation37_spill] sm:$0xff]  ;;  %v17039_v9 = vld [vmem:[#allocation38_spill] sm:$0xff] }
 0xb67   :  { %v2260_v57 = vpop.f32.mrb[10].mxu0  ;;  %v17041_v51 = vld [vmem:[#allocation40_spill] sm:$0xff] }
 0xb68   :  { %11716 = vtanh.f32 %v11547_v13  ;;  %v9809_v37 = vpop.f32.mrb[11].mxu0  ;;  %v8403_v4 = vmul.f32 -1.442695, %v11547_v13  ;;  %v17040_v13 = vld [vmem:[#allocation39_spill] sm:$0xff]  ;;  %v17042_v57 = vld [vmem:[#allocation41_spill] sm:$0xff] }
 0xb69   :  { %v17043_v37 = vld [vmem:[#allocation42_spill] sm:$0xff] }
 0xb6a   :  { %v11715_v24 = vpop.eup %11714  ;;  %11718 = vpow2.f32 %v8403_v4  ;;  %v17045_v4 = vld [vmem:[#allocation44_spill] sm:$0xff] }
 0xb6b   :  { %2164 = vst [vmem:[#allocation2] sm:$0xff] %v11715_v24  ;;  %v17044_v24 = vld [vmem:[#allocation43_spill] sm:$0xff] }
 0xb72   :  { %v11717_v28 = vpop.eup %11716 }
 0xb73   :  { %2272 = vrot.lane.b32.xlu0 %v11717_v28, %s12380_s26 }
 0xb74   :  { %v11719_v0 = vpop.eup %11718 }
 0xb75   :  { %v2266_v6 = vadd.f32 1.0, %v11719_v0  ;;  %v17046_v0 = vld [vmem:[#allocation45_spill] sm:$0xff] }
 0xb77   :  { %11720 = vrcp.f32 %v2266_v6 }
 0xb81   :  { %v11721_v59 = vpop.eup %11720 }
 0xb82   :  { %v2270_v21 = vmul.f32 %v11721_v59, %v17014_v27  ;;  %v17048_v27 = vld [vmem:[#allocation47_spill] sm:$0xff] }
 0xbe5   :  { %v2273_v29 = vpop.permute.xlu0 %2272 }
 0xbe6   :  { %v2275_v26 = vmul.f32 %v11721_v59, %v2273_v29  ;;  %v17047_v29 = vld [vmem:[#allocation46_spill] sm:$0xff] }
 0xbe8   :  { %2277 = vrot.lane.b32.xlu1 %v2275_v26, %s12381_s29 }
 0xc5a   :  { %v2278_v23 = vpop.permute.xlu1 %2277 }
 0xc5b   :  { %v13643_v31 = vadd.f32 %v2278_v23, %v2270_v21 }
 0xc5d   :  { %11722 = vtanh.f32 %v13643_v31 }
 0xc67   :  { %v11723_v33 = vpop.eup %11722 }
 0xc68   :  { %2283 = vrot.lane.b32.xlu0 %v11723_v33, %s12380_s26  ;;  %v17049_v33 = vld [vmem:[#allocation48_spill] sm:$0xff] }
 0xcda   :  { %v2284_v35 = vpop.permute.xlu0 %2283 }
 0xcdb   :  { %v2286_v46 = vmul.f32 %v11721_v59, %v2284_v35 }
 0xcdd   :  { %v2287_v36 = vpack.c.bf16 %v2286_v46, %v2286_v46  ;;  %v17050_v46 = vld [vmem:[#allocation49_spill] sm:$0xff] }
 0xcdf   :  { %2329 = vrot.lane.b32.xlu1 %v2287_v36, %s12381_s29  ;;  %v17051_v36 = vld [vmem:[#allocation50_spill] sm:$0xff] }
 0xd51   :  { %v2330_v39 = vpop.permute.xlu1 %2329 }
 0xd52   :  { %9823 = vmatmul.mubr.msk.bf16.vlgmr.msra.gmra.mrb[44].mxu1 %vm218_vm1, %v2330_v39  ;;  %8406 = vmatmul.mubr.msk.bf16.vlgmr.msra.gmra.mrb[48].mxu0 %vm218_vm1, %v2330_v39  ;;  %v17052_v39 = vld [vmem:[#allocation51_spill] sm:$0xff] }
 0xd53   :  { %9827 = vmatpush3.bf16.xpose.msra.mxu1 %v17015_v40  ;;  %9847 = vmatpush3.bf16.xpose.msra.mxu0 %v17016_v44 }
 0xd54   :  { %9828 = vmatprep.subr.bf16.mxu1 %v16994_v34  ;;  %9848 = vmatprep.subr.bf16.mxu0 %v16994_v34 }
 0xd55   :  { %9842 = vmatprep.mubr.msk.bf16.mxu1 %vm12379_vm0, %v16994_v34  ;;  %9862 = vmatprep.mubr.msk.bf16.mxu0 %vm12379_vm0, %v16994_v34 }
 0xd5b   :  { %9829 = vmatpush3.bf16.xpose.msra.mxu1 %v17017_v45  ;;  %9849 = vmatpush3.bf16.xpose.msra.mxu0 %v17018_v48 }
 0xd5c   :  { %9830 = vmatprep.subr.bf16.mxu1 %v16994_v34  ;;  %9850 = vmatprep.subr.bf16.mxu0 %v16994_v34 }
 0xd63   :  { %9831 = vmatpush3.bf16.xpose.msra.mxu1 %v17019_v49  ;;  %9851 = vmatpush3.bf16.xpose.msra.mxu0 %v17020_v54 }
 0xd64   :  { %9832 = vmatprep.subr.bf16.mxu1 %v16994_v34  ;;  %9852 = vmatprep.subr.bf16.mxu0 %v16994_v34 }
 0xd6b   :  { %9833 = vmatpush3.bf16.xpose.msra.mxu1 %v17021_v56  ;;  %9853 = vmatpush3.bf16.xpose.msra.mxu0 %v17022_v58 }
 0xd6c   :  { %9834 = vmatprep.subr.bf16.mxu1 %v16994_v34  ;;  %9854 = vmatprep.subr.bf16.mxu0 %v16994_v34 }
 0xd73   :  { %9835 = vmatpush3.bf16.xpose.msra.mxu1 %v17023_v61  ;;  %9855 = vmatpush3.bf16.xpose.msra.mxu0 %v17024_v62 }
 0xd74   :  { %9836 = vmatprep.subr.bf16.mxu1 %v16994_v34  ;;  %9856 = vmatprep.subr.bf16.mxu0 %v16994_v34 }
 0xd7b   :  { %9837 = vmatpush3.bf16.xpose.msra.mxu1 %v17025_v50  ;;  %9857 = vmatpush3.bf16.xpose.msra.mxu0 %v17026_v38 }
 0xd7c   :  { %9838 = vmatprep.subr.bf16.mxu1 %v16994_v34  ;;  %9858 = vmatprep.subr.bf16.mxu0 %v16994_v34 }
 0xd83   :  { %9839 = vmatpush3.bf16.xpose.msra.mxu1 %v17027_v47  ;;  %9859 = vmatpush3.bf16.xpose.msra.mxu0 %v17028_v60 }
 0xd84   :  { %9840 = vmatprep.subr.bf16.mxu1 %v16994_v34  ;;  %9860 = vmatprep.subr.bf16.mxu0 %v16994_v34 }
 0xd8b   :  { %9841 = vmatpush3.bf16.xpose.msra.mxu1 %v17029_v42  ;;  %9861 = vmatpush3.bf16.xpose.msra.mxu0 %v17030_v18 }
 0xd8c   :  { %9866 = vmatprep.subr.bf16.mxu1 %v16994_v34  ;;  %9886 = vmatprep.subr.bf16.mxu0 %v16994_v34 }
 0xe25   :  { %v13686_v25 = vpop.f32.mrb[48].mxu0 }
 0xe26   :  { %v2410_v11 = vpop.f32.mrb[49].mxu0 }
 0xe27   :  { %v2411_v52 = vadd.f32 %v11899_v8, %v2410_v11  ;;  %v2412_v10 = vpop.f32.mrb[50].mxu0  ;;  %v17053_v11 = vld [vmem:[#allocation52_spill] sm:$0xff]  ;;  %v17054_v8 = vld [vmem:[#allocation53_spill] sm:$0xff] }
 0xe28   :  { %v2413_v5 = vpop.f32.mrb[51].mxu0  ;;  %v17056_v10 = vld [vmem:[#allocation55_spill] sm:$0xff] }
 0xe29   :  { %v2415_v14 = vpack.c.bf16 %v2411_v52, %v2411_v52  ;;  %v17055_v52 = vld [vmem:[#allocation54_spill] sm:$0xff]  ;;  %v17057_v5 = vld [vmem:[#allocation56_spill] sm:$0xff] }
 0xe2b   :  { %v2423_v55 = vrot.slane %v2415_v14, %v17031_v63  ;;  %v17058_v14 = vld [vmem:[#allocation57_spill] sm:$0xff] }
 0xe2d   :  { %v13693_v32 = vrot.slane %v2423_v55, %v17031_v63  ;;  %v2424_v28 = vcombine.high %v2423_v55, %v2423_v55  ;;  %v17059_v55 = vld [vmem:[#allocation58_spill] sm:$0xff] }
 0xe2f   :  { %v2442_v22 = vunpack.i.h.s16 %v13693_v32  ;;  %v8407_v2 = vpack.i.b16 %v13693_v32, %v13693_v32  ;;  %v13734_v6 = vrot.slane %v2424_v28, %v17031_v63  ;;  %v17063_v28 = vld [vmem:[#allocation63_spill] sm:$0xff] }
 0xe31   :  { %v2453_v16 = vrot.slane %v8407_v2, %v17032_v7  ;;  %v2497_v43 = vpack.i.b16 %v2442_v22, %v2442_v22  ;;  %v2444_v59 = vunpack.i.h.s16 %v13734_v6  ;;  %v8410_v26 = vpack.i.b16 %v13734_v6, %v13734_v6  ;;  %v17060_v22 = vld [vmem:[#allocation59_spill] sm:$0xff]  ;;  %v17061_v2 = vld [vmem:[#allocation60_spill] sm:$0xff] }
 0xe33   :  { %9843 = vmatmul.mubr.msk.bf16.vlgmr.msra.gmra.mrb[48].mxu1 %vm218_vm1, %v2453_v16  ;;  %v2501_v12 = vrot.slane %v2497_v43, %v17032_v7  ;;  %v2593_v21 = vpack.i.b16 %v2444_v59, %v2444_v59  ;;  %v2549_v23 = vrot.slane %v8410_v26, %v17032_v7  ;;  %v17062_v16 = vld [vmem:[#allocation61_spill] sm:$0xff]  ;;  %v2439_v43 = vcombine.high %v13693_v32, %v13693_v32  ;;  %v17064_v26 = vld [vmem:[#allocation64_spill] sm:$0xff] }
 0xe34   :  { %9867 = vmatpush3.bf16.xpose.msra.mxu1 %v17033_v15  ;;  %9882 = vmatprep.mubr.msk.bf16.mxu1 %vm12379_vm0, %v16994_v34 }
 0xe35   :  { %9868 = vmatprep.subr.bf16.mxu1 %v16994_v34  ;;  %9863 = vmatmul.mubr.msk.bf16.vlgmr.msra.gmra.mrb[52].mxu0 %vm218_vm1, %v2501_v12  ;;  %v2597_v35 = vrot.slane %v2593_v21, %v17032_v7  ;;  %v2446_v12 = vunpack.i.h.s16 %v2439_v43  ;;  %v8413_v59 = vpack.i.b16 %v2439_v43, %v2439_v43  ;;  %v17066_v43 = vld [vmem:[#allocation68_spill] sm:$0xff] }
 0xe36   :  { %9887 = vmatpush3.bf16.xpose.msra.mxu0 %v17034_v20  ;;  %9902 = vmatprep.mubr.msk.bf16.mxu0 %vm12379_vm0, %v16994_v34 }
 0xe37   :  { %9888 = vmatprep.subr.bf16.mxu0 %v16994_v34  ;;  %v2689_v21 = vpack.i.b16 %v2446_v12, %v2446_v12  ;;  %v17067_v12 = vld [vmem:[#allocation71_spill] sm:$0xff] }
 0xe39   :  { %v2693_v32 = vrot.slane %v2689_v21, %v17032_v7  ;;  %v17069_v21 = vld [vmem:[#allocation75_spill] sm:$0xff] }
 0xe3c   :  { %9869 = vmatpush3.bf16.xpose.msra.mxu1 %v17035_v17 }
 0xe3d   :  { %9870 = vmatprep.subr.bf16.mxu1 %v16994_v34 }
 0xe3e   :  { %9889 = vmatpush3.bf16.xpose.msra.mxu0 %v17036_v3 }
 0xe3f   :  { %9890 = vmatprep.subr.bf16.mxu0 %v16994_v34 }
 0xe44   :  { %9871 = vmatpush3.bf16.xpose.msra.mxu1 %v17037_v53 }
 0xe45   :  { %9872 = vmatprep.subr.bf16.mxu1 %v16994_v34 }
 0xe46   :  { %9891 = vmatpush3.bf16.xpose.msra.mxu0 %v17038_v1 }
 0xe47   :  { %9892 = vmatprep.subr.bf16.mxu0 %v16994_v34 }
 0xe4c   :  { %9873 = vmatpush3.bf16.xpose.msra.mxu1 %v17039_v9 }
 0xe4d   :  { %9874 = vmatprep.subr.bf16.mxu1 %v16994_v34 }
 0xe4e   :  { %9893 = vmatpush3.bf16.xpose.msra.mxu0 %v17040_v13 }
 0xe4f   :  { %9894 = vmatprep.subr.bf16.mxu0 %v16994_v34 }
 0xe54   :  { %9875 = vmatpush3.bf16.xpose.msra.mxu1 %v17041_v51 }
 0xe55   :  { %9876 = vmatprep.subr.bf16.mxu1 %v16994_v34 }
 0xe56   :  { %9895 = vmatpush3.bf16.xpose.msra.mxu0 %v17042_v57 }
 0xe57   :  { %9896 = vmatprep.subr.bf16.mxu0 %v16994_v34 }
 0xe5c   :  { %9877 = vmatpush3.bf16.xpose.msra.mxu1 %v17043_v37 }
 0xe5d   :  { %9878 = vmatprep.subr.bf16.mxu1 %v16994_v34 }
 0xe5e   :  { %9897 = vmatpush3.bf16.xpose.msra.mxu0 %v17044_v24 }
 0xe5f   :  { %9898 = vmatprep.subr.bf16.mxu0 %v16994_v34 }
 0xe64   :  { %9879 = vmatpush3.bf16.xpose.msra.mxu1 %v17045_v4 }
 0xe65   :  { %9880 = vmatprep.subr.bf16.mxu1 %v16994_v34 }
 0xe66   :  { %9899 = vmatpush3.bf16.xpose.msra.mxu0 %v17046_v0 }
 0xe67   :  { %9900 = vmatprep.subr.bf16.mxu0 %v16994_v34 }
 0xe6c   :  { %9881 = vmatpush3.bf16.xpose.msra.mxu1 %v17047_v29 }
 0xe6d   :  { %9906 = vmatprep.subr.bf16.mxu1 %v16994_v34 }
 0xe6e   :  { %9901 = vmatpush3.bf16.xpose.msra.mxu0 %v17048_v27 }
 0xe6f   :  { %9926 = vmatprep.subr.bf16.mxu0 %v16994_v34 }
 0xe73   :  { %9883 = vmatmul.mubr.msk.bf16.vlgmr.msra.gmra.mrb[52].mxu1 %vm218_vm1, %v2549_v23  ;;  %v2645_v23 = vrot.slane %v8413_v59, %v17032_v7  ;;  %v17068_v59 = vld [vmem:[#allocation72_spill] sm:$0xff] }
 0xe74   :  { %9907 = vmatpush3.bf16.xpose.msra.mxu1 %v17049_v33  ;;  %9922 = vmatprep.mubr.msk.bf16.mxu1 %vm12379_vm0, %v16994_v34 }
 0xe75   :  { %9908 = vmatprep.subr.bf16.mxu1 %v16994_v34  ;;  %9903 = vmatmul.mubr.msk.bf16.vlgmr.msra.gmra.mrb[56].mxu0 %vm218_vm1, %v2597_v35  ;;  %v17065_v35 = vld [vmem:[#allocation67_spill] sm:$0xff] }
 0xe76   :  { %9927 = vmatpush3.bf16.xpose.msra.mxu0 %v17050_v46  ;;  %9942 = vmatprep.mubr.msk.bf16.mxu0 %vm12379_vm0, %v16994_v34 }
 0xe77   :  { %9928 = vmatprep.subr.bf16.mxu0 %v16994_v34 }
 0xe7c   :  { %9909 = vmatpush3.bf16.xpose.msra.mxu1 %v17051_v36 }
 0xe7d   :  { %9910 = vmatprep.subr.bf16.mxu1 %v16994_v34 }
 0xe7e   :  { %9929 = vmatpush3.bf16.xpose.msra.mxu0 %v17052_v39  ;;  %v17082_v39 = vld [vmem:[#allocation98_spill] sm:$0xff] }
 0xe7f   :  { %9930 = vmatprep.subr.bf16.mxu0 %v16994_v34 }
 0xe84   :  { %9911 = vmatpush3.bf16.xpose.msra.mxu1 %v17053_v11  ;;  %v17081_v11 = vld [vmem:[#allocation97_spill] sm:$0xff] }
 0xe85   :  { %9912 = vmatprep.subr.bf16.mxu1 %v16994_v34 }
 0xe86   :  { %9931 = vmatpush3.bf16.xpose.msra.mxu0 %v17054_v8 }
 0xe87   :  { %9932 = vmatprep.subr.bf16.mxu0 %v16994_v34 }
 0xe8c   :  { %9913 = vmatpush3.bf16.xpose.msra.mxu1 %v17055_v52 }
 0xe8d   :  { %9914 = vmatprep.subr.bf16.mxu1 %v16994_v34 }
 0xe8e   :  { %9933 = vmatpush3.bf16.xpose.msra.mxu0 %v17056_v10 }
 0xe8f   :  { %9934 = vmatprep.subr.bf16.mxu0 %v16994_v34 }
 0xe94   :  { %9915 = vmatpush3.bf16.xpose.msra.mxu1 %v17057_v5 }
 0xe95   :  { %9916 = vmatprep.subr.bf16.mxu1 %v16994_v34 }
 0xe96   :  { %9935 = vmatpush3.bf16.xpose.msra.mxu0 %v17058_v14 }
 0xe97   :  { %9936 = vmatprep.subr.bf16.mxu0 %v16994_v34 }
 0xe9c   :  { %9917 = vmatpush3.bf16.xpose.msra.mxu1 %v17059_v55 }
 0xe9d   :  { %9918 = vmatprep.subr.bf16.mxu1 %v16994_v34 }
 0xe9e   :  { %9937 = vmatpush3.bf16.xpose.msra.mxu0 %v17060_v22 }
 0xe9f   :  { %9938 = vmatprep.subr.bf16.mxu0 %v16994_v34 }
 0xea4   :  { %9919 = vmatpush3.bf16.xpose.msra.mxu1 %v17061_v2 }
 0xea5   :  { %9920 = vmatprep.subr.bf16.mxu1 %v16994_v34 }
 0xea6   :  { %9939 = vmatpush3.bf16.xpose.msra.mxu0 %v17062_v16 }
 0xea7   :  { %9940 = vmatprep.subr.bf16.mxu0 %v16994_v34 }
 0xeac   :  { %9921 = vmatpush3.bf16.xpose.msra.mxu1 %v17063_v28 }
 0xead   :  { %9946 = vmatprep.subr.bf16.mxu1 %v16994_v34 }
 0xeae   :  { %9941 = vmatpush3.bf16.xpose.msra.mxu0 %v17064_v26 }
 0xeaf   :  { %9966 = vmatprep.subr.bf16.mxu0 %v16994_v34 }
 0xeb3   :  { %9923 = vmatmul.mubr.msk.bf16.vlgmr.msra.gmra.mrb[56].mxu1 %vm218_vm1, %v2645_v23  ;;  %v17070_v23 = vld [vmem:[#allocation76_spill] sm:$0xff] }
 0xeb4   :  { %9947 = vmatpush3.bf16.xpose.msra.mxu1 %v17065_v35  ;;  %9962 = vmatprep.mubr.msk.bf16.mxu1 %vm12379_vm0, %v16994_v34  ;;  %v17079_v35 = vld [vmem:[#allocation95_spill] sm:$0xff] }
 0xeb5   :  { %9948 = vmatprep.subr.bf16.mxu1 %v16994_v34  ;;  %9943 = vmatmul.mubr.msk.bf16.vlgmr.msra.gmra.mrb[60].mxu0 %vm218_vm1, %v2693_v32  ;;  %v17071_v32 = vld [vmem:[#allocation79_spill] sm:$0xff] }
 0xeb6   :  { %9967 = vmatpush3.bf16.xpose.msra.mxu0 %v17066_v43  ;;  %9982 = vmatprep.mubr.msk.bf16.mxu0 %vm12379_vm0, %v16994_v34  ;;  %v17072_v43 = vld [vmem:[#allocation80_spill] sm:$0xff] }
 0xeb7   :  { %9968 = vmatprep.subr.bf16.mxu0 %v16994_v34 }
 0xebc   :  { %9949 = vmatpush3.bf16.xpose.msra.mxu1 %v17067_v12  ;;  %v17073_v12 = vld [vmem:[#allocation83_spill] sm:$0xff] }
 0xebd   :  { %9950 = vmatprep.subr.bf16.mxu1 %v16994_v34 }
 0xebe   :  { %9969 = vmatpush3.bf16.xpose.msra.mxu0 %v17068_v59  ;;  %v17074_v59 = vld [vmem:[#allocation84_spill] sm:$0xff] }
 0xebf   :  { %9970 = vmatprep.subr.bf16.mxu0 %v16994_v34 }
 0xec4   :  { %9951 = vmatpush3.bf16.xpose.msra.mxu1 %v17069_v21  ;;  %v17075_v21 = vld [vmem:[#allocation87_spill] sm:$0xff] }
 0xec5   :  { %9952 = vmatprep.subr.bf16.mxu1 %v16994_v34 }
 0xec6   :  { %9971 = vmatpush3.bf16.xpose.msra.mxu0 %v17070_v23  ;;  %v17076_v23 = vld [vmem:[#allocation88_spill] sm:$0xff] }
 0xec7   :  { %9972 = vmatprep.subr.bf16.mxu0 %v16994_v34 }
 0xecc   :  { %9953 = vmatpush3.bf16.xpose.msra.mxu1 %v17071_v32  ;;  %v17077_v32 = vld [vmem:[#allocation91_spill] sm:$0xff] }
 0xecd   :  { %9954 = vmatprep.subr.bf16.mxu1 %v16994_v34 }
 0xece   :  { %9973 = vmatpush3.bf16.xpose.msra.mxu0 %v17072_v43  ;;  %v17078_v43 = vld [vmem:[#allocation92_spill] sm:$0xff] }
 0xecf   :  { %9974 = vmatprep.subr.bf16.mxu0 %v16994_v34 }
 0xed4   :  { %9955 = vmatpush3.bf16.xpose.msra.mxu1 %v17073_v12  ;;  %v2440_v12 = vcombine.high %v13734_v6, %v13734_v6  ;;  %v11900_v6 = vld [vmem:[%s16721_s3] sm:$0xff]  }
 0xed5   :  { %9956 = vmatprep.subr.bf16.mxu1 %v16994_v34 }
 0xed6   :  { %9975 = vmatpush3.bf16.xpose.msra.mxu0 %v17074_v59  ;;  %v2448_v59 = vunpack.i.h.s16 %v2440_v12 }
 0xed7   :  { %9976 = vmatprep.subr.bf16.mxu0 %v16994_v34 }
 0xed8   :  { %v2785_v26 = vpack.i.b16 %v2448_v59, %v2448_v59  ;;  %v11904_v59 = vld [vmem:[%s16721_s3 + $0x10] sm:$0xff]  }
 0xedc   :  { %9957 = vmatpush3.bf16.xpose.msra.mxu1 %v17075_v21  ;;  %v8416_v21 = vpack.i.b16 %v2440_v12, %v2440_v12  ;;  %v11901_v12 = vld [vmem:[%s16721_s3 + $0x40] sm:$0xff]  }
 0xedd   :  { %9958 = vmatprep.subr.bf16.mxu1 %v16994_v34 }
 0xede   :  { %9977 = vmatpush3.bf16.xpose.msra.mxu0 %v17076_v23  ;;  %v17080_v23 = vld [vmem:[#allocation96_spill] sm:$0xff] }
 0xedf   :  { %9978 = vmatprep.subr.bf16.mxu0 %v16994_v34 }
 0xee4   :  { %9959 = vmatpush3.bf16.xpose.msra.mxu1 %v17077_v32  ;;  %v2741_v32 = vrot.slane %v8416_v21, %v17032_v7  ;;  %v11905_v21 = vld [vmem:[%s16721_s3 + $0x50] sm:$0xff]  }
 0xee5   :  { %9960 = vmatprep.subr.bf16.mxu1 %v16994_v34 }
 0xee6   :  { %9979 = vmatpush3.bf16.xpose.msra.mxu0 %v17078_v43  ;;  %v2789_v43 = vrot.slane %v2785_v26, %v17032_v7  ;;  %v11902_v26 = vld [vmem:[%s16721_s3 + $0x8] sm:$0xff]  }
 0xee7   :  { %9980 = vmatprep.subr.bf16.mxu0 %v16994_v34 }
 0xeec   :  { %9961 = vmatpush3.bf16.xpose.msra.mxu1 %v17079_v35 }
 0xeed   :  { %9986 = vmatprep.subr.bf16.mxu1 %v16994_v34 }
 0xeee   :  { %9981 = vmatpush3.bf16.xpose.msra.mxu0 %v17080_v23 }
 0xeef   :  { %10006 = vmatprep.subr.bf16.mxu0 %v16994_v34 }
 0xef3   :  { %9963 = vmatmul.mubr.msk.bf16.vlgmr.msra.gmra.mrb[60].mxu1 %vm218_vm1, %v2741_v32  ;;  %v11906_v32 = vld [vmem:[%s16721_s3 + $0x18] sm:$0xff]  }
 0xef4   :  { %9987 = vmatpush3.bf16.msra.mxu1 %v11900_v6  ;;  %10002 = vmatprep.mubr.msk.bf16.mxu1 %vm12379_vm0, %v16994_v34  ;;  %v11907_v6 = vld [vmem:[%s16721_s3 + $0x58] sm:$0xff]  }
 0xef5   :  { %9988 = vmatprep.subr.bf16.mxu1 %v16994_v34  ;;  %9983 = vmatmul.mubr.msk.bf16.vlgmr.msra.gmra.mrb[64].mxu0 %vm218_vm1, %v2789_v43  ;;  %v11903_v43 = vld [vmem:[%s16721_s3 + $0x48] sm:$0xff]  }
 0xef6   :  { %10007 = vmatpush3.bf16.msra.mxu0 %v11901_v12  ;;  %10022 = vmatprep.mubr.msk.bf16.mxu0 %vm12379_vm0, %v16994_v34  ;;  %v11908_v12 = vld [vmem:[%s16721_s3 + $0x20] sm:$0xff]  }
 0xef7   :  { %10008 = vmatprep.subr.bf16.mxu0 %v16994_v34 }
 0xef8   :  { %9989 = vmatpush3.bf16.msra.mxu1 %v11902_v26 }
 0xef9   :  { %9990 = vmatprep.subr.bf16.mxu1 %v16994_v34 }
 0xefa   :  { %10009 = vmatpush3.bf16.msra.mxu0 %v11903_v43 }
 0xefb   :  { %10010 = vmatprep.subr.bf16.mxu0 %v16994_v34 }
 0xefc   :  { %9991 = vmatpush3.bf16.msra.mxu1 %v11904_v59  ;;  %v11909_v59 = vld [vmem:[%s16721_s3 + $0x60] sm:$0xff]  }
 0xefd   :  { %9992 = vmatprep.subr.bf16.mxu1 %v16994_v34 }
 0xefe   :  { %10011 = vmatpush3.bf16.msra.mxu0 %v11905_v21 }
 0xeff   :  { %10012 = vmatprep.subr.bf16.mxu0 %v16994_v34 }
 0xf00   :  { %9993 = vmatpush3.bf16.msra.mxu1 %v11906_v32  ;;  %v11910_v32 = vld [vmem:[%s16721_s3 + $0x28] sm:$0xff]  }
 0xf01   :  { %9994 = vmatprep.subr.bf16.mxu1 %v16994_v34 }
 0xf02   :  { %10013 = vmatpush3.bf16.msra.mxu0 %v11907_v6 }
 0xf03   :  { %10014 = vmatprep.subr.bf16.mxu0 %v16994_v34 }
 0xf04   :  { %9995 = vmatpush3.bf16.msra.mxu1 %v11908_v12 }
 0xf05   :  { %9996 = vmatprep.subr.bf16.mxu1 %v16994_v34 }
 0xf06   :  { %v2491_v26 = vpop.f32.mrb[48].mxu1  ;;  %10015 = vmatpush3.bf16.msra.mxu0 %v11909_v59 }
 0xf07   :  { %v9844_v43 = vpop.f32.mrb[49].mxu1  ;;  %10016 = vmatprep.subr.bf16.mxu0 %v16994_v34 }
 0xf08   :  { %v2494_v21 = vpop.f32.mrb[50].mxu1  ;;  %9997 = vmatpush3.bf16.msra.mxu1 %v11910_v32  ;;  %v2539_v6 = vpop.f32.mrb[52].mxu0  ;;  %v11911_v43 = vld [vmem:[%s16721_s3 + $0x68] sm:$0xff]   ;;  %v11915_v32 = vld [vmem:[%s16721_s3 + $0x78] sm:$0xff]  }
 0xf09   :  { %v9845_v12 = vpop.f32.mrb[51].mxu1  ;;  %9998 = vmatprep.subr.bf16.mxu1 %v16994_v34  ;;  %v9864_v23 = vpop.f32.mrb[53].mxu0  ;;  %v11912_v21 = vld [vmem:[%s16721_s3 + $0x30] sm:$0xff]  }
 0xf0a   :  { %v2542_v35 = vpop.f32.mrb[54].mxu0  ;;  %10017 = vmatpush3.bf16.msra.mxu0 %v11911_v43  ;;  %v11913_v23 = vld [vmem:[%s16721_s3 + $0x70] sm:$0xff]  }
 0xf0b   :  { %v9865_v59 = vpop.f32.mrb[55].mxu0  ;;  %10018 = vmatprep.subr.bf16.mxu0 %v16994_v34  ;;  %v11914_v35 = vld [vmem:[%s16721_s3 + $0x38] sm:$0xff]  }
 0xf0c   :  { %9999 = vmatpush3.bf16.msra.mxu1 %v11912_v21 }
 0xf0d   :  { %10000 = vmatprep.subr.bf16.mxu1 %v16994_v34 }
 0xf0e   :  { %10019 = vmatpush3.bf16.msra.mxu0 %v11913_v23 }
 0xf0f   :  { %10020 = vmatprep.subr.bf16.mxu0 %v16994_v34 }
 0xf10   :  { %10001 = vmatpush3.bf16.msra.mxu1 %v11914_v35 }
 0xf11   :  { %10026 = vmatprep.subr.bf16.mxu1 %v16994_v34 }
 0xf12   :  { %10021 = vmatpush3.bf16.msra.mxu0 %v11915_v32  ;;  %v2842_v32 = vadd.f32 %v2539_v6, %v17081_v11 }
 0xf13   :  { %10046 = vmatprep.subr.bf16.mxu0 %v16994_v34 }
 0xf14   :  { %v2857_v46 = vrot.slane %v2842_v32, 7 }
 0xf46   :  { %v2587_v12 = vpop.f32.mrb[52].mxu1 }
 0xf47   :  { %v9884_v43 = vpop.f32.mrb[53].mxu1  ;;  %v2843_v36 = vadd.f32 %v2587_v12, %v17082_v39 }
 0xf48   :  { %v2590_v59 = vpop.f32.mrb[54].mxu1  ;;  %v2635_v21 = vpop.f32.mrb[56].mxu0  ;;  %v17083_v43 = vld [vmem:[#allocation99_spill] sm:$0xff] }
 0xf49   :  { %v9885_v23 = vpop.f32.mrb[55].mxu1  ;;  %v9904_v28 = vpop.f32.mrb[57].mxu0  ;;  %v2844_v59 = vadd.f32 %v2635_v21, %v17083_v43  ;;  %v2859_v33 = vrot.slane %v2843_v36, 6 }
 0xf4a   :  { %v2638_v16 = vpop.f32.mrb[58].mxu0  ;;  %v17084_v23 = vld [vmem:[#allocation100_spill] sm:$0xff] }
 0xf4b   :  { %v9905_v2 = vpop.f32.mrb[59].mxu0 }
 0xf86   :  { %v2683_v35 = vpop.f32.mrb[56].mxu1 }
 0xf87   :  { %v9924_v22 = vpop.f32.mrb[57].mxu1  ;;  %v2845_v28 = vadd.f32 %v2683_v35, %v17084_v23  ;;  %v17086_v35 = vld [vmem:[#allocation102_spill] sm:$0xff] }
 0xf88   :  { %v2686_v55 = vpop.f32.mrb[58].mxu1  ;;  %v2731_v14 = vpop.f32.mrb[60].mxu0  ;;  %v11916_v22 = vld [vmem:[%s16729_s11] sm:$0xff] }
 0xf89   :  { %v9925_v5 = vpop.f32.mrb[59].mxu1  ;;  %v9944_v10 = vpop.f32.mrb[61].mxu0  ;;  %v2841_v55 = vadd.f32 %v11916_v22, %v2491_v26  ;;  %v2863_v16 = vrot.slane %v2845_v28, 4 }
 0xf8a   :  { %v2734_v52 = vpop.f32.mrb[62].mxu0  ;;  %v2861_v10 = vrot.slane %v2844_v59, 5 }
 0xf8b   :  { %v9945_v8 = vpop.f32.mrb[63].mxu0  ;;  %v2858_v5 = vsel %vm1556_vm2, %v2857_v46, %v2841_v55  ;;  %v17085_v52 = vld [vmem:[#allocation101_spill] sm:$0xff]  ;;  %v17087_v46 = vld [vmem:[#allocation103_spill] sm:$0xff] }
 0xf8c   :  { %v2846_v8 = vadd.f32 %v2731_v14, %v17085_v52  ;;  %v2860_v2 = vsel %vm1559_vm3, %v2859_v33, %v2858_v5 }
 0xf8d   :  { %v2862_v6 = vsel %vm1562_vm4, %v2861_v10, %v2860_v2 }
 0xf8e   :  { %v2865_v12 = vrot.slane %v2846_v8, 3  ;;  %v2864_v43 = vsel %vm1565_vm5, %v2863_v16, %v2862_v6 }
 0xf90   :  { %v2866_v14 = vsel %vm1568_vm6, %v2865_v12, %v2864_v43 }
 0xfc6   :  { %v2779_v21 = vpop.f32.mrb[60].mxu1 }
 0xfc7   :  { %v2847_v23 = vadd.f32 %v2779_v21, %v17086_v35  ;;  %v9964_v39 = vpop.f32.mrb[61].mxu1 }
 0xfc8   :  { %v2782_v11 = vpop.f32.mrb[62].mxu1  ;;  %v2827_v26 = vpop.f32.mrb[64].mxu0  ;;  %v8420_v39 = vld [vmem:[%s16718_s0 + $0x10] sm:$0xff] }
 0xfc9   :  { %v2867_v27 = vrot.slane %v2847_v23, 2  ;;  %v9965_v22 = vpop.f32.mrb[63].mxu1  ;;  %v2848_v29 = vadd.f32 %v2827_v26, %v17087_v46  ;;  %v9984_v0 = vpop.f32.mrb[65].mxu0  ;;  %v3412_v11 = vadd.f32 %v8420_v39, %v13631_v30 }
 0xfca   :  { %v2830_v33 = vpop.f32.mrb[66].mxu0 }
 0xfcb   :  { %v2868_v5 = vsel %vm1571_vm7, %v2867_v27, %v2866_v14  ;;  %v2869_v10 = vrot.slane %v2848_v29, 1  ;;  %v9985_v2 = vpop.f32.mrb[67].mxu0  ;;  %11724 = vtanh.f32 %v3412_v11 }
 0xfcd   :  { %v2870_v52 = vsel %vm1574_vm8, %v2869_v10, %v2868_v5 }
 0xfce   :  { %2872 = vmax.xlane.f32.xlu0 %v2870_v52 }
 0xfd5   :  { %v11725_v16 = vpop.eup %11724 }
 0xfe4   :  { %3422 = vrot.lane.b32.xlu0 %v11725_v16, %s12380_s26 }
0x105b   :  { %v2873_v0 = vpop.xlane.xlu0 %2872 }
0x105c   :  { %v2875_v43 = vrot.slane %v2873_v0, 1  ;;  %v2876_v6 = vrot.slane %v2873_v0, 2  ;;  %v2877_v12 = vrot.slane %v2873_v0, 3  ;;  %v2878_v27 = vrot.slane %v2873_v0, 4 }
0x105d   :  { %v2879_v21 = vrot.slane %v2873_v0, 5  ;;  %v2880_v26 = vrot.slane %v2873_v0, 6  ;;  %v2890_v22 = vsub.f32 %v2841_v55, %v2873_v0  ;;  %v2881_v14 = vrot.slane %v2873_v0, 7 }
0x105e   :  { %v2891_v52 = vsub.f32 %v2842_v32, %v2875_v43  ;;  %v2892_v33 = vsub.f32 %v2843_v36, %v2876_v6  ;;  %v2893_v5 = vsub.f32 %v2844_v59, %v2877_v12  ;;  %v2894_v10 = vsub.f32 %v2845_v28, %v2878_v27 }
0x105f   :  { %v2898_v2 = vmul.f32 1.442695, %v2890_v22  ;;  %v2895_v46 = vsub.f32 %v2846_v8, %v2879_v21  ;;  %v2896_v30 = vsub.f32 %v2847_v23, %v2880_v26  ;;  %v2897_v16 = vsub.f32 %v2848_v29, %v2881_v14 }
0x1060   :  { %v2900_v39 = vmul.f32 1.442695, %v2891_v52  ;;  %v2902_v35 = vmul.f32 1.442695, %v2892_v33  ;;  %v2904_v4 = vmul.f32 1.442695, %v2893_v5  ;;  %v3423_v5 = vpop.permute.xlu0 %3422 }
0x1061   :  { %11726 = vpow2.f32 %v2898_v2  ;;  %v2906_v24 = vmul.f32 1.442695, %v2894_v10  ;;  %v2908_v37 = vmul.f32 1.442695, %v2895_v46  ;;  %v2910_v57 = vmul.f32 1.442695, %v2896_v30 }
0x1062   :  { %11728 = vpow2.f32 %v2900_v39  ;;  %v2912_v55 = vmul.f32 1.442695, %v2897_v16  ;;  %v8421_v0 = vmul.f32 -1.442695, %v3412_v11 }
0x1063   :  { %11730 = vpow2.f32 %v2902_v35 }
0x1064   :  { %11732 = vpow2.f32 %v2904_v4 }
0x1065   :  { %11734 = vpow2.f32 %v2906_v24 }
0x1066   :  { %11736 = vpow2.f32 %v2908_v37 }
0x1067   :  { %11738 = vpow2.f32 %v2910_v57 }
0x1068   :  { %11740 = vpow2.f32 %v2912_v55 }
0x1069   :  { %11742 = vpow2.f32 %v8421_v0 }
0x106b   :  { %v11727_v36 = vpop.eup %11726 }
0x106c   :  { %v11729_v32 = vpop.eup %11728 }
0x106d   :  { %v11731_v59 = vpop.eup %11730  ;;  %v2922_v23 = vrot.slane %v11729_v32, 7 }
0x106e   :  { %v11733_v28 = vpop.eup %11732  ;;  %v2924_v29 = vrot.slane %v11731_v59, 6 }
0x106f   :  { %v11735_v8 = vpop.eup %11734  ;;  %v2923_v43 = vsel %vm1556_vm2, %v2922_v23, %v11727_v36  ;;  %v2926_v46 = vrot.slane %v11733_v28, 5 }
0x1070   :  { %v11737_v35 = vpop.eup %11736  ;;  %v2925_v4 = vsel %vm1559_vm3, %v2924_v29, %v2923_v43  ;;  %v2928_v6 = vrot.slane %v11735_v8, 4 }
0x1071   :  { %v11739_v11 = vpop.eup %11738  ;;  %v2927_v37 = vsel %vm1562_vm4, %v2926_v46, %v2925_v4  ;;  %v2930_v57 = vrot.slane %v11737_v35, 3 }
0x1072   :  { %v11741_v24 = vpop.eup %11740  ;;  %v2929_v12 = vsel %vm1565_vm5, %v2928_v6, %v2927_v37  ;;  %v2932_v27 = vrot.slane %v11739_v11, 2 }
0x1073   :  { %v11743_v21 = vpop.eup %11742  ;;  %v2931_v26 = vsel %vm1568_vm6, %v2930_v57, %v2929_v12  ;;  %v2934_v22 = vrot.slane %v11741_v24, 1 }
0x1074   :  { %v2933_v14 = vsel %vm1571_vm7, %v2932_v27, %v2931_v26  ;;  %v3416_v33 = vadd.f32 1.0, %v11743_v21 }
0x1075   :  { %v2935_v52 = vsel %vm1574_vm8, %v2934_v22, %v2933_v14 }
0x1076   :  { %2937 = vadd.xlane.f32.xlu1 %v2935_v52  ;;  %11744 = vrcp.f32 %v3416_v33 }
0x1080   :  { %v13929_v10 = vpop.eup %11744 }
0x1081   :  { %v3425_v2 = vmul.f32 %v13929_v10, %v3423_v5  ;;  %v3420_v39 = vmul.f32 %v13929_v10, %v13418_v41  ;;  %v11917_v5 = vld [vmem:[%s16721_s3 + $0x80] sm:$0xff]  }
0x1087   :  { %3427 = vrot.lane.b32.xlu1 %v3425_v2, %s12381_s29 }
0x1103   :  { %v2938_v30 = vpop.xlane.xlu1 %2937 }
0x1104   :  { %11746 = vrcp.f32 %v2938_v30 }
0x1107   :  { %v3428_v16 = vpop.permute.xlu1 %3427 }
0x1108   :  { %v13935_v55 = vadd.f32 %v3428_v16, %v3420_v39  ;;  %v11919_v39 = vld [vmem:[%s16721_s3 + $0x88] sm:$0xff]  }
0x110a   :  { %11748 = vtanh.f32 %v13935_v55 }
0x110e   :  { %v11747_v0 = vpop.eup %11746 }
0x110f   :  { %v2956_v23 = vmul.f32 %v11747_v0, %v11727_v36  ;;  %v2941_v29 = vrot.slane %v11747_v0, 1  ;;  %v2942_v43 = vrot.slane %v11747_v0, 2  ;;  %v2943_v46 = vrot.slane %v11747_v0, 3 }
0x1110   :  { %v2944_v4 = vrot.slane %v11747_v0, 4  ;;  %v2945_v6 = vrot.slane %v11747_v0, 5  ;;  %v2946_v37 = vrot.slane %v11747_v0, 6  ;;  %v2947_v57 = vrot.slane %v11747_v0, 7 }
0x1111   :  { %v2964_v12 = vpack.c.bf16 %v2956_v23, %v2956_v23  ;;  %v2957_v27 = vmul.f32 %v11729_v32, %v2941_v29  ;;  %v13938_v21 = vmul.f32 %v11731_v59, %v2942_v43  ;;  %v13940_v26 = vmul.f32 %v11733_v28, %v2943_v46  ;;  %v11920_v43 = vld [vmem:[%s16721_s3 + $0xc8] sm:$0xff]  }
0x1112   :  { %v13942_v41 = vmul.f32 %v11735_v8, %v2944_v4  ;;  %v13945_v52 = vmul.f32 %v11737_v35, %v2945_v6  ;;  %v13952_v32 = vmul.f32 %v11739_v11, %v2946_v37  ;;  %v13957_v8 = vmul.f32 %v11741_v24, %v2947_v57  ;;  %v11918_v35 = vld [vmem:[%s16721_s3 + $0xc0] sm:$0xff]   ;;  %v11921_v6 = vld [vmem:[%s16721_s3 + $0x90] sm:$0xff]   ;;  %v11923_v57 = vld [vmem:[%s16721_s3 + $0x98] sm:$0xff]  }
0x1113   :  { %10003 = vmatmul.mubr.bf16.vlgmr.msra.gmra.mrb[64].mxu1 %v2964_v12  ;;  %v2965_v22 = vpack.c.bf16 %v2957_v27, %v2957_v27  ;;  %v3393_v14 = vrot.slane %v2957_v27, 7  ;;  %v3395_v36 = vrot.slane %v13938_v21, 6  ;;  %v3397_v28 = vrot.slane %v13940_v26, 5  ;;  %v11922_v37 = vld [vmem:[%s16721_s3 + $0xd0] sm:$0xff]   ;;  %v11924_v12 = vld [vmem:[%s16721_s3 + $0xd8] sm:$0xff]   ;;  %v11925_v27 = vld [vmem:[%s16721_s3 + $0xa0] sm:$0xff]  }
0x1114   :  { %v11749_v33 = vpop.eup %11748  ;;  %10027 = vmatpush3.bf16.msra.mxu1 %v11917_v5  ;;  %10042 = vmatprep.mubr.msk.bf16.mxu1 %vm12379_vm0, %v16994_v34  ;;  %v3399_v11 = vrot.slane %v13942_v41, 4  ;;  %v3401_v24 = vrot.slane %v13945_v52, 3  ;;  %v3403_v0 = vrot.slane %v13952_v32, 2  ;;  %v3405_v29 = vrot.slane %v13957_v8, 1  ;;  %v11930_v5 = vld [vmem:[%s16721_s3 + $0xf0] sm:$0xff]  }
0x1115   :  { %10023 = vmatmul.mubr.bf16.vlgmr.msra.gmra.mrb[68].mxu0 %v2965_v22  ;;  %v3394_v59 = vsel %vm1556_vm2, %v3393_v14, %v2956_v23  ;;  %3433 = vrot.lane.b32.xlu0 %v11749_v33, %s12380_s26  ;;  %v11926_v22 = vld [vmem:[%s16721_s3 + $0xe0] sm:$0xff]   ;;  %v11927_v14 = vld [vmem:[%s16721_s3 + $0xa8] sm:$0xff]   ;;  %v11929_v33 = vld [vmem:[%s16721_s3 + $0xb0] sm:$0xff]  }
0x1116   :  { %10047 = vmatpush3.bf16.msra.mxu0 %v11918_v35  ;;  %10028 = vmatprep.subr.bf16.mxu1 %v16994_v34  ;;  %v3396_v2 = vsel %vm1559_vm3, %v3395_v36, %v3394_v59  ;;  %v11928_v36 = vld [vmem:[%s16721_s3 + $0xe8] sm:$0xff]   ;;  %v11931_v59 = vld [vmem:[%s16721_s3 + $0xb8] sm:$0xff]  }
0x1117   :  { %10048 = vmatprep.subr.bf16.mxu0 %v16994_v34  ;;  %10062 = vmatprep.mubr.msk.bf16.mxu0 %vm12379_vm0, %v16994_v34  ;;  %v3398_v30 = vsel %vm1562_vm4, %v3397_v28, %v3396_v2  ;;  %v2966_v28 = vpack.c.bf16 %v13938_v21, %v13938_v21  ;;  %v11932_v35 = vld [vmem:[%s16721_s3 + $0xf8] sm:$0xff]   ;;  %v2967_v2 = vpack.c.bf16 %v13940_v26, %v13940_v26  ;;  %v11934_v21 = vld [vmem:[%s16721_s3 + $0x140] sm:$0xff]   ;;  %v11935_v26 = vld [vmem:[%s16721_s3 + $0x108] sm:$0xff]  }
0x1118   :  { %10029 = vmatpush3.bf16.msra.mxu1 %v11919_v39  ;;  %v3400_v16 = vsel %vm1565_vm5, %v3399_v11, %v3398_v30  ;;  %v11933_v11 = vld [vmem:[%s16721_s3 + $0x100] sm:$0xff]   ;;  %v11936_v30 = vld [vmem:[%s16721_s3 + $0x148] sm:$0xff]   ;;  %v11938_v39 = vld [vmem:[%s16721_s3 + $0x150] sm:$0xff]  }
0x1119   :  { %10030 = vmatprep.subr.bf16.mxu1 %v16994_v34  ;;  %v3402_v23 = vsel %vm1568_vm6, %v3401_v24, %v3400_v16  ;;  %v11937_v24 = vld [vmem:[%s16721_s3 + $0x110] sm:$0xff]   ;;  %v11939_v16 = vld [vmem:[%s16721_s3 + $0x118] sm:$0xff]  }
0x111a   :  { %10049 = vmatpush3.bf16.msra.mxu0 %v11920_v43  ;;  %v3404_v46 = vsel %vm1571_vm7, %v3403_v0, %v3402_v23  ;;  %v11940_v0 = vld [vmem:[%s16721_s3 + $0x158] sm:$0xff]   ;;  %v11941_v23 = vld [vmem:[%s16721_s3 + $0x120] sm:$0xff]   ;;  %v11943_v43 = vld [vmem:[%s16721_s3 + $0x128] sm:$0xff]  }
0x111b   :  { %10050 = vmatprep.subr.bf16.mxu0 %v16994_v34  ;;  %v3406_v4 = vsel %vm1574_vm8, %v3405_v29, %v3404_v46  ;;  %v11942_v29 = vld [vmem:[%s16721_s3 + $0x160] sm:$0xff]   ;;  %v11944_v46 = vld [vmem:[%s16721_s3 + $0x168] sm:$0xff]  }
0x111c   :  { %10031 = vmatpush3.bf16.msra.mxu1 %v11921_v6  ;;  %3409 = vst [vmem:[#allocation4 + $0x8] sm:$0xff] %v3406_v4  ;;  %v11945_v4 = vld [vmem:[%s16721_s3 + $0x130] sm:$0xff]  }
0x111d   :  { %10032 = vmatprep.subr.bf16.mxu1 %v16994_v34  ;;  %v11946_v6 = vld [vmem:[%s16721_s3 + $0x170] sm:$0xff]  }
0x111e   :  { %10051 = vmatpush3.bf16.msra.mxu0 %v11922_v37  ;;  %v11947_v37 = vld [vmem:[%s16721_s3 + $0x138] sm:$0xff]  }
0x111f   :  { %10052 = vmatprep.subr.bf16.mxu0 %v16994_v34 }
0x1120   :  { %10033 = vmatpush3.bf16.msra.mxu1 %v11923_v57  ;;  %v2968_v57 = vpack.c.bf16 %v13942_v41, %v13942_v41  ;;  %v11950_v41 = vld [vmem:[%s16721_s3 + $0x1c0] sm:$0xff]  }
0x1121   :  { %10034 = vmatprep.subr.bf16.mxu1 %v16994_v34 }
0x1122   :  { %10053 = vmatpush3.bf16.msra.mxu0 %v11924_v12  ;;  %v11948_v12 = vld [vmem:[%s16721_s3 + $0x178] sm:$0xff]  }
0x1123   :  { %10054 = vmatprep.subr.bf16.mxu0 %v16994_v34 }
0x1124   :  { %10035 = vmatpush3.bf16.msra.mxu1 %v11925_v27  ;;  %v2969_v27 = vpack.c.bf16 %v13945_v52, %v13945_v52  ;;  %v11951_v52 = vld [vmem:[%s16721_s3 + $0x188] sm:$0xff]  }
0x1125   :  { %10036 = vmatprep.subr.bf16.mxu1 %v16994_v34 }
0x1126   :  { %10055 = vmatpush3.bf16.msra.mxu0 %v11926_v22  ;;  %v11949_v22 = vld [vmem:[%s16721_s3 + $0x180] sm:$0xff]  }
0x1127   :  { %10056 = vmatprep.subr.bf16.mxu0 %v16994_v34 }
0x1128   :  { %10037 = vmatpush3.bf16.msra.mxu1 %v11927_v14  ;;  %v11952_v14 = vld [vmem:[%s16721_s3 + $0x1c8] sm:$0xff]  }
0x1129   :  { %10038 = vmatprep.subr.bf16.mxu1 %v16994_v34 }
0x112a   :  { %10057 = vmatpush3.bf16.msra.mxu0 %v11928_v36  ;;  %v11953_v36 = vld [vmem:[%s16721_s3 + $0x190] sm:$0xff]  }
0x112b   :  { %10058 = vmatprep.subr.bf16.mxu0 %v16994_v34 }
0x112c   :  { %10039 = vmatpush3.bf16.msra.mxu1 %v11929_v33  ;;  %v11954_v33 = vld [vmem:[%s16721_s3 + $0x1d0] sm:$0xff]  }
0x112d   :  { %10040 = vmatprep.subr.bf16.mxu1 %v16994_v34 }
0x112e   :  { %10059 = vmatpush3.bf16.msra.mxu0 %v11930_v5  ;;  %v11955_v5 = vld [vmem:[%s16721_s3 + $0x198] sm:$0xff]  }
0x112f   :  { %10060 = vmatprep.subr.bf16.mxu0 %v16994_v34 }
0x1130   :  { %10041 = vmatpush3.bf16.msra.mxu1 %v11931_v59  ;;  %v11956_v59 = vld [vmem:[%s16721_s3 + $0x1d8] sm:$0xff]  }
0x1131   :  { %10066 = vmatprep.subr.bf16.mxu1 %v16994_v34 }
0x1132   :  { %10061 = vmatpush3.bf16.msra.mxu0 %v11932_v35  ;;  %v11958_v35 = vld [vmem:[%s16721_s3 + $0x1e0] sm:$0xff]  }
0x1133   :  { %10043 = vmatmul.mubr.bf16.vlgmr.msra.gmra.mrb[68].mxu1 %v2966_v28  ;;  %10086 = vmatprep.subr.bf16.mxu0 %v16994_v34  ;;  %v11957_v28 = vld [vmem:[%s16721_s3 + $0x1a0] sm:$0xff]  }
0x1134   :  { %10067 = vmatpush3.bf16.msra.mxu1 %v11933_v11  ;;  %10082 = vmatprep.mubr.msk.bf16.mxu1 %vm12379_vm0, %v16994_v34  ;;  %v11960_v11 = vld [vmem:[%s16721_s3 + $0x1e8] sm:$0xff]  }
0x1135   :  { %10063 = vmatmul.mubr.bf16.vlgmr.msra.gmra.mrb[72].mxu0 %v2967_v2  ;;  %10068 = vmatprep.subr.bf16.mxu1 %v16994_v34  ;;  %v11959_v2 = vld [vmem:[%s16721_s3 + $0x1a8] sm:$0xff]  }
0x1136   :  { %10087 = vmatpush3.bf16.msra.mxu0 %v11934_v21  ;;  %10102 = vmatprep.mubr.msk.bf16.mxu0 %vm12379_vm0, %v16994_v34  ;;  %v11961_v21 = vld [vmem:[%s16721_s3 + $0x1b0] sm:$0xff]  }
0x1137   :  { %10088 = vmatprep.subr.bf16.mxu0 %v16994_v34 }
0x1138   :  { %10069 = vmatpush3.bf16.msra.mxu1 %v11935_v26  ;;  %v11962_v26 = vld [vmem:[%s16721_s3 + $0x1f0] sm:$0xff]  }
0x1139   :  { %10070 = vmatprep.subr.bf16.mxu1 %v16994_v34 }
0x113a   :  { %10089 = vmatpush3.bf16.msra.mxu0 %v11936_v30  ;;  %v11963_v30 = vld [vmem:[%s16721_s3 + $0x1b8] sm:$0xff]  }
0x113b   :  { %10090 = vmatprep.subr.bf16.mxu0 %v16994_v34 }
0x113c   :  { %10071 = vmatpush3.bf16.msra.mxu1 %v11937_v24  ;;  %v2970_v24 = vpack.c.bf16 %v13952_v32, %v13952_v32  ;;  %v11966_v32 = vld [vmem:[%s16722_s4] sm:$0xff]  }
0x113d   :  { %10072 = vmatprep.subr.bf16.mxu1 %v16994_v34 }
0x113e   :  { %10091 = vmatpush3.bf16.msra.mxu0 %v11938_v39  ;;  %v11964_v39 = vld [vmem:[%s16721_s3 + $0x1f8] sm:$0xff]  }
0x113f   :  { %10092 = vmatprep.subr.bf16.mxu0 %v16994_v34 }
0x1140   :  { %10073 = vmatpush3.bf16.msra.mxu1 %v11939_v16  ;;  %v2971_v16 = vpack.c.bf16 %v13957_v8, %v13957_v8  ;;  %v11967_v8 = vld [vmem:[%s16728_s10 + $0x8] sm:$0xff]  }
0x1141   :  { %10074 = vmatprep.subr.bf16.mxu1 %v16994_v34 }
0x1142   :  { %10093 = vmatpush3.bf16.msra.mxu0 %v11940_v0  ;;  %v11965_v0 = vld [vmem:[%s16728_s10] sm:$0xff]  }
0x1143   :  { %10094 = vmatprep.subr.bf16.mxu0 %v16994_v34 }
0x1144   :  { %10075 = vmatpush3.bf16.msra.mxu1 %v11941_v23  ;;  %v11968_v23 = vld [vmem:[%s16722_s4 + $0x8] sm:$0xff]  }
0x1145   :  { %10076 = vmatprep.subr.bf16.mxu1 %v16994_v34 }
0x1146   :  { %10095 = vmatpush3.bf16.msra.mxu0 %v11942_v29 }
0x1147   :  { %10096 = vmatprep.subr.bf16.mxu0 %v16994_v34 }
0x1148   :  { %10077 = vmatpush3.bf16.msra.mxu1 %v11943_v43 }
0x1149   :  { %10078 = vmatprep.subr.bf16.mxu1 %v16994_v34 }
0x114a   :  { %10097 = vmatpush3.bf16.msra.mxu0 %v11944_v46 }
0x114b   :  { %10098 = vmatprep.subr.bf16.mxu0 %v16994_v34 }
0x114c   :  { %10079 = vmatpush3.bf16.msra.mxu1 %v11945_v4 }
0x114d   :  { %10080 = vmatprep.subr.bf16.mxu1 %v16994_v34 }
0x114e   :  { %10099 = vmatpush3.bf16.msra.mxu0 %v11946_v6 }
0x114f   :  { %10100 = vmatprep.subr.bf16.mxu0 %v16994_v34 }
0x1150   :  { %10081 = vmatpush3.bf16.msra.mxu1 %v11947_v37 }
0x1151   :  { %10106 = vmatprep.subr.bf16.mxu1 %v16994_v34 }
0x1152   :  { %10101 = vmatpush3.bf16.msra.mxu0 %v11948_v12 }
0x1153   :  { %10083 = vmatmul.mubr.bf16.vlgmr.msra.gmra.mrb[72].mxu1 %v2968_v57  ;;  %10126 = vmatprep.subr.bf16.mxu0 %v16994_v34 }
0x1154   :  { %10107 = vmatpush3.bf16.msra.mxu1 %v11949_v22  ;;  %10122 = vmatprep.mubr.msk.bf16.mxu1 %vm12379_vm0, %v16994_v34 }
0x1155   :  { %10103 = vmatmul.mubr.bf16.vlgmr.msra.gmra.mrb[76].mxu0 %v2969_v27  ;;  %10108 = vmatprep.subr.bf16.mxu1 %v16994_v34 }
0x1156   :  { %10127 = vmatpush3.bf16.msra.mxu0 %v11950_v41  ;;  %10142 = vmatprep.mubr.msk.bf16.mxu0 %vm12379_vm0, %v16994_v34 }
0x1157   :  { %10128 = vmatprep.subr.bf16.mxu0 %v16994_v34 }
0x1158   :  { %10109 = vmatpush3.bf16.msra.mxu1 %v11951_v52 }
0x1159   :  { %10110 = vmatprep.subr.bf16.mxu1 %v16994_v34 }
0x115a   :  { %10129 = vmatpush3.bf16.msra.mxu0 %v11952_v14 }
0x115b   :  { %10130 = vmatprep.subr.bf16.mxu0 %v16994_v34 }
0x115c   :  { %10111 = vmatpush3.bf16.msra.mxu1 %v11953_v36 }
0x115d   :  { %10112 = vmatprep.subr.bf16.mxu1 %v16994_v34 }
0x115e   :  { %10131 = vmatpush3.bf16.msra.mxu0 %v11954_v33 }
0x115f   :  { %10132 = vmatprep.subr.bf16.mxu0 %v16994_v34 }
0x1160   :  { %10113 = vmatpush3.bf16.msra.mxu1 %v11955_v5 }
0x1161   :  { %10114 = vmatprep.subr.bf16.mxu1 %v16994_v34 }
0x1162   :  { %10133 = vmatpush3.bf16.msra.mxu0 %v11956_v59 }
0x1163   :  { %10134 = vmatprep.subr.bf16.mxu0 %v16994_v34 }
0x1164   :  { %10115 = vmatpush3.bf16.msra.mxu1 %v11957_v28 }
0x1165   :  { %10116 = vmatprep.subr.bf16.mxu1 %v16994_v34 }
0x1166   :  { %10135 = vmatpush3.bf16.msra.mxu0 %v11958_v35  ;;  %v11970_v35 = vld [vmem:[%s16724_s6 + $0x8] sm:$0xff]  }
0x1167   :  { %10136 = vmatprep.subr.bf16.mxu0 %v16994_v34 }
0x1168   :  { %10117 = vmatpush3.bf16.msra.mxu1 %v11959_v2 }
0x1169   :  { %10118 = vmatprep.subr.bf16.mxu1 %v16994_v34 }
0x116a   :  { %10137 = vmatpush3.bf16.msra.mxu0 %v11960_v11 }
0x116b   :  { %10138 = vmatprep.subr.bf16.mxu0 %v16994_v34 }
0x116c   :  { %10119 = vmatpush3.bf16.msra.mxu1 %v11961_v21 }
0x116d   :  { %10120 = vmatprep.subr.bf16.mxu1 %v16994_v34 }
0x116e   :  { %10139 = vmatpush3.bf16.msra.mxu0 %v11962_v26 }
0x116f   :  { %10140 = vmatprep.subr.bf16.mxu0 %v16994_v34 }
0x1170   :  { %10121 = vmatpush3.bf16.msra.mxu1 %v11963_v30 }
0x1171   :  { %10146 = vmatprep.subr.bf16.mxu1 %v16994_v34 }
0x1172   :  { %10141 = vmatpush3.bf16.msra.mxu0 %v11964_v39 }
0x1173   :  { %10123 = vmatmul.mubr.bf16.vlgmr.msra.gmra.mrb[76].mxu1 %v2970_v24  ;;  %10162 = vmatprep.subr.bf16.mxu0 %v16994_v34 }
0x1174   :  { %10147 = vmatpush3.bf16.msra.mxu1 %v11965_v0  ;;  %10150 = vmatprep.mubr.msk.bf16.mxu1 %vm12379_vm0, %v16994_v34 }
0x1175   :  { %10143 = vmatmul.mubr.bf16.vlgmr.msra.gmra.mrb[80].mxu0 %v2971_v16  ;;  %10148 = vmatprep.subr.bf16.mxu1 %v16994_v34 }
0x1176   :  { %10163 = vmatpush3.bf16.msra.mxu0 %v11966_v32  ;;  %10166 = vmatprep.mubr.msk.bf16.mxu0 %vm12379_vm0, %v16994_v34 }
0x1177   :  { %10164 = vmatprep.subr.bf16.mxu0 %v16994_v34 }
0x1178   :  { %10149 = vmatpush3.bf16.msra.mxu1 %v11967_v8 }
0x1179   :  { %10154 = vmatprep.subr.bf16.mxu1 %v16994_v34 }
0x117a   :  { %10165 = vmatpush3.bf16.msra.mxu0 %v11968_v23 }
0x117b   :  { %10170 = vmatprep.subr.bf16.mxu0 %v16994_v34 }
0x1187   :  { %v3434_v29 = vpop.permute.xlu0 %3433 }
0x1188   :  { %v3436_v43 = vmul.f32 %v13929_v10, %v3434_v29  ;;  %v11969_v10 = vld [vmem:[%s16724_s6] sm:$0xff]  }
0x118a   :  { %v3437_v46 = vpack.c.bf16 %v3436_v43, %v3436_v43 }
0x118c   :  { %3439 = vrot.lane.b32.xlu1 %v3437_v46, %s12381_s29 }
0x11e6   :  { %v3006_v4 = vpop.f32.mrb[64].mxu1 }
0x11e7   :  { %v10004_v6 = vpop.f32.mrb[65].mxu1  ;;  %v3300_v12 = vpack.c.bf16 %v3006_v4, %v3006_v4 }
0x11e8   :  { %v3009_v37 = vpop.f32.mrb[66].mxu1  ;;  %v3046_v57 = vpop.f32.mrb[68].mxu0 }
0x11e9   :  { %v3301_v27 = vpack.c.bf16 %v3046_v57, %v3046_v57  ;;  %v10005_v22 = vpop.f32.mrb[67].mxu1  ;;  %v10024_v41 = vpop.f32.mrb[69].mxu0  ;;  %v3316_v33 = vunpack.c.l.b16 %v3300_v12 }
0x11ea   :  { %v3049_v52 = vpop.f32.mrb[70].mxu0 }
0x11eb   :  { %v3317_v14 = vunpack.c.l.b16 %v3301_v27  ;;  %v10025_v36 = vpop.f32.mrb[71].mxu0 }
0x11ed   :  { %v3324_v5 = vrot.slane %v3317_v14, 7 }
0x11ef   :  { %v3325_v59 = vsel %vm1556_vm2, %v3324_v5, %v3316_v33 }
0x11fe   :  { %v14203_v28 = vpop.permute.xlu1 %3439 }
0x11ff   :  { %10167 = vmatmul.mubr.msk.bf16.vlgmr.msra.gmra.mrb[84].mxu0 %vm218_vm1, %v14203_v28 }
0x1200   :  { %10171 = vmatpush3.bf16.msra.mxu0 %v11969_v10  ;;  %10174 = vmatprep.mubr.msk.bf16.mxu0 %vm12379_vm0, %v16994_v34 }
0x1201   :  { %10172 = vmatprep.subr.bf16.mxu0 %v16994_v34 }
0x1204   :  { %10173 = vmatpush3.bf16.msra.mxu0 %v11970_v35 }
0x1205   :  { %10178 = vmatprep.subr.bf16.mxu0 %v16994_v34 }
0x1206   :  { %v3086_v2 = vpop.f32.mrb[68].mxu1 }
0x1207   :  { %v3302_v11 = vpack.c.bf16 %v3086_v2, %v3086_v2  ;;  %v10044_v21 = vpop.f32.mrb[69].mxu1 }
0x1208   :  { %v3089_v26 = vpop.f32.mrb[70].mxu1  ;;  %v3126_v30 = vpop.f32.mrb[72].mxu0 }
0x1209   :  { %v3318_v24 = vunpack.c.l.b16 %v3302_v11  ;;  %v3303_v39 = vpack.c.bf16 %v3126_v30, %v3126_v30  ;;  %v10045_v16 = vpop.f32.mrb[71].mxu1  ;;  %v10064_v0 = vpop.f32.mrb[73].mxu0 }
0x120a   :  { %v3129_v32 = vpop.f32.mrb[74].mxu0 }
0x120b   :  { %v3326_v8 = vrot.slane %v3318_v24, 6  ;;  %v3319_v23 = vunpack.c.l.b16 %v3303_v39  ;;  %v10065_v29 = vpop.f32.mrb[75].mxu0 }
0x120d   :  { %v3327_v43 = vsel %vm1559_vm3, %v3326_v8, %v3325_v59  ;;  %v3328_v46 = vrot.slane %v3319_v23, 5 }
0x120f   :  { %v3329_v4 = vsel %vm1562_vm4, %v3328_v46, %v3327_v43 }
0x1226   :  { %v3166_v6 = vpop.f32.mrb[72].mxu1 }
0x1227   :  { %v3304_v37 = vpack.c.bf16 %v3166_v6, %v3166_v6  ;;  %v10084_v57 = vpop.f32.mrb[73].mxu1 }
0x1228   :  { %v3169_v12 = vpop.f32.mrb[74].mxu1  ;;  %v3206_v27 = vpop.f32.mrb[76].mxu0  ;;  %v11971_v57 = vld [vmem:[%s16723_s5] sm:$0xff]  }
0x1229   :  { %v3320_v22 = vunpack.c.l.b16 %v3304_v37  ;;  %v3305_v41 = vpack.c.bf16 %v3206_v27, %v3206_v27  ;;  %v10085_v52 = vpop.f32.mrb[75].mxu1  ;;  %v10104_v14 = vpop.f32.mrb[77].mxu0  ;;  %v11972_v12 = vld [vmem:[%s16723_s5 + $0x8] sm:$0xff]  }
0x122a   :  { %v3209_v36 = vpop.f32.mrb[78].mxu0  ;;  %v11973_v27 = vld [vmem:[%s16726_s8 + $0x4] ss:$8 sps:$4 sm:$0xff]   ;;  %v11976_v52 = vld [vmem:[%s16726_s8 + $0x10] ss:$8 sps:$4 sm:$0xff]  }
0x122b   :  { %v3330_v33 = vrot.slane %v3320_v22, 4  ;;  %v3321_v5 = vunpack.c.l.b16 %v3305_v41  ;;  %v10105_v10 = vpop.f32.mrb[79].mxu0  ;;  %v11974_v22 = vld [vmem:[%s16726_s8] ss:$8 sps:$4 sm:$0xff]   ;;  %v11975_v41 = vld [vmem:[%s16726_s8 + $0x14] ss:$8 sps:$4 sm:$0xff]  }
0x122d   :  { %v3331_v35 = vsel %vm1565_vm5, %v3330_v33, %v3329_v4  ;;  %v3332_v2 = vrot.slane %v3321_v5, 3  ;;  %v11977_v5 = vld [vmem:[%s16727_s9] sm:$0xff] }
0x122e   :  { %v2409_v10 = vadd.f32 %v11977_v5, %v13686_v25 }
0x122f   :  { %v3333_v59 = vsel %vm1568_vm6, %v3332_v2, %v3331_v35 }
0x1246   :  { %v3246_v11 = vpop.f32.mrb[76].mxu1 }
0x1247   :  { %v3306_v21 = vpack.c.bf16 %v3246_v11, %v3246_v11  ;;  %v10124_v26 = vpop.f32.mrb[77].mxu1 }
0x1248   :  { %v3249_v30 = vpop.f32.mrb[78].mxu1  ;;  %v3286_v24 = vpop.f32.mrb[80].mxu0 }
0x1249   :  { %v3322_v39 = vunpack.c.l.b16 %v3306_v21  ;;  %v3307_v16 = vpack.c.bf16 %v3286_v24, %v3286_v24  ;;  %v10125_v0 = vpop.f32.mrb[79].mxu1  ;;  %v10144_v32 = vpop.f32.mrb[81].mxu0  ;;  %v11978_v30 = vld [vmem:[%s16725_s7] sm:$0xff] }
0x124a   :  { %v3289_v8 = vpop.f32.mrb[82].mxu0 }
0x124b   :  { %v3334_v23 = vrot.slane %v3322_v39, 2  ;;  %v3323_v29 = vunpack.c.l.b16 %v3307_v16  ;;  %v10145_v43 = vpop.f32.mrb[83].mxu0 }
0x124d   :  { %v3335_v46 = vsel %vm1571_vm7, %v3334_v23, %v3333_v59  ;;  %v3336_v6 = vrot.slane %v3323_v29, 1 }
0x124f   :  { %v3337_v4 = vsel %vm1574_vm8, %v3336_v6, %v3335_v46 }
0x1250   :  { %v3338_v37 = vpack.c.b16 %v3337_v4, %v3337_v4 }
0x1252   :  { %10151 = vmatmul.mubr.msk.bf16.vlgmr.msra.gmra.mrb[80].mxu1 %vm218_vm1, %v3338_v37 }
0x1253   :  { %10155 = vmatpush3.bf16.msra.mxu1 %v11971_v57  ;;  %10158 = vmatprep.mubr.msk.bf16.mxu1 %vm12379_vm0, %v16994_v34 }
0x1254   :  { %10156 = vmatprep.subr.bf16.mxu1 %v16994_v34 }
0x1257   :  { %10157 = vmatpush3.bf16.msra.mxu1 %v11972_v12 }
0x1258   :  { %3595 = vmatprep.subr.bf16.mxu1 %v11973_v27 }
0x125a   :  { %10159 = vmatmul.mubr.msk.bf16.vlgmr.msra.gmra.mrb[44].mxu1 %vm218_vm1, %v14203_v28 }
0x125b   :  { %3596 = vmatpush1.bf16.msra.mxu1 %v11974_v22  ;;  %3627 = vmatprep.mubr.bf16.mxu1 %v17012_v19 }
0x125c   :  { %3597 = vmatprep.subr.bf16.mxu1 %v11975_v41 }
0x125f   :  { %3598 = vmatpush1.bf16.msra.mxu1 %v11976_v52 }
0x1260   :  { %10198 = vmatprep.subr.bf16.mxu1 %v16994_v34 }
0x12d2   :  { %v14249_v28 = vpop.f32.mrb[84].mxu0 }
0x12d3   :  { %v10168_v14 = vpop.f32.mrb[85].mxu0 }
0x12d4   :  { %v3546_v36 = vpop.f32.mrb[86].mxu0 }
0x12d5   :  { %v10169_v33 = vpop.f32.mrb[87].mxu0  ;;  %v11979_v36 = vld [vmem:[%s16727_s9 + $0x8] sm:$0xff] }
0x1325   :  { %v3376_v35 = vpop.f32.mrb[80].mxu1 }
0x1326   :  { %v3377_v2 = vadd.f32 %v3376_v35, %v2409_v10  ;;  %v10152_v59 = vpop.f32.mrb[81].mxu1 }
0x1327   :  { %v3379_v11 = vpop.f32.mrb[82].mxu1 }
0x1328   :  { %11750 = vtanh.f32 %v3377_v2  ;;  %v10153_v21 = vpop.f32.mrb[83].mxu1 }
0x132d   :  { %v3478_v26 = vpop.f32.mrb[44].mxu1 }
0x132e   :  { %v11548_v24 = vadd.f32 %v11978_v30, %v3478_v26  ;;  %v10160_v39 = vpop.f32.mrb[45].mxu1 }
0x132f   :  { %v3481_v16 = vpop.f32.mrb[46].mxu1  ;;  %v17088_v39 = vld [vmem:[#allocation41_spill] sm:$0xff] }
0x1330   :  { %11752 = vtanh.f32 %v11548_v24  ;;  %v10161_v0 = vpop.f32.mrb[47].mxu1  ;;  %v8423_v25 = vmul.f32 -1.442695, %v11548_v24  ;;  %v17089_v16 = vld [vmem:[#allocation42_spill] sm:$0xff] }
0x1331   :  { %v17090_v0 = vld [vmem:[#allocation43_spill] sm:$0xff] }
0x1332   :  { %v11751_v32 = vpop.eup %11750  ;;  %11754 = vpow2.f32 %v8423_v25  ;;  %v17092_v25 = vld [vmem:[#allocation45_spill] sm:$0xff] }
0x1333   :  { %3384 = vst [vmem:[#allocation2 + $0x8] sm:$0xff] %v11751_v32 }
0x133a   :  { %v11753_v8 = vpop.eup %11752 }
0x133b   :  { %3493 = vrot.lane.b32.xlu0 %v11753_v8, %s12380_s26  ;;  %v17091_v8 = vld [vmem:[#allocation44_spill] sm:$0xff] }
0x133c   :  { %v11755_v23 = vpop.eup %11754 }
0x133d   :  { %v3487_v29 = vadd.f32 1.0, %v11755_v23 }
0x133f   :  { %11756 = vrcp.f32 %v3487_v29 }
0x1349   :  { %v11757_v43 = vpop.eup %11756 }
0x134a   :  { %v3491_v4 = vmul.f32 %v11757_v43, %v13643_v31 }
0x13ad   :  { %v3494_v46 = vpop.permute.xlu0 %3493 }
0x13ae   :  { %v3496_v6 = vmul.f32 %v11757_v43, %v3494_v46 }
0x13b0   :  { %3498 = vrot.lane.b32.xlu1 %v3496_v6, %s12381_s29  ;;  %v17094_v6 = vld [vmem:[#allocation47_spill] sm:$0xff] }
0x1422   :  { %v3499_v37 = vpop.permute.xlu1 %3498 }
0x1423   :  { %v14261_v57 = vadd.f32 %v3499_v37, %v3491_v4 }
0x1425   :  { %11758 = vtanh.f32 %v14261_v57 }
0x142f   :  { %v11759_v12 = vpop.eup %11758 }
0x1430   :  { %3504 = vrot.lane.b32.xlu0 %v11759_v12, %s12380_s26  ;;  %v17095_v12 = vld [vmem:[#allocation48_spill] sm:$0xff] }
0x14a2   :  { %v3505_v27 = vpop.permute.xlu0 %3504 }
0x14a3   :  { %v3507_v22 = vmul.f32 %v11757_v43, %v3505_v27  ;;  %v17093_v43 = vld [vmem:[#allocation46_spill] sm:$0xff] }
0x14a5   :  { %v3508_v41 = vpack.c.bf16 %v3507_v22, %v3507_v22  ;;  %v17096_v22 = vld [vmem:[#allocation49_spill] sm:$0xff] }
0x14a7   :  { %3550 = vrot.lane.b32.xlu1 %v3508_v41, %s12381_s29  ;;  %v17097_v41 = vld [vmem:[#allocation50_spill] sm:$0xff] }
0x1519   :  { %v3551_v52 = vpop.permute.xlu1 %3550 }
0x151a   :  { %10175 = vmatmul.mubr.msk.bf16.vlgmr.msra.gmra.mrb[88].mxu0 %vm218_vm1, %v3551_v52  ;;  %8426 = vmatmul.mubr.msk.bf16.vlgmr.msra.gmra.mrb[84].mxu1 %vm218_vm1, %v3551_v52  ;;  %v17098_v52 = vld [vmem:[#allocation51_spill] sm:$0xff] }
0x151b   :  { %10179 = vmatpush3.bf16.xpose.msra.mxu0 %v17015_v40  ;;  %10199 = vmatpush3.bf16.xpose.msra.mxu1 %v17016_v44 }
0x151c   :  { %10180 = vmatprep.subr.bf16.mxu0 %v16994_v34  ;;  %10200 = vmatprep.subr.bf16.mxu1 %v16994_v34 }
0x151d   :  { %10194 = vmatprep.mubr.msk.bf16.mxu0 %vm12379_vm0, %v16994_v34  ;;  %10214 = vmatprep.mubr.msk.bf16.mxu1 %vm12379_vm0, %v16994_v34 }
0x1523   :  { %10181 = vmatpush3.bf16.xpose.msra.mxu0 %v17017_v45  ;;  %10201 = vmatpush3.bf16.xpose.msra.mxu1 %v17018_v48 }
0x1524   :  { %10182 = vmatprep.subr.bf16.mxu0 %v16994_v34  ;;  %10202 = vmatprep.subr.bf16.mxu1 %v16994_v34 }
0x152b   :  { %10183 = vmatpush3.bf16.xpose.msra.mxu0 %v17019_v49  ;;  %10203 = vmatpush3.bf16.xpose.msra.mxu1 %v17020_v54 }
0x152c   :  { %10184 = vmatprep.subr.bf16.mxu0 %v16994_v34  ;;  %10204 = vmatprep.subr.bf16.mxu1 %v16994_v34 }
0x1533   :  { %10185 = vmatpush3.bf16.xpose.msra.mxu0 %v17021_v56  ;;  %10205 = vmatpush3.bf16.xpose.msra.mxu1 %v17022_v58 }
0x1534   :  { %10186 = vmatprep.subr.bf16.mxu0 %v16994_v34  ;;  %10206 = vmatprep.subr.bf16.mxu1 %v16994_v34 }
0x153b   :  { %10187 = vmatpush3.bf16.xpose.msra.mxu0 %v17023_v61  ;;  %10207 = vmatpush3.bf16.xpose.msra.mxu1 %v17024_v62 }
0x153c   :  { %10188 = vmatprep.subr.bf16.mxu0 %v16994_v34  ;;  %10208 = vmatprep.subr.bf16.mxu1 %v16994_v34 }
0x1543   :  { %10189 = vmatpush3.bf16.xpose.msra.mxu0 %v17025_v50  ;;  %10209 = vmatpush3.bf16.xpose.msra.mxu1 %v17026_v38 }
0x1544   :  { %10190 = vmatprep.subr.bf16.mxu0 %v16994_v34  ;;  %10210 = vmatprep.subr.bf16.mxu1 %v16994_v34 }
0x154b   :  { %10191 = vmatpush3.bf16.xpose.msra.mxu0 %v17027_v47  ;;  %10211 = vmatpush3.bf16.xpose.msra.mxu1 %v17028_v60 }
0x154c   :  { %10192 = vmatprep.subr.bf16.mxu0 %v16994_v34  ;;  %10212 = vmatprep.subr.bf16.mxu1 %v16994_v34 }
0x1553   :  { %10193 = vmatpush3.bf16.xpose.msra.mxu0 %v17029_v42  ;;  %10213 = vmatpush3.bf16.xpose.msra.mxu1 %v17030_v18 }
0x1554   :  { %10218 = vmatprep.subr.bf16.mxu0 %v16994_v34  ;;  %10238 = vmatprep.subr.bf16.mxu1 %v16994_v34 }
0x15ed   :  { %v14304_v31 = vpop.f32.mrb[84].mxu1 }
0x15ee   :  { %v3631_v14 = vpop.f32.mrb[85].mxu1 }
0x15ef   :  { %v3632_v33 = vadd.f32 %v11979_v36, %v3631_v14  ;;  %v3633_v5 = vpop.f32.mrb[86].mxu1  ;;  %v17099_v14 = vld [vmem:[#allocation52_spill] sm:$0xff]  ;;  %v17100_v36 = vld [vmem:[#allocation53_spill] sm:$0xff] }
0x15f0   :  { %v3634_v10 = vpop.f32.mrb[87].mxu1  ;;  %v17102_v5 = vld [vmem:[#allocation55_spill] sm:$0xff] }
0x15f1   :  { %v3636_v35 = vpack.c.bf16 %v3632_v33, %v3632_v33  ;;  %v17101_v33 = vld [vmem:[#allocation54_spill] sm:$0xff]  ;;  %v17103_v10 = vld [vmem:[#allocation56_spill] sm:$0xff] }
0x15f3   :  { %v3644_v2 = vrot.slane %v3636_v35, %v17031_v63  ;;  %v17104_v35 = vld [vmem:[#allocation57_spill] sm:$0xff] }
0x15f5   :  { %v14311_v59 = vrot.slane %v3644_v2, %v17031_v63  ;;  %v3645_v32 = vcombine.high %v3644_v2, %v3644_v2  ;;  %v17105_v2 = vld [vmem:[#allocation58_spill] sm:$0xff] }
0x15f7   :  { %v3663_v11 = vunpack.i.h.s16 %v14311_v59  ;;  %v8427_v21 = vpack.i.b16 %v14311_v59, %v14311_v59  ;;  %v14352_v23 = vrot.slane %v3645_v32, %v17031_v63  ;;  %v17109_v32 = vld [vmem:[#allocation63_spill] sm:$0xff] }
0x15f9   :  { %v3674_v26 = vrot.slane %v8427_v21, %v17032_v7  ;;  %v3718_v30 = vpack.i.b16 %v3663_v11, %v3663_v11  ;;  %v3665_v29 = vunpack.i.h.s16 %v14352_v23  ;;  %v8430_v46 = vpack.i.b16 %v14352_v23, %v14352_v23  ;;  %v17106_v11 = vld [vmem:[#allocation59_spill] sm:$0xff]  ;;  %v17107_v21 = vld [vmem:[#allocation60_spill] sm:$0xff] }
0x15fb   :  { %10195 = vmatmul.mubr.msk.bf16.vlgmr.msra.gmra.mrb[92].mxu0 %vm218_vm1, %v3674_v26  ;;  %v3722_v24 = vrot.slane %v3718_v30, %v17032_v7  ;;  %v3814_v4 = vpack.i.b16 %v3665_v29, %v3665_v29  ;;  %v3770_v37 = vrot.slane %v8430_v46, %v17032_v7  ;;  %v17108_v26 = vld [vmem:[#allocation61_spill] sm:$0xff]  ;;  %v3660_v30 = vcombine.high %v14311_v59, %v14311_v59  ;;  %v17110_v46 = vld [vmem:[#allocation64_spill] sm:$0xff] }
0x15fc   :  { %10219 = vmatpush3.bf16.xpose.msra.mxu0 %v17033_v15  ;;  %10234 = vmatprep.mubr.msk.bf16.mxu0 %vm12379_vm0, %v16994_v34 }
0x15fd   :  { %10220 = vmatprep.subr.bf16.mxu0 %v16994_v34  ;;  %10215 = vmatmul.mubr.msk.bf16.vlgmr.msra.gmra.mrb[88].mxu1 %vm218_vm1, %v3722_v24  ;;  %v3818_v27 = vrot.slane %v3814_v4, %v17032_v7  ;;  %v3667_v24 = vunpack.i.h.s16 %v3660_v30  ;;  %v8433_v29 = vpack.i.b16 %v3660_v30, %v3660_v30  ;;  %v17112_v30 = vld [vmem:[#allocation68_spill] sm:$0xff] }
0x15fe   :  { %10239 = vmatpush3.bf16.xpose.msra.mxu1 %v17034_v20  ;;  %10254 = vmatprep.mubr.msk.bf16.mxu1 %vm12379_vm0, %v16994_v34 }
0x15ff   :  { %10240 = vmatprep.subr.bf16.mxu1 %v16994_v34  ;;  %v3910_v4 = vpack.i.b16 %v3667_v24, %v3667_v24  ;;  %v17113_v24 = vld [vmem:[#allocation71_spill] sm:$0xff] }
0x1601   :  { %v3914_v59 = vrot.slane %v3910_v4, %v17032_v7  ;;  %v17115_v4 = vld [vmem:[#allocation75_spill] sm:$0xff] }
0x1604   :  { %10221 = vmatpush3.bf16.xpose.msra.mxu0 %v17035_v17 }
0x1605   :  { %10222 = vmatprep.subr.bf16.mxu0 %v16994_v34 }
0x1606   :  { %10241 = vmatpush3.bf16.xpose.msra.mxu1 %v17036_v3 }
0x1607   :  { %10242 = vmatprep.subr.bf16.mxu1 %v16994_v34 }
0x160c   :  { %10223 = vmatpush3.bf16.xpose.msra.mxu0 %v17037_v53 }
0x160d   :  { %10224 = vmatprep.subr.bf16.mxu0 %v16994_v34 }
0x160e   :  { %10243 = vmatpush3.bf16.xpose.msra.mxu1 %v17038_v1 }
0x160f   :  { %10244 = vmatprep.subr.bf16.mxu1 %v16994_v34 }
0x1614   :  { %10225 = vmatpush3.bf16.xpose.msra.mxu0 %v17039_v9 }
0x1615   :  { %10226 = vmatprep.subr.bf16.mxu0 %v16994_v34 }
0x1616   :  { %10245 = vmatpush3.bf16.xpose.msra.mxu1 %v17040_v13 }
0x1617   :  { %10246 = vmatprep.subr.bf16.mxu1 %v16994_v34 }
0x161c   :  { %10227 = vmatpush3.bf16.xpose.msra.mxu0 %v17041_v51 }
0x161d   :  { %10228 = vmatprep.subr.bf16.mxu0 %v16994_v34 }
0x161e   :  { %10247 = vmatpush3.bf16.xpose.msra.mxu1 %v17088_v39 }
0x161f   :  { %10248 = vmatprep.subr.bf16.mxu1 %v16994_v34 }
0x1624   :  { %10229 = vmatpush3.bf16.xpose.msra.mxu0 %v17089_v16 }
0x1625   :  { %10230 = vmatprep.subr.bf16.mxu0 %v16994_v34 }
0x1626   :  { %10249 = vmatpush3.bf16.xpose.msra.mxu1 %v17090_v0 }
0x1627   :  { %10250 = vmatprep.subr.bf16.mxu1 %v16994_v34 }
0x162c   :  { %10231 = vmatpush3.bf16.xpose.msra.mxu0 %v17091_v8 }
0x162d   :  { %10232 = vmatprep.subr.bf16.mxu0 %v16994_v34 }
0x162e   :  { %10251 = vmatpush3.bf16.xpose.msra.mxu1 %v17092_v25 }
0x162f   :  { %10252 = vmatprep.subr.bf16.mxu1 %v16994_v34 }
0x1634   :  { %10233 = vmatpush3.bf16.xpose.msra.mxu0 %v17093_v43 }
0x1635   :  { %10258 = vmatprep.subr.bf16.mxu0 %v16994_v34 }
0x1636   :  { %10253 = vmatpush3.bf16.xpose.msra.mxu1 %v17094_v6 }
0x1637   :  { %10278 = vmatprep.subr.bf16.mxu1 %v16994_v34 }
0x163b   :  { %10235 = vmatmul.mubr.msk.bf16.vlgmr.msra.gmra.mrb[96].mxu0 %vm218_vm1, %v3770_v37  ;;  %v3866_v37 = vrot.slane %v8433_v29, %v17032_v7  ;;  %v17114_v29 = vld [vmem:[#allocation72_spill] sm:$0xff] }
0x163c   :  { %10259 = vmatpush3.bf16.xpose.msra.mxu0 %v17095_v12  ;;  %10274 = vmatprep.mubr.msk.bf16.mxu0 %vm12379_vm0, %v16994_v34 }
0x163d   :  { %10260 = vmatprep.subr.bf16.mxu0 %v16994_v34  ;;  %10255 = vmatmul.mubr.msk.bf16.vlgmr.msra.gmra.mrb[92].mxu1 %vm218_vm1, %v3818_v27  ;;  %v17111_v27 = vld [vmem:[#allocation67_spill] sm:$0xff] }
0x163e   :  { %10279 = vmatpush3.bf16.xpose.msra.mxu1 %v17096_v22  ;;  %10294 = vmatprep.mubr.msk.bf16.mxu1 %vm12379_vm0, %v16994_v34 }
0x163f   :  { %10280 = vmatprep.subr.bf16.mxu1 %v16994_v34 }
0x1644   :  { %10261 = vmatpush3.bf16.xpose.msra.mxu0 %v17097_v41 }
0x1645   :  { %10262 = vmatprep.subr.bf16.mxu0 %v16994_v34 }
0x1646   :  { %10281 = vmatpush3.bf16.xpose.msra.mxu1 %v17098_v52  ;;  %v17128_v52 = vld [vmem:[#allocation98_spill] sm:$0xff] }
0x1647   :  { %10282 = vmatprep.subr.bf16.mxu1 %v16994_v34 }
0x164c   :  { %10263 = vmatpush3.bf16.xpose.msra.mxu0 %v17099_v14  ;;  %v17127_v14 = vld [vmem:[#allocation97_spill] sm:$0xff] }
0x164d   :  { %10264 = vmatprep.subr.bf16.mxu0 %v16994_v34 }
0x164e   :  { %10283 = vmatpush3.bf16.xpose.msra.mxu1 %v17100_v36 }
0x164f   :  { %10284 = vmatprep.subr.bf16.mxu1 %v16994_v34 }
0x1654   :  { %10265 = vmatpush3.bf16.xpose.msra.mxu0 %v17101_v33 }
0x1655   :  { %10266 = vmatprep.subr.bf16.mxu0 %v16994_v34 }
0x1656   :  { %10285 = vmatpush3.bf16.xpose.msra.mxu1 %v17102_v5 }
0x1657   :  { %10286 = vmatprep.subr.bf16.mxu1 %v16994_v34 }
0x165c   :  { %10267 = vmatpush3.bf16.xpose.msra.mxu0 %v17103_v10 }
0x165d   :  { %10268 = vmatprep.subr.bf16.mxu0 %v16994_v34 }
0x165e   :  { %10287 = vmatpush3.bf16.xpose.msra.mxu1 %v17104_v35 }
0x165f   :  { %10288 = vmatprep.subr.bf16.mxu1 %v16994_v34 }
0x1664   :  { %10269 = vmatpush3.bf16.xpose.msra.mxu0 %v17105_v2 }
0x1665   :  { %10270 = vmatprep.subr.bf16.mxu0 %v16994_v34 }
0x1666   :  { %10289 = vmatpush3.bf16.xpose.msra.mxu1 %v17106_v11 }
0x1667   :  { %10290 = vmatprep.subr.bf16.mxu1 %v16994_v34 }
0x166c   :  { %10271 = vmatpush3.bf16.xpose.msra.mxu0 %v17107_v21 }
0x166d   :  { %10272 = vmatprep.subr.bf16.mxu0 %v16994_v34 }
0x166e   :  { %10291 = vmatpush3.bf16.xpose.msra.mxu1 %v17108_v26 }
0x166f   :  { %10292 = vmatprep.subr.bf16.mxu1 %v16994_v34 }
0x1674   :  { %10273 = vmatpush3.bf16.xpose.msra.mxu0 %v17109_v32 }
0x1675   :  { %10298 = vmatprep.subr.bf16.mxu0 %v16994_v34 }
0x1676   :  { %10293 = vmatpush3.bf16.xpose.msra.mxu1 %v17110_v46 }
0x1677   :  { %10318 = vmatprep.subr.bf16.mxu1 %v16994_v34 }
0x167b   :  { %10275 = vmatmul.mubr.msk.bf16.vlgmr.msra.gmra.mrb[100].mxu0 %vm218_vm1, %v3866_v37  ;;  %v17116_v37 = vld [vmem:[#allocation76_spill] sm:$0xff] }
0x167c   :  { %10299 = vmatpush3.bf16.xpose.msra.mxu0 %v17111_v27  ;;  %10314 = vmatprep.mubr.msk.bf16.mxu0 %vm12379_vm0, %v16994_v34  ;;  %v17125_v27 = vld [vmem:[#allocation95_spill] sm:$0xff] }
0x167d   :  { %10300 = vmatprep.subr.bf16.mxu0 %v16994_v34  ;;  %10295 = vmatmul.mubr.msk.bf16.vlgmr.msra.gmra.mrb[96].mxu1 %vm218_vm1, %v3914_v59  ;;  %v17117_v59 = vld [vmem:[#allocation79_spill] sm:$0xff] }
0x167e   :  { %10319 = vmatpush3.bf16.xpose.msra.mxu1 %v17112_v30  ;;  %10334 = vmatprep.mubr.msk.bf16.mxu1 %vm12379_vm0, %v16994_v34  ;;  %v17118_v30 = vld [vmem:[#allocation80_spill] sm:$0xff] }
0x167f   :  { %10320 = vmatprep.subr.bf16.mxu1 %v16994_v34 }
0x1684   :  { %10301 = vmatpush3.bf16.xpose.msra.mxu0 %v17113_v24  ;;  %v17119_v24 = vld [vmem:[#allocation83_spill] sm:$0xff] }
0x1685   :  { %10302 = vmatprep.subr.bf16.mxu0 %v16994_v34 }
0x1686   :  { %10321 = vmatpush3.bf16.xpose.msra.mxu1 %v17114_v29  ;;  %v17120_v29 = vld [vmem:[#allocation84_spill] sm:$0xff] }
0x1687   :  { %10322 = vmatprep.subr.bf16.mxu1 %v16994_v34 }
0x168c   :  { %10303 = vmatpush3.bf16.xpose.msra.mxu0 %v17115_v4  ;;  %v17121_v4 = vld [vmem:[#allocation87_spill] sm:$0xff] }
0x168d   :  { %10304 = vmatprep.subr.bf16.mxu0 %v16994_v34 }
0x168e   :  { %10323 = vmatpush3.bf16.xpose.msra.mxu1 %v17116_v37  ;;  %v17122_v37 = vld [vmem:[#allocation88_spill] sm:$0xff] }
0x168f   :  { %10324 = vmatprep.subr.bf16.mxu1 %v16994_v34 }
0x1694   :  { %10305 = vmatpush3.bf16.xpose.msra.mxu0 %v17117_v59  ;;  %v17123_v59 = vld [vmem:[#allocation91_spill] sm:$0xff] }
0x1695   :  { %10306 = vmatprep.subr.bf16.mxu0 %v16994_v34 }
0x1696   :  { %10325 = vmatpush3.bf16.xpose.msra.mxu1 %v17118_v30  ;;  %v17124_v30 = vld [vmem:[#allocation92_spill] sm:$0xff] }
0x1697   :  { %10326 = vmatprep.subr.bf16.mxu1 %v16994_v34 }
0x169c   :  { %10307 = vmatpush3.bf16.xpose.msra.mxu0 %v17119_v24  ;;  %v3661_v24 = vcombine.high %v14352_v23, %v14352_v23  ;;  %v11980_v23 = vld [vmem:[%s16721_s3] sm:$0xff]  }
0x169d   :  { %10308 = vmatprep.subr.bf16.mxu0 %v16994_v34 }
0x169e   :  { %10327 = vmatpush3.bf16.xpose.msra.mxu1 %v17120_v29  ;;  %v3669_v29 = vunpack.i.h.s16 %v3661_v24 }
0x169f   :  { %10328 = vmatprep.subr.bf16.mxu1 %v16994_v34 }
0x16a0   :  { %v4006_v46 = vpack.i.b16 %v3669_v29, %v3669_v29  ;;  %v11984_v29 = vld [vmem:[%s16721_s3 + $0x10] sm:$0xff]  }
0x16a4   :  { %10309 = vmatpush3.bf16.xpose.msra.mxu0 %v17121_v4  ;;  %v8436_v4 = vpack.i.b16 %v3661_v24, %v3661_v24  ;;  %v11981_v24 = vld [vmem:[%s16721_s3 + $0x40] sm:$0xff]  }
0x16a5   :  { %10310 = vmatprep.subr.bf16.mxu0 %v16994_v34 }
0x16a6   :  { %10329 = vmatpush3.bf16.xpose.msra.mxu1 %v17122_v37  ;;  %v17126_v37 = vld [vmem:[#allocation96_spill] sm:$0xff] }
0x16a7   :  { %10330 = vmatprep.subr.bf16.mxu1 %v16994_v34 }
0x16ac   :  { %10311 = vmatpush3.bf16.xpose.msra.mxu0 %v17123_v59  ;;  %v3962_v59 = vrot.slane %v8436_v4, %v17032_v7  ;;  %v11985_v4 = vld [vmem:[%s16721_s3 + $0x50] sm:$0xff]  }
0x16ad   :  { %10312 = vmatprep.subr.bf16.mxu0 %v16994_v34 }
0x16ae   :  { %10331 = vmatpush3.bf16.xpose.msra.mxu1 %v17124_v30  ;;  %v4010_v30 = vrot.slane %v4006_v46, %v17032_v7  ;;  %v11982_v46 = vld [vmem:[%s16721_s3 + $0x8] sm:$0xff]  }
0x16af   :  { %10332 = vmatprep.subr.bf16.mxu1 %v16994_v34 }
0x16b4   :  { %10313 = vmatpush3.bf16.xpose.msra.mxu0 %v17125_v27 }
0x16b5   :  { %10338 = vmatprep.subr.bf16.mxu0 %v16994_v34 }
0x16b6   :  { %10333 = vmatpush3.bf16.xpose.msra.mxu1 %v17126_v37 }
0x16b7   :  { %10358 = vmatprep.subr.bf16.mxu1 %v16994_v34 }
0x16bb   :  { %10315 = vmatmul.mubr.msk.bf16.vlgmr.msra.gmra.mrb[104].mxu0 %vm218_vm1, %v3962_v59  ;;  %v11986_v59 = vld [vmem:[%s16721_s3 + $0x18] sm:$0xff]  }
0x16bc   :  { %10339 = vmatpush3.bf16.msra.mxu0 %v11980_v23  ;;  %10354 = vmatprep.mubr.msk.bf16.mxu0 %vm12379_vm0, %v16994_v34  ;;  %v11987_v23 = vld [vmem:[%s16721_s3 + $0x58] sm:$0xff]  }
0x16bd   :  { %10340 = vmatprep.subr.bf16.mxu0 %v16994_v34  ;;  %10335 = vmatmul.mubr.msk.bf16.vlgmr.msra.gmra.mrb[100].mxu1 %vm218_vm1, %v4010_v30  ;;  %v11983_v30 = vld [vmem:[%s16721_s3 + $0x48] sm:$0xff]  }
0x16be   :  { %10359 = vmatpush3.bf16.msra.mxu1 %v11981_v24  ;;  %10374 = vmatprep.mubr.msk.bf16.mxu1 %vm12379_vm0, %v16994_v34  ;;  %v11988_v24 = vld [vmem:[%s16721_s3 + $0x20] sm:$0xff]  }
0x16bf   :  { %10360 = vmatprep.subr.bf16.mxu1 %v16994_v34 }
0x16c0   :  { %10341 = vmatpush3.bf16.msra.mxu0 %v11982_v46 }
0x16c1   :  { %10342 = vmatprep.subr.bf16.mxu0 %v16994_v34 }
0x16c2   :  { %10361 = vmatpush3.bf16.msra.mxu1 %v11983_v30 }
0x16c3   :  { %10362 = vmatprep.subr.bf16.mxu1 %v16994_v34 }
0x16c4   :  { %10343 = vmatpush3.bf16.msra.mxu0 %v11984_v29  ;;  %v11989_v29 = vld [vmem:[%s16721_s3 + $0x60] sm:$0xff]  }
0x16c5   :  { %10344 = vmatprep.subr.bf16.mxu0 %v16994_v34 }
0x16c6   :  { %10363 = vmatpush3.bf16.msra.mxu1 %v11985_v4 }
0x16c7   :  { %10364 = vmatprep.subr.bf16.mxu1 %v16994_v34 }
0x16c8   :  { %10345 = vmatpush3.bf16.msra.mxu0 %v11986_v59  ;;  %v11990_v59 = vld [vmem:[%s16721_s3 + $0x28] sm:$0xff]  }
0x16c9   :  { %10346 = vmatprep.subr.bf16.mxu0 %v16994_v34 }
0x16ca   :  { %10365 = vmatpush3.bf16.msra.mxu1 %v11987_v23 }
0x16cb   :  { %10366 = vmatprep.subr.bf16.mxu1 %v16994_v34 }
0x16cc   :  { %10347 = vmatpush3.bf16.msra.mxu0 %v11988_v24 }
0x16cd   :  { %10348 = vmatprep.subr.bf16.mxu0 %v16994_v34 }
0x16ce   :  { %v3712_v46 = vpop.f32.mrb[92].mxu0  ;;  %10367 = vmatpush3.bf16.msra.mxu1 %v11989_v29 }
0x16cf   :  { %v10196_v30 = vpop.f32.mrb[93].mxu0  ;;  %10368 = vmatprep.subr.bf16.mxu1 %v16994_v34 }
0x16d0   :  { %v3715_v4 = vpop.f32.mrb[94].mxu0  ;;  %10349 = vmatpush3.bf16.msra.mxu0 %v11990_v59  ;;  %v3760_v23 = vpop.f32.mrb[88].mxu1  ;;  %v11991_v30 = vld [vmem:[%s16721_s3 + $0x68] sm:$0xff]   ;;  %v11995_v59 = vld [vmem:[%s16721_s3 + $0x78] sm:$0xff]  }
0x16d1   :  { %v10197_v24 = vpop.f32.mrb[95].mxu0  ;;  %10350 = vmatprep.subr.bf16.mxu0 %v16994_v34  ;;  %v10216_v37 = vpop.f32.mrb[89].mxu1  ;;  %v11992_v4 = vld [vmem:[%s16721_s3 + $0x30] sm:$0xff]  }
0x16d2   :  { %v3763_v27 = vpop.f32.mrb[90].mxu1  ;;  %10369 = vmatpush3.bf16.msra.mxu1 %v11991_v30  ;;  %v11993_v37 = vld [vmem:[%s16721_s3 + $0x70] sm:$0xff]  }
0x16d3   :  { %v10217_v29 = vpop.f32.mrb[91].mxu1  ;;  %10370 = vmatprep.subr.bf16.mxu1 %v16994_v34  ;;  %v11994_v27 = vld [vmem:[%s16721_s3 + $0x38] sm:$0xff]  }
0x16d4   :  { %10351 = vmatpush3.bf16.msra.mxu0 %v11992_v4 }
0x16d5   :  { %10352 = vmatprep.subr.bf16.mxu0 %v16994_v34 }
0x16d6   :  { %10371 = vmatpush3.bf16.msra.mxu1 %v11993_v37 }
0x16d7   :  { %10372 = vmatprep.subr.bf16.mxu1 %v16994_v34 }
0x16d8   :  { %10353 = vmatpush3.bf16.msra.mxu0 %v11994_v27 }
0x16d9   :  { %10378 = vmatprep.subr.bf16.mxu0 %v16994_v34 }
0x16da   :  { %10373 = vmatpush3.bf16.msra.mxu1 %v11995_v59  ;;  %v4063_v59 = vadd.f32 %v3760_v23, %v17127_v14 }
0x16db   :  { %10398 = vmatprep.subr.bf16.mxu1 %v16994_v34 }
0x16dc   :  { %v4078_v22 = vrot.slane %v4063_v59, 7 }
0x170e   :  { %v3808_v24 = vpop.f32.mrb[96].mxu0 }
0x170f   :  { %v10236_v30 = vpop.f32.mrb[97].mxu0  ;;  %v4064_v41 = vadd.f32 %v3808_v24, %v17128_v52 }
0x1710   :  { %v3811_v29 = vpop.f32.mrb[98].mxu0  ;;  %v3856_v4 = vpop.f32.mrb[92].mxu1  ;;  %v17129_v30 = vld [vmem:[#allocation99_spill] sm:$0xff] }
0x1711   :  { %v10237_v37 = vpop.f32.mrb[99].mxu0  ;;  %v10256_v32 = vpop.f32.mrb[93].mxu1  ;;  %v4065_v29 = vadd.f32 %v3856_v4, %v17129_v30  ;;  %v4080_v12 = vrot.slane %v4064_v41, 6 }
0x1712   :  { %v3859_v26 = vpop.f32.mrb[94].mxu1  ;;  %v17130_v37 = vld [vmem:[#allocation100_spill] sm:$0xff] }
0x1713   :  { %v10257_v21 = vpop.f32.mrb[95].mxu1 }
0x174e   :  { %v3904_v27 = vpop.f32.mrb[100].mxu0 }
0x174f   :  { %v10276_v11 = vpop.f32.mrb[101].mxu0  ;;  %v4066_v32 = vadd.f32 %v3904_v27, %v17130_v37  ;;  %v17132_v27 = vld [vmem:[#allocation102_spill] sm:$0xff] }
0x1750   :  { %v3907_v2 = vpop.f32.mrb[102].mxu0  ;;  %v3952_v35 = vpop.f32.mrb[96].mxu1  ;;  %v11996_v11 = vld [vmem:[%s16729_s11] sm:$0xff] }
0x1751   :  { %v10277_v10 = vpop.f32.mrb[103].mxu0  ;;  %v10296_v5 = vpop.f32.mrb[97].mxu1  ;;  %v4062_v2 = vadd.f32 %v11996_v11, %v3712_v46  ;;  %v4084_v26 = vrot.slane %v4066_v32, 4 }
0x1752   :  { %v3955_v33 = vpop.f32.mrb[98].mxu1  ;;  %v4082_v5 = vrot.slane %v4065_v29, 5 }
0x1753   :  { %v10297_v36 = vpop.f32.mrb[99].mxu1  ;;  %v4079_v10 = vsel %vm1556_vm2, %v4078_v22, %v4062_v2  ;;  %v17131_v33 = vld [vmem:[#allocation101_spill] sm:$0xff]  ;;  %v17133_v22 = vld [vmem:[#allocation103_spill] sm:$0xff] }
0x1754   :  { %v4067_v36 = vadd.f32 %v3952_v35, %v17131_v33  ;;  %v4081_v21 = vsel %vm1559_vm3, %v4080_v12, %v4079_v10 }
0x1755   :  { %v4083_v23 = vsel %vm1562_vm4, %v4082_v5, %v4081_v21 }
0x1756   :  { %v4086_v24 = vrot.slane %v4067_v36, 3  ;;  %v4085_v30 = vsel %vm1565_vm5, %v4084_v26, %v4083_v23 }
0x1758   :  { %v4087_v35 = vsel %vm1568_vm6, %v4086_v24, %v4085_v30 }
0x178e   :  { %v4000_v4 = vpop.f32.mrb[104].mxu0 }
0x178f   :  { %v4068_v37 = vadd.f32 %v4000_v4, %v17132_v27  ;;  %v10316_v52 = vpop.f32.mrb[105].mxu0 }
0x1790   :  { %v4003_v14 = vpop.f32.mrb[106].mxu0  ;;  %v4048_v46 = vpop.f32.mrb[100].mxu1  ;;  %v8440_v52 = vld [vmem:[%s16718_s0 + $0x18] sm:$0xff] }
0x1791   :  { %v4088_v6 = vrot.slane %v4068_v37, 2  ;;  %v10317_v11 = vpop.f32.mrb[107].mxu0  ;;  %v4069_v43 = vadd.f32 %v4048_v46, %v17133_v22  ;;  %v10336_v25 = vpop.f32.mrb[101].mxu1  ;;  %v4633_v14 = vadd.f32 %v8440_v52, %v14249_v28 }
0x1792   :  { %v4051_v12 = vpop.f32.mrb[102].mxu1 }
0x1793   :  { %v4089_v10 = vsel %vm1571_vm7, %v4088_v6, %v4087_v35  ;;  %v4090_v5 = vrot.slane %v4069_v43, 1  ;;  %v10337_v21 = vpop.f32.mrb[103].mxu1  ;;  %11760 = vtanh.f32 %v4633_v14 }
0x1795   :  { %v4091_v33 = vsel %vm1574_vm8, %v4090_v5, %v4089_v10 }
0x1796   :  { %4093 = vmax.xlane.f32.xlu0 %v4091_v33 }
0x179d   :  { %v11761_v26 = vpop.eup %11760 }
0x17ac   :  { %4643 = vrot.lane.b32.xlu0 %v11761_v26, %s12380_s26 }
0x1823   :  { %v4094_v25 = vpop.xlane.xlu0 %4093 }
0x1824   :  { %v4096_v30 = vrot.slane %v4094_v25, 1  ;;  %v4097_v23 = vrot.slane %v4094_v25, 2  ;;  %v4098_v24 = vrot.slane %v4094_v25, 3  ;;  %v4099_v6 = vrot.slane %v4094_v25, 4 }
0x1825   :  { %v4100_v4 = vrot.slane %v4094_v25, 5  ;;  %v4101_v46 = vrot.slane %v4094_v25, 6  ;;  %v4111_v11 = vsub.f32 %v4062_v2, %v4094_v25  ;;  %v4102_v35 = vrot.slane %v4094_v25, 7 }
0x1826   :  { %v4112_v33 = vsub.f32 %v4063_v59, %v4096_v30  ;;  %v4113_v12 = vsub.f32 %v4064_v41, %v4097_v23  ;;  %v4114_v10 = vsub.f32 %v4065_v29, %v4098_v24  ;;  %v4115_v5 = vsub.f32 %v4066_v32, %v4099_v6 }
0x1827   :  { %v4119_v21 = vmul.f32 1.442695, %v4111_v11  ;;  %v4116_v22 = vsub.f32 %v4067_v36, %v4100_v4  ;;  %v4117_v28 = vsub.f32 %v4068_v37, %v4101_v46  ;;  %v4118_v26 = vsub.f32 %v4069_v43, %v4102_v35 }
0x1828   :  { %v4121_v52 = vmul.f32 1.442695, %v4112_v33  ;;  %v4123_v27 = vmul.f32 1.442695, %v4113_v12  ;;  %v4125_v8 = vmul.f32 1.442695, %v4114_v10  ;;  %v4644_v10 = vpop.permute.xlu0 %4643 }
0x1829   :  { %11762 = vpow2.f32 %v4119_v21  ;;  %v4127_v0 = vmul.f32 1.442695, %v4115_v5  ;;  %v4129_v16 = vmul.f32 1.442695, %v4116_v22  ;;  %v4131_v39 = vmul.f32 1.442695, %v4117_v28 }
0x182a   :  { %11764 = vpow2.f32 %v4121_v52  ;;  %v4133_v2 = vmul.f32 1.442695, %v4118_v26  ;;  %v8441_v25 = vmul.f32 -1.442695, %v4633_v14 }
0x182b   :  { %11766 = vpow2.f32 %v4123_v27 }
0x182c   :  { %11768 = vpow2.f32 %v4125_v8 }
0x182d   :  { %11770 = vpow2.f32 %v4127_v0 }
0x182e   :  { %11772 = vpow2.f32 %v4129_v16 }
0x182f   :  { %11774 = vpow2.f32 %v4131_v39 }
0x1830   :  { %11776 = vpow2.f32 %v4133_v2 }
0x1831   :  { %11778 = vpow2.f32 %v8441_v25 }
0x1833   :  { %v11763_v41 = vpop.eup %11762 }
0x1834   :  { %v11765_v59 = vpop.eup %11764 }
0x1835   :  { %v11767_v29 = vpop.eup %11766  ;;  %v4143_v37 = vrot.slane %v11765_v59, 7 }
0x1836   :  { %v11769_v32 = vpop.eup %11768  ;;  %v4145_v43 = vrot.slane %v11767_v29, 6 }
0x1837   :  { %v11771_v36 = vpop.eup %11770  ;;  %v4144_v30 = vsel %vm1556_vm2, %v4143_v37, %v11763_v41  ;;  %v4147_v22 = vrot.slane %v11769_v32, 5 }
0x1838   :  { %v11773_v27 = vpop.eup %11772  ;;  %v4146_v8 = vsel %vm1559_vm3, %v4145_v43, %v4144_v30  ;;  %v4149_v23 = vrot.slane %v11771_v36, 4 }
0x1839   :  { %v11775_v14 = vpop.eup %11774  ;;  %v4148_v16 = vsel %vm1562_vm4, %v4147_v22, %v4146_v8  ;;  %v4151_v39 = vrot.slane %v11773_v27, 3 }
0x183a   :  { %v11777_v0 = vpop.eup %11776  ;;  %v4150_v24 = vsel %vm1565_vm5, %v4149_v23, %v4148_v16  ;;  %v4153_v6 = vrot.slane %v11775_v14, 2 }
0x183b   :  { %v11779_v4 = vpop.eup %11778  ;;  %v4152_v46 = vsel %vm1568_vm6, %v4151_v39, %v4150_v24  ;;  %v4155_v11 = vrot.slane %v11777_v0, 1 }
0x183c   :  { %v4154_v35 = vsel %vm1571_vm7, %v4153_v6, %v4152_v46  ;;  %v4637_v12 = vadd.f32 1.0, %v11779_v4 }
0x183d   :  { %v4156_v33 = vsel %vm1574_vm8, %v4155_v11, %v4154_v35 }
0x183e   :  { %4158 = vadd.xlane.f32.xlu1 %v4156_v33  ;;  %11780 = vrcp.f32 %v4637_v12 }
0x1848   :  { %v14547_v5 = vpop.eup %11780 }
0x1849   :  { %v4646_v21 = vmul.f32 %v14547_v5, %v4644_v10  ;;  %v4641_v52 = vmul.f32 %v14547_v5, %v13935_v55  ;;  %v11997_v10 = vld [vmem:[%s16721_s3 + $0x80] sm:$0xff]  }
0x184f   :  { %4648 = vrot.lane.b32.xlu1 %v4646_v21, %s12381_s29 }
0x18cb   :  { %v4159_v28 = vpop.xlane.xlu1 %4158 }
0x18cc   :  { %11782 = vrcp.f32 %v4159_v28 }
0x18cf   :  { %v4649_v26 = vpop.permute.xlu1 %4648 }
0x18d0   :  { %v14553_v2 = vadd.f32 %v4649_v26, %v4641_v52  ;;  %v11999_v52 = vld [vmem:[%s16721_s3 + $0x88] sm:$0xff]  }
0x18d2   :  { %11784 = vtanh.f32 %v14553_v2 }
0x18d6   :  { %v11783_v25 = vpop.eup %11782 }
0x18d7   :  { %v4177_v37 = vmul.f32 %v11783_v25, %v11763_v41  ;;  %v4162_v43 = vrot.slane %v11783_v25, 1  ;;  %v4163_v30 = vrot.slane %v11783_v25, 2  ;;  %v4164_v22 = vrot.slane %v11783_v25, 3 }
0x18d8   :  { %v4165_v8 = vrot.slane %v11783_v25, 4  ;;  %v4166_v23 = vrot.slane %v11783_v25, 5  ;;  %v4167_v16 = vrot.slane %v11783_v25, 6  ;;  %v4168_v39 = vrot.slane %v11783_v25, 7 }
0x18d9   :  { %v4185_v24 = vpack.c.bf16 %v4177_v37, %v4177_v37  ;;  %v4178_v6 = vmul.f32 %v11765_v59, %v4162_v43  ;;  %v14556_v4 = vmul.f32 %v11767_v29, %v4163_v30  ;;  %v14558_v46 = vmul.f32 %v11769_v32, %v4164_v22  ;;  %v12000_v30 = vld [vmem:[%s16721_s3 + $0xc8] sm:$0xff]  }
0x18da   :  { %v14560_v55 = vmul.f32 %v11771_v36, %v4165_v8  ;;  %v14563_v33 = vmul.f32 %v11773_v27, %v4166_v23  ;;  %v14570_v59 = vmul.f32 %v11775_v14, %v4167_v16  ;;  %v14575_v36 = vmul.f32 %v11777_v0, %v4168_v39  ;;  %v11998_v27 = vld [vmem:[%s16721_s3 + $0xc0] sm:$0xff]   ;;  %v12001_v23 = vld [vmem:[%s16721_s3 + $0x90] sm:$0xff]   ;;  %v12003_v39 = vld [vmem:[%s16721_s3 + $0x98] sm:$0xff]  }
0x18db   :  { %10355 = vmatmul.mubr.bf16.vlgmr.msra.gmra.mrb[108].mxu0 %v4185_v24  ;;  %v4186_v11 = vpack.c.bf16 %v4178_v6, %v4178_v6  ;;  %v4614_v35 = vrot.slane %v4178_v6, 7  ;;  %v4616_v41 = vrot.slane %v14556_v4, 6  ;;  %v4618_v32 = vrot.slane %v14558_v46, 5  ;;  %v12002_v16 = vld [vmem:[%s16721_s3 + $0xd0] sm:$0xff]   ;;  %v12004_v24 = vld [vmem:[%s16721_s3 + $0xd8] sm:$0xff]   ;;  %v12005_v6 = vld [vmem:[%s16721_s3 + $0xa0] sm:$0xff]  }
0x18dc   :  { %v11785_v12 = vpop.eup %11784  ;;  %10379 = vmatpush3.bf16.msra.mxu0 %v11997_v10  ;;  %10394 = vmatprep.mubr.msk.bf16.mxu0 %vm12379_vm0, %v16994_v34  ;;  %v4620_v14 = vrot.slane %v14560_v55, 4  ;;  %v4622_v0 = vrot.slane %v14563_v33, 3  ;;  %v4624_v25 = vrot.slane %v14570_v59, 2  ;;  %v4626_v43 = vrot.slane %v14575_v36, 1  ;;  %v12010_v10 = vld [vmem:[%s16721_s3 + $0xf0] sm:$0xff]  }
0x18dd   :  { %10375 = vmatmul.mubr.bf16.vlgmr.msra.gmra.mrb[104].mxu1 %v4186_v11  ;;  %v4615_v29 = vsel %vm1556_vm2, %v4614_v35, %v4177_v37  ;;  %4654 = vrot.lane.b32.xlu0 %v11785_v12, %s12380_s26  ;;  %v12006_v11 = vld [vmem:[%s16721_s3 + $0xe0] sm:$0xff]   ;;  %v12007_v35 = vld [vmem:[%s16721_s3 + $0xa8] sm:$0xff]   ;;  %v12009_v12 = vld [vmem:[%s16721_s3 + $0xb0] sm:$0xff]  }
0x18de   :  { %10399 = vmatpush3.bf16.msra.mxu1 %v11998_v27  ;;  %10380 = vmatprep.subr.bf16.mxu0 %v16994_v34  ;;  %v4617_v21 = vsel %vm1559_vm3, %v4616_v41, %v4615_v29  ;;  %v12008_v41 = vld [vmem:[%s16721_s3 + $0xe8] sm:$0xff]   ;;  %v12011_v29 = vld [vmem:[%s16721_s3 + $0xb8] sm:$0xff]  }
0x18df   :  { %10400 = vmatprep.subr.bf16.mxu1 %v16994_v34  ;;  %10414 = vmatprep.mubr.msk.bf16.mxu1 %vm12379_vm0, %v16994_v34  ;;  %v4619_v28 = vsel %vm1562_vm4, %v4618_v32, %v4617_v21  ;;  %v4187_v32 = vpack.c.bf16 %v14556_v4, %v14556_v4  ;;  %v12012_v27 = vld [vmem:[%s16721_s3 + $0xf8] sm:$0xff]   ;;  %v4188_v21 = vpack.c.bf16 %v14558_v46, %v14558_v46  ;;  %v12014_v4 = vld [vmem:[%s16721_s3 + $0x140] sm:$0xff]   ;;  %v12015_v46 = vld [vmem:[%s16721_s3 + $0x108] sm:$0xff]  }
0x18e0   :  { %10381 = vmatpush3.bf16.msra.mxu0 %v11999_v52  ;;  %v4621_v26 = vsel %vm1565_vm5, %v4620_v14, %v4619_v28  ;;  %v12013_v14 = vld [vmem:[%s16721_s3 + $0x100] sm:$0xff]   ;;  %v12016_v28 = vld [vmem:[%s16721_s3 + $0x148] sm:$0xff]   ;;  %v12018_v52 = vld [vmem:[%s16721_s3 + $0x150] sm:$0xff]  }
0x18e1   :  { %10382 = vmatprep.subr.bf16.mxu0 %v16994_v34  ;;  %v4623_v37 = vsel %vm1568_vm6, %v4622_v0, %v4621_v26  ;;  %v12017_v0 = vld [vmem:[%s16721_s3 + $0x110] sm:$0xff]   ;;  %v12019_v26 = vld [vmem:[%s16721_s3 + $0x118] sm:$0xff]  }
0x18e2   :  { %10401 = vmatpush3.bf16.msra.mxu1 %v12000_v30  ;;  %v4625_v22 = vsel %vm1571_vm7, %v4624_v25, %v4623_v37  ;;  %v12020_v25 = vld [vmem:[%s16721_s3 + $0x158] sm:$0xff]   ;;  %v12021_v37 = vld [vmem:[%s16721_s3 + $0x120] sm:$0xff]   ;;  %v12023_v30 = vld [vmem:[%s16721_s3 + $0x128] sm:$0xff]  }
0x18e3   :  { %10402 = vmatprep.subr.bf16.mxu1 %v16994_v34  ;;  %v4627_v8 = vsel %vm1574_vm8, %v4626_v43, %v4625_v22  ;;  %v12022_v43 = vld [vmem:[%s16721_s3 + $0x160] sm:$0xff]   ;;  %v12024_v22 = vld [vmem:[%s16721_s3 + $0x168] sm:$0xff]  }
0x18e4   :  { %10383 = vmatpush3.bf16.msra.mxu0 %v12001_v23  ;;  %4630 = vst [vmem:[#allocation4 + $0x10] sm:$0xff] %v4627_v8  ;;  %v12025_v8 = vld [vmem:[%s16721_s3 + $0x130] sm:$0xff]  }
0x18e5   :  { %10384 = vmatprep.subr.bf16.mxu0 %v16994_v34  ;;  %v12026_v23 = vld [vmem:[%s16721_s3 + $0x170] sm:$0xff]  }
0x18e6   :  { %10403 = vmatpush3.bf16.msra.mxu1 %v12002_v16  ;;  %v12027_v16 = vld [vmem:[%s16721_s3 + $0x138] sm:$0xff]  }
0x18e7   :  { %10404 = vmatprep.subr.bf16.mxu1 %v16994_v34 }
0x18e8   :  { %10385 = vmatpush3.bf16.msra.mxu0 %v12003_v39  ;;  %v4189_v39 = vpack.c.bf16 %v14560_v55, %v14560_v55  ;;  %v12030_v55 = vld [vmem:[%s16721_s3 + $0x1c0] sm:$0xff]  }
0x18e9   :  { %10386 = vmatprep.subr.bf16.mxu0 %v16994_v34 }
0x18ea   :  { %10405 = vmatpush3.bf16.msra.mxu1 %v12004_v24  ;;  %v12028_v24 = vld [vmem:[%s16721_s3 + $0x178] sm:$0xff]  }
0x18eb   :  { %10406 = vmatprep.subr.bf16.mxu1 %v16994_v34 }
0x18ec   :  { %10387 = vmatpush3.bf16.msra.mxu0 %v12005_v6  ;;  %v4190_v6 = vpack.c.bf16 %v14563_v33, %v14563_v33  ;;  %v12031_v33 = vld [vmem:[%s16721_s3 + $0x188] sm:$0xff]  }
0x18ed   :  { %10388 = vmatprep.subr.bf16.mxu0 %v16994_v34 }
0x18ee   :  { %10407 = vmatpush3.bf16.msra.mxu1 %v12006_v11  ;;  %v12029_v11 = vld [vmem:[%s16721_s3 + $0x180] sm:$0xff]  }
0x18ef   :  { %10408 = vmatprep.subr.bf16.mxu1 %v16994_v34 }
0x18f0   :  { %10389 = vmatpush3.bf16.msra.mxu0 %v12007_v35  ;;  %v12032_v35 = vld [vmem:[%s16721_s3 + $0x1c8] sm:$0xff]  }
0x18f1   :  { %10390 = vmatprep.subr.bf16.mxu0 %v16994_v34 }
0x18f2   :  { %10409 = vmatpush3.bf16.msra.mxu1 %v12008_v41  ;;  %v12033_v41 = vld [vmem:[%s16721_s3 + $0x190] sm:$0xff]  }
0x18f3   :  { %10410 = vmatprep.subr.bf16.mxu1 %v16994_v34 }
0x18f4   :  { %10391 = vmatpush3.bf16.msra.mxu0 %v12009_v12  ;;  %v12034_v12 = vld [vmem:[%s16721_s3 + $0x1d0] sm:$0xff]  }
0x18f5   :  { %10392 = vmatprep.subr.bf16.mxu0 %v16994_v34 }
0x18f6   :  { %10411 = vmatpush3.bf16.msra.mxu1 %v12010_v10  ;;  %v12035_v10 = vld [vmem:[%s16721_s3 + $0x198] sm:$0xff]  }
0x18f7   :  { %10412 = vmatprep.subr.bf16.mxu1 %v16994_v34 }
0x18f8   :  { %10393 = vmatpush3.bf16.msra.mxu0 %v12011_v29  ;;  %v12036_v29 = vld [vmem:[%s16721_s3 + $0x1d8] sm:$0xff]  }
0x18f9   :  { %10418 = vmatprep.subr.bf16.mxu0 %v16994_v34 }
0x18fa   :  { %10413 = vmatpush3.bf16.msra.mxu1 %v12012_v27  ;;  %v12038_v27 = vld [vmem:[%s16721_s3 + $0x1e0] sm:$0xff]  }
0x18fb   :  { %10395 = vmatmul.mubr.bf16.vlgmr.msra.gmra.mrb[112].mxu0 %v4187_v32  ;;  %10438 = vmatprep.subr.bf16.mxu1 %v16994_v34  ;;  %v12037_v32 = vld [vmem:[%s16721_s3 + $0x1a0] sm:$0xff]  }
0x18fc   :  { %10419 = vmatpush3.bf16.msra.mxu0 %v12013_v14  ;;  %10434 = vmatprep.mubr.msk.bf16.mxu0 %vm12379_vm0, %v16994_v34  ;;  %v12040_v14 = vld [vmem:[%s16721_s3 + $0x1e8] sm:$0xff]  }
0x18fd   :  { %10415 = vmatmul.mubr.bf16.vlgmr.msra.gmra.mrb[108].mxu1 %v4188_v21  ;;  %10420 = vmatprep.subr.bf16.mxu0 %v16994_v34  ;;  %v12039_v21 = vld [vmem:[%s16721_s3 + $0x1a8] sm:$0xff]  }
0x18fe   :  { %10439 = vmatpush3.bf16.msra.mxu1 %v12014_v4  ;;  %10454 = vmatprep.mubr.msk.bf16.mxu1 %vm12379_vm0, %v16994_v34  ;;  %v12041_v4 = vld [vmem:[%s16721_s3 + $0x1b0] sm:$0xff]  }
0x18ff   :  { %10440 = vmatprep.subr.bf16.mxu1 %v16994_v34 }
0x1900   :  { %10421 = vmatpush3.bf16.msra.mxu0 %v12015_v46  ;;  %v12042_v46 = vld [vmem:[%s16721_s3 + $0x1f0] sm:$0xff]  }
0x1901   :  { %10422 = vmatprep.subr.bf16.mxu0 %v16994_v34 }
0x1902   :  { %10441 = vmatpush3.bf16.msra.mxu1 %v12016_v28  ;;  %v12043_v28 = vld [vmem:[%s16721_s3 + $0x1b8] sm:$0xff]  }
0x1903   :  { %10442 = vmatprep.subr.bf16.mxu1 %v16994_v34 }
0x1904   :  { %10423 = vmatpush3.bf16.msra.mxu0 %v12017_v0  ;;  %v4191_v0 = vpack.c.bf16 %v14570_v59, %v14570_v59  ;;  %v12046_v59 = vld [vmem:[%s16722_s4] sm:$0xff]  }
0x1905   :  { %10424 = vmatprep.subr.bf16.mxu0 %v16994_v34 }
0x1906   :  { %10443 = vmatpush3.bf16.msra.mxu1 %v12018_v52  ;;  %v12044_v52 = vld [vmem:[%s16721_s3 + $0x1f8] sm:$0xff]  }
0x1907   :  { %10444 = vmatprep.subr.bf16.mxu1 %v16994_v34 }
0x1908   :  { %10425 = vmatpush3.bf16.msra.mxu0 %v12019_v26  ;;  %v4192_v26 = vpack.c.bf16 %v14575_v36, %v14575_v36  ;;  %v12047_v36 = vld [vmem:[%s16728_s10 + $0x8] sm:$0xff]  }
0x1909   :  { %10426 = vmatprep.subr.bf16.mxu0 %v16994_v34 }
0x190a   :  { %10445 = vmatpush3.bf16.msra.mxu1 %v12020_v25  ;;  %v12045_v25 = vld [vmem:[%s16728_s10] sm:$0xff]  }
0x190b   :  { %10446 = vmatprep.subr.bf16.mxu1 %v16994_v34 }
0x190c   :  { %10427 = vmatpush3.bf16.msra.mxu0 %v12021_v37  ;;  %v12048_v37 = vld [vmem:[%s16722_s4 + $0x8] sm:$0xff]  }
0x190d   :  { %10428 = vmatprep.subr.bf16.mxu0 %v16994_v34 }
0x190e   :  { %10447 = vmatpush3.bf16.msra.mxu1 %v12022_v43 }
0x190f   :  { %10448 = vmatprep.subr.bf16.mxu1 %v16994_v34 }
0x1910   :  { %10429 = vmatpush3.bf16.msra.mxu0 %v12023_v30 }
0x1911   :  { %10430 = vmatprep.subr.bf16.mxu0 %v16994_v34 }
0x1912   :  { %10449 = vmatpush3.bf16.msra.mxu1 %v12024_v22 }
0x1913   :  { %10450 = vmatprep.subr.bf16.mxu1 %v16994_v34 }
0x1914   :  { %10431 = vmatpush3.bf16.msra.mxu0 %v12025_v8 }
0x1915   :  { %10432 = vmatprep.subr.bf16.mxu0 %v16994_v34 }
0x1916   :  { %10451 = vmatpush3.bf16.msra.mxu1 %v12026_v23 }
0x1917   :  { %10452 = vmatprep.subr.bf16.mxu1 %v16994_v34 }
0x1918   :  { %10433 = vmatpush3.bf16.msra.mxu0 %v12027_v16 }
0x1919   :  { %10458 = vmatprep.subr.bf16.mxu0 %v16994_v34 }
0x191a   :  { %10453 = vmatpush3.bf16.msra.mxu1 %v12028_v24 }
0x191b   :  { %10435 = vmatmul.mubr.bf16.vlgmr.msra.gmra.mrb[116].mxu0 %v4189_v39  ;;  %10478 = vmatprep.subr.bf16.mxu1 %v16994_v34 }
0x191c   :  { %10459 = vmatpush3.bf16.msra.mxu0 %v12029_v11  ;;  %10474 = vmatprep.mubr.msk.bf16.mxu0 %vm12379_vm0, %v16994_v34 }
0x191d   :  { %10455 = vmatmul.mubr.bf16.vlgmr.msra.gmra.mrb[112].mxu1 %v4190_v6  ;;  %10460 = vmatprep.subr.bf16.mxu0 %v16994_v34 }
0x191e   :  { %10479 = vmatpush3.bf16.msra.mxu1 %v12030_v55  ;;  %10494 = vmatprep.mubr.msk.bf16.mxu1 %vm12379_vm0, %v16994_v34 }
0x191f   :  { %10480 = vmatprep.subr.bf16.mxu1 %v16994_v34 }
0x1920   :  { %10461 = vmatpush3.bf16.msra.mxu0 %v12031_v33 }
0x1921   :  { %10462 = vmatprep.subr.bf16.mxu0 %v16994_v34 }
0x1922   :  { %10481 = vmatpush3.bf16.msra.mxu1 %v12032_v35 }
0x1923   :  { %10482 = vmatprep.subr.bf16.mxu1 %v16994_v34 }
0x1924   :  { %10463 = vmatpush3.bf16.msra.mxu0 %v12033_v41 }
0x1925   :  { %10464 = vmatprep.subr.bf16.mxu0 %v16994_v34 }
0x1926   :  { %10483 = vmatpush3.bf16.msra.mxu1 %v12034_v12 }
0x1927   :  { %10484 = vmatprep.subr.bf16.mxu1 %v16994_v34 }
0x1928   :  { %10465 = vmatpush3.bf16.msra.mxu0 %v12035_v10 }
0x1929   :  { %10466 = vmatprep.subr.bf16.mxu0 %v16994_v34 }
0x192a   :  { %10485 = vmatpush3.bf16.msra.mxu1 %v12036_v29 }
0x192b   :  { %10486 = vmatprep.subr.bf16.mxu1 %v16994_v34 }
0x192c   :  { %10467 = vmatpush3.bf16.msra.mxu0 %v12037_v32 }
0x192d   :  { %10468 = vmatprep.subr.bf16.mxu0 %v16994_v34 }
0x192e   :  { %10487 = vmatpush3.bf16.msra.mxu1 %v12038_v27  ;;  %v12050_v27 = vld [vmem:[%s16724_s6 + $0x8] sm:$0xff]  }
0x192f   :  { %10488 = vmatprep.subr.bf16.mxu1 %v16994_v34 }
0x1930   :  { %10469 = vmatpush3.bf16.msra.mxu0 %v12039_v21 }
0x1931   :  { %10470 = vmatprep.subr.bf16.mxu0 %v16994_v34 }
0x1932   :  { %10489 = vmatpush3.bf16.msra.mxu1 %v12040_v14 }
0x1933   :  { %10490 = vmatprep.subr.bf16.mxu1 %v16994_v34 }
0x1934   :  { %10471 = vmatpush3.bf16.msra.mxu0 %v12041_v4 }
0x1935   :  { %10472 = vmatprep.subr.bf16.mxu0 %v16994_v34 }
0x1936   :  { %10491 = vmatpush3.bf16.msra.mxu1 %v12042_v46 }
0x1937   :  { %10492 = vmatprep.subr.bf16.mxu1 %v16994_v34 }
0x1938   :  { %10473 = vmatpush3.bf16.msra.mxu0 %v12043_v28 }
0x1939   :  { %10498 = vmatprep.subr.bf16.mxu0 %v16994_v34 }
0x193a   :  { %10493 = vmatpush3.bf16.msra.mxu1 %v12044_v52 }
0x193b   :  { %10475 = vmatmul.mubr.bf16.vlgmr.msra.gmra.mrb[120].mxu0 %v4191_v0  ;;  %10514 = vmatprep.subr.bf16.mxu1 %v16994_v34 }
0x193c   :  { %10499 = vmatpush3.bf16.msra.mxu0 %v12045_v25  ;;  %10502 = vmatprep.mubr.msk.bf16.mxu0 %vm12379_vm0, %v16994_v34 }
0x193d   :  { %10495 = vmatmul.mubr.bf16.vlgmr.msra.gmra.mrb[116].mxu1 %v4192_v26  ;;  %10500 = vmatprep.subr.bf16.mxu0 %v16994_v34 }
0x193e   :  { %10515 = vmatpush3.bf16.msra.mxu1 %v12046_v59  ;;  %10518 = vmatprep.mubr.msk.bf16.mxu1 %vm12379_vm0, %v16994_v34 }
0x193f   :  { %10516 = vmatprep.subr.bf16.mxu1 %v16994_v34 }
0x1940   :  { %10501 = vmatpush3.bf16.msra.mxu0 %v12047_v36 }
0x1941   :  { %10506 = vmatprep.subr.bf16.mxu0 %v16994_v34 }
0x1942   :  { %10517 = vmatpush3.bf16.msra.mxu1 %v12048_v37 }
0x1943   :  { %10522 = vmatprep.subr.bf16.mxu1 %v16994_v34 }
0x194f   :  { %v4655_v43 = vpop.permute.xlu0 %4654 }
0x1950   :  { %v4657_v30 = vmul.f32 %v14547_v5, %v4655_v43  ;;  %v12049_v5 = vld [vmem:[%s16724_s6] sm:$0xff]  }
0x1952   :  { %v4658_v22 = vpack.c.bf16 %v4657_v30, %v4657_v30 }
0x1954   :  { %4660 = vrot.lane.b32.xlu1 %v4658_v22, %s12381_s29 }
0x19ae   :  { %v4227_v8 = vpop.f32.mrb[108].mxu0 }
0x19af   :  { %v10356_v23 = vpop.f32.mrb[109].mxu0  ;;  %v4521_v24 = vpack.c.bf16 %v4227_v8, %v4227_v8 }
0x19b0   :  { %v4230_v16 = vpop.f32.mrb[110].mxu0  ;;  %v4267_v39 = vpop.f32.mrb[104].mxu1 }
0x19b1   :  { %v4522_v6 = vpack.c.bf16 %v4267_v39, %v4267_v39  ;;  %v10357_v11 = vpop.f32.mrb[111].mxu0  ;;  %v10376_v55 = vpop.f32.mrb[105].mxu1  ;;  %v4537_v12 = vunpack.c.l.b16 %v4521_v24 }
0x19b2   :  { %v4270_v33 = vpop.f32.mrb[106].mxu1 }
0x19b3   :  { %v4538_v35 = vunpack.c.l.b16 %v4522_v6  ;;  %v10377_v41 = vpop.f32.mrb[107].mxu1 }
0x19b5   :  { %v4545_v10 = vrot.slane %v4538_v35, 7 }
0x19b7   :  { %v4546_v29 = vsel %vm1556_vm2, %v4545_v10, %v4537_v12 }
0x19c6   :  { %v14821_v32 = vpop.permute.xlu1 %4660 }
0x19c7   :  { %10519 = vmatmul.mubr.msk.bf16.vlgmr.msra.gmra.mrb[120].mxu1 %vm218_vm1, %v14821_v32 }
0x19c8   :  { %10523 = vmatpush3.bf16.msra.mxu1 %v12049_v5  ;;  %10526 = vmatprep.mubr.msk.bf16.mxu1 %vm12379_vm0, %v16994_v34 }
0x19c9   :  { %10524 = vmatprep.subr.bf16.mxu1 %v16994_v34 }
0x19cc   :  { %10525 = vmatpush3.bf16.msra.mxu1 %v12050_v27 }
0x19cd   :  { %10530 = vmatprep.subr.bf16.mxu1 %v16994_v34 }
0x19ce   :  { %v4307_v21 = vpop.f32.mrb[112].mxu0 }
0x19cf   :  { %v4523_v14 = vpack.c.bf16 %v4307_v21, %v4307_v21  ;;  %v10396_v4 = vpop.f32.mrb[113].mxu0 }
0x19d0   :  { %v4310_v46 = vpop.f32.mrb[114].mxu0  ;;  %v4347_v28 = vpop.f32.mrb[108].mxu1 }
0x19d1   :  { %v4539_v0 = vunpack.c.l.b16 %v4523_v14  ;;  %v4524_v52 = vpack.c.bf16 %v4347_v28, %v4347_v28  ;;  %v10397_v26 = vpop.f32.mrb[115].mxu0  ;;  %v10416_v25 = vpop.f32.mrb[109].mxu1 }
0x19d2   :  { %v4350_v59 = vpop.f32.mrb[110].mxu1 }
0x19d3   :  { %v4547_v36 = vrot.slane %v4539_v0, 6  ;;  %v4540_v37 = vunpack.c.l.b16 %v4524_v52  ;;  %v10417_v43 = vpop.f32.mrb[111].mxu1 }
0x19d5   :  { %v4548_v30 = vsel %vm1559_vm3, %v4547_v36, %v4546_v29  ;;  %v4549_v22 = vrot.slane %v4540_v37, 5 }
0x19d7   :  { %v4550_v8 = vsel %vm1562_vm4, %v4549_v22, %v4548_v30 }
0x19ee   :  { %v4387_v23 = vpop.f32.mrb[116].mxu0 }
0x19ef   :  { %v4525_v16 = vpack.c.bf16 %v4387_v23, %v4387_v23  ;;  %v10436_v39 = vpop.f32.mrb[117].mxu0 }
0x19f0   :  { %v4390_v24 = vpop.f32.mrb[118].mxu0  ;;  %v4427_v6 = vpop.f32.mrb[112].mxu1  ;;  %v12051_v39 = vld [vmem:[%s16723_s5] sm:$0xff]  }
0x19f1   :  { %v4541_v11 = vunpack.c.l.b16 %v4525_v16  ;;  %v4526_v55 = vpack.c.bf16 %v4427_v6, %v4427_v6  ;;  %v10437_v33 = vpop.f32.mrb[119].mxu0  ;;  %v10456_v35 = vpop.f32.mrb[113].mxu1  ;;  %v12052_v24 = vld [vmem:[%s16723_s5 + $0x8] sm:$0xff]  }
0x19f2   :  { %v4430_v41 = vpop.f32.mrb[114].mxu1  ;;  %v12053_v6 = vld [vmem:[%s16726_s8 + $0x4] ss:$8 sps:$4 sm:$0xff]   ;;  %v12056_v33 = vld [vmem:[%s16726_s8 + $0x10] ss:$8 sps:$4 sm:$0xff]  }
0x19f3   :  { %v4551_v12 = vrot.slane %v4541_v11, 4  ;;  %v4542_v10 = vunpack.c.l.b16 %v4526_v55  ;;  %v10457_v5 = vpop.f32.mrb[115].mxu1  ;;  %v12054_v11 = vld [vmem:[%s16726_s8] ss:$8 sps:$4 sm:$0xff]   ;;  %v12055_v55 = vld [vmem:[%s16726_s8 + $0x14] ss:$8 sps:$4 sm:$0xff]  }
0x19f5   :  { %v4552_v27 = vsel %vm1565_vm5, %v4551_v12, %v4550_v8  ;;  %v4553_v21 = vrot.slane %v4542_v10, 3  ;;  %v12057_v10 = vld [vmem:[%s16727_s9] sm:$0xff] }
0x19f6   :  { %v3630_v5 = vadd.f32 %v12057_v10, %v14304_v31 }
0x19f7   :  { %v4554_v29 = vsel %vm1568_vm6, %v4553_v21, %v4552_v27 }
0x1a0e   :  { %v4467_v14 = vpop.f32.mrb[120].mxu0 }
0x1a0f   :  { %v4527_v4 = vpack.c.bf16 %v4467_v14, %v4467_v14  ;;  %v10476_v46 = vpop.f32.mrb[121].mxu0 }
0x1a10   :  { %v4470_v28 = vpop.f32.mrb[122].mxu0  ;;  %v4507_v0 = vpop.f32.mrb[116].mxu1 }
0x1a11   :  { %v4543_v52 = vunpack.c.l.b16 %v4527_v4  ;;  %v4528_v26 = vpack.c.bf16 %v4507_v0, %v4507_v0  ;;  %v10477_v25 = vpop.f32.mrb[123].mxu0  ;;  %v10496_v59 = vpop.f32.mrb[117].mxu1  ;;  %v12058_v28 = vld [vmem:[%s16725_s7] sm:$0xff] }
0x1a12   :  { %v4510_v36 = vpop.f32.mrb[118].mxu1 }
0x1a13   :  { %v4555_v37 = vrot.slane %v4543_v52, 2  ;;  %v4544_v43 = vunpack.c.l.b16 %v4528_v26  ;;  %v10497_v30 = vpop.f32.mrb[119].mxu1 }
0x1a15   :  { %v4556_v22 = vsel %vm1571_vm7, %v4555_v37, %v4554_v29  ;;  %v4557_v23 = vrot.slane %v4544_v43, 1 }
0x1a17   :  { %v4558_v8 = vsel %vm1574_vm8, %v4557_v23, %v4556_v22 }
0x1a18   :  { %v4559_v16 = vpack.c.b16 %v4558_v8, %v4558_v8 }
0x1a1a   :  { %10503 = vmatmul.mubr.msk.bf16.vlgmr.msra.gmra.mrb[124].mxu0 %vm218_vm1, %v4559_v16 }
0x1a1b   :  { %10507 = vmatpush3.bf16.msra.mxu0 %v12051_v39  ;;  %10510 = vmatprep.mubr.msk.bf16.mxu0 %vm12379_vm0, %v16994_v34 }
0x1a1c   :  { %10508 = vmatprep.subr.bf16.mxu0 %v16994_v34 }
0x1a1f   :  { %10509 = vmatpush3.bf16.msra.mxu0 %v12052_v24 }
0x1a20   :  { %4816 = vmatprep.subr.bf16.mxu0 %v12053_v6 }
0x1a22   :  { %10511 = vmatmul.mubr.msk.bf16.vlgmr.msra.gmra.mrb[88].mxu0 %vm218_vm1, %v14821_v32 }
0x1a23   :  { %4817 = vmatpush1.bf16.msra.mxu0 %v12054_v11  ;;  %4848 = vmatprep.mubr.bf16.mxu0 %v17012_v19 }
0x1a24   :  { %4818 = vmatprep.subr.bf16.mxu0 %v12055_v55 }
0x1a27   :  { %4819 = vmatpush1.bf16.msra.mxu0 %v12056_v33 }
0x1a28   :  { %10550 = vmatprep.subr.bf16.mxu0 %v16994_v34 }
0x1a9a   :  { %v14867_v32 = vpop.f32.mrb[120].mxu1 }
0x1a9b   :  { %v10520_v35 = vpop.f32.mrb[121].mxu1 }
0x1a9c   :  { %v4767_v41 = vpop.f32.mrb[122].mxu1 }
0x1a9d   :  { %v10521_v12 = vpop.f32.mrb[123].mxu1  ;;  %v12059_v41 = vld [vmem:[%s16727_s9 + $0x8] sm:$0xff] }
0x1aed   :  { %v4597_v27 = vpop.f32.mrb[124].mxu0 }
0x1aee   :  { %v4598_v21 = vadd.f32 %v4597_v27, %v3630_v5  ;;  %v10504_v29 = vpop.f32.mrb[125].mxu0 }
0x1aef   :  { %v4600_v14 = vpop.f32.mrb[126].mxu0 }
0x1af0   :  { %11786 = vtanh.f32 %v4598_v21  ;;  %v10505_v4 = vpop.f32.mrb[127].mxu0 }
0x1af5   :  { %v4699_v46 = vpop.f32.mrb[88].mxu0 }
0x1af6   :  { %v11549_v0 = vadd.f32 %v12058_v28, %v4699_v46  ;;  %v10512_v52 = vpop.f32.mrb[89].mxu0 }
0x1af7   :  { %v4702_v26 = vpop.f32.mrb[90].mxu0  ;;  %v17134_v52 = vld [vmem:[#allocation41_spill] sm:$0xff] }
0x1af8   :  { %11788 = vtanh.f32 %v11549_v0  ;;  %v10513_v25 = vpop.f32.mrb[91].mxu0  ;;  %v8443_v31 = vmul.f32 -1.442695, %v11549_v0  ;;  %v17135_v26 = vld [vmem:[#allocation42_spill] sm:$0xff] }
0x1af9   :  { %v17136_v25 = vld [vmem:[#allocation43_spill] sm:$0xff] }
0x1afa   :  { %v11787_v59 = vpop.eup %11786  ;;  %11790 = vpow2.f32 %v8443_v31  ;;  %v17138_v31 = vld [vmem:[#allocation45_spill] sm:$0xff] }
0x1afb   :  { %4605 = vst [vmem:[#allocation2 + $0x10] sm:$0xff] %v11787_v59 }
0x1b02   :  { %v11789_v36 = vpop.eup %11788 }
0x1b03   :  { %4714 = vrot.lane.b32.xlu0 %v11789_v36, %s12380_s26  ;;  %v17137_v36 = vld [vmem:[#allocation44_spill] sm:$0xff] }
0x1b04   :  { %v11791_v37 = vpop.eup %11790 }
0x1b05   :  { %v4708_v43 = vadd.f32 1.0, %v11791_v37 }
0x1b07   :  { %11792 = vrcp.f32 %v4708_v43 }
0x1b11   :  { %v11793_v30 = vpop.eup %11792 }
0x1b12   :  { %v4712_v8 = vmul.f32 %v11793_v30, %v14261_v57 }
0x1b75   :  { %v4715_v22 = vpop.permute.xlu0 %4714 }
0x1b76   :  { %v4717_v23 = vmul.f32 %v11793_v30, %v4715_v22 }
0x1b78   :  { %4719 = vrot.lane.b32.xlu1 %v4717_v23, %s12381_s29  ;;  %v17140_v23 = vld [vmem:[#allocation47_spill] sm:$0xff] }
0x1bea   :  { %v4720_v16 = vpop.permute.xlu1 %4719 }
0x1beb   :  { %v14879_v39 = vadd.f32 %v4720_v16, %v4712_v8 }
0x1bed   :  { %11794 = vtanh.f32 %v14879_v39 }
0x1bf7   :  { %v11795_v24 = vpop.eup %11794 }
0x1bf8   :  { %4725 = vrot.lane.b32.xlu0 %v11795_v24, %s12380_s26  ;;  %v17141_v24 = vld [vmem:[#allocation48_spill] sm:$0xff] }
0x1c6a   :  { %v4726_v6 = vpop.permute.xlu0 %4725 }
0x1c6b   :  { %v4728_v11 = vmul.f32 %v11793_v30, %v4726_v6  ;;  %v17139_v30 = vld [vmem:[#allocation46_spill] sm:$0xff] }
0x1c6d   :  { %v4729_v55 = vpack.c.bf16 %v4728_v11, %v4728_v11  ;;  %v17142_v11 = vld [vmem:[#allocation49_spill] sm:$0xff] }
0x1c6f   :  { %4771 = vrot.lane.b32.xlu1 %v4729_v55, %s12381_s29  ;;  %v17143_v55 = vld [vmem:[#allocation50_spill] sm:$0xff] }
0x1ce1   :  { %v4772_v33 = vpop.permute.xlu1 %4771 }
0x1ce2   :  { %10527 = vmatmul.mubr.msk.bf16.vlgmr.msra.gmra.mrb[124].mxu1 %vm218_vm1, %v4772_v33  ;;  %8446 = vmatmul.mubr.msk.bf16.vlgmr.msra.gmra.mrb[128].mxu0 %vm218_vm1, %v4772_v33  ;;  %v17144_v33 = vld [vmem:[#allocation51_spill] sm:$0xff] }
0x1ce3   :  { %10531 = vmatpush3.bf16.xpose.msra.mxu1 %v17015_v40  ;;  %10551 = vmatpush3.bf16.xpose.msra.mxu0 %v17016_v44 }
0x1ce4   :  { %10532 = vmatprep.subr.bf16.mxu1 %v16994_v34  ;;  %10552 = vmatprep.subr.bf16.mxu0 %v16994_v34 }
0x1ce5   :  { %10546 = vmatprep.mubr.msk.bf16.mxu1 %vm12379_vm0, %v16994_v34  ;;  %10566 = vmatprep.mubr.msk.bf16.mxu0 %vm12379_vm0, %v16994_v34 }
0x1ceb   :  { %10533 = vmatpush3.bf16.xpose.msra.mxu1 %v17017_v45  ;;  %10553 = vmatpush3.bf16.xpose.msra.mxu0 %v17018_v48 }
0x1cec   :  { %10534 = vmatprep.subr.bf16.mxu1 %v16994_v34  ;;  %10554 = vmatprep.subr.bf16.mxu0 %v16994_v34 }
0x1cf3   :  { %10535 = vmatpush3.bf16.xpose.msra.mxu1 %v17019_v49  ;;  %10555 = vmatpush3.bf16.xpose.msra.mxu0 %v17020_v54 }
0x1cf4   :  { %10536 = vmatprep.subr.bf16.mxu1 %v16994_v34  ;;  %10556 = vmatprep.subr.bf16.mxu0 %v16994_v34 }
0x1cfb   :  { %10537 = vmatpush3.bf16.xpose.msra.mxu1 %v17021_v56  ;;  %10557 = vmatpush3.bf16.xpose.msra.mxu0 %v17022_v58 }
0x1cfc   :  { %10538 = vmatprep.subr.bf16.mxu1 %v16994_v34  ;;  %10558 = vmatprep.subr.bf16.mxu0 %v16994_v34 }
0x1d03   :  { %10539 = vmatpush3.bf16.xpose.msra.mxu1 %v17023_v61  ;;  %10559 = vmatpush3.bf16.xpose.msra.mxu0 %v17024_v62 }
0x1d04   :  { %10540 = vmatprep.subr.bf16.mxu1 %v16994_v34  ;;  %10560 = vmatprep.subr.bf16.mxu0 %v16994_v34 }
0x1d0b   :  { %10541 = vmatpush3.bf16.xpose.msra.mxu1 %v17025_v50  ;;  %10561 = vmatpush3.bf16.xpose.msra.mxu0 %v17026_v38 }
0x1d0c   :  { %10542 = vmatprep.subr.bf16.mxu1 %v16994_v34  ;;  %10562 = vmatprep.subr.bf16.mxu0 %v16994_v34 }
0x1d13   :  { %10543 = vmatpush3.bf16.xpose.msra.mxu1 %v17027_v47  ;;  %10563 = vmatpush3.bf16.xpose.msra.mxu0 %v17028_v60 }
0x1d14   :  { %10544 = vmatprep.subr.bf16.mxu1 %v16994_v34  ;;  %10564 = vmatprep.subr.bf16.mxu0 %v16994_v34 }
0x1d1b   :  { %10545 = vmatpush3.bf16.xpose.msra.mxu1 %v17029_v42  ;;  %10565 = vmatpush3.bf16.xpose.msra.mxu0 %v17030_v18 }
0x1d1c   :  { %10570 = vmatprep.subr.bf16.mxu1 %v16994_v34  ;;  %10590 = vmatprep.subr.bf16.mxu0 %v16994_v34 }
0x1db5   :  { %v14922_v57 = vpop.f32.mrb[128].mxu0 }
0x1db6   :  { %v4852_v35 = vpop.f32.mrb[129].mxu0 }
0x1db7   :  { %v4853_v12 = vadd.f32 %v12059_v41, %v4852_v35  ;;  %v4854_v10 = vpop.f32.mrb[130].mxu0  ;;  %v17145_v35 = vld [vmem:[#allocation52_spill] sm:$0xff]  ;;  %v17146_v41 = vld [vmem:[#allocation53_spill] sm:$0xff] }
0x1db8   :  { %v4855_v5 = vpop.f32.mrb[131].mxu0  ;;  %v17148_v10 = vld [vmem:[#allocation55_spill] sm:$0xff] }
0x1db9   :  { %v4857_v27 = vpack.c.bf16 %v4853_v12, %v4853_v12  ;;  %v17147_v12 = vld [vmem:[#allocation54_spill] sm:$0xff]  ;;  %v17149_v5 = vld [vmem:[#allocation56_spill] sm:$0xff] }
0x1dbb   :  { %v4865_v21 = vrot.slane %v4857_v27, %v17031_v63  ;;  %v17150_v27 = vld [vmem:[#allocation57_spill] sm:$0xff] }
0x1dbd   :  { %v14929_v29 = vrot.slane %v4865_v21, %v17031_v63  ;;  %v4866_v59 = vcombine.high %v4865_v21, %v4865_v21  ;;  %v17151_v21 = vld [vmem:[#allocation58_spill] sm:$0xff] }
0x1dbf   :  { %v4884_v14 = vunpack.i.h.s16 %v14929_v29  ;;  %v8447_v4 = vpack.i.b16 %v14929_v29, %v14929_v29  ;;  %v14970_v37 = vrot.slane %v4866_v59, %v17031_v63  ;;  %v17155_v59 = vld [vmem:[#allocation63_spill] sm:$0xff] }
0x1dc1   :  { %v4895_v46 = vrot.slane %v8447_v4, %v17032_v7  ;;  %v4939_v28 = vpack.i.b16 %v4884_v14, %v4884_v14  ;;  %v4886_v43 = vunpack.i.h.s16 %v14970_v37  ;;  %v8450_v22 = vpack.i.b16 %v14970_v37, %v14970_v37  ;;  %v17152_v14 = vld [vmem:[#allocation59_spill] sm:$0xff]  ;;  %v17153_v4 = vld [vmem:[#allocation60_spill] sm:$0xff] }
0x1dc3   :  { %10547 = vmatmul.mubr.msk.bf16.vlgmr.msra.gmra.mrb[128].mxu1 %vm218_vm1, %v4895_v46  ;;  %v4943_v0 = vrot.slane %v4939_v28, %v17032_v7  ;;  %v5035_v8 = vpack.i.b16 %v4886_v43, %v4886_v43  ;;  %v4991_v16 = vrot.slane %v8450_v22, %v17032_v7  ;;  %v17154_v46 = vld [vmem:[#allocation61_spill] sm:$0xff]  ;;  %v4881_v28 = vcombine.high %v14929_v29, %v14929_v29  ;;  %v17156_v22 = vld [vmem:[#allocation64_spill] sm:$0xff] }
0x1dc4   :  { %10571 = vmatpush3.bf16.xpose.msra.mxu1 %v17033_v15  ;;  %10586 = vmatprep.mubr.msk.bf16.mxu1 %vm12379_vm0, %v16994_v34 }
0x1dc5   :  { %10572 = vmatprep.subr.bf16.mxu1 %v16994_v34  ;;  %10567 = vmatmul.mubr.msk.bf16.vlgmr.msra.gmra.mrb[132].mxu0 %vm218_vm1, %v4943_v0  ;;  %v5039_v6 = vrot.slane %v5035_v8, %v17032_v7  ;;  %v4888_v0 = vunpack.i.h.s16 %v4881_v28  ;;  %v8453_v43 = vpack.i.b16 %v4881_v28, %v4881_v28  ;;  %v17158_v28 = vld [vmem:[#allocation68_spill] sm:$0xff] }
0x1dc6   :  { %10591 = vmatpush3.bf16.xpose.msra.mxu0 %v17034_v20  ;;  %10606 = vmatprep.mubr.msk.bf16.mxu0 %vm12379_vm0, %v16994_v34 }
0x1dc7   :  { %10592 = vmatprep.subr.bf16.mxu0 %v16994_v34  ;;  %v5131_v8 = vpack.i.b16 %v4888_v0, %v4888_v0  ;;  %v17159_v0 = vld [vmem:[#allocation71_spill] sm:$0xff] }
0x1dc9   :  { %v5135_v29 = vrot.slane %v5131_v8, %v17032_v7  ;;  %v17161_v8 = vld [vmem:[#allocation75_spill] sm:$0xff] }
0x1dcc   :  { %10573 = vmatpush3.bf16.xpose.msra.mxu1 %v17035_v17 }
0x1dcd   :  { %10574 = vmatprep.subr.bf16.mxu1 %v16994_v34 }
0x1dce   :  { %10593 = vmatpush3.bf16.xpose.msra.mxu0 %v17036_v3 }
0x1dcf   :  { %10594 = vmatprep.subr.bf16.mxu0 %v16994_v34 }
0x1dd4   :  { %10575 = vmatpush3.bf16.xpose.msra.mxu1 %v17037_v53 }
0x1dd5   :  { %10576 = vmatprep.subr.bf16.mxu1 %v16994_v34 }
0x1dd6   :  { %10595 = vmatpush3.bf16.xpose.msra.mxu0 %v17038_v1 }
0x1dd7   :  { %10596 = vmatprep.subr.bf16.mxu0 %v16994_v34 }
0x1ddc   :  { %10577 = vmatpush3.bf16.xpose.msra.mxu1 %v17039_v9 }
0x1ddd   :  { %10578 = vmatprep.subr.bf16.mxu1 %v16994_v34 }
0x1dde   :  { %10597 = vmatpush3.bf16.xpose.msra.mxu0 %v17040_v13 }
0x1ddf   :  { %10598 = vmatprep.subr.bf16.mxu0 %v16994_v34 }
0x1de4   :  { %10579 = vmatpush3.bf16.xpose.msra.mxu1 %v17041_v51 }
0x1de5   :  { %10580 = vmatprep.subr.bf16.mxu1 %v16994_v34 }
0x1de6   :  { %10599 = vmatpush3.bf16.xpose.msra.mxu0 %v17134_v52 }
0x1de7   :  { %10600 = vmatprep.subr.bf16.mxu0 %v16994_v34 }
0x1dec   :  { %10581 = vmatpush3.bf16.xpose.msra.mxu1 %v17135_v26 }
0x1ded   :  { %10582 = vmatprep.subr.bf16.mxu1 %v16994_v34 }
0x1dee   :  { %10601 = vmatpush3.bf16.xpose.msra.mxu0 %v17136_v25 }
0x1def   :  { %10602 = vmatprep.subr.bf16.mxu0 %v16994_v34 }
0x1df4   :  { %10583 = vmatpush3.bf16.xpose.msra.mxu1 %v17137_v36 }
0x1df5   :  { %10584 = vmatprep.subr.bf16.mxu1 %v16994_v34 }
0x1df6   :  { %10603 = vmatpush3.bf16.xpose.msra.mxu0 %v17138_v31 }
0x1df7   :  { %10604 = vmatprep.subr.bf16.mxu0 %v16994_v34 }
0x1dfc   :  { %10585 = vmatpush3.bf16.xpose.msra.mxu1 %v17139_v30 }
0x1dfd   :  { %10610 = vmatprep.subr.bf16.mxu1 %v16994_v34 }
0x1dfe   :  { %10605 = vmatpush3.bf16.xpose.msra.mxu0 %v17140_v23 }
0x1dff   :  { %10630 = vmatprep.subr.bf16.mxu0 %v16994_v34 }
0x1e03   :  { %10587 = vmatmul.mubr.msk.bf16.vlgmr.msra.gmra.mrb[132].mxu1 %vm218_vm1, %v4991_v16  ;;  %v5087_v16 = vrot.slane %v8453_v43, %v17032_v7  ;;  %v17160_v43 = vld [vmem:[#allocation72_spill] sm:$0xff] }
0x1e04   :  { %10611 = vmatpush3.bf16.xpose.msra.mxu1 %v17141_v24  ;;  %10626 = vmatprep.mubr.msk.bf16.mxu1 %vm12379_vm0, %v16994_v34 }
0x1e05   :  { %10612 = vmatprep.subr.bf16.mxu1 %v16994_v34  ;;  %10607 = vmatmul.mubr.msk.bf16.vlgmr.msra.gmra.mrb[136].mxu0 %vm218_vm1, %v5039_v6  ;;  %v17157_v6 = vld [vmem:[#allocation67_spill] sm:$0xff] }
0x1e06   :  { %10631 = vmatpush3.bf16.xpose.msra.mxu0 %v17142_v11  ;;  %10646 = vmatprep.mubr.msk.bf16.mxu0 %vm12379_vm0, %v16994_v34 }
0x1e07   :  { %10632 = vmatprep.subr.bf16.mxu0 %v16994_v34 }
0x1e0c   :  { %10613 = vmatpush3.bf16.xpose.msra.mxu1 %v17143_v55 }
0x1e0d   :  { %10614 = vmatprep.subr.bf16.mxu1 %v16994_v34 }
0x1e0e   :  { %10633 = vmatpush3.bf16.xpose.msra.mxu0 %v17144_v33  ;;  %v17174_v33 = vld [vmem:[#allocation98_spill] sm:$0xff] }
0x1e0f   :  { %10634 = vmatprep.subr.bf16.mxu0 %v16994_v34 }
0x1e14   :  { %10615 = vmatpush3.bf16.xpose.msra.mxu1 %v17145_v35  ;;  %v17173_v35 = vld [vmem:[#allocation97_spill] sm:$0xff] }
0x1e15   :  { %10616 = vmatprep.subr.bf16.mxu1 %v16994_v34 }
0x1e16   :  { %10635 = vmatpush3.bf16.xpose.msra.mxu0 %v17146_v41 }
0x1e17   :  { %10636 = vmatprep.subr.bf16.mxu0 %v16994_v34 }
0x1e1c   :  { %10617 = vmatpush3.bf16.xpose.msra.mxu1 %v17147_v12 }
0x1e1d   :  { %10618 = vmatprep.subr.bf16.mxu1 %v16994_v34 }
0x1e1e   :  { %10637 = vmatpush3.bf16.xpose.msra.mxu0 %v17148_v10 }
0x1e1f   :  { %10638 = vmatprep.subr.bf16.mxu0 %v16994_v34 }
0x1e24   :  { %10619 = vmatpush3.bf16.xpose.msra.mxu1 %v17149_v5 }
0x1e25   :  { %10620 = vmatprep.subr.bf16.mxu1 %v16994_v34 }
0x1e26   :  { %10639 = vmatpush3.bf16.xpose.msra.mxu0 %v17150_v27 }
0x1e27   :  { %10640 = vmatprep.subr.bf16.mxu0 %v16994_v34 }
0x1e2c   :  { %10621 = vmatpush3.bf16.xpose.msra.mxu1 %v17151_v21 }
0x1e2d   :  { %10622 = vmatprep.subr.bf16.mxu1 %v16994_v34 }
0x1e2e   :  { %10641 = vmatpush3.bf16.xpose.msra.mxu0 %v17152_v14 }
0x1e2f   :  { %10642 = vmatprep.subr.bf16.mxu0 %v16994_v34 }
0x1e34   :  { %10623 = vmatpush3.bf16.xpose.msra.mxu1 %v17153_v4 }
0x1e35   :  { %10624 = vmatprep.subr.bf16.mxu1 %v16994_v34 }
0x1e36   :  { %10643 = vmatpush3.bf16.xpose.msra.mxu0 %v17154_v46 }
0x1e37   :  { %10644 = vmatprep.subr.bf16.mxu0 %v16994_v34 }
0x1e3c   :  { %10625 = vmatpush3.bf16.xpose.msra.mxu1 %v17155_v59 }
0x1e3d   :  { %10650 = vmatprep.subr.bf16.mxu1 %v16994_v34 }
0x1e3e   :  { %10645 = vmatpush3.bf16.xpose.msra.mxu0 %v17156_v22 }
0x1e3f   :  { %10670 = vmatprep.subr.bf16.mxu0 %v16994_v34 }
0x1e43   :  { %10627 = vmatmul.mubr.msk.bf16.vlgmr.msra.gmra.mrb[136].mxu1 %vm218_vm1, %v5087_v16  ;;  %v17162_v16 = vld [vmem:[#allocation76_spill] sm:$0xff] }
0x1e44   :  { %10651 = vmatpush3.bf16.xpose.msra.mxu1 %v17157_v6  ;;  %10666 = vmatprep.mubr.msk.bf16.mxu1 %vm12379_vm0, %v16994_v34  ;;  %v17171_v6 = vld [vmem:[#allocation95_spill] sm:$0xff] }
0x1e45   :  { %10652 = vmatprep.subr.bf16.mxu1 %v16994_v34  ;;  %10647 = vmatmul.mubr.msk.bf16.vlgmr.msra.gmra.mrb[140].mxu0 %vm218_vm1, %v5135_v29  ;;  %v17163_v29 = vld [vmem:[#allocation79_spill] sm:$0xff] }
0x1e46   :  { %10671 = vmatpush3.bf16.xpose.msra.mxu0 %v17158_v28  ;;  %10686 = vmatprep.mubr.msk.bf16.mxu0 %vm12379_vm0, %v16994_v34  ;;  %v17164_v28 = vld [vmem:[#allocation80_spill] sm:$0xff] }
0x1e47   :  { %10672 = vmatprep.subr.bf16.mxu0 %v16994_v34 }
0x1e4c   :  { %10653 = vmatpush3.bf16.xpose.msra.mxu1 %v17159_v0  ;;  %v17165_v0 = vld [vmem:[#allocation83_spill] sm:$0xff] }
0x1e4d   :  { %10654 = vmatprep.subr.bf16.mxu1 %v16994_v34 }
0x1e4e   :  { %10673 = vmatpush3.bf16.xpose.msra.mxu0 %v17160_v43  ;;  %v17166_v43 = vld [vmem:[#allocation84_spill] sm:$0xff] }
0x1e4f   :  { %10674 = vmatprep.subr.bf16.mxu0 %v16994_v34 }
0x1e54   :  { %10655 = vmatpush3.bf16.xpose.msra.mxu1 %v17161_v8  ;;  %v17167_v8 = vld [vmem:[#allocation87_spill] sm:$0xff] }
0x1e55   :  { %10656 = vmatprep.subr.bf16.mxu1 %v16994_v34 }
0x1e56   :  { %10675 = vmatpush3.bf16.xpose.msra.mxu0 %v17162_v16  ;;  %v17168_v16 = vld [vmem:[#allocation88_spill] sm:$0xff] }
0x1e57   :  { %10676 = vmatprep.subr.bf16.mxu0 %v16994_v34 }
0x1e5c   :  { %10657 = vmatpush3.bf16.xpose.msra.mxu1 %v17163_v29  ;;  %v17169_v29 = vld [vmem:[#allocation91_spill] sm:$0xff] }
0x1e5d   :  { %10658 = vmatprep.subr.bf16.mxu1 %v16994_v34 }
0x1e5e   :  { %10677 = vmatpush3.bf16.xpose.msra.mxu0 %v17164_v28  ;;  %v17170_v28 = vld [vmem:[#allocation92_spill] sm:$0xff] }
0x1e5f   :  { %10678 = vmatprep.subr.bf16.mxu0 %v16994_v34 }
0x1e64   :  { %10659 = vmatpush3.bf16.xpose.msra.mxu1 %v17165_v0  ;;  %v4882_v0 = vcombine.high %v14970_v37, %v14970_v37  ;;  %v12060_v37 = vld [vmem:[%s16721_s3] sm:$0xff]  }
0x1e65   :  { %10660 = vmatprep.subr.bf16.mxu1 %v16994_v34 }
0x1e66   :  { %10679 = vmatpush3.bf16.xpose.msra.mxu0 %v17166_v43  ;;  %v4890_v43 = vunpack.i.h.s16 %v4882_v0 }
0x1e67   :  { %10680 = vmatprep.subr.bf16.mxu0 %v16994_v34 }
0x1e68   :  { %v5227_v22 = vpack.i.b16 %v4890_v43, %v4890_v43  ;;  %v12064_v43 = vld [vmem:[%s16721_s3 + $0x10] sm:$0xff]  }
0x1e6c   :  { %10661 = vmatpush3.bf16.xpose.msra.mxu1 %v17167_v8  ;;  %v8456_v8 = vpack.i.b16 %v4882_v0, %v4882_v0  ;;  %v12061_v0 = vld [vmem:[%s16721_s3 + $0x40] sm:$0xff]  }
0x1e6d   :  { %10662 = vmatprep.subr.bf16.mxu1 %v16994_v34 }
0x1e6e   :  { %10681 = vmatpush3.bf16.xpose.msra.mxu0 %v17168_v16  ;;  %v17172_v16 = vld [vmem:[#allocation96_spill] sm:$0xff] }
0x1e6f   :  { %10682 = vmatprep.subr.bf16.mxu0 %v16994_v34 }
0x1e74   :  { %10663 = vmatpush3.bf16.xpose.msra.mxu1 %v17169_v29  ;;  %v5183_v29 = vrot.slane %v8456_v8, %v17032_v7  ;;  %v12065_v8 = vld [vmem:[%s16721_s3 + $0x50] sm:$0xff]  }
0x1e75   :  { %10664 = vmatprep.subr.bf16.mxu1 %v16994_v34 }
0x1e76   :  { %10683 = vmatpush3.bf16.xpose.msra.mxu0 %v17170_v28  ;;  %v5231_v28 = vrot.slane %v5227_v22, %v17032_v7  ;;  %v12062_v22 = vld [vmem:[%s16721_s3 + $0x8] sm:$0xff]  }
0x1e77   :  { %10684 = vmatprep.subr.bf16.mxu0 %v16994_v34 }
0x1e7c   :  { %10665 = vmatpush3.bf16.xpose.msra.mxu1 %v17171_v6 }
0x1e7d   :  { %10690 = vmatprep.subr.bf16.mxu1 %v16994_v34 }
0x1e7e   :  { %10685 = vmatpush3.bf16.xpose.msra.mxu0 %v17172_v16 }
0x1e7f   :  { %10710 = vmatprep.subr.bf16.mxu0 %v16994_v34 }
0x1e83   :  { %10667 = vmatmul.mubr.msk.bf16.vlgmr.msra.gmra.mrb[140].mxu1 %vm218_vm1, %v5183_v29  ;;  %v12066_v29 = vld [vmem:[%s16721_s3 + $0x18] sm:$0xff]  }
0x1e84   :  { %10691 = vmatpush3.bf16.msra.mxu1 %v12060_v37  ;;  %10706 = vmatprep.mubr.msk.bf16.mxu1 %vm12379_vm0, %v16994_v34  ;;  %v12067_v37 = vld [vmem:[%s16721_s3 + $0x58] sm:$0xff]  }
0x1e85   :  { %10692 = vmatprep.subr.bf16.mxu1 %v16994_v34  ;;  %10687 = vmatmul.mubr.msk.bf16.vlgmr.msra.gmra.mrb[144].mxu0 %vm218_vm1, %v5231_v28  ;;  %v12063_v28 = vld [vmem:[%s16721_s3 + $0x48] sm:$0xff]  }
0x1e86   :  { %10711 = vmatpush3.bf16.msra.mxu0 %v12061_v0  ;;  %10726 = vmatprep.mubr.msk.bf16.mxu0 %vm12379_vm0, %v16994_v34  ;;  %v12068_v0 = vld [vmem:[%s16721_s3 + $0x20] sm:$0xff]  }
0x1e87   :  { %10712 = vmatprep.subr.bf16.mxu0 %v16994_v34 }
0x1e88   :  { %10693 = vmatpush3.bf16.msra.mxu1 %v12062_v22 }
0x1e89   :  { %10694 = vmatprep.subr.bf16.mxu1 %v16994_v34 }
0x1e8a   :  { %10713 = vmatpush3.bf16.msra.mxu0 %v12063_v28 }
0x1e8b   :  { %10714 = vmatprep.subr.bf16.mxu0 %v16994_v34 }
0x1e8c   :  { %10695 = vmatpush3.bf16.msra.mxu1 %v12064_v43  ;;  %v12069_v43 = vld [vmem:[%s16721_s3 + $0x60] sm:$0xff]  }
0x1e8d   :  { %10696 = vmatprep.subr.bf16.mxu1 %v16994_v34 }
0x1e8e   :  { %10715 = vmatpush3.bf16.msra.mxu0 %v12065_v8 }
0x1e8f   :  { %10716 = vmatprep.subr.bf16.mxu0 %v16994_v34 }
0x1e90   :  { %10697 = vmatpush3.bf16.msra.mxu1 %v12066_v29  ;;  %v12070_v29 = vld [vmem:[%s16721_s3 + $0x28] sm:$0xff]  }
0x1e91   :  { %10698 = vmatprep.subr.bf16.mxu1 %v16994_v34 }
0x1e92   :  { %10717 = vmatpush3.bf16.msra.mxu0 %v12067_v37 }
0x1e93   :  { %10718 = vmatprep.subr.bf16.mxu0 %v16994_v34 }
0x1e94   :  { %10699 = vmatpush3.bf16.msra.mxu1 %v12068_v0 }
0x1e95   :  { %10700 = vmatprep.subr.bf16.mxu1 %v16994_v34 }
0x1e96   :  { %v4933_v22 = vpop.f32.mrb[128].mxu1  ;;  %10719 = vmatpush3.bf16.msra.mxu0 %v12069_v43 }
0x1e97   :  { %v10548_v28 = vpop.f32.mrb[129].mxu1  ;;  %10720 = vmatprep.subr.bf16.mxu0 %v16994_v34 }
0x1e98   :  { %v4936_v8 = vpop.f32.mrb[130].mxu1  ;;  %10701 = vmatpush3.bf16.msra.mxu1 %v12070_v29  ;;  %v4981_v37 = vpop.f32.mrb[132].mxu0  ;;  %v12071_v28 = vld [vmem:[%s16721_s3 + $0x68] sm:$0xff]   ;;  %v12075_v29 = vld [vmem:[%s16721_s3 + $0x78] sm:$0xff]  }
0x1e99   :  { %v10549_v0 = vpop.f32.mrb[131].mxu1  ;;  %10702 = vmatprep.subr.bf16.mxu1 %v16994_v34  ;;  %v10568_v16 = vpop.f32.mrb[133].mxu0  ;;  %v12072_v8 = vld [vmem:[%s16721_s3 + $0x30] sm:$0xff]  }
0x1e9a   :  { %v4984_v6 = vpop.f32.mrb[134].mxu0  ;;  %10721 = vmatpush3.bf16.msra.mxu0 %v12071_v28  ;;  %v12073_v16 = vld [vmem:[%s16721_s3 + $0x70] sm:$0xff]  }
0x1e9b   :  { %v10569_v43 = vpop.f32.mrb[135].mxu0  ;;  %10722 = vmatprep.subr.bf16.mxu0 %v16994_v34  ;;  %v12074_v6 = vld [vmem:[%s16721_s3 + $0x38] sm:$0xff]  }
0x1e9c   :  { %10703 = vmatpush3.bf16.msra.mxu1 %v12072_v8 }
0x1e9d   :  { %10704 = vmatprep.subr.bf16.mxu1 %v16994_v34 }
0x1e9e   :  { %10723 = vmatpush3.bf16.msra.mxu0 %v12073_v16 }
0x1e9f   :  { %10724 = vmatprep.subr.bf16.mxu0 %v16994_v34 }
0x1ea0   :  { %10705 = vmatpush3.bf16.msra.mxu1 %v12074_v6 }
0x1ea1   :  { %10730 = vmatprep.subr.bf16.mxu1 %v16994_v34 }
0x1ea2   :  { %10725 = vmatpush3.bf16.msra.mxu0 %v12075_v29  ;;  %v5284_v29 = vadd.f32 %v4981_v37, %v17173_v35 }
0x1ea3   :  { %10750 = vmatprep.subr.bf16.mxu0 %v16994_v34 }
0x1ea4   :  { %v5299_v11 = vrot.slane %v5284_v29, 7 }
0x1ed6   :  { %v5029_v0 = vpop.f32.mrb[132].mxu1 }
0x1ed7   :  { %v10588_v28 = vpop.f32.mrb[133].mxu1  ;;  %v5285_v55 = vadd.f32 %v5029_v0, %v17174_v33 }
0x1ed8   :  { %v5032_v43 = vpop.f32.mrb[134].mxu1  ;;  %v5077_v8 = vpop.f32.mrb[136].mxu0  ;;  %v17175_v28 = vld [vmem:[#allocation99_spill] sm:$0xff] }
0x1ed9   :  { %v10589_v16 = vpop.f32.mrb[135].mxu1  ;;  %v10608_v59 = vpop.f32.mrb[137].mxu0  ;;  %v5286_v43 = vadd.f32 %v5077_v8, %v17175_v28  ;;  %v5301_v24 = vrot.slane %v5285_v55, 6 }
0x1eda   :  { %v5080_v46 = vpop.f32.mrb[138].mxu0  ;;  %v17176_v16 = vld [vmem:[#allocation100_spill] sm:$0xff] }
0x1edb   :  { %v10609_v4 = vpop.f32.mrb[139].mxu0 }
0x1f16   :  { %v5125_v6 = vpop.f32.mrb[136].mxu1 }
0x1f17   :  { %v10628_v14 = vpop.f32.mrb[137].mxu1  ;;  %v5287_v59 = vadd.f32 %v5125_v6, %v17176_v16  ;;  %v17178_v6 = vld [vmem:[#allocation102_spill] sm:$0xff] }
0x1f18   :  { %v5128_v21 = vpop.f32.mrb[138].mxu1  ;;  %v5173_v27 = vpop.f32.mrb[140].mxu0  ;;  %v12076_v14 = vld [vmem:[%s16729_s11] sm:$0xff] }
0x1f19   :  { %v10629_v5 = vpop.f32.mrb[139].mxu1  ;;  %v10648_v10 = vpop.f32.mrb[141].mxu0  ;;  %v5283_v21 = vadd.f32 %v12076_v14, %v4933_v22  ;;  %v5305_v46 = vrot.slane %v5287_v59, 4 }
0x1f1a   :  { %v5176_v12 = vpop.f32.mrb[142].mxu0  ;;  %v5303_v10 = vrot.slane %v5286_v43, 5 }
0x1f1b   :  { %v10649_v41 = vpop.f32.mrb[143].mxu0  ;;  %v5300_v5 = vsel %vm1556_vm2, %v5299_v11, %v5283_v21  ;;  %v17177_v12 = vld [vmem:[#allocation101_spill] sm:$0xff]  ;;  %v17179_v11 = vld [vmem:[#allocation103_spill] sm:$0xff] }
0x1f1c   :  { %v5288_v41 = vadd.f32 %v5173_v27, %v17177_v12  ;;  %v5302_v4 = vsel %vm1559_vm3, %v5301_v24, %v5300_v5 }
0x1f1d   :  { %v5304_v37 = vsel %vm1562_vm4, %v5303_v10, %v5302_v4 }
0x1f1e   :  { %v5307_v0 = vrot.slane %v5288_v41, 3  ;;  %v5306_v28 = vsel %vm1565_vm5, %v5305_v46, %v5304_v37 }
0x1f20   :  { %v5308_v27 = vsel %vm1568_vm6, %v5307_v0, %v5306_v28 }
0x1f56   :  { %v5221_v8 = vpop.f32.mrb[140].mxu1 }
0x1f57   :  { %v5289_v16 = vadd.f32 %v5221_v8, %v17178_v6  ;;  %v10668_v33 = vpop.f32.mrb[141].mxu1 }
0x1f58   :  { %v5224_v35 = vpop.f32.mrb[142].mxu1  ;;  %v5269_v22 = vpop.f32.mrb[144].mxu0  ;;  %v8460_v33 = vld [vmem:[%s16718_s0 + $0x20] sm:$0xff] }
0x1f59   :  { %v5309_v23 = vrot.slane %v5289_v16, 2  ;;  %v10669_v14 = vpop.f32.mrb[143].mxu1  ;;  %v5290_v30 = vadd.f32 %v5269_v22, %v17179_v11  ;;  %v10688_v31 = vpop.f32.mrb[145].mxu0  ;;  %v5854_v35 = vadd.f32 %v8460_v33, %v14867_v32 }
0x1f5a   :  { %v5272_v24 = vpop.f32.mrb[146].mxu0 }
0x1f5b   :  { %v5310_v5 = vsel %vm1571_vm7, %v5309_v23, %v5308_v27  ;;  %v5311_v10 = vrot.slane %v5290_v30, 1  ;;  %v10689_v4 = vpop.f32.mrb[147].mxu0  ;;  %11796 = vtanh.f32 %v5854_v35 }
0x1f5d   :  { %v5312_v12 = vsel %vm1574_vm8, %v5311_v10, %v5310_v5 }
0x1f5e   :  { %5314 = vmax.xlane.f32.xlu0 %v5312_v12 }
0x1f65   :  { %v11797_v46 = vpop.eup %11796 }
0x1f74   :  { %5864 = vrot.lane.b32.xlu0 %v11797_v46, %s12380_s26 }
0x1feb   :  { %v5315_v31 = vpop.xlane.xlu0 %5314 }
0x1fec   :  { %v5317_v28 = vrot.slane %v5315_v31, 1  ;;  %v5318_v37 = vrot.slane %v5315_v31, 2  ;;  %v5319_v0 = vrot.slane %v5315_v31, 3  ;;  %v5320_v23 = vrot.slane %v5315_v31, 4 }
0x1fed   :  { %v5321_v8 = vrot.slane %v5315_v31, 5  ;;  %v5322_v22 = vrot.slane %v5315_v31, 6  ;;  %v5332_v14 = vsub.f32 %v5283_v21, %v5315_v31  ;;  %v5323_v27 = vrot.slane %v5315_v31, 7 }
0x1fee   :  { %v5333_v12 = vsub.f32 %v5284_v29, %v5317_v28  ;;  %v5334_v24 = vsub.f32 %v5285_v55, %v5318_v37  ;;  %v5335_v5 = vsub.f32 %v5286_v43, %v5319_v0  ;;  %v5336_v10 = vsub.f32 %v5287_v59, %v5320_v23 }
0x1fef   :  { %v5340_v4 = vmul.f32 1.442695, %v5332_v14  ;;  %v5337_v11 = vsub.f32 %v5288_v41, %v5321_v8  ;;  %v5338_v32 = vsub.f32 %v5289_v16, %v5322_v22  ;;  %v5339_v46 = vsub.f32 %v5290_v30, %v5323_v27 }
0x1ff0   :  { %v5342_v33 = vmul.f32 1.442695, %v5333_v12  ;;  %v5344_v6 = vmul.f32 1.442695, %v5334_v24  ;;  %v5346_v36 = vmul.f32 1.442695, %v5335_v5  ;;  %v5865_v5 = vpop.permute.xlu0 %5864 }
0x1ff1   :  { %11798 = vpow2.f32 %v5340_v4  ;;  %v5348_v25 = vmul.f32 1.442695, %v5336_v10  ;;  %v5350_v26 = vmul.f32 1.442695, %v5337_v11  ;;  %v5352_v52 = vmul.f32 1.442695, %v5338_v32 }
0x1ff2   :  { %11800 = vpow2.f32 %v5342_v33  ;;  %v5354_v21 = vmul.f32 1.442695, %v5339_v46  ;;  %v8461_v31 = vmul.f32 -1.442695, %v5854_v35 }
0x1ff3   :  { %11802 = vpow2.f32 %v5344_v6 }
0x1ff4   :  { %11804 = vpow2.f32 %v5346_v36 }
0x1ff5   :  { %11806 = vpow2.f32 %v5348_v25 }
0x1ff6   :  { %11808 = vpow2.f32 %v5350_v26 }
0x1ff7   :  { %11810 = vpow2.f32 %v5352_v52 }
0x1ff8   :  { %11812 = vpow2.f32 %v5354_v21 }
0x1ff9   :  { %11814 = vpow2.f32 %v8461_v31 }
0x1ffb   :  { %v11799_v55 = vpop.eup %11798 }
0x1ffc   :  { %v11801_v29 = vpop.eup %11800 }
0x1ffd   :  { %v11803_v43 = vpop.eup %11802  ;;  %v5364_v16 = vrot.slane %v11801_v29, 7 }
0x1ffe   :  { %v11805_v59 = vpop.eup %11804  ;;  %v5366_v30 = vrot.slane %v11803_v43, 6 }
0x1fff   :  { %v11807_v41 = vpop.eup %11806  ;;  %v5365_v28 = vsel %vm1556_vm2, %v5364_v16, %v11799_v55  ;;  %v5368_v11 = vrot.slane %v11805_v59, 5 }
0x2000   :  { %v11809_v6 = vpop.eup %11808  ;;  %v5367_v36 = vsel %vm1559_vm3, %v5366_v30, %v5365_v28  ;;  %v5370_v37 = vrot.slane %v11807_v41, 4 }
0x2001   :  { %v11811_v35 = vpop.eup %11810  ;;  %v5369_v26 = vsel %vm1562_vm4, %v5368_v11, %v5367_v36  ;;  %v5372_v52 = vrot.slane %v11809_v6, 3 }
0x2002   :  { %v11813_v25 = vpop.eup %11812  ;;  %v5371_v0 = vsel %vm1565_vm5, %v5370_v37, %v5369_v26  ;;  %v5374_v23 = vrot.slane %v11811_v35, 2 }
0x2003   :  { %v11815_v8 = vpop.eup %11814  ;;  %v5373_v22 = vsel %vm1568_vm6, %v5372_v52, %v5371_v0  ;;  %v5376_v14 = vrot.slane %v11813_v25, 1 }
0x2004   :  { %v5375_v27 = vsel %vm1571_vm7, %v5374_v23, %v5373_v22  ;;  %v5858_v24 = vadd.f32 1.0, %v11815_v8 }
0x2005   :  { %v5377_v12 = vsel %vm1574_vm8, %v5376_v14, %v5375_v27 }
0x2006   :  { %5379 = vadd.xlane.f32.xlu1 %v5377_v12  ;;  %11816 = vrcp.f32 %v5858_v24 }
0x2010   :  { %v15165_v10 = vpop.eup %11816 }
0x2011   :  { %v5867_v4 = vmul.f32 %v15165_v10, %v5865_v5  ;;  %v5862_v33 = vmul.f32 %v15165_v10, %v14553_v2  ;;  %v12077_v5 = vld [vmem:[%s16721_s3 + $0x80] sm:$0xff]  }
0x2017   :  { %5869 = vrot.lane.b32.xlu1 %v5867_v4, %s12381_s29 }
0x2093   :  { %v5380_v32 = vpop.xlane.xlu1 %5379 }
0x2094   :  { %11818 = vrcp.f32 %v5380_v32 }
0x2097   :  { %v5870_v46 = vpop.permute.xlu1 %5869 }
0x2098   :  { %v15171_v21 = vadd.f32 %v5870_v46, %v5862_v33  ;;  %v12079_v33 = vld [vmem:[%s16721_s3 + $0x88] sm:$0xff]  }
0x209a   :  { %11820 = vtanh.f32 %v15171_v21 }
0x209e   :  { %v11819_v31 = vpop.eup %11818 }
0x209f   :  { %v5398_v16 = vmul.f32 %v11819_v31, %v11799_v55  ;;  %v5383_v30 = vrot.slane %v11819_v31, 1  ;;  %v5384_v28 = vrot.slane %v11819_v31, 2  ;;  %v5385_v11 = vrot.slane %v11819_v31, 3 }
0x20a0   :  { %v5386_v36 = vrot.slane %v11819_v31, 4  ;;  %v5387_v37 = vrot.slane %v11819_v31, 5  ;;  %v5388_v26 = vrot.slane %v11819_v31, 6  ;;  %v5389_v52 = vrot.slane %v11819_v31, 7 }
0x20a1   :  { %v5406_v0 = vpack.c.bf16 %v5398_v16, %v5398_v16  ;;  %v5399_v23 = vmul.f32 %v11801_v29, %v5383_v30  ;;  %v15174_v8 = vmul.f32 %v11803_v43, %v5384_v28  ;;  %v15176_v22 = vmul.f32 %v11805_v59, %v5385_v11  ;;  %v12080_v28 = vld [vmem:[%s16721_s3 + $0xc8] sm:$0xff]  }
0x20a2   :  { %v15178_v2 = vmul.f32 %v11807_v41, %v5386_v36  ;;  %v15181_v12 = vmul.f32 %v11809_v6, %v5387_v37  ;;  %v15188_v29 = vmul.f32 %v11811_v35, %v5388_v26  ;;  %v15193_v41 = vmul.f32 %v11813_v25, %v5389_v52  ;;  %v12078_v6 = vld [vmem:[%s16721_s3 + $0xc0] sm:$0xff]   ;;  %v12081_v37 = vld [vmem:[%s16721_s3 + $0x90] sm:$0xff]   ;;  %v12083_v52 = vld [vmem:[%s16721_s3 + $0x98] sm:$0xff]  }
0x20a3   :  { %10707 = vmatmul.mubr.bf16.vlgmr.msra.gmra.mrb[144].mxu1 %v5406_v0  ;;  %v5407_v14 = vpack.c.bf16 %v5399_v23, %v5399_v23  ;;  %v5835_v27 = vrot.slane %v5399_v23, 7  ;;  %v5837_v55 = vrot.slane %v15174_v8, 6  ;;  %v5839_v59 = vrot.slane %v15176_v22, 5  ;;  %v12082_v26 = vld [vmem:[%s16721_s3 + $0xd0] sm:$0xff]   ;;  %v12084_v0 = vld [vmem:[%s16721_s3 + $0xd8] sm:$0xff]   ;;  %v12085_v23 = vld [vmem:[%s16721_s3 + $0xa0] sm:$0xff]  }
0x20a4   :  { %v11821_v24 = vpop.eup %11820  ;;  %10731 = vmatpush3.bf16.msra.mxu1 %v12077_v5  ;;  %10746 = vmatprep.mubr.msk.bf16.mxu1 %vm12379_vm0, %v16994_v34  ;;  %v5841_v35 = vrot.slane %v15178_v2, 4  ;;  %v5843_v25 = vrot.slane %v15181_v12, 3  ;;  %v5845_v31 = vrot.slane %v15188_v29, 2  ;;  %v5847_v30 = vrot.slane %v15193_v41, 1  ;;  %v12090_v5 = vld [vmem:[%s16721_s3 + $0xf0] sm:$0xff]  }
0x20a5   :  { %10727 = vmatmul.mubr.bf16.vlgmr.msra.gmra.mrb[148].mxu0 %v5407_v14  ;;  %v5836_v43 = vsel %vm1556_vm2, %v5835_v27, %v5398_v16  ;;  %5875 = vrot.lane.b32.xlu0 %v11821_v24, %s12380_s26  ;;  %v12086_v14 = vld [vmem:[%s16721_s3 + $0xe0] sm:$0xff]   ;;  %v12087_v27 = vld [vmem:[%s16721_s3 + $0xa8] sm:$0xff]   ;;  %v12089_v24 = vld [vmem:[%s16721_s3 + $0xb0] sm:$0xff]  }
0x20a6   :  { %10751 = vmatpush3.bf16.msra.mxu0 %v12078_v6  ;;  %10732 = vmatprep.subr.bf16.mxu1 %v16994_v34  ;;  %v5838_v4 = vsel %vm1559_vm3, %v5837_v55, %v5836_v43  ;;  %v12088_v55 = vld [vmem:[%s16721_s3 + $0xe8] sm:$0xff]   ;;  %v12091_v43 = vld [vmem:[%s16721_s3 + $0xb8] sm:$0xff]  }
0x20a7   :  { %10752 = vmatprep.subr.bf16.mxu0 %v16994_v34  ;;  %10766 = vmatprep.mubr.msk.bf16.mxu0 %vm12379_vm0, %v16994_v34  ;;  %v5840_v32 = vsel %vm1562_vm4, %v5839_v59, %v5838_v4  ;;  %v5408_v59 = vpack.c.bf16 %v15174_v8, %v15174_v8  ;;  %v12092_v6 = vld [vmem:[%s16721_s3 + $0xf8] sm:$0xff]   ;;  %v5409_v4 = vpack.c.bf16 %v15176_v22, %v15176_v22  ;;  %v12094_v8 = vld [vmem:[%s16721_s3 + $0x140] sm:$0xff]   ;;  %v12095_v22 = vld [vmem:[%s16721_s3 + $0x108] sm:$0xff]  }
0x20a8   :  { %10733 = vmatpush3.bf16.msra.mxu1 %v12079_v33  ;;  %v5842_v46 = vsel %vm1565_vm5, %v5841_v35, %v5840_v32  ;;  %v12093_v35 = vld [vmem:[%s16721_s3 + $0x100] sm:$0xff]   ;;  %v12096_v32 = vld [vmem:[%s16721_s3 + $0x148] sm:$0xff]   ;;  %v12098_v33 = vld [vmem:[%s16721_s3 + $0x150] sm:$0xff]  }
0x20a9   :  { %10734 = vmatprep.subr.bf16.mxu1 %v16994_v34  ;;  %v5844_v16 = vsel %vm1568_vm6, %v5843_v25, %v5842_v46  ;;  %v12097_v25 = vld [vmem:[%s16721_s3 + $0x110] sm:$0xff]   ;;  %v12099_v46 = vld [vmem:[%s16721_s3 + $0x118] sm:$0xff]  }
0x20aa   :  { %10753 = vmatpush3.bf16.msra.mxu0 %v12080_v28  ;;  %v5846_v11 = vsel %vm1571_vm7, %v5845_v31, %v5844_v16  ;;  %v12100_v31 = vld [vmem:[%s16721_s3 + $0x158] sm:$0xff]   ;;  %v12101_v16 = vld [vmem:[%s16721_s3 + $0x120] sm:$0xff]   ;;  %v12103_v28 = vld [vmem:[%s16721_s3 + $0x128] sm:$0xff]  }
0x20ab   :  { %10754 = vmatprep.subr.bf16.mxu0 %v16994_v34  ;;  %v5848_v36 = vsel %vm1574_vm8, %v5847_v30, %v5846_v11  ;;  %v12102_v30 = vld [vmem:[%s16721_s3 + $0x160] sm:$0xff]   ;;  %v12104_v11 = vld [vmem:[%s16721_s3 + $0x168] sm:$0xff]  }
0x20ac   :  { %10735 = vmatpush3.bf16.msra.mxu1 %v12081_v37  ;;  %5851 = vst [vmem:[#allocation4 + $0x18] sm:$0xff] %v5848_v36  ;;  %v12105_v36 = vld [vmem:[%s16721_s3 + $0x130] sm:$0xff]  }
0x20ad   :  { %10736 = vmatprep.subr.bf16.mxu1 %v16994_v34  ;;  %v12106_v37 = vld [vmem:[%s16721_s3 + $0x170] sm:$0xff]  }
0x20ae   :  { %10755 = vmatpush3.bf16.msra.mxu0 %v12082_v26  ;;  %v12107_v26 = vld [vmem:[%s16721_s3 + $0x138] sm:$0xff]  }
0x20af   :  { %10756 = vmatprep.subr.bf16.mxu0 %v16994_v34 }
0x20b0   :  { %10737 = vmatpush3.bf16.msra.mxu1 %v12083_v52  ;;  %v5410_v52 = vpack.c.bf16 %v15178_v2, %v15178_v2  ;;  %v12110_v2 = vld [vmem:[%s16721_s3 + $0x1c0] sm:$0xff]  }
0x20b1   :  { %10738 = vmatprep.subr.bf16.mxu1 %v16994_v34 }
0x20b2   :  { %10757 = vmatpush3.bf16.msra.mxu0 %v12084_v0  ;;  %v12108_v0 = vld [vmem:[%s16721_s3 + $0x178] sm:$0xff]  }
0x20b3   :  { %10758 = vmatprep.subr.bf16.mxu0 %v16994_v34 }
0x20b4   :  { %10739 = vmatpush3.bf16.msra.mxu1 %v12085_v23  ;;  %v5411_v23 = vpack.c.bf16 %v15181_v12, %v15181_v12  ;;  %v12111_v12 = vld [vmem:[%s16721_s3 + $0x188] sm:$0xff]  }
0x20b5   :  { %10740 = vmatprep.subr.bf16.mxu1 %v16994_v34 }
0x20b6   :  { %10759 = vmatpush3.bf16.msra.mxu0 %v12086_v14  ;;  %v12109_v14 = vld [vmem:[%s16721_s3 + $0x180] sm:$0xff]  }
0x20b7   :  { %10760 = vmatprep.subr.bf16.mxu0 %v16994_v34 }
0x20b8   :  { %10741 = vmatpush3.bf16.msra.mxu1 %v12087_v27  ;;  %v12112_v27 = vld [vmem:[%s16721_s3 + $0x1c8] sm:$0xff]  }
0x20b9   :  { %10742 = vmatprep.subr.bf16.mxu1 %v16994_v34 }
0x20ba   :  { %10761 = vmatpush3.bf16.msra.mxu0 %v12088_v55  ;;  %v12113_v55 = vld [vmem:[%s16721_s3 + $0x190] sm:$0xff]  }
0x20bb   :  { %10762 = vmatprep.subr.bf16.mxu0 %v16994_v34 }
0x20bc   :  { %10743 = vmatpush3.bf16.msra.mxu1 %v12089_v24  ;;  %v12114_v24 = vld [vmem:[%s16721_s3 + $0x1d0] sm:$0xff]  }
0x20bd   :  { %10744 = vmatprep.subr.bf16.mxu1 %v16994_v34 }
0x20be   :  { %10763 = vmatpush3.bf16.msra.mxu0 %v12090_v5  ;;  %v12115_v5 = vld [vmem:[%s16721_s3 + $0x198] sm:$0xff]  }
0x20bf   :  { %10764 = vmatprep.subr.bf16.mxu0 %v16994_v34 }
0x20c0   :  { %10745 = vmatpush3.bf16.msra.mxu1 %v12091_v43  ;;  %v12116_v43 = vld [vmem:[%s16721_s3 + $0x1d8] sm:$0xff]  }
0x20c1   :  { %10770 = vmatprep.subr.bf16.mxu1 %v16994_v34 }
0x20c2   :  { %10765 = vmatpush3.bf16.msra.mxu0 %v12092_v6  ;;  %v12118_v6 = vld [vmem:[%s16721_s3 + $0x1e0] sm:$0xff]  }
0x20c3   :  { %10747 = vmatmul.mubr.bf16.vlgmr.msra.gmra.mrb[148].mxu1 %v5408_v59  ;;  %10790 = vmatprep.subr.bf16.mxu0 %v16994_v34  ;;  %v12117_v59 = vld [vmem:[%s16721_s3 + $0x1a0] sm:$0xff]  }
0x20c4   :  { %10771 = vmatpush3.bf16.msra.mxu1 %v12093_v35  ;;  %10786 = vmatprep.mubr.msk.bf16.mxu1 %vm12379_vm0, %v16994_v34  ;;  %v12120_v35 = vld [vmem:[%s16721_s3 + $0x1e8] sm:$0xff]  }
0x20c5   :  { %10767 = vmatmul.mubr.bf16.vlgmr.msra.gmra.mrb[152].mxu0 %v5409_v4  ;;  %10772 = vmatprep.subr.bf16.mxu1 %v16994_v34  ;;  %v12119_v4 = vld [vmem:[%s16721_s3 + $0x1a8] sm:$0xff]  }
0x20c6   :  { %10791 = vmatpush3.bf16.msra.mxu0 %v12094_v8  ;;  %10806 = vmatprep.mubr.msk.bf16.mxu0 %vm12379_vm0, %v16994_v34  ;;  %v12121_v8 = vld [vmem:[%s16721_s3 + $0x1b0] sm:$0xff]  }
0x20c7   :  { %10792 = vmatprep.subr.bf16.mxu0 %v16994_v34 }
0x20c8   :  { %10773 = vmatpush3.bf16.msra.mxu1 %v12095_v22  ;;  %v12122_v22 = vld [vmem:[%s16721_s3 + $0x1f0] sm:$0xff]  }
0x20c9   :  { %10774 = vmatprep.subr.bf16.mxu1 %v16994_v34 }
0x20ca   :  { %10793 = vmatpush3.bf16.msra.mxu0 %v12096_v32  ;;  %v12123_v32 = vld [vmem:[%s16721_s3 + $0x1b8] sm:$0xff]  }
0x20cb   :  { %10794 = vmatprep.subr.bf16.mxu0 %v16994_v34 }
0x20cc   :  { %10775 = vmatpush3.bf16.msra.mxu1 %v12097_v25  ;;  %v5412_v25 = vpack.c.bf16 %v15188_v29, %v15188_v29  ;;  %v12126_v29 = vld [vmem:[%s16722_s4] sm:$0xff]  }
0x20cd   :  { %10776 = vmatprep.subr.bf16.mxu1 %v16994_v34 }
0x20ce   :  { %10795 = vmatpush3.bf16.msra.mxu0 %v12098_v33  ;;  %v12124_v33 = vld [vmem:[%s16721_s3 + $0x1f8] sm:$0xff]  }
0x20cf   :  { %10796 = vmatprep.subr.bf16.mxu0 %v16994_v34 }
0x20d0   :  { %10777 = vmatpush3.bf16.msra.mxu1 %v12099_v46  ;;  %v5413_v46 = vpack.c.bf16 %v15193_v41, %v15193_v41  ;;  %v12127_v41 = vld [vmem:[%s16728_s10 + $0x8] sm:$0xff]  }
0x20d1   :  { %10778 = vmatprep.subr.bf16.mxu1 %v16994_v34 }
0x20d2   :  { %10797 = vmatpush3.bf16.msra.mxu0 %v12100_v31  ;;  %v12125_v31 = vld [vmem:[%s16728_s10] sm:$0xff]  }
0x20d3   :  { %10798 = vmatprep.subr.bf16.mxu0 %v16994_v34 }
0x20d4   :  { %10779 = vmatpush3.bf16.msra.mxu1 %v12101_v16  ;;  %v12128_v16 = vld [vmem:[%s16722_s4 + $0x8] sm:$0xff]  }
0x20d5   :  { %10780 = vmatprep.subr.bf16.mxu1 %v16994_v34 }
0x20d6   :  { %10799 = vmatpush3.bf16.msra.mxu0 %v12102_v30 }
0x20d7   :  { %10800 = vmatprep.subr.bf16.mxu0 %v16994_v34 }
0x20d8   :  { %10781 = vmatpush3.bf16.msra.mxu1 %v12103_v28 }
0x20d9   :  { %10782 = vmatprep.subr.bf16.mxu1 %v16994_v34 }
0x20da   :  { %10801 = vmatpush3.bf16.msra.mxu0 %v12104_v11 }
0x20db   :  { %10802 = vmatprep.subr.bf16.mxu0 %v16994_v34 }
0x20dc   :  { %10783 = vmatpush3.bf16.msra.mxu1 %v12105_v36 }
0x20dd   :  { %10784 = vmatprep.subr.bf16.mxu1 %v16994_v34 }
0x20de   :  { %10803 = vmatpush3.bf16.msra.mxu0 %v12106_v37 }
0x20df   :  { %10804 = vmatprep.subr.bf16.mxu0 %v16994_v34 }
0x20e0   :  { %10785 = vmatpush3.bf16.msra.mxu1 %v12107_v26 }
0x20e1   :  { %10810 = vmatprep.subr.bf16.mxu1 %v16994_v34 }
0x20e2   :  { %10805 = vmatpush3.bf16.msra.mxu0 %v12108_v0 }
0x20e3   :  { %10787 = vmatmul.mubr.bf16.vlgmr.msra.gmra.mrb[152].mxu1 %v5410_v52  ;;  %10830 = vmatprep.subr.bf16.mxu0 %v16994_v34 }
0x20e4   :  { %10811 = vmatpush3.bf16.msra.mxu1 %v12109_v14  ;;  %10826 = vmatprep.mubr.msk.bf16.mxu1 %vm12379_vm0, %v16994_v34 }
0x20e5   :  { %10807 = vmatmul.mubr.bf16.vlgmr.msra.gmra.mrb[156].mxu0 %v5411_v23  ;;  %10812 = vmatprep.subr.bf16.mxu1 %v16994_v34 }
0x20e6   :  { %10831 = vmatpush3.bf16.msra.mxu0 %v12110_v2  ;;  %10846 = vmatprep.mubr.msk.bf16.mxu0 %vm12379_vm0, %v16994_v34 }
0x20e7   :  { %10832 = vmatprep.subr.bf16.mxu0 %v16994_v34 }
0x20e8   :  { %10813 = vmatpush3.bf16.msra.mxu1 %v12111_v12 }
0x20e9   :  { %10814 = vmatprep.subr.bf16.mxu1 %v16994_v34 }
0x20ea   :  { %10833 = vmatpush3.bf16.msra.mxu0 %v12112_v27 }
0x20eb   :  { %10834 = vmatprep.subr.bf16.mxu0 %v16994_v34 }
0x20ec   :  { %10815 = vmatpush3.bf16.msra.mxu1 %v12113_v55 }
0x20ed   :  { %10816 = vmatprep.subr.bf16.mxu1 %v16994_v34 }
0x20ee   :  { %10835 = vmatpush3.bf16.msra.mxu0 %v12114_v24 }
0x20ef   :  { %10836 = vmatprep.subr.bf16.mxu0 %v16994_v34 }
0x20f0   :  { %10817 = vmatpush3.bf16.msra.mxu1 %v12115_v5 }
0x20f1   :  { %10818 = vmatprep.subr.bf16.mxu1 %v16994_v34 }
0x20f2   :  { %10837 = vmatpush3.bf16.msra.mxu0 %v12116_v43 }
0x20f3   :  { %10838 = vmatprep.subr.bf16.mxu0 %v16994_v34 }
0x20f4   :  { %10819 = vmatpush3.bf16.msra.mxu1 %v12117_v59 }
0x20f5   :  { %10820 = vmatprep.subr.bf16.mxu1 %v16994_v34 }
0x20f6   :  { %10839 = vmatpush3.bf16.msra.mxu0 %v12118_v6  ;;  %v12130_v6 = vld [vmem:[%s16724_s6 + $0x8] sm:$0xff]  }
0x20f7   :  { %10840 = vmatprep.subr.bf16.mxu0 %v16994_v34 }
0x20f8   :  { %10821 = vmatpush3.bf16.msra.mxu1 %v12119_v4 }
0x20f9   :  { %10822 = vmatprep.subr.bf16.mxu1 %v16994_v34 }
0x20fa   :  { %10841 = vmatpush3.bf16.msra.mxu0 %v12120_v35 }
0x20fb   :  { %10842 = vmatprep.subr.bf16.mxu0 %v16994_v34 }
0x20fc   :  { %10823 = vmatpush3.bf16.msra.mxu1 %v12121_v8 }
0x20fd   :  { %10824 = vmatprep.subr.bf16.mxu1 %v16994_v34 }
0x20fe   :  { %10843 = vmatpush3.bf16.msra.mxu0 %v12122_v22 }
0x20ff   :  { %10844 = vmatprep.subr.bf16.mxu0 %v16994_v34 }
0x2100   :  { %10825 = vmatpush3.bf16.msra.mxu1 %v12123_v32 }
0x2101   :  { %10850 = vmatprep.subr.bf16.mxu1 %v16994_v34 }
0x2102   :  { %10845 = vmatpush3.bf16.msra.mxu0 %v12124_v33 }
0x2103   :  { %10827 = vmatmul.mubr.bf16.vlgmr.msra.gmra.mrb[156].mxu1 %v5412_v25  ;;  %10866 = vmatprep.subr.bf16.mxu0 %v16994_v34 }
0x2104   :  { %10851 = vmatpush3.bf16.msra.mxu1 %v12125_v31  ;;  %10854 = vmatprep.mubr.msk.bf16.mxu1 %vm12379_vm0, %v16994_v34 }
0x2105   :  { %10847 = vmatmul.mubr.bf16.vlgmr.msra.gmra.mrb[160].mxu0 %v5413_v46  ;;  %10852 = vmatprep.subr.bf16.mxu1 %v16994_v34 }
0x2106   :  { %10867 = vmatpush3.bf16.msra.mxu0 %v12126_v29  ;;  %10870 = vmatprep.mubr.msk.bf16.mxu0 %vm12379_vm0, %v16994_v34 }
0x2107   :  { %10868 = vmatprep.subr.bf16.mxu0 %v16994_v34 }
0x2108   :  { %10853 = vmatpush3.bf16.msra.mxu1 %v12127_v41 }
0x2109   :  { %10858 = vmatprep.subr.bf16.mxu1 %v16994_v34 }
0x210a   :  { %10869 = vmatpush3.bf16.msra.mxu0 %v12128_v16 }
0x210b   :  { %10874 = vmatprep.subr.bf16.mxu0 %v16994_v34 }
0x2117   :  { %v5876_v30 = vpop.permute.xlu0 %5875 }
0x2118   :  { %v5878_v28 = vmul.f32 %v15165_v10, %v5876_v30  ;;  %v12129_v10 = vld [vmem:[%s16724_s6] sm:$0xff]  }
0x211a   :  { %v5879_v11 = vpack.c.bf16 %v5878_v28, %v5878_v28 }
0x211c   :  { %5881 = vrot.lane.b32.xlu1 %v5879_v11, %s12381_s29 }
0x2176   :  { %v5448_v36 = vpop.f32.mrb[144].mxu1 }
0x2177   :  { %v10708_v37 = vpop.f32.mrb[145].mxu1  ;;  %v5742_v0 = vpack.c.bf16 %v5448_v36, %v5448_v36 }
0x2178   :  { %v5451_v26 = vpop.f32.mrb[146].mxu1  ;;  %v5488_v52 = vpop.f32.mrb[148].mxu0 }
0x2179   :  { %v5743_v23 = vpack.c.bf16 %v5488_v52, %v5488_v52  ;;  %v10709_v14 = vpop.f32.mrb[147].mxu1  ;;  %v10728_v2 = vpop.f32.mrb[149].mxu0  ;;  %v5758_v24 = vunpack.c.l.b16 %v5742_v0 }
0x217a   :  { %v5491_v12 = vpop.f32.mrb[150].mxu0 }
0x217b   :  { %v5759_v27 = vunpack.c.l.b16 %v5743_v23  ;;  %v10729_v55 = vpop.f32.mrb[151].mxu0 }
0x217d   :  { %v5766_v5 = vrot.slane %v5759_v27, 7 }
0x217f   :  { %v5767_v43 = vsel %vm1556_vm2, %v5766_v5, %v5758_v24 }
0x218e   :  { %v15439_v59 = vpop.permute.xlu1 %5881 }
0x218f   :  { %10871 = vmatmul.mubr.msk.bf16.vlgmr.msra.gmra.mrb[164].mxu0 %vm218_vm1, %v15439_v59 }
0x2190   :  { %10875 = vmatpush3.bf16.msra.mxu0 %v12129_v10  ;;  %10878 = vmatprep.mubr.msk.bf16.mxu0 %vm12379_vm0, %v16994_v34 }
0x2191   :  { %10876 = vmatprep.subr.bf16.mxu0 %v16994_v34 }
0x2194   :  { %10877 = vmatpush3.bf16.msra.mxu0 %v12130_v6 }
0x2195   :  { %10882 = vmatprep.subr.bf16.mxu0 %v16994_v34 }
0x2196   :  { %v5528_v4 = vpop.f32.mrb[148].mxu1 }
0x2197   :  { %v5744_v35 = vpack.c.bf16 %v5528_v4, %v5528_v4  ;;  %v10748_v8 = vpop.f32.mrb[149].mxu1 }
0x2198   :  { %v5531_v22 = vpop.f32.mrb[150].mxu1  ;;  %v5568_v32 = vpop.f32.mrb[152].mxu0 }
0x2199   :  { %v5760_v25 = vunpack.c.l.b16 %v5744_v35  ;;  %v5745_v33 = vpack.c.bf16 %v5568_v32, %v5568_v32  ;;  %v10749_v46 = vpop.f32.mrb[151].mxu1  ;;  %v10768_v31 = vpop.f32.mrb[153].mxu0 }
0x219a   :  { %v5571_v29 = vpop.f32.mrb[154].mxu0 }
0x219b   :  { %v5768_v41 = vrot.slane %v5760_v25, 6  ;;  %v5761_v16 = vunpack.c.l.b16 %v5745_v33  ;;  %v10769_v30 = vpop.f32.mrb[155].mxu0 }
0x219d   :  { %v5769_v28 = vsel %vm1559_vm3, %v5768_v41, %v5767_v43  ;;  %v5770_v11 = vrot.slane %v5761_v16, 5 }
0x219f   :  { %v5771_v36 = vsel %vm1562_vm4, %v5770_v11, %v5769_v28 }
0x21b6   :  { %v5608_v37 = vpop.f32.mrb[152].mxu1 }
0x21b7   :  { %v5746_v26 = vpack.c.bf16 %v5608_v37, %v5608_v37  ;;  %v10788_v52 = vpop.f32.mrb[153].mxu1 }
0x21b8   :  { %v5611_v0 = vpop.f32.mrb[154].mxu1  ;;  %v5648_v23 = vpop.f32.mrb[156].mxu0  ;;  %v12131_v52 = vld [vmem:[%s16723_s5] sm:$0xff]  }
0x21b9   :  { %v5762_v14 = vunpack.c.l.b16 %v5746_v26  ;;  %v5747_v2 = vpack.c.bf16 %v5648_v23, %v5648_v23  ;;  %v10789_v12 = vpop.f32.mrb[155].mxu1  ;;  %v10808_v27 = vpop.f32.mrb[157].mxu0  ;;  %v12132_v0 = vld [vmem:[%s16723_s5 + $0x8] sm:$0xff]  }
0x21ba   :  { %v5651_v55 = vpop.f32.mrb[158].mxu0  ;;  %v12133_v23 = vld [vmem:[%s16726_s8 + $0x4] ss:$8 sps:$4 sm:$0xff]   ;;  %v12136_v12 = vld [vmem:[%s16726_s8 + $0x10] ss:$8 sps:$4 sm:$0xff]  }
0x21bb   :  { %v5772_v24 = vrot.slane %v5762_v14, 4  ;;  %v5763_v5 = vunpack.c.l.b16 %v5747_v2  ;;  %v10809_v10 = vpop.f32.mrb[159].mxu0  ;;  %v12134_v14 = vld [vmem:[%s16726_s8] ss:$8 sps:$4 sm:$0xff]   ;;  %v12135_v2 = vld [vmem:[%s16726_s8 + $0x14] ss:$8 sps:$4 sm:$0xff]  }
0x21bd   :  { %v5773_v6 = vsel %vm1565_vm5, %v5772_v24, %v5771_v36  ;;  %v5774_v4 = vrot.slane %v5763_v5, 3  ;;  %v12137_v5 = vld [vmem:[%s16727_s9] sm:$0xff] }
0x21be   :  { %v4851_v10 = vadd.f32 %v12137_v5, %v14922_v57 }
0x21bf   :  { %v5775_v43 = vsel %vm1568_vm6, %v5774_v4, %v5773_v6 }
0x21d6   :  { %v5688_v35 = vpop.f32.mrb[156].mxu1 }
0x21d7   :  { %v5748_v8 = vpack.c.bf16 %v5688_v35, %v5688_v35  ;;  %v10828_v22 = vpop.f32.mrb[157].mxu1 }
0x21d8   :  { %v5691_v32 = vpop.f32.mrb[158].mxu1  ;;  %v5728_v25 = vpop.f32.mrb[160].mxu0 }
0x21d9   :  { %v5764_v33 = vunpack.c.l.b16 %v5748_v8  ;;  %v5749_v46 = vpack.c.bf16 %v5728_v25, %v5728_v25  ;;  %v10829_v31 = vpop.f32.mrb[159].mxu1  ;;  %v10848_v29 = vpop.f32.mrb[161].mxu0  ;;  %v12138_v32 = vld [vmem:[%s16725_s7] sm:$0xff] }
0x21da   :  { %v5731_v41 = vpop.f32.mrb[162].mxu0 }
0x21db   :  { %v5776_v16 = vrot.slane %v5764_v33, 2  ;;  %v5765_v30 = vunpack.c.l.b16 %v5749_v46  ;;  %v10849_v28 = vpop.f32.mrb[163].mxu0 }
0x21dd   :  { %v5777_v11 = vsel %vm1571_vm7, %v5776_v16, %v5775_v43  ;;  %v5778_v37 = vrot.slane %v5765_v30, 1 }
0x21df   :  { %v5779_v36 = vsel %vm1574_vm8, %v5778_v37, %v5777_v11 }
0x21e0   :  { %v5780_v26 = vpack.c.b16 %v5779_v36, %v5779_v36 }
0x21e2   :  { %10855 = vmatmul.mubr.msk.bf16.vlgmr.msra.gmra.mrb[160].mxu1 %vm218_vm1, %v5780_v26 }
0x21e3   :  { %10859 = vmatpush3.bf16.msra.mxu1 %v12131_v52  ;;  %10862 = vmatprep.mubr.msk.bf16.mxu1 %vm12379_vm0, %v16994_v34 }
0x21e4   :  { %10860 = vmatprep.subr.bf16.mxu1 %v16994_v34 }
0x21e7   :  { %10861 = vmatpush3.bf16.msra.mxu1 %v12132_v0 }
0x21e8   :  { %6037 = vmatprep.subr.bf16.mxu1 %v12133_v23 }
0x21ea   :  { %10863 = vmatmul.mubr.msk.bf16.vlgmr.msra.gmra.mrb[124].mxu1 %vm218_vm1, %v15439_v59 }
0x21eb   :  { %6038 = vmatpush1.bf16.msra.mxu1 %v12134_v14  ;;  %6069 = vmatprep.mubr.bf16.mxu1 %v17012_v19 }
0x21ec   :  { %6039 = vmatprep.subr.bf16.mxu1 %v12135_v2 }
0x21ef   :  { %6040 = vmatpush1.bf16.msra.mxu1 %v12136_v12 }
0x21f0   :  { %10902 = vmatprep.subr.bf16.mxu1 %v16994_v34 }
0x2262   :  { %v15485_v59 = vpop.f32.mrb[164].mxu0 }
0x2263   :  { %v10872_v27 = vpop.f32.mrb[165].mxu0 }
0x2264   :  { %v5988_v55 = vpop.f32.mrb[166].mxu0 }
0x2265   :  { %v10873_v24 = vpop.f32.mrb[167].mxu0  ;;  %v12139_v55 = vld [vmem:[%s16727_s9 + $0x8] sm:$0xff] }
0x22b5   :  { %v5818_v6 = vpop.f32.mrb[160].mxu1 }
0x22b6   :  { %v5819_v4 = vadd.f32 %v5818_v6, %v4851_v10  ;;  %v10856_v43 = vpop.f32.mrb[161].mxu1 }
0x22b7   :  { %v5821_v35 = vpop.f32.mrb[162].mxu1 }
0x22b8   :  { %11822 = vtanh.f32 %v5819_v4  ;;  %v10857_v8 = vpop.f32.mrb[163].mxu1 }
0x22bd   :  { %v5920_v22 = vpop.f32.mrb[124].mxu1 }
0x22be   :  { %v11550_v25 = vadd.f32 %v12138_v32, %v5920_v22  ;;  %v10864_v33 = vpop.f32.mrb[125].mxu1 }
0x22bf   :  { %v5923_v46 = vpop.f32.mrb[126].mxu1  ;;  %v17180_v33 = vld [vmem:[#allocation41_spill] sm:$0xff] }
0x22c0   :  { %11824 = vtanh.f32 %v11550_v25  ;;  %v10865_v31 = vpop.f32.mrb[127].mxu1  ;;  %v8463_v57 = vmul.f32 -1.442695, %v11550_v25  ;;  %v17181_v46 = vld [vmem:[#allocation42_spill] sm:$0xff] }
0x22c1   :  { %v17182_v31 = vld [vmem:[#allocation43_spill] sm:$0xff] }
0x22c2   :  { %v11823_v29 = vpop.eup %11822  ;;  %11826 = vpow2.f32 %v8463_v57  ;;  %v17184_v57 = vld [vmem:[#allocation45_spill] sm:$0xff] }
0x22c3   :  { %5826 = vst [vmem:[#allocation2 + $0x18] sm:$0xff] %v11823_v29 }
0x22ca   :  { %v11825_v41 = vpop.eup %11824 }
0x22cb   :  { %5935 = vrot.lane.b32.xlu0 %v11825_v41, %s12380_s26  ;;  %v17183_v41 = vld [vmem:[#allocation44_spill] sm:$0xff] }
0x22cc   :  { %v11827_v16 = vpop.eup %11826 }
0x22cd   :  { %v5929_v30 = vadd.f32 1.0, %v11827_v16 }
0x22cf   :  { %11828 = vrcp.f32 %v5929_v30 }
0x22d9   :  { %v11829_v28 = vpop.eup %11828 }
0x22da   :  { %v5933_v36 = vmul.f32 %v11829_v28, %v14879_v39 }
0x233d   :  { %v5936_v11 = vpop.permute.xlu0 %5935 }
0x233e   :  { %v5938_v37 = vmul.f32 %v11829_v28, %v5936_v11 }
0x2340   :  { %5940 = vrot.lane.b32.xlu1 %v5938_v37, %s12381_s29  ;;  %v17186_v37 = vld [vmem:[#allocation47_spill] sm:$0xff] }
0x23b2   :  { %v5941_v26 = vpop.permute.xlu1 %5940 }
0x23b3   :  { %v15497_v52 = vadd.f32 %v5941_v26, %v5933_v36 }
0x23b5   :  { %11830 = vtanh.f32 %v15497_v52 }
0x23bf   :  { %v11831_v0 = vpop.eup %11830 }
0x23c0   :  { %5946 = vrot.lane.b32.xlu0 %v11831_v0, %s12380_s26  ;;  %v17187_v0 = vld [vmem:[#allocation48_spill] sm:$0xff] }
0x2432   :  { %v5947_v23 = vpop.permute.xlu0 %5946 }
0x2433   :  { %v5949_v14 = vmul.f32 %v11829_v28, %v5947_v23  ;;  %v17185_v28 = vld [vmem:[#allocation46_spill] sm:$0xff] }
0x2435   :  { %v5950_v2 = vpack.c.bf16 %v5949_v14, %v5949_v14  ;;  %v17188_v14 = vld [vmem:[#allocation49_spill] sm:$0xff] }
0x2437   :  { %5992 = vrot.lane.b32.xlu1 %v5950_v2, %s12381_s29  ;;  %v17189_v2 = vld [vmem:[#allocation50_spill] sm:$0xff] }
0x24a9   :  { %v5993_v12 = vpop.permute.xlu1 %5992 }
0x24aa   :  { %10879 = vmatmul.mubr.msk.bf16.vlgmr.msra.gmra.mrb[168].mxu0 %vm218_vm1, %v5993_v12  ;;  %8466 = vmatmul.mubr.msk.bf16.vlgmr.msra.gmra.mrb[164].mxu1 %vm218_vm1, %v5993_v12  ;;  %v17190_v12 = vld [vmem:[#allocation51_spill] sm:$0xff] }
0x24ab   :  { %10883 = vmatpush3.bf16.xpose.msra.mxu0 %v17015_v40  ;;  %10903 = vmatpush3.bf16.xpose.msra.mxu1 %v17016_v44 }
0x24ac   :  { %10884 = vmatprep.subr.bf16.mxu0 %v16994_v34  ;;  %10904 = vmatprep.subr.bf16.mxu1 %v16994_v34 }
0x24ad   :  { %10898 = vmatprep.mubr.msk.bf16.mxu0 %vm12379_vm0, %v16994_v34  ;;  %10918 = vmatprep.mubr.msk.bf16.mxu1 %vm12379_vm0, %v16994_v34 }
0x24b3   :  { %10885 = vmatpush3.bf16.xpose.msra.mxu0 %v17017_v45  ;;  %10905 = vmatpush3.bf16.xpose.msra.mxu1 %v17018_v48 }
0x24b4   :  { %10886 = vmatprep.subr.bf16.mxu0 %v16994_v34  ;;  %10906 = vmatprep.subr.bf16.mxu1 %v16994_v34 }
0x24bb   :  { %10887 = vmatpush3.bf16.xpose.msra.mxu0 %v17019_v49  ;;  %10907 = vmatpush3.bf16.xpose.msra.mxu1 %v17020_v54 }
0x24bc   :  { %10888 = vmatprep.subr.bf16.mxu0 %v16994_v34  ;;  %10908 = vmatprep.subr.bf16.mxu1 %v16994_v34 }
0x24c3   :  { %10889 = vmatpush3.bf16.xpose.msra.mxu0 %v17021_v56  ;;  %10909 = vmatpush3.bf16.xpose.msra.mxu1 %v17022_v58 }
0x24c4   :  { %10890 = vmatprep.subr.bf16.mxu0 %v16994_v34  ;;  %10910 = vmatprep.subr.bf16.mxu1 %v16994_v34 }
0x24cb   :  { %10891 = vmatpush3.bf16.xpose.msra.mxu0 %v17023_v61  ;;  %10911 = vmatpush3.bf16.xpose.msra.mxu1 %v17024_v62 }
0x24cc   :  { %10892 = vmatprep.subr.bf16.mxu0 %v16994_v34  ;;  %10912 = vmatprep.subr.bf16.mxu1 %v16994_v34 }
0x24d3   :  { %10893 = vmatpush3.bf16.xpose.msra.mxu0 %v17025_v50  ;;  %10913 = vmatpush3.bf16.xpose.msra.mxu1 %v17026_v38 }
0x24d4   :  { %10894 = vmatprep.subr.bf16.mxu0 %v16994_v34  ;;  %10914 = vmatprep.subr.bf16.mxu1 %v16994_v34 }
0x24db   :  { %10895 = vmatpush3.bf16.xpose.msra.mxu0 %v17027_v47  ;;  %10915 = vmatpush3.bf16.xpose.msra.mxu1 %v17028_v60 }
0x24dc   :  { %10896 = vmatprep.subr.bf16.mxu0 %v16994_v34  ;;  %10916 = vmatprep.subr.bf16.mxu1 %v16994_v34 }
0x24e3   :  { %10897 = vmatpush3.bf16.xpose.msra.mxu0 %v17029_v42  ;;  %10917 = vmatpush3.bf16.xpose.msra.mxu1 %v17030_v18 }
0x24e4   :  { %10922 = vmatprep.subr.bf16.mxu0 %v16994_v34  ;;  %10942 = vmatprep.subr.bf16.mxu1 %v16994_v34 }
0x257d   :  { %v15540_v39 = vpop.f32.mrb[164].mxu1 }
0x257e   :  { %v6073_v27 = vpop.f32.mrb[165].mxu1 }
0x257f   :  { %v6074_v24 = vadd.f32 %v12139_v55, %v6073_v27  ;;  %v6075_v5 = vpop.f32.mrb[166].mxu1  ;;  %v17191_v27 = vld [vmem:[#allocation52_spill] sm:$0xff]  ;;  %v17192_v55 = vld [vmem:[#allocation53_spill] sm:$0xff] }
0x2580   :  { %v6076_v10 = vpop.f32.mrb[167].mxu1  ;;  %v17194_v5 = vld [vmem:[#allocation55_spill] sm:$0xff] }
0x2581   :  { %v6078_v6 = vpack.c.bf16 %v6074_v24, %v6074_v24  ;;  %v17193_v24 = vld [vmem:[#allocation54_spill] sm:$0xff]  ;;  %v17195_v10 = vld [vmem:[#allocation56_spill] sm:$0xff] }
0x2583   :  { %v6086_v4 = vrot.slane %v6078_v6, %v17031_v63  ;;  %v17196_v6 = vld [vmem:[#allocation57_spill] sm:$0xff] }
0x2585   :  { %v15547_v43 = vrot.slane %v6086_v4, %v17031_v63  ;;  %v6087_v29 = vcombine.high %v6086_v4, %v6086_v4  ;;  %v17197_v4 = vld [vmem:[#allocation58_spill] sm:$0xff] }
0x2587   :  { %v6105_v35 = vunpack.i.h.s16 %v15547_v43  ;;  %v8467_v8 = vpack.i.b16 %v15547_v43, %v15547_v43  ;;  %v15588_v16 = vrot.slane %v6087_v29, %v17031_v63  ;;  %v17201_v29 = vld [vmem:[#allocation63_spill] sm:$0xff] }
0x2589   :  { %v6116_v22 = vrot.slane %v8467_v8, %v17032_v7  ;;  %v6160_v32 = vpack.i.b16 %v6105_v35, %v6105_v35  ;;  %v6107_v30 = vunpack.i.h.s16 %v15588_v16  ;;  %v8470_v11 = vpack.i.b16 %v15588_v16, %v15588_v16  ;;  %v17198_v35 = vld [vmem:[#allocation59_spill] sm:$0xff]  ;;  %v17199_v8 = vld [vmem:[#allocation60_spill] sm:$0xff] }
0x258b   :  { %10899 = vmatmul.mubr.msk.bf16.vlgmr.msra.gmra.mrb[172].mxu0 %vm218_vm1, %v6116_v22  ;;  %v6164_v25 = vrot.slane %v6160_v32, %v17032_v7  ;;  %v6256_v36 = vpack.i.b16 %v6107_v30, %v6107_v30  ;;  %v6212_v26 = vrot.slane %v8470_v11, %v17032_v7  ;;  %v17200_v22 = vld [vmem:[#allocation61_spill] sm:$0xff]  ;;  %v6102_v32 = vcombine.high %v15547_v43, %v15547_v43  ;;  %v17202_v11 = vld [vmem:[#allocation64_spill] sm:$0xff] }
0x258c   :  { %10923 = vmatpush3.bf16.xpose.msra.mxu0 %v17033_v15  ;;  %10938 = vmatprep.mubr.msk.bf16.mxu0 %vm12379_vm0, %v16994_v34 }
0x258d   :  { %10924 = vmatprep.subr.bf16.mxu0 %v16994_v34  ;;  %10919 = vmatmul.mubr.msk.bf16.vlgmr.msra.gmra.mrb[168].mxu1 %vm218_vm1, %v6164_v25  ;;  %v6260_v23 = vrot.slane %v6256_v36, %v17032_v7  ;;  %v6109_v25 = vunpack.i.h.s16 %v6102_v32  ;;  %v8473_v30 = vpack.i.b16 %v6102_v32, %v6102_v32  ;;  %v17204_v32 = vld [vmem:[#allocation68_spill] sm:$0xff] }
0x258e   :  { %10943 = vmatpush3.bf16.xpose.msra.mxu1 %v17034_v20  ;;  %10958 = vmatprep.mubr.msk.bf16.mxu1 %vm12379_vm0, %v16994_v34 }
0x258f   :  { %10944 = vmatprep.subr.bf16.mxu1 %v16994_v34  ;;  %v6352_v36 = vpack.i.b16 %v6109_v25, %v6109_v25  ;;  %v17205_v25 = vld [vmem:[#allocation71_spill] sm:$0xff] }
0x2591   :  { %v6356_v43 = vrot.slane %v6352_v36, %v17032_v7  ;;  %v17207_v36 = vld [vmem:[#allocation75_spill] sm:$0xff] }
0x2594   :  { %10925 = vmatpush3.bf16.xpose.msra.mxu0 %v17035_v17 }
0x2595   :  { %10926 = vmatprep.subr.bf16.mxu0 %v16994_v34 }
0x2596   :  { %10945 = vmatpush3.bf16.xpose.msra.mxu1 %v17036_v3 }
0x2597   :  { %10946 = vmatprep.subr.bf16.mxu1 %v16994_v34 }
0x259c   :  { %10927 = vmatpush3.bf16.xpose.msra.mxu0 %v17037_v53 }
0x259d   :  { %10928 = vmatprep.subr.bf16.mxu0 %v16994_v34 }
0x259e   :  { %10947 = vmatpush3.bf16.xpose.msra.mxu1 %v17038_v1 }
0x259f   :  { %10948 = vmatprep.subr.bf16.mxu1 %v16994_v34 }
0x25a4   :  { %10929 = vmatpush3.bf16.xpose.msra.mxu0 %v17039_v9 }
0x25a5   :  { %10930 = vmatprep.subr.bf16.mxu0 %v16994_v34 }
0x25a6   :  { %10949 = vmatpush3.bf16.xpose.msra.mxu1 %v17040_v13 }
0x25a7   :  { %10950 = vmatprep.subr.bf16.mxu1 %v16994_v34 }
0x25ac   :  { %10931 = vmatpush3.bf16.xpose.msra.mxu0 %v17041_v51 }
0x25ad   :  { %10932 = vmatprep.subr.bf16.mxu0 %v16994_v34 }
0x25ae   :  { %10951 = vmatpush3.bf16.xpose.msra.mxu1 %v17180_v33 }
0x25af   :  { %10952 = vmatprep.subr.bf16.mxu1 %v16994_v34 }
0x25b4   :  { %10933 = vmatpush3.bf16.xpose.msra.mxu0 %v17181_v46 }
0x25b5   :  { %10934 = vmatprep.subr.bf16.mxu0 %v16994_v34 }
0x25b6   :  { %10953 = vmatpush3.bf16.xpose.msra.mxu1 %v17182_v31 }
0x25b7   :  { %10954 = vmatprep.subr.bf16.mxu1 %v16994_v34 }
0x25bc   :  { %10935 = vmatpush3.bf16.xpose.msra.mxu0 %v17183_v41 }
0x25bd   :  { %10936 = vmatprep.subr.bf16.mxu0 %v16994_v34 }
0x25be   :  { %10955 = vmatpush3.bf16.xpose.msra.mxu1 %v17184_v57 }
0x25bf   :  { %10956 = vmatprep.subr.bf16.mxu1 %v16994_v34 }
0x25c4   :  { %10937 = vmatpush3.bf16.xpose.msra.mxu0 %v17185_v28 }
0x25c5   :  { %10962 = vmatprep.subr.bf16.mxu0 %v16994_v34 }
0x25c6   :  { %10957 = vmatpush3.bf16.xpose.msra.mxu1 %v17186_v37 }
0x25c7   :  { %10982 = vmatprep.subr.bf16.mxu1 %v16994_v34 }
0x25cb   :  { %10939 = vmatmul.mubr.msk.bf16.vlgmr.msra.gmra.mrb[176].mxu0 %vm218_vm1, %v6212_v26  ;;  %v6308_v26 = vrot.slane %v8473_v30, %v17032_v7  ;;  %v17206_v30 = vld [vmem:[#allocation72_spill] sm:$0xff] }
0x25cc   :  { %10963 = vmatpush3.bf16.xpose.msra.mxu0 %v17187_v0  ;;  %10978 = vmatprep.mubr.msk.bf16.mxu0 %vm12379_vm0, %v16994_v34 }
0x25cd   :  { %10964 = vmatprep.subr.bf16.mxu0 %v16994_v34  ;;  %10959 = vmatmul.mubr.msk.bf16.vlgmr.msra.gmra.mrb[172].mxu1 %vm218_vm1, %v6260_v23  ;;  %v17203_v23 = vld [vmem:[#allocation67_spill] sm:$0xff] }
0x25ce   :  { %10983 = vmatpush3.bf16.xpose.msra.mxu1 %v17188_v14  ;;  %10998 = vmatprep.mubr.msk.bf16.mxu1 %vm12379_vm0, %v16994_v34 }
0x25cf   :  { %10984 = vmatprep.subr.bf16.mxu1 %v16994_v34 }
0x25d4   :  { %10965 = vmatpush3.bf16.xpose.msra.mxu0 %v17189_v2 }
0x25d5   :  { %10966 = vmatprep.subr.bf16.mxu0 %v16994_v34 }
0x25d6   :  { %10985 = vmatpush3.bf16.xpose.msra.mxu1 %v17190_v12  ;;  %v17220_v12 = vld [vmem:[#allocation98_spill] sm:$0xff] }
0x25d7   :  { %10986 = vmatprep.subr.bf16.mxu1 %v16994_v34 }
0x25dc   :  { %10967 = vmatpush3.bf16.xpose.msra.mxu0 %v17191_v27  ;;  %v17219_v27 = vld [vmem:[#allocation97_spill] sm:$0xff] }
0x25dd   :  { %10968 = vmatprep.subr.bf16.mxu0 %v16994_v34 }
0x25de   :  { %10987 = vmatpush3.bf16.xpose.msra.mxu1 %v17192_v55 }
0x25df   :  { %10988 = vmatprep.subr.bf16.mxu1 %v16994_v34 }
0x25e4   :  { %10969 = vmatpush3.bf16.xpose.msra.mxu0 %v17193_v24 }
0x25e5   :  { %10970 = vmatprep.subr.bf16.mxu0 %v16994_v34 }
0x25e6   :  { %10989 = vmatpush3.bf16.xpose.msra.mxu1 %v17194_v5 }
0x25e7   :  { %10990 = vmatprep.subr.bf16.mxu1 %v16994_v34 }
0x25ec   :  { %10971 = vmatpush3.bf16.xpose.msra.mxu0 %v17195_v10 }
0x25ed   :  { %10972 = vmatprep.subr.bf16.mxu0 %v16994_v34 }
0x25ee   :  { %10991 = vmatpush3.bf16.xpose.msra.mxu1 %v17196_v6 }
0x25ef   :  { %10992 = vmatprep.subr.bf16.mxu1 %v16994_v34 }
0x25f4   :  { %10973 = vmatpush3.bf16.xpose.msra.mxu0 %v17197_v4 }
0x25f5   :  { %10974 = vmatprep.subr.bf16.mxu0 %v16994_v34 }
0x25f6   :  { %10993 = vmatpush3.bf16.xpose.msra.mxu1 %v17198_v35 }
0x25f7   :  { %10994 = vmatprep.subr.bf16.mxu1 %v16994_v34 }
0x25fc   :  { %10975 = vmatpush3.bf16.xpose.msra.mxu0 %v17199_v8 }
0x25fd   :  { %10976 = vmatprep.subr.bf16.mxu0 %v16994_v34 }
0x25fe   :  { %10995 = vmatpush3.bf16.xpose.msra.mxu1 %v17200_v22 }
0x25ff   :  { %10996 = vmatprep.subr.bf16.mxu1 %v16994_v34 }
0x2604   :  { %10977 = vmatpush3.bf16.xpose.msra.mxu0 %v17201_v29 }
0x2605   :  { %11002 = vmatprep.subr.bf16.mxu0 %v16994_v34 }
0x2606   :  { %10997 = vmatpush3.bf16.xpose.msra.mxu1 %v17202_v11 }
0x2607   :  { %11022 = vmatprep.subr.bf16.mxu1 %v16994_v34 }
0x260b   :  { %10979 = vmatmul.mubr.msk.bf16.vlgmr.msra.gmra.mrb[180].mxu0 %vm218_vm1, %v6308_v26  ;;  %v17208_v26 = vld [vmem:[#allocation76_spill] sm:$0xff] }
0x260c   :  { %11003 = vmatpush3.bf16.xpose.msra.mxu0 %v17203_v23  ;;  %11018 = vmatprep.mubr.msk.bf16.mxu0 %vm12379_vm0, %v16994_v34  ;;  %v17217_v23 = vld [vmem:[#allocation95_spill] sm:$0xff] }
0x260d   :  { %11004 = vmatprep.subr.bf16.mxu0 %v16994_v34  ;;  %10999 = vmatmul.mubr.msk.bf16.vlgmr.msra.gmra.mrb[176].mxu1 %vm218_vm1, %v6356_v43  ;;  %v17209_v43 = vld [vmem:[#allocation79_spill] sm:$0xff] }
0x260e   :  { %11023 = vmatpush3.bf16.xpose.msra.mxu1 %v17204_v32  ;;  %11038 = vmatprep.mubr.msk.bf16.mxu1 %vm12379_vm0, %v16994_v34  ;;  %v17210_v32 = vld [vmem:[#allocation80_spill] sm:$0xff] }
0x260f   :  { %11024 = vmatprep.subr.bf16.mxu1 %v16994_v34 }
0x2614   :  { %11005 = vmatpush3.bf16.xpose.msra.mxu0 %v17205_v25  ;;  %v17211_v25 = vld [vmem:[#allocation83_spill] sm:$0xff] }
0x2615   :  { %11006 = vmatprep.subr.bf16.mxu0 %v16994_v34 }
0x2616   :  { %11025 = vmatpush3.bf16.xpose.msra.mxu1 %v17206_v30  ;;  %v17212_v30 = vld [vmem:[#allocation84_spill] sm:$0xff] }
0x2617   :  { %11026 = vmatprep.subr.bf16.mxu1 %v16994_v34 }
0x261c   :  { %11007 = vmatpush3.bf16.xpose.msra.mxu0 %v17207_v36  ;;  %v17213_v36 = vld [vmem:[#allocation87_spill] sm:$0xff] }
0x261d   :  { %11008 = vmatprep.subr.bf16.mxu0 %v16994_v34 }
0x261e   :  { %11027 = vmatpush3.bf16.xpose.msra.mxu1 %v17208_v26  ;;  %v17214_v26 = vld [vmem:[#allocation88_spill] sm:$0xff] }
0x261f   :  { %11028 = vmatprep.subr.bf16.mxu1 %v16994_v34 }
0x2624   :  { %11009 = vmatpush3.bf16.xpose.msra.mxu0 %v17209_v43  ;;  %v17215_v43 = vld [vmem:[#allocation91_spill] sm:$0xff] }
0x2625   :  { %11010 = vmatprep.subr.bf16.mxu0 %v16994_v34 }
0x2626   :  { %11029 = vmatpush3.bf16.xpose.msra.mxu1 %v17210_v32  ;;  %v17216_v32 = vld [vmem:[#allocation92_spill] sm:$0xff] }
0x2627   :  { %11030 = vmatprep.subr.bf16.mxu1 %v16994_v34 }
0x262c   :  { %11011 = vmatpush3.bf16.xpose.msra.mxu0 %v17211_v25  ;;  %v6103_v25 = vcombine.high %v15588_v16, %v15588_v16  ;;  %v12140_v16 = vld [vmem:[%s16721_s3] sm:$0xff]  }
0x262d   :  { %11012 = vmatprep.subr.bf16.mxu0 %v16994_v34 }
0x262e   :  { %11031 = vmatpush3.bf16.xpose.msra.mxu1 %v17212_v30  ;;  %v6111_v30 = vunpack.i.h.s16 %v6103_v25 }
0x262f   :  { %11032 = vmatprep.subr.bf16.mxu1 %v16994_v34 }
0x2630   :  { %v6448_v11 = vpack.i.b16 %v6111_v30, %v6111_v30  ;;  %v12144_v30 = vld [vmem:[%s16721_s3 + $0x10] sm:$0xff]  }
0x2634   :  { %11013 = vmatpush3.bf16.xpose.msra.mxu0 %v17213_v36  ;;  %v8476_v36 = vpack.i.b16 %v6103_v25, %v6103_v25  ;;  %v12141_v25 = vld [vmem:[%s16721_s3 + $0x40] sm:$0xff]  }
0x2635   :  { %11014 = vmatprep.subr.bf16.mxu0 %v16994_v34 }
0x2636   :  { %11033 = vmatpush3.bf16.xpose.msra.mxu1 %v17214_v26  ;;  %v17218_v26 = vld [vmem:[#allocation96_spill] sm:$0xff] }
0x2637   :  { %11034 = vmatprep.subr.bf16.mxu1 %v16994_v34 }
0x263c   :  { %11015 = vmatpush3.bf16.xpose.msra.mxu0 %v17215_v43  ;;  %v6404_v43 = vrot.slane %v8476_v36, %v17032_v7  ;;  %v12145_v36 = vld [vmem:[%s16721_s3 + $0x50] sm:$0xff]  }
0x263d   :  { %11016 = vmatprep.subr.bf16.mxu0 %v16994_v34 }
0x263e   :  { %11035 = vmatpush3.bf16.xpose.msra.mxu1 %v17216_v32  ;;  %v6452_v32 = vrot.slane %v6448_v11, %v17032_v7  ;;  %v12142_v11 = vld [vmem:[%s16721_s3 + $0x8] sm:$0xff]  }
0x263f   :  { %11036 = vmatprep.subr.bf16.mxu1 %v16994_v34 }
0x2644   :  { %11017 = vmatpush3.bf16.xpose.msra.mxu0 %v17217_v23 }
0x2645   :  { %11042 = vmatprep.subr.bf16.mxu0 %v16994_v34 }
0x2646   :  { %11037 = vmatpush3.bf16.xpose.msra.mxu1 %v17218_v26 }
0x2647   :  { %11062 = vmatprep.subr.bf16.mxu1 %v16994_v34 }
0x264b   :  { %11019 = vmatmul.mubr.msk.bf16.vlgmr.msra.gmra.mrb[184].mxu0 %vm218_vm1, %v6404_v43  ;;  %v12146_v43 = vld [vmem:[%s16721_s3 + $0x18] sm:$0xff]  }
0x264c   :  { %11043 = vmatpush3.bf16.msra.mxu0 %v12140_v16  ;;  %11058 = vmatprep.mubr.msk.bf16.mxu0 %vm12379_vm0, %v16994_v34  ;;  %v12147_v16 = vld [vmem:[%s16721_s3 + $0x58] sm:$0xff]  }
0x264d   :  { %11044 = vmatprep.subr.bf16.mxu0 %v16994_v34  ;;  %11039 = vmatmul.mubr.msk.bf16.vlgmr.msra.gmra.mrb[180].mxu1 %vm218_vm1, %v6452_v32  ;;  %v12143_v32 = vld [vmem:[%s16721_s3 + $0x48] sm:$0xff]  }
0x264e   :  { %11063 = vmatpush3.bf16.msra.mxu1 %v12141_v25  ;;  %11078 = vmatprep.mubr.msk.bf16.mxu1 %vm12379_vm0, %v16994_v34  ;;  %v12148_v25 = vld [vmem:[%s16721_s3 + $0x20] sm:$0xff]  }
0x264f   :  { %11064 = vmatprep.subr.bf16.mxu1 %v16994_v34 }
0x2650   :  { %11045 = vmatpush3.bf16.msra.mxu0 %v12142_v11 }
0x2651   :  { %11046 = vmatprep.subr.bf16.mxu0 %v16994_v34 }
0x2652   :  { %11065 = vmatpush3.bf16.msra.mxu1 %v12143_v32 }
0x2653   :  { %11066 = vmatprep.subr.bf16.mxu1 %v16994_v34 }
0x2654   :  { %11047 = vmatpush3.bf16.msra.mxu0 %v12144_v30  ;;  %v12149_v30 = vld [vmem:[%s16721_s3 + $0x60] sm:$0xff]  }
0x2655   :  { %11048 = vmatprep.subr.bf16.mxu0 %v16994_v34 }
0x2656   :  { %11067 = vmatpush3.bf16.msra.mxu1 %v12145_v36 }
0x2657   :  { %11068 = vmatprep.subr.bf16.mxu1 %v16994_v34 }
0x2658   :  { %11049 = vmatpush3.bf16.msra.mxu0 %v12146_v43  ;;  %v12150_v43 = vld [vmem:[%s16721_s3 + $0x28] sm:$0xff]  }
0x2659   :  { %11050 = vmatprep.subr.bf16.mxu0 %v16994_v34 }
0x265a   :  { %11069 = vmatpush3.bf16.msra.mxu1 %v12147_v16 }
0x265b   :  { %11070 = vmatprep.subr.bf16.mxu1 %v16994_v34 }
0x265c   :  { %11051 = vmatpush3.bf16.msra.mxu0 %v12148_v25 }
0x265d   :  { %11052 = vmatprep.subr.bf16.mxu0 %v16994_v34 }
0x265e   :  { %v6154_v11 = vpop.f32.mrb[172].mxu0  ;;  %11071 = vmatpush3.bf16.msra.mxu1 %v12149_v30 }
0x265f   :  { %v10900_v32 = vpop.f32.mrb[173].mxu0  ;;  %11072 = vmatprep.subr.bf16.mxu1 %v16994_v34 }
0x2660   :  { %v6157_v36 = vpop.f32.mrb[174].mxu0  ;;  %11053 = vmatpush3.bf16.msra.mxu0 %v12150_v43  ;;  %v6202_v16 = vpop.f32.mrb[168].mxu1  ;;  %v12151_v32 = vld [vmem:[%s16721_s3 + $0x68] sm:$0xff]   ;;  %v12155_v43 = vld [vmem:[%s16721_s3 + $0x78] sm:$0xff]  }
0x2661   :  { %v10901_v25 = vpop.f32.mrb[175].mxu0  ;;  %11054 = vmatprep.subr.bf16.mxu0 %v16994_v34  ;;  %v10920_v26 = vpop.f32.mrb[169].mxu1  ;;  %v12152_v36 = vld [vmem:[%s16721_s3 + $0x30] sm:$0xff]  }
0x2662   :  { %v6205_v23 = vpop.f32.mrb[170].mxu1  ;;  %11073 = vmatpush3.bf16.msra.mxu1 %v12151_v32  ;;  %v12153_v26 = vld [vmem:[%s16721_s3 + $0x70] sm:$0xff]  }
0x2663   :  { %v10921_v30 = vpop.f32.mrb[171].mxu1  ;;  %11074 = vmatprep.subr.bf16.mxu1 %v16994_v34  ;;  %v12154_v23 = vld [vmem:[%s16721_s3 + $0x38] sm:$0xff]  }
0x2664   :  { %11055 = vmatpush3.bf16.msra.mxu0 %v12152_v36 }
0x2665   :  { %11056 = vmatprep.subr.bf16.mxu0 %v16994_v34 }
0x2666   :  { %11075 = vmatpush3.bf16.msra.mxu1 %v12153_v26 }
0x2667   :  { %11076 = vmatprep.subr.bf16.mxu1 %v16994_v34 }
0x2668   :  { %11057 = vmatpush3.bf16.msra.mxu0 %v12154_v23 }
0x2669   :  { %11082 = vmatprep.subr.bf16.mxu0 %v16994_v34 }
0x266a   :  { %11077 = vmatpush3.bf16.msra.mxu1 %v12155_v43  ;;  %v6505_v43 = vadd.f32 %v6202_v16, %v17219_v27 }
0x266b   :  { %11102 = vmatprep.subr.bf16.mxu1 %v16994_v34 }
0x266c   :  { %v6520_v14 = vrot.slane %v6505_v43, 7 }
0x269e   :  { %v6250_v25 = vpop.f32.mrb[176].mxu0 }
0x269f   :  { %v10940_v32 = vpop.f32.mrb[177].mxu0  ;;  %v6506_v2 = vadd.f32 %v6250_v25, %v17220_v12 }
0x26a0   :  { %v6253_v30 = vpop.f32.mrb[178].mxu0  ;;  %v6298_v36 = vpop.f32.mrb[172].mxu1  ;;  %v17221_v32 = vld [vmem:[#allocation99_spill] sm:$0xff] }
0x26a1   :  { %v10941_v26 = vpop.f32.mrb[179].mxu0  ;;  %v10960_v29 = vpop.f32.mrb[173].mxu1  ;;  %v6507_v30 = vadd.f32 %v6298_v36, %v17221_v32  ;;  %v6522_v0 = vrot.slane %v6506_v2, 6 }
0x26a2   :  { %v6301_v22 = vpop.f32.mrb[174].mxu1  ;;  %v17222_v26 = vld [vmem:[#allocation100_spill] sm:$0xff] }
0x26a3   :  { %v10961_v8 = vpop.f32.mrb[175].mxu1 }
0x26de   :  { %v6346_v23 = vpop.f32.mrb[180].mxu0 }
0x26df   :  { %v10980_v35 = vpop.f32.mrb[181].mxu0  ;;  %v6508_v29 = vadd.f32 %v6346_v23, %v17222_v26  ;;  %v17224_v23 = vld [vmem:[#allocation102_spill] sm:$0xff] }
0x26e0   :  { %v6349_v4 = vpop.f32.mrb[182].mxu0  ;;  %v6394_v6 = vpop.f32.mrb[176].mxu1  ;;  %v12156_v35 = vld [vmem:[%s16729_s11] sm:$0xff] }
0x26e1   :  { %v10981_v10 = vpop.f32.mrb[183].mxu0  ;;  %v11000_v5 = vpop.f32.mrb[177].mxu1  ;;  %v6504_v4 = vadd.f32 %v12156_v35, %v6154_v11  ;;  %v6526_v22 = vrot.slane %v6508_v29, 4 }
0x26e2   :  { %v6397_v24 = vpop.f32.mrb[178].mxu1  ;;  %v6524_v5 = vrot.slane %v6507_v30, 5 }
0x26e3   :  { %v11001_v55 = vpop.f32.mrb[179].mxu1  ;;  %v6521_v10 = vsel %vm1556_vm2, %v6520_v14, %v6504_v4  ;;  %v17223_v24 = vld [vmem:[#allocation101_spill] sm:$0xff]  ;;  %v17225_v14 = vld [vmem:[#allocation103_spill] sm:$0xff] }
0x26e4   :  { %v6509_v55 = vadd.f32 %v6394_v6, %v17223_v24  ;;  %v6523_v8 = vsel %vm1559_vm3, %v6522_v0, %v6521_v10 }
0x26e5   :  { %v6525_v16 = vsel %vm1562_vm4, %v6524_v5, %v6523_v8 }
0x26e6   :  { %v6528_v25 = vrot.slane %v6509_v55, 3  ;;  %v6527_v32 = vsel %vm1565_vm5, %v6526_v22, %v6525_v16 }
0x26e8   :  { %v6529_v6 = vsel %vm1568_vm6, %v6528_v25, %v6527_v32 }
0x271e   :  { %v6442_v36 = vpop.f32.mrb[184].mxu0 }
0x271f   :  { %v6510_v26 = vadd.f32 %v6442_v36, %v17224_v23  ;;  %v11020_v12 = vpop.f32.mrb[185].mxu0 }
0x2720   :  { %v6445_v27 = vpop.f32.mrb[186].mxu0  ;;  %v6490_v11 = vpop.f32.mrb[180].mxu1  ;;  %v8480_v12 = vld [vmem:[%s16718_s0 + $0x28] sm:$0xff] }
0x2721   :  { %v6530_v37 = vrot.slane %v6510_v26, 2  ;;  %v11021_v35 = vpop.f32.mrb[187].mxu0  ;;  %v6511_v28 = vadd.f32 %v6490_v11, %v17225_v14  ;;  %v11040_v57 = vpop.f32.mrb[181].mxu1  ;;  %v7075_v27 = vadd.f32 %v8480_v12, %v15485_v59 }
0x2722   :  { %v6493_v0 = vpop.f32.mrb[182].mxu1 }
0x2723   :  { %v6531_v10 = vsel %vm1571_vm7, %v6530_v37, %v6529_v6  ;;  %v6532_v5 = vrot.slane %v6511_v28, 1  ;;  %v11041_v8 = vpop.f32.mrb[183].mxu1  ;;  %11832 = vtanh.f32 %v7075_v27 }
0x2725   :  { %v6533_v24 = vsel %vm1574_vm8, %v6532_v5, %v6531_v10 }
0x2726   :  { %6535 = vmax.xlane.f32.xlu0 %v6533_v24 }
0x272d   :  { %v11833_v22 = vpop.eup %11832 }
0x273c   :  { %7085 = vrot.lane.b32.xlu0 %v11833_v22, %s12380_s26 }
0x27b3   :  { %v6536_v57 = vpop.xlane.xlu0 %6535 }
0x27b4   :  { %v6538_v32 = vrot.slane %v6536_v57, 1  ;;  %v6539_v16 = vrot.slane %v6536_v57, 2  ;;  %v6540_v25 = vrot.slane %v6536_v57, 3  ;;  %v6541_v37 = vrot.slane %v6536_v57, 4 }
0x27b5   :  { %v6542_v36 = vrot.slane %v6536_v57, 5  ;;  %v6543_v11 = vrot.slane %v6536_v57, 6  ;;  %v6553_v35 = vsub.f32 %v6504_v4, %v6536_v57  ;;  %v6544_v6 = vrot.slane %v6536_v57, 7 }
0x27b6   :  { %v6554_v24 = vsub.f32 %v6505_v43, %v6538_v32  ;;  %v6555_v0 = vsub.f32 %v6506_v2, %v6539_v16  ;;  %v6556_v10 = vsub.f32 %v6507_v30, %v6540_v25  ;;  %v6557_v5 = vsub.f32 %v6508_v29, %v6541_v37 }
0x27b7   :  { %v6561_v8 = vmul.f32 1.442695, %v6553_v35  ;;  %v6558_v14 = vsub.f32 %v6509_v55, %v6542_v36  ;;  %v6559_v59 = vsub.f32 %v6510_v26, %v6543_v11  ;;  %v6560_v22 = vsub.f32 %v6511_v28, %v6544_v6 }
0x27b8   :  { %v6563_v12 = vmul.f32 1.442695, %v6554_v24  ;;  %v6565_v23 = vmul.f32 1.442695, %v6555_v0  ;;  %v6567_v41 = vmul.f32 1.442695, %v6556_v10  ;;  %v7086_v10 = vpop.permute.xlu0 %7085 }
0x27b9   :  { %11834 = vpow2.f32 %v6561_v8  ;;  %v6569_v31 = vmul.f32 1.442695, %v6557_v5  ;;  %v6571_v46 = vmul.f32 1.442695, %v6558_v14  ;;  %v6573_v33 = vmul.f32 1.442695, %v6559_v59 }
0x27ba   :  { %11836 = vpow2.f32 %v6563_v12  ;;  %v6575_v4 = vmul.f32 1.442695, %v6560_v22  ;;  %v8481_v57 = vmul.f32 -1.442695, %v7075_v27 }
0x27bb   :  { %11838 = vpow2.f32 %v6565_v23 }
0x27bc   :  { %11840 = vpow2.f32 %v6567_v41 }
0x27bd   :  { %11842 = vpow2.f32 %v6569_v31 }
0x27be   :  { %11844 = vpow2.f32 %v6571_v46 }
0x27bf   :  { %11846 = vpow2.f32 %v6573_v33 }
0x27c0   :  { %11848 = vpow2.f32 %v6575_v4 }
0x27c1   :  { %11850 = vpow2.f32 %v8481_v57 }
0x27c3   :  { %v11835_v2 = vpop.eup %11834 }
0x27c4   :  { %v11837_v43 = vpop.eup %11836 }
0x27c5   :  { %v11839_v30 = vpop.eup %11838  ;;  %v6585_v26 = vrot.slane %v11837_v43, 7 }
0x27c6   :  { %v11841_v29 = vpop.eup %11840  ;;  %v6587_v28 = vrot.slane %v11839_v30, 6 }
0x27c7   :  { %v11843_v55 = vpop.eup %11842  ;;  %v6586_v32 = vsel %vm1556_vm2, %v6585_v26, %v11835_v2  ;;  %v6589_v14 = vrot.slane %v11841_v29, 5 }
0x27c8   :  { %v11845_v23 = vpop.eup %11844  ;;  %v6588_v41 = vsel %vm1559_vm3, %v6587_v28, %v6586_v32  ;;  %v6591_v16 = vrot.slane %v11843_v55, 4 }
0x27c9   :  { %v11847_v27 = vpop.eup %11846  ;;  %v6590_v46 = vsel %vm1562_vm4, %v6589_v14, %v6588_v41  ;;  %v6593_v33 = vrot.slane %v11845_v23, 3 }
0x27ca   :  { %v11849_v31 = vpop.eup %11848  ;;  %v6592_v25 = vsel %vm1565_vm5, %v6591_v16, %v6590_v46  ;;  %v6595_v37 = vrot.slane %v11847_v27, 2 }
0x27cb   :  { %v11851_v36 = vpop.eup %11850  ;;  %v6594_v11 = vsel %vm1568_vm6, %v6593_v33, %v6592_v25  ;;  %v6597_v35 = vrot.slane %v11849_v31, 1 }
0x27cc   :  { %v6596_v6 = vsel %vm1571_vm7, %v6595_v37, %v6594_v11  ;;  %v7079_v0 = vadd.f32 1.0, %v11851_v36 }
0x27cd   :  { %v6598_v24 = vsel %vm1574_vm8, %v6597_v35, %v6596_v6 }
0x27ce   :  { %6600 = vadd.xlane.f32.xlu1 %v6598_v24  ;;  %11852 = vrcp.f32 %v7079_v0 }
0x27d8   :  { %v15783_v5 = vpop.eup %11852 }
0x27d9   :  { %v7088_v8 = vmul.f32 %v15783_v5, %v7086_v10  ;;  %v7083_v12 = vmul.f32 %v15783_v5, %v15171_v21  ;;  %v12157_v10 = vld [vmem:[%s16721_s3 + $0x80] sm:$0xff]  }
0x27df   :  { %7090 = vrot.lane.b32.xlu1 %v7088_v8, %s12381_s29 }
0x285b   :  { %v6601_v59 = vpop.xlane.xlu1 %6600 }
0x285c   :  { %11854 = vrcp.f32 %v6601_v59 }
0x285f   :  { %v7091_v22 = vpop.permute.xlu1 %7090 }
0x2860   :  { %v15789_v4 = vadd.f32 %v7091_v22, %v7083_v12  ;;  %v12159_v12 = vld [vmem:[%s16721_s3 + $0x88] sm:$0xff]  }
0x2862   :  { %11856 = vtanh.f32 %v15789_v4 }
0x2866   :  { %v11855_v57 = vpop.eup %11854 }
0x2867   :  { %v6619_v26 = vmul.f32 %v11855_v57, %v11835_v2  ;;  %v6604_v28 = vrot.slane %v11855_v57, 1  ;;  %v6605_v32 = vrot.slane %v11855_v57, 2  ;;  %v6606_v14 = vrot.slane %v11855_v57, 3 }
0x2868   :  { %v6607_v41 = vrot.slane %v11855_v57, 4  ;;  %v6608_v16 = vrot.slane %v11855_v57, 5  ;;  %v6609_v46 = vrot.slane %v11855_v57, 6  ;;  %v6610_v33 = vrot.slane %v11855_v57, 7 }
0x2869   :  { %v6627_v25 = vpack.c.bf16 %v6619_v26, %v6619_v26  ;;  %v6620_v37 = vmul.f32 %v11837_v43, %v6604_v28  ;;  %v15792_v36 = vmul.f32 %v11839_v30, %v6605_v32  ;;  %v15794_v11 = vmul.f32 %v11841_v29, %v6606_v14  ;;  %v12160_v32 = vld [vmem:[%s16721_s3 + $0xc8] sm:$0xff]  }
0x286a   :  { %v15796_v21 = vmul.f32 %v11843_v55, %v6607_v41  ;;  %v15799_v24 = vmul.f32 %v11845_v23, %v6608_v16  ;;  %v15806_v43 = vmul.f32 %v11847_v27, %v6609_v46  ;;  %v15811_v55 = vmul.f32 %v11849_v31, %v6610_v33  ;;  %v12158_v23 = vld [vmem:[%s16721_s3 + $0xc0] sm:$0xff]   ;;  %v12161_v16 = vld [vmem:[%s16721_s3 + $0x90] sm:$0xff]   ;;  %v12163_v33 = vld [vmem:[%s16721_s3 + $0x98] sm:$0xff]  }
0x286b   :  { %11059 = vmatmul.mubr.bf16.vlgmr.msra.gmra.mrb[188].mxu0 %v6627_v25  ;;  %v6628_v35 = vpack.c.bf16 %v6620_v37, %v6620_v37  ;;  %v7056_v6 = vrot.slane %v6620_v37, 7  ;;  %v7058_v2 = vrot.slane %v15792_v36, 6  ;;  %v7060_v29 = vrot.slane %v15794_v11, 5  ;;  %v12162_v46 = vld [vmem:[%s16721_s3 + $0xd0] sm:$0xff]   ;;  %v12164_v25 = vld [vmem:[%s16721_s3 + $0xd8] sm:$0xff]   ;;  %v12165_v37 = vld [vmem:[%s16721_s3 + $0xa0] sm:$0xff]  }
0x286c   :  { %v11857_v0 = vpop.eup %11856  ;;  %11083 = vmatpush3.bf16.msra.mxu0 %v12157_v10  ;;  %11098 = vmatprep.mubr.msk.bf16.mxu0 %vm12379_vm0, %v16994_v34  ;;  %v7062_v27 = vrot.slane %v15796_v21, 4  ;;  %v7064_v31 = vrot.slane %v15799_v24, 3  ;;  %v7066_v57 = vrot.slane %v15806_v43, 2  ;;  %v7068_v28 = vrot.slane %v15811_v55, 1  ;;  %v12170_v10 = vld [vmem:[%s16721_s3 + $0xf0] sm:$0xff]  }
0x286d   :  { %11079 = vmatmul.mubr.bf16.vlgmr.msra.gmra.mrb[184].mxu1 %v6628_v35  ;;  %v7057_v30 = vsel %vm1556_vm2, %v7056_v6, %v6619_v26  ;;  %7096 = vrot.lane.b32.xlu0 %v11857_v0, %s12380_s26  ;;  %v12166_v35 = vld [vmem:[%s16721_s3 + $0xe0] sm:$0xff]   ;;  %v12167_v6 = vld [vmem:[%s16721_s3 + $0xa8] sm:$0xff]   ;;  %v12169_v0 = vld [vmem:[%s16721_s3 + $0xb0] sm:$0xff]  }
0x286e   :  { %11103 = vmatpush3.bf16.msra.mxu1 %v12158_v23  ;;  %11084 = vmatprep.subr.bf16.mxu0 %v16994_v34  ;;  %v7059_v8 = vsel %vm1559_vm3, %v7058_v2, %v7057_v30  ;;  %v12168_v2 = vld [vmem:[%s16721_s3 + $0xe8] sm:$0xff]   ;;  %v12171_v30 = vld [vmem:[%s16721_s3 + $0xb8] sm:$0xff]  }
0x286f   :  { %11104 = vmatprep.subr.bf16.mxu1 %v16994_v34  ;;  %11118 = vmatprep.mubr.msk.bf16.mxu1 %vm12379_vm0, %v16994_v34  ;;  %v7061_v59 = vsel %vm1562_vm4, %v7060_v29, %v7059_v8  ;;  %v6629_v29 = vpack.c.bf16 %v15792_v36, %v15792_v36  ;;  %v12172_v23 = vld [vmem:[%s16721_s3 + $0xf8] sm:$0xff]   ;;  %v6630_v8 = vpack.c.bf16 %v15794_v11, %v15794_v11  ;;  %v12174_v36 = vld [vmem:[%s16721_s3 + $0x140] sm:$0xff]   ;;  %v12175_v11 = vld [vmem:[%s16721_s3 + $0x108] sm:$0xff]  }
0x2870   :  { %11085 = vmatpush3.bf16.msra.mxu0 %v12159_v12  ;;  %v7063_v22 = vsel %vm1565_vm5, %v7062_v27, %v7061_v59  ;;  %v12173_v27 = vld [vmem:[%s16721_s3 + $0x100] sm:$0xff]   ;;  %v12176_v59 = vld [vmem:[%s16721_s3 + $0x148] sm:$0xff]   ;;  %v12178_v12 = vld [vmem:[%s16721_s3 + $0x150] sm:$0xff]  }
0x2871   :  { %11086 = vmatprep.subr.bf16.mxu0 %v16994_v34  ;;  %v7065_v26 = vsel %vm1568_vm6, %v7064_v31, %v7063_v22  ;;  %v12177_v31 = vld [vmem:[%s16721_s3 + $0x110] sm:$0xff]   ;;  %v12179_v22 = vld [vmem:[%s16721_s3 + $0x118] sm:$0xff]  }
0x2872   :  { %11105 = vmatpush3.bf16.msra.mxu1 %v12160_v32  ;;  %v7067_v14 = vsel %vm1571_vm7, %v7066_v57, %v7065_v26  ;;  %v12180_v57 = vld [vmem:[%s16721_s3 + $0x158] sm:$0xff]   ;;  %v12181_v26 = vld [vmem:[%s16721_s3 + $0x120] sm:$0xff]   ;;  %v12183_v32 = vld [vmem:[%s16721_s3 + $0x128] sm:$0xff]  }
0x2873   :  { %11106 = vmatprep.subr.bf16.mxu1 %v16994_v34  ;;  %v7069_v41 = vsel %vm1574_vm8, %v7068_v28, %v7067_v14  ;;  %v12182_v28 = vld [vmem:[%s16721_s3 + $0x160] sm:$0xff]   ;;  %v12184_v14 = vld [vmem:[%s16721_s3 + $0x168] sm:$0xff]  }
0x2874   :  { %11087 = vmatpush3.bf16.msra.mxu0 %v12161_v16  ;;  %7072 = vst [vmem:[#allocation4 + $0x20] sm:$0xff] %v7069_v41  ;;  %v12185_v41 = vld [vmem:[%s16721_s3 + $0x130] sm:$0xff]  }
0x2875   :  { %11088 = vmatprep.subr.bf16.mxu0 %v16994_v34  ;;  %v12186_v16 = vld [vmem:[%s16721_s3 + $0x170] sm:$0xff]  }
0x2876   :  { %11107 = vmatpush3.bf16.msra.mxu1 %v12162_v46  ;;  %v12187_v46 = vld [vmem:[%s16721_s3 + $0x138] sm:$0xff]  }
0x2877   :  { %11108 = vmatprep.subr.bf16.mxu1 %v16994_v34 }
0x2878   :  { %11089 = vmatpush3.bf16.msra.mxu0 %v12163_v33  ;;  %v6631_v33 = vpack.c.bf16 %v15796_v21, %v15796_v21  ;;  %v12190_v21 = vld [vmem:[%s16721_s3 + $0x1c0] sm:$0xff]  }
0x2879   :  { %11090 = vmatprep.subr.bf16.mxu0 %v16994_v34 }
0x287a   :  { %11109 = vmatpush3.bf16.msra.mxu1 %v12164_v25  ;;  %v12188_v25 = vld [vmem:[%s16721_s3 + $0x178] sm:$0xff]  }
0x287b   :  { %11110 = vmatprep.subr.bf16.mxu1 %v16994_v34 }
0x287c   :  { %11091 = vmatpush3.bf16.msra.mxu0 %v12165_v37  ;;  %v6632_v37 = vpack.c.bf16 %v15799_v24, %v15799_v24  ;;  %v12191_v24 = vld [vmem:[%s16721_s3 + $0x188] sm:$0xff]  }
0x287d   :  { %11092 = vmatprep.subr.bf16.mxu0 %v16994_v34 }
0x287e   :  { %11111 = vmatpush3.bf16.msra.mxu1 %v12166_v35  ;;  %v12189_v35 = vld [vmem:[%s16721_s3 + $0x180] sm:$0xff]  }
0x287f   :  { %11112 = vmatprep.subr.bf16.mxu1 %v16994_v34 }
0x2880   :  { %11093 = vmatpush3.bf16.msra.mxu0 %v12167_v6  ;;  %v12192_v6 = vld [vmem:[%s16721_s3 + $0x1c8] sm:$0xff]  }
0x2881   :  { %11094 = vmatprep.subr.bf16.mxu0 %v16994_v34 }
0x2882   :  { %11113 = vmatpush3.bf16.msra.mxu1 %v12168_v2  ;;  %v12193_v2 = vld [vmem:[%s16721_s3 + $0x190] sm:$0xff]  }
0x2883   :  { %11114 = vmatprep.subr.bf16.mxu1 %v16994_v34 }
0x2884   :  { %11095 = vmatpush3.bf16.msra.mxu0 %v12169_v0  ;;  %v12194_v0 = vld [vmem:[%s16721_s3 + $0x1d0] sm:$0xff]  }
0x2885   :  { %11096 = vmatprep.subr.bf16.mxu0 %v16994_v34 }
0x2886   :  { %11115 = vmatpush3.bf16.msra.mxu1 %v12170_v10  ;;  %v12195_v10 = vld [vmem:[%s16721_s3 + $0x198] sm:$0xff]  }
0x2887   :  { %11116 = vmatprep.subr.bf16.mxu1 %v16994_v34 }
0x2888   :  { %11097 = vmatpush3.bf16.msra.mxu0 %v12171_v30  ;;  %v12196_v30 = vld [vmem:[%s16721_s3 + $0x1d8] sm:$0xff]  }
0x2889   :  { %11122 = vmatprep.subr.bf16.mxu0 %v16994_v34 }
0x288a   :  { %11117 = vmatpush3.bf16.msra.mxu1 %v12172_v23  ;;  %v12198_v23 = vld [vmem:[%s16721_s3 + $0x1e0] sm:$0xff]  }
0x288b   :  { %11099 = vmatmul.mubr.bf16.vlgmr.msra.gmra.mrb[192].mxu0 %v6629_v29  ;;  %11142 = vmatprep.subr.bf16.mxu1 %v16994_v34  ;;  %v12197_v29 = vld [vmem:[%s16721_s3 + $0x1a0] sm:$0xff]  }
0x288c   :  { %11123 = vmatpush3.bf16.msra.mxu0 %v12173_v27  ;;  %11138 = vmatprep.mubr.msk.bf16.mxu0 %vm12379_vm0, %v16994_v34  ;;  %v12200_v27 = vld [vmem:[%s16721_s3 + $0x1e8] sm:$0xff]  }
0x288d   :  { %11119 = vmatmul.mubr.bf16.vlgmr.msra.gmra.mrb[188].mxu1 %v6630_v8  ;;  %11124 = vmatprep.subr.bf16.mxu0 %v16994_v34  ;;  %v12199_v8 = vld [vmem:[%s16721_s3 + $0x1a8] sm:$0xff]  }
0x288e   :  { %11143 = vmatpush3.bf16.msra.mxu1 %v12174_v36  ;;  %11158 = vmatprep.mubr.msk.bf16.mxu1 %vm12379_vm0, %v16994_v34  ;;  %v12201_v36 = vld [vmem:[%s16721_s3 + $0x1b0] sm:$0xff]  }
0x288f   :  { %11144 = vmatprep.subr.bf16.mxu1 %v16994_v34 }
0x2890   :  { %11125 = vmatpush3.bf16.msra.mxu0 %v12175_v11  ;;  %v12202_v11 = vld [vmem:[%s16721_s3 + $0x1f0] sm:$0xff]  }
0x2891   :  { %11126 = vmatprep.subr.bf16.mxu0 %v16994_v34 }
0x2892   :  { %11145 = vmatpush3.bf16.msra.mxu1 %v12176_v59  ;;  %v12203_v59 = vld [vmem:[%s16721_s3 + $0x1b8] sm:$0xff]  }
0x2893   :  { %11146 = vmatprep.subr.bf16.mxu1 %v16994_v34 }
0x2894   :  { %11127 = vmatpush3.bf16.msra.mxu0 %v12177_v31  ;;  %v6633_v31 = vpack.c.bf16 %v15806_v43, %v15806_v43  ;;  %v12206_v43 = vld [vmem:[%s16728_s10] sm:$0xff]  }
0x2895   :  { %11128 = vmatprep.subr.bf16.mxu0 %v16994_v34 }
0x2896   :  { %11147 = vmatpush3.bf16.msra.mxu1 %v12178_v12  ;;  %v12204_v12 = vld [vmem:[%s16721_s3 + $0x1f8] sm:$0xff]  }
0x2897   :  { %11148 = vmatprep.subr.bf16.mxu1 %v16994_v34 }
0x2898   :  { %11129 = vmatpush3.bf16.msra.mxu0 %v12179_v22  ;;  %v6634_v22 = vpack.c.bf16 %v15811_v55, %v15811_v55  ;;  %v12207_v55 = vld [vmem:[%s16726_s8] ss:$8 sps:$4 sm:$0xff]  }
0x2899   :  { %11130 = vmatprep.subr.bf16.mxu0 %v16994_v34 }
0x289a   :  { %11149 = vmatpush3.bf16.msra.mxu1 %v12180_v57  ;;  %v12205_v57 = vld [vmem:[%s16726_s8 + $0x4] ss:$8 sps:$4 sm:$0xff]  }
0x289b   :  { %11150 = vmatprep.subr.bf16.mxu1 %v16994_v34 }
0x289c   :  { %11131 = vmatpush3.bf16.msra.mxu0 %v12181_v26  ;;  %v12208_v26 = vld [vmem:[%s16726_s8 + $0x14] ss:$8 sps:$4 sm:$0xff]  }
0x289d   :  { %11132 = vmatprep.subr.bf16.mxu0 %v16994_v34 }
0x289e   :  { %11151 = vmatpush3.bf16.msra.mxu1 %v12182_v28  ;;  %v12209_v28 = vld [vmem:[%s16728_s10 + $0x8] sm:$0xff]  }
0x289f   :  { %11152 = vmatprep.subr.bf16.mxu1 %v16994_v34 }
0x28a0   :  { %11133 = vmatpush3.bf16.msra.mxu0 %v12183_v32  ;;  %v12210_v32 = vld [vmem:[%s16726_s8 + $0x10] ss:$8 sps:$4 sm:$0xff]  }
0x28a1   :  { %11134 = vmatprep.subr.bf16.mxu0 %v16994_v34 }
0x28a2   :  { %11153 = vmatpush3.bf16.msra.mxu1 %v12184_v14 }
0x28a3   :  { %11154 = vmatprep.subr.bf16.mxu1 %v16994_v34 }
0x28a4   :  { %11135 = vmatpush3.bf16.msra.mxu0 %v12185_v41 }
0x28a5   :  { %11136 = vmatprep.subr.bf16.mxu0 %v16994_v34 }
0x28a6   :  { %11155 = vmatpush3.bf16.msra.mxu1 %v12186_v16 }
0x28a7   :  { %11156 = vmatprep.subr.bf16.mxu1 %v16994_v34 }
0x28a8   :  { %11137 = vmatpush3.bf16.msra.mxu0 %v12187_v46 }
0x28a9   :  { %11162 = vmatprep.subr.bf16.mxu0 %v16994_v34 }
0x28aa   :  { %11157 = vmatpush3.bf16.msra.mxu1 %v12188_v25 }
0x28ab   :  { %11139 = vmatmul.mubr.bf16.vlgmr.msra.gmra.mrb[196].mxu0 %v6631_v33  ;;  %11182 = vmatprep.subr.bf16.mxu1 %v16994_v34 }
0x28ac   :  { %11163 = vmatpush3.bf16.msra.mxu0 %v12189_v35  ;;  %11178 = vmatprep.mubr.msk.bf16.mxu0 %vm12379_vm0, %v16994_v34 }
0x28ad   :  { %11159 = vmatmul.mubr.bf16.vlgmr.msra.gmra.mrb[192].mxu1 %v6632_v37  ;;  %11164 = vmatprep.subr.bf16.mxu0 %v16994_v34 }
0x28ae   :  { %11183 = vmatpush3.bf16.msra.mxu1 %v12190_v21  ;;  %11198 = vmatprep.mubr.msk.bf16.mxu1 %vm12379_vm0, %v16994_v34 }
0x28af   :  { %11184 = vmatprep.subr.bf16.mxu1 %v16994_v34 }
0x28b0   :  { %11165 = vmatpush3.bf16.msra.mxu0 %v12191_v24 }
0x28b1   :  { %11166 = vmatprep.subr.bf16.mxu0 %v16994_v34 }
0x28b2   :  { %11185 = vmatpush3.bf16.msra.mxu1 %v12192_v6 }
0x28b3   :  { %11186 = vmatprep.subr.bf16.mxu1 %v16994_v34 }
0x28b4   :  { %11167 = vmatpush3.bf16.msra.mxu0 %v12193_v2 }
0x28b5   :  { %11168 = vmatprep.subr.bf16.mxu0 %v16994_v34 }
0x28b6   :  { %11187 = vmatpush3.bf16.msra.mxu1 %v12194_v0 }
0x28b7   :  { %11188 = vmatprep.subr.bf16.mxu1 %v16994_v34 }
0x28b8   :  { %11169 = vmatpush3.bf16.msra.mxu0 %v12195_v10 }
0x28b9   :  { %11170 = vmatprep.subr.bf16.mxu0 %v16994_v34 }
0x28ba   :  { %11189 = vmatpush3.bf16.msra.mxu1 %v12196_v30 }
0x28bb   :  { %11190 = vmatprep.subr.bf16.mxu1 %v16994_v34 }
0x28bc   :  { %11171 = vmatpush3.bf16.msra.mxu0 %v12197_v29 }
0x28bd   :  { %11172 = vmatprep.subr.bf16.mxu0 %v16994_v34 }
0x28be   :  { %11191 = vmatpush3.bf16.msra.mxu1 %v12198_v23 }
0x28bf   :  { %11192 = vmatprep.subr.bf16.mxu1 %v16994_v34 }
0x28c0   :  { %11173 = vmatpush3.bf16.msra.mxu0 %v12199_v8 }
0x28c1   :  { %11174 = vmatprep.subr.bf16.mxu0 %v16994_v34 }
0x28c2   :  { %11193 = vmatpush3.bf16.msra.mxu1 %v12200_v27 }
0x28c3   :  { %11194 = vmatprep.subr.bf16.mxu1 %v16994_v34 }
0x28c4   :  { %11175 = vmatpush3.bf16.msra.mxu0 %v12201_v36 }
0x28c5   :  { %11176 = vmatprep.subr.bf16.mxu0 %v16994_v34 }
0x28c6   :  { %11195 = vmatpush3.bf16.msra.mxu1 %v12202_v11 }
0x28c7   :  { %11196 = vmatprep.subr.bf16.mxu1 %v16994_v34 }
0x28c8   :  { %11177 = vmatpush3.bf16.msra.mxu0 %v12203_v59 }
0x28c9   :  { %11202 = vmatprep.subr.bf16.mxu0 %v16994_v34 }
0x28ca   :  { %11197 = vmatpush3.bf16.msra.mxu1 %v12204_v12 }
0x28cb   :  { %11179 = vmatmul.mubr.bf16.vlgmr.msra.gmra.mrb[200].mxu0 %v6633_v31  ;;  %7178 = vmatprep.subr.bf16.mxu1 %v12205_v57 }
0x28cc   :  { %11203 = vmatpush3.bf16.msra.mxu0 %v12206_v43  ;;  %11206 = vmatprep.mubr.msk.bf16.mxu0 %vm12379_vm0, %v16994_v34 }
0x28cd   :  { %11199 = vmatmul.mubr.bf16.vlgmr.msra.gmra.mrb[196].mxu1 %v6634_v22  ;;  %11204 = vmatprep.subr.bf16.mxu0 %v16994_v34 }
0x28ce   :  { %7179 = vmatpush1.bf16.msra.mxu1 %v12207_v55  ;;  %7210 = vmatprep.mubr.bf16.mxu1 %v17012_v19 }
0x28cf   :  { %7180 = vmatprep.subr.bf16.mxu1 %v12208_v26 }
0x28d0   :  { %11205 = vmatpush3.bf16.msra.mxu0 %v12209_v28 }
0x28d1   :  { %11210 = vmatprep.subr.bf16.mxu0 %v16994_v34 }
0x28d2   :  { %7181 = vmatpush1.bf16.msra.mxu1 %v12210_v32 }
0x28d3   :  { %11218 = vmatprep.subr.bf16.mxu1 %v16994_v34 }
0x28df   :  { %v7097_v19 = vpop.permute.xlu0 %7096 }
0x28e0   :  { %v16058_v14 = vmul.f32 %v15783_v5, %v7097_v19 }
0x28e2   :  { %v7100_v41 = vpack.c.bf16 %v16058_v14, %v16058_v14 }
0x28e4   :  { %7102 = vrot.lane.b32.xlu1 %v7100_v41, %s12381_s29 }
0x293e   :  { %v6669_v16 = vpop.f32.mrb[188].mxu0 }
0x293f   :  { %v11060_v46 = vpop.f32.mrb[189].mxu0  ;;  %v6963_v37 = vpack.c.bf16 %v6669_v16, %v6669_v16 }
0x2940   :  { %v6672_v33 = vpop.f32.mrb[190].mxu0  ;;  %v6709_v25 = vpop.f32.mrb[184].mxu1 }
0x2941   :  { %v6964_v35 = vpack.c.bf16 %v6709_v25, %v6709_v25  ;;  %v11061_v21 = vpop.f32.mrb[191].mxu0  ;;  %v11080_v24 = vpop.f32.mrb[185].mxu1  ;;  %v6979_v10 = vunpack.c.l.b16 %v6963_v37 }
0x2942   :  { %v6712_v6 = vpop.f32.mrb[186].mxu1 }
0x2943   :  { %v6980_v2 = vunpack.c.l.b16 %v6964_v35  ;;  %v11081_v0 = vpop.f32.mrb[187].mxu1 }
0x2945   :  { %v6987_v30 = vrot.slane %v6980_v2, 7 }
0x2947   :  { %v6988_v5 = vsel %vm1556_vm2, %v6987_v30, %v6979_v10 }
0x295e   :  { %v6749_v29 = vpop.f32.mrb[192].mxu0 }
0x295f   :  { %v6965_v23 = vpack.c.bf16 %v6749_v29, %v6749_v29  ;;  %v11100_v8 = vpop.f32.mrb[193].mxu0 }
0x2960   :  { %v6752_v27 = vpop.f32.mrb[194].mxu0  ;;  %v6789_v36 = vpop.f32.mrb[188].mxu1 }
0x2961   :  { %v6981_v11 = vunpack.c.l.b16 %v6965_v23  ;;  %v6966_v59 = vpack.c.bf16 %v6789_v36, %v6789_v36  ;;  %v11101_v31 = vpop.f32.mrb[195].mxu0  ;;  %v11120_v12 = vpop.f32.mrb[189].mxu1 }
0x2962   :  { %v6792_v22 = vpop.f32.mrb[190].mxu1 }
0x2963   :  { %v6989_v57 = vrot.slane %v6981_v11, 6  ;;  %v6982_v43 = vunpack.c.l.b16 %v6966_v59  ;;  %v11121_v55 = vpop.f32.mrb[191].mxu1 }
0x2965   :  { %v6990_v26 = vsel %vm1559_vm3, %v6989_v57, %v6988_v5  ;;  %v6991_v28 = vrot.slane %v6982_v43, 5 }
0x2967   :  { %v6992_v32 = vsel %vm1562_vm4, %v6991_v28, %v6990_v26 }
0x297e   :  { %v6829_v19 = vpop.f32.mrb[196].mxu0 }
0x297f   :  { %v6967_v41 = vpack.c.bf16 %v6829_v19, %v6829_v19  ;;  %v11140_v16 = vpop.f32.mrb[197].mxu0 }
0x2980   :  { %v6832_v46 = vpop.f32.mrb[198].mxu0  ;;  %v6869_v33 = vpop.f32.mrb[192].mxu1  ;;  %v12212_v16 = vld [vmem:[%s16723_s5 + $0x8] sm:$0xff]  }
0x2981   :  { %v6983_v25 = vunpack.c.l.b16 %v6967_v41  ;;  %v6968_v37 = vpack.c.bf16 %v6869_v33, %v6869_v33  ;;  %v11141_v35 = vpop.f32.mrb[199].mxu0  ;;  %v11160_v21 = vpop.f32.mrb[193].mxu1  ;;  %v12211_v41 = vld [vmem:[%s16723_s5] sm:$0xff]  }
0x2982   :  { %v6872_v24 = vpop.f32.mrb[194].mxu1  ;;  %v7103_v46 = vpop.permute.xlu1 %7102 }
0x2983   :  { %v6993_v6 = vrot.slane %v6983_v25, 4  ;;  %v6984_v2 = vunpack.c.l.b16 %v6968_v37  ;;  %v11161_v0 = vpop.f32.mrb[195].mxu1 }
0x2985   :  { %v6994_v10 = vsel %vm1565_vm5, %v6993_v6, %v6992_v32  ;;  %v6995_v30 = vrot.slane %v6984_v2, 3 }
0x2987   :  { %v6996_v5 = vsel %vm1568_vm6, %v6995_v30, %v6994_v10 }
0x299e   :  { %v6909_v29 = vpop.f32.mrb[200].mxu0 }
0x299f   :  { %v6969_v23 = vpack.c.bf16 %v6909_v29, %v6909_v29  ;;  %v11180_v8 = vpop.f32.mrb[201].mxu0 }
0x29a0   :  { %v6912_v27 = vpop.f32.mrb[202].mxu0  ;;  %v6949_v36 = vpop.f32.mrb[196].mxu1 }
0x29a1   :  { %v6985_v11 = vunpack.c.l.b16 %v6969_v23  ;;  %v6970_v59 = vpack.c.bf16 %v6949_v36, %v6949_v36  ;;  %v11181_v31 = vpop.f32.mrb[203].mxu0  ;;  %v11200_v12 = vpop.f32.mrb[197].mxu1 }
0x29a2   :  { %v6952_v22 = vpop.f32.mrb[198].mxu1 }
0x29a3   :  { %v6997_v57 = vrot.slane %v6985_v11, 2  ;;  %v6986_v43 = vunpack.c.l.b16 %v6970_v59  ;;  %v11201_v55 = vpop.f32.mrb[199].mxu1 }
0x29a5   :  { %v6998_v26 = vsel %vm1571_vm7, %v6997_v57, %v6996_v5  ;;  %v6999_v28 = vrot.slane %v6986_v43, 1 }
0x29a7   :  { %v7000_v32 = vsel %vm1574_vm8, %v6999_v28, %v6998_v26 }
0x29a8   :  { %v7001_v19 = vpack.c.b16 %v7000_v32, %v7000_v32  ;;  %v17232_v32 = vld [vmem:[#allocation47_spill] sm:$0xff] }
0x29aa   :  { %11207 = vmatmul.mubr.msk.bf16.vlgmr.msra.gmra.mrb[204].mxu0 %vm218_vm1, %v7001_v19 }
0x29ab   :  { %11211 = vmatpush3.bf16.msra.mxu0 %v12211_v41  ;;  %11214 = vmatprep.mubr.msk.bf16.mxu0 %vm12379_vm0, %v16994_v34 }
0x29ac   :  { %11212 = vmatprep.subr.bf16.mxu0 %v16994_v34 }
0x29af   :  { %11213 = vmatpush3.bf16.msra.mxu0 %v12212_v16 }
0x29b0   :  { %11238 = vmatprep.subr.bf16.mxu0 %v16994_v34 }
0x29b2   :  { %11215 = vmatmul.mubr.msk.bf16.vlgmr.msra.gmra.mrb[168].mxu0 %vm218_vm1, %v7103_v46  ;;  %v17234_v46 = vld [vmem:[#allocation49_spill] sm:$0xff] }
0x29b3   :  { %11254 = vmatprep.mubr.msk.bf16.mxu0 %vm12379_vm0, %v16994_v34 }
0x29b8   :  { %11239 = vmatpush3.bf16.xpose.msra.mxu0 %v17016_v44  ;;  %v12213_v44 = vld [vmem:[%s16727_s9] sm:$0xff] }
0x29b9   :  { %11240 = vmatprep.subr.bf16.mxu0 %v16994_v34 }
0x29c0   :  { %11241 = vmatpush3.bf16.xpose.msra.mxu0 %v17018_v48  ;;  %v6072_v48 = vadd.f32 %v12213_v44, %v15540_v39  ;;  %v17235_v44 = vld [vmem:[#allocation50_spill] sm:$0xff] }
0x29c1   :  { %11242 = vmatprep.subr.bf16.mxu0 %v16994_v34 }
0x29c8   :  { %11243 = vmatpush3.bf16.xpose.msra.mxu0 %v17020_v54 }
0x29c9   :  { %11244 = vmatprep.subr.bf16.mxu0 %v16994_v34 }
0x29d0   :  { %11245 = vmatpush3.bf16.xpose.msra.mxu0 %v17022_v58 }
0x29d1   :  { %11246 = vmatprep.subr.bf16.mxu0 %v16994_v34 }
0x29d8   :  { %11247 = vmatpush3.bf16.xpose.msra.mxu0 %v17024_v62 }
0x29d9   :  { %11248 = vmatprep.subr.bf16.mxu0 %v16994_v34 }
0x29e0   :  { %11249 = vmatpush3.bf16.xpose.msra.mxu0 %v17026_v38 }
0x29e1   :  { %11250 = vmatprep.subr.bf16.mxu0 %v16994_v34 }
0x29e8   :  { %11251 = vmatpush3.bf16.xpose.msra.mxu0 %v17028_v60  ;;  %v12214_v60 = vld [vmem:[%s16725_s7] sm:$0xff] }
0x29e9   :  { %11252 = vmatprep.subr.bf16.mxu0 %v16994_v34 }
0x29f0   :  { %11253 = vmatpush3.bf16.xpose.msra.mxu0 %v17030_v18 }
0x29f1   :  { %11278 = vmatprep.subr.bf16.mxu0 %v16994_v34 }
0x2a7d   :  { %v7039_v54 = vpop.f32.mrb[204].mxu0 }
0x2a7e   :  { %v7040_v58 = vadd.f32 %v7039_v54, %v6072_v48  ;;  %v11208_v62 = vpop.f32.mrb[205].mxu0  ;;  %v17236_v48 = vld [vmem:[#allocation51_spill] sm:$0xff]  ;;  %v17237_v54 = vld [vmem:[#allocation52_spill] sm:$0xff] }
0x2a7f   :  { %v7042_v38 = vpop.f32.mrb[206].mxu0  ;;  %v17239_v62 = vld [vmem:[#allocation54_spill] sm:$0xff] }
0x2a80   :  { %11858 = vtanh.f32 %v7040_v58  ;;  %v11209_v33 = vpop.f32.mrb[207].mxu0  ;;  %v17238_v58 = vld [vmem:[#allocation53_spill] sm:$0xff]  ;;  %v17240_v38 = vld [vmem:[#allocation55_spill] sm:$0xff] }
0x2a81   :  { %v17241_v33 = vld [vmem:[#allocation56_spill] sm:$0xff] }
0x2a85   :  { %v7141_v25 = vpop.f32.mrb[168].mxu0 }
0x2a86   :  { %v11551_v18 = vadd.f32 %v12214_v60, %v7141_v25  ;;  %v11216_v37 = vpop.f32.mrb[169].mxu0  ;;  %v17242_v25 = vld [vmem:[#allocation57_spill] sm:$0xff]  ;;  %v17243_v60 = vld [vmem:[#allocation58_spill] sm:$0xff] }
0x2a87   :  { %v7144_v35 = vpop.f32.mrb[170].mxu0  ;;  %v17245_v37 = vld [vmem:[#allocation60_spill] sm:$0xff] }
0x2a88   :  { %11860 = vtanh.f32 %v11551_v18  ;;  %v11217_v21 = vpop.f32.mrb[171].mxu0  ;;  %v8483_v39 = vmul.f32 -1.442695, %v11551_v18  ;;  %v17244_v18 = vld [vmem:[#allocation59_spill] sm:$0xff]  ;;  %v17246_v35 = vld [vmem:[#allocation61_spill] sm:$0xff] }
0x2a8a   :  { %v11859_v24 = vpop.eup %11858  ;;  %11862 = vpow2.f32 %v8483_v39 }
0x2a8b   :  { %7047 = vst [vmem:[#allocation2 + $0x20] sm:$0xff] %v11859_v24 }
0x2a92   :  { %v11861_v6 = vpop.eup %11860 }
0x2a93   :  { %7156 = vrot.lane.b32.xlu0 %v11861_v6, %s12380_s26  ;;  %v17247_v6 = vld [vmem:[#allocation63_spill] sm:$0xff] }
0x2a94   :  { %v11863_v2 = vpop.eup %11862 }
0x2a95   :  { %v7150_v0 = vadd.f32 1.0, %v11863_v2  ;;  %v17248_v2 = vld [vmem:[#allocation64_spill] sm:$0xff] }
0x2a97   :  { %11864 = vrcp.f32 %v7150_v0 }
0x2aa1   :  { %v11865_v10 = vpop.eup %11864 }
0x2aa2   :  { %v7154_v29 = vmul.f32 %v11865_v10, %v15497_v52 }
0x2b05   :  { %v7157_v30 = vpop.permute.xlu0 %7156 }
0x2b06   :  { %v7159_v5 = vmul.f32 %v11865_v10, %v7157_v30  ;;  %v17249_v30 = vld [vmem:[#allocation67_spill] sm:$0xff] }
0x2b08   :  { %7161 = vrot.lane.b32.xlu1 %v7159_v5, %s12381_s29 }
0x2b7a   :  { %v7162_v23 = vpop.permute.xlu1 %7161 }
0x2b7b   :  { %v16110_v8 = vadd.f32 %v7162_v23, %v7154_v29  ;;  %v17250_v29 = vld [vmem:[#allocation68_spill] sm:$0xff]  ;;  %v17251_v23 = vld [vmem:[#allocation71_spill] sm:$0xff] }
0x2b7d   :  { %11866 = vtanh.f32 %v16110_v8 }
0x2b87   :  { %v11867_v27 = vpop.eup %11866 }
0x2b88   :  { %7167 = vrot.lane.b32.xlu0 %v11867_v27, %s12380_s26  ;;  %v17252_v27 = vld [vmem:[#allocation72_spill] sm:$0xff] }
0x2bfa   :  { %v7168_v36 = vpop.permute.xlu0 %7167 }
0x2bfb   :  { %v16114_v11 = vmul.f32 %v11865_v10, %v7168_v36  ;;  %v17253_v36 = vld [vmem:[#allocation75_spill] sm:$0xff] }
0x2bfd   :  { %v7171_v59 = vpack.c.bf16 %v16114_v11, %v16114_v11  ;;  %v11589_v31 = vpack.i.bf16 %v16114_v11, %v16058_v14 }
0x2bff   :  { %7173 = vrot.lane.b32.xlu1 %v7171_v59, %s12381_s29  ;;  %v17254_v59 = vld [vmem:[#allocation76_spill] sm:$0xff] }
0x2c71   :  { %v7174_v52 = vpop.permute.xlu1 %7173 }
0x2c72   :  { %8484 = vmatmul.mubr.msk.bf16.vlgmr.msra.gmra.mrb[200].mxu1 %vm218_vm1, %v7174_v52  ;;  %v17255_v52 = vld [vmem:[#allocation79_spill] sm:$0xff] }
0x2c73   :  { %11219 = vmatpush3.bf16.xpose.msra.mxu1 %v17015_v40  ;;  %11234 = vmatprep.mubr.msk.bf16.mxu1 %vm12379_vm0, %v16994_v34 }
0x2c74   :  { %11220 = vmatprep.subr.bf16.mxu1 %v16994_v34 }
0x2c7b   :  { %11221 = vmatpush3.bf16.xpose.msra.mxu1 %v17017_v45 }
0x2c7c   :  { %11222 = vmatprep.subr.bf16.mxu1 %v16994_v34 }
0x2c83   :  { %11223 = vmatpush3.bf16.xpose.msra.mxu1 %v17019_v49  ;;  %v12215_v49 = vld [vmem:[%s16727_s9 + $0x8] sm:$0xff] }
0x2c84   :  { %11224 = vmatprep.subr.bf16.mxu1 %v16994_v34 }
0x2c8b   :  { %11225 = vmatpush3.bf16.xpose.msra.mxu1 %v17021_v56 }
0x2c8c   :  { %11226 = vmatprep.subr.bf16.mxu1 %v16994_v34 }
0x2c93   :  { %11227 = vmatpush3.bf16.xpose.msra.mxu1 %v17023_v61 }
0x2c94   :  { %11228 = vmatprep.subr.bf16.mxu1 %v16994_v34 }
0x2c9b   :  { %11229 = vmatpush3.bf16.xpose.msra.mxu1 %v17025_v50 }
0x2c9c   :  { %11230 = vmatprep.subr.bf16.mxu1 %v16994_v34 }
0x2ca3   :  { %11231 = vmatpush3.bf16.xpose.msra.mxu1 %v17027_v47 }
0x2ca4   :  { %11232 = vmatprep.subr.bf16.mxu1 %v16994_v34 }
0x2cab   :  { %11233 = vmatpush3.bf16.xpose.msra.mxu1 %v17029_v42 }
0x2cac   :  { %11258 = vmatprep.subr.bf16.mxu1 %v16994_v34 }
0x2d45   :  { %v16140_v40 = vpop.f32.mrb[200].mxu1 }
0x2d46   :  { %v7214_v45 = vpop.f32.mrb[201].mxu1 }
0x2d47   :  { %v7215_v56 = vadd.f32 %v12215_v49, %v7214_v45  ;;  %v7216_v61 = vpop.f32.mrb[202].mxu1  ;;  %v17256_v45 = vld [vmem:[#allocation80_spill] sm:$0xff]  ;;  %v17257_v49 = vld [vmem:[#allocation83_spill] sm:$0xff] }
0x2d48   :  { %v7217_v50 = vpop.f32.mrb[203].mxu1  ;;  %v17259_v61 = vld [vmem:[#allocation87_spill] sm:$0xff] }
0x2d49   :  { %v7219_v12 = vpack.c.bf16 %v7215_v56, %v7215_v56  ;;  %v17258_v56 = vld [vmem:[#allocation84_spill] sm:$0xff] }
0x2d4a   :  { %v17260_v50 = vld [vmem:[#allocation88_spill] sm:$0xff] }
0x2d4b   :  { %v7227_v22 = vrot.slane %v7219_v12, %v17031_v63  ;;  %v17261_v12 = vld [vmem:[#allocation91_spill] sm:$0xff] }
0x2d4d   :  { %v16147_v47 = vrot.slane %v7227_v22, %v17031_v63 }
0x2d4f   :  { %v7246_v42 = vunpack.i.h.s16 %v16147_v47  ;;  %v8485_v57 = vpack.i.b16 %v16147_v47, %v16147_v47  ;;  %v7243_v21 = vcombine.high %v16147_v47, %v16147_v47 }
0x2d51   :  { %v7257_v43 = vrot.slane %v8485_v57, %v17032_v7  ;;  %v7301_v55 = vpack.i.b16 %v7246_v42, %v7246_v42  ;;  %v7250_v24 = vunpack.i.h.s16 %v7243_v21  ;;  %v8491_v39 = vpack.i.b16 %v7243_v21, %v7243_v21  ;;  %v17263_v57 = vld [vmem:[#allocation95_spill] sm:$0xff] }
0x2d53   :  { %11235 = vmatmul.mubr.msk.bf16.vlgmr.msra.gmra.mrb[204].mxu1 %vm218_vm1, %v7257_v43  ;;  %v7305_v26 = vrot.slane %v7301_v55, %v17032_v7  ;;  %v7493_v0 = vpack.i.b16 %v7250_v24, %v7250_v24  ;;  %v7449_v10 = vrot.slane %v8491_v39, %v17032_v7  ;;  %v17264_v55 = vld [vmem:[#allocation96_spill] sm:$0xff] }
0x2d54   :  { %11259 = vmatpush3.bf16.xpose.msra.mxu1 %v17033_v15  ;;  %11274 = vmatprep.mubr.msk.bf16.mxu1 %vm12379_vm0, %v16994_v34  ;;  %v17226_v15 = vld [vmem:[#allocation41_spill] sm:$0xff] }
0x2d55   :  { %11260 = vmatprep.subr.bf16.mxu1 %v16994_v34  ;;  %11255 = vmatmul.mubr.msk.bf16.vlgmr.msra.gmra.mrb[208].mxu0 %vm218_vm1, %v7305_v26  ;;  %v7497_v5 = vrot.slane %v7493_v0, %v17032_v7 }
0x2d56   :  { %11279 = vmatpush3.bf16.xpose.msra.mxu0 %v17034_v20  ;;  %11294 = vmatprep.mubr.msk.bf16.mxu0 %vm12379_vm0, %v16994_v34  ;;  %v17227_v20 = vld [vmem:[#allocation42_spill] sm:$0xff] }
0x2d57   :  { %11280 = vmatprep.subr.bf16.mxu0 %v16994_v34 }
0x2d5c   :  { %11261 = vmatpush3.bf16.xpose.msra.mxu1 %v17035_v17  ;;  %v17228_v17 = vld [vmem:[#allocation43_spill] sm:$0xff] }
0x2d5d   :  { %11262 = vmatprep.subr.bf16.mxu1 %v16994_v34 }
0x2d5e   :  { %11281 = vmatpush3.bf16.xpose.msra.mxu0 %v17036_v3  ;;  %v7228_v3 = vcombine.high %v7227_v22, %v7227_v22  ;;  %v17262_v22 = vld [vmem:[#allocation92_spill] sm:$0xff] }
0x2d5f   :  { %11282 = vmatprep.subr.bf16.mxu0 %v16994_v34 }
0x2d64   :  { %11263 = vmatpush3.bf16.xpose.msra.mxu1 %v17037_v53  ;;  %v17229_v53 = vld [vmem:[#allocation44_spill] sm:$0xff] }
0x2d65   :  { %11264 = vmatprep.subr.bf16.mxu1 %v16994_v34 }
0x2d66   :  { %11283 = vmatpush3.bf16.xpose.msra.mxu0 %v17038_v1  ;;  %v17230_v1 = vld [vmem:[#allocation45_spill] sm:$0xff] }
0x2d67   :  { %11284 = vmatprep.subr.bf16.mxu0 %v16994_v34 }
0x2d6c   :  { %11265 = vmatpush3.bf16.xpose.msra.mxu1 %v17039_v9  ;;  %v16188_v9 = vrot.slane %v7228_v3, %v17031_v63  ;;  %v17233_v63 = vld [vmem:[#allocation48_spill] sm:$0xff] }
0x2d6d   :  { %11266 = vmatprep.subr.bf16.mxu1 %v16994_v34  ;;  %v12217_v3 = vld [vmem:[%s16721_s3 + $0x40] sm:$0xff]  }
0x2d6e   :  { %11285 = vmatpush3.bf16.xpose.msra.mxu0 %v17040_v13  ;;  %v7248_v13 = vunpack.i.h.s16 %v16188_v9  ;;  %v8488_v28 = vpack.i.b16 %v16188_v9, %v16188_v9  ;;  %v7244_v47 = vcombine.high %v16188_v9, %v16188_v9  ;;  %v12221_v9 = vld [vmem:[%s16721_s3 + $0x50] sm:$0xff]  }
0x2d6f   :  { %11286 = vmatprep.subr.bf16.mxu0 %v16994_v34 }
0x2d70   :  { %v7397_v19 = vpack.i.b16 %v7248_v13, %v7248_v13  ;;  %v7353_v41 = vrot.slane %v8488_v28, %v17032_v7  ;;  %v7252_v42 = vunpack.i.h.s16 %v7244_v47  ;;  %v8494_v43 = vpack.i.b16 %v7244_v47, %v7244_v47  ;;  %v12222_v13 = vld [vmem:[%s16721_s3 + $0x18] sm:$0xff]   ;;  %v12224_v28 = vld [vmem:[%s16721_s3 + $0x20] sm:$0xff]  }
0x2d72   :  { %v7401_v16 = vrot.slane %v7397_v19, %v17032_v7  ;;  %v7589_v26 = vpack.i.b16 %v7252_v42, %v7252_v42  ;;  %v12232_v42 = vld [vmem:[%s16729_s11] sm:$0xff]  ;;  %s12384_s11 = smov 96  }
0x2d74   :  { %11267 = vmatpush3.bf16.xpose.msra.mxu1 %v17041_v51  ;;  %v17231_v51 = vld [vmem:[#allocation46_spill] sm:$0xff] }
0x2d75   :  { %11268 = vmatprep.subr.bf16.mxu1 %v16994_v34 }
0x2d76   :  { %11287 = vmatpush3.bf16.xpose.msra.mxu0 %v17226_v15  ;;  %v7545_v15 = vrot.slane %v8494_v43, %v17032_v7 }
0x2d77   :  { %11288 = vmatprep.subr.bf16.mxu0 %v16994_v34 }
0x2d7c   :  { %11269 = vmatpush3.bf16.xpose.msra.mxu1 %v17227_v20  ;;  %v7593_v20 = vrot.slane %v7589_v26, %v17032_v7  ;;  %v12218_v7 = vld [vmem:[%s16721_s3 + $0x8] sm:$0xff]  }
0x2d7d   :  { %11270 = vmatprep.subr.bf16.mxu1 %v16994_v34  ;;  %v17269_v26 = vld [vmem:[#allocation101_spill] sm:$0xff] }
0x2d7e   :  { %11289 = vmatpush3.bf16.xpose.msra.mxu0 %v17228_v17  ;;  %v12216_v17 = vld [vmem:[%s16721_s3] sm:$0xff]  }
0x2d7f   :  { %11290 = vmatprep.subr.bf16.mxu0 %v16994_v34 }
0x2d84   :  { %11271 = vmatpush3.bf16.xpose.msra.mxu1 %v17229_v53  ;;  %v12219_v53 = vld [vmem:[%s16721_s3 + $0x48] sm:$0xff]  }
0x2d85   :  { %11272 = vmatprep.subr.bf16.mxu1 %v16994_v34 }
0x2d86   :  { %11291 = vmatpush3.bf16.xpose.msra.mxu0 %v17230_v1  ;;  %v12220_v1 = vld [vmem:[%s16721_s3 + $0x10] sm:$0xff]  }
0x2d87   :  { %11292 = vmatprep.subr.bf16.mxu0 %v16994_v34 }
0x2d8c   :  { %11273 = vmatpush3.bf16.xpose.msra.mxu1 %v17231_v51  ;;  %v12223_v51 = vld [vmem:[%s16721_s3 + $0x58] sm:$0xff]  }
0x2d8d   :  { %11298 = vmatprep.subr.bf16.mxu1 %v16994_v34 }
0x2d8e   :  { %11293 = vmatpush3.bf16.xpose.msra.mxu0 %v17232_v32 }
0x2d8f   :  { %11318 = vmatprep.subr.bf16.mxu0 %v16994_v34 }
0x2d93   :  { %11275 = vmatmul.mubr.msk.bf16.vlgmr.msra.gmra.mrb[208].mxu1 %vm218_vm1, %v7353_v41  ;;  %v12225_v41 = vld [vmem:[%s16721_s3 + $0x60] sm:$0xff]  }
0x2d94   :  { %11299 = vmatpush3.bf16.xpose.msra.mxu1 %v17233_v63  ;;  %11314 = vmatprep.mubr.msk.bf16.mxu1 %vm12379_vm0, %v16994_v34 }
0x2d95   :  { %11300 = vmatprep.subr.bf16.mxu1 %v16994_v34  ;;  %11295 = vmatmul.mubr.msk.bf16.vlgmr.msra.gmra.mrb[212].mxu0 %vm218_vm1, %v7401_v16  ;;  %v12226_v16 = vld [vmem:[%s16721_s3 + $0x28] sm:$0xff]  }
0x2d96   :  { %11319 = vmatpush3.bf16.xpose.msra.mxu0 %v17234_v46  ;;  %11334 = vmatprep.mubr.msk.bf16.mxu0 %vm12379_vm0, %v16994_v34 }
0x2d97   :  { %11320 = vmatprep.subr.bf16.mxu0 %v16994_v34 }
0x2d9c   :  { %11301 = vmatpush3.bf16.xpose.msra.mxu1 %v17235_v44 }
0x2d9d   :  { %11302 = vmatprep.subr.bf16.mxu1 %v16994_v34 }
0x2d9e   :  { %11321 = vmatpush3.bf16.xpose.msra.mxu0 %v17236_v48 }
0x2d9f   :  { %11322 = vmatprep.subr.bf16.mxu0 %v16994_v34 }
0x2da4   :  { %11303 = vmatpush3.bf16.xpose.msra.mxu1 %v17237_v54 }
0x2da5   :  { %11304 = vmatprep.subr.bf16.mxu1 %v16994_v34 }
0x2da6   :  { %11323 = vmatpush3.bf16.xpose.msra.mxu0 %v17238_v58  ;;  %v12227_v58 = vld [vmem:[%s16721_s3 + $0x68] sm:$0xff]  }
0x2da7   :  { %11324 = vmatprep.subr.bf16.mxu0 %v16994_v34 }
0x2dac   :  { %11305 = vmatpush3.bf16.xpose.msra.mxu1 %v17239_v62 }
0x2dad   :  { %11306 = vmatprep.subr.bf16.mxu1 %v16994_v34 }
0x2dae   :  { %11325 = vmatpush3.bf16.xpose.msra.mxu0 %v17240_v38  ;;  %v12228_v38 = vld [vmem:[%s16721_s3 + $0x30] sm:$0xff]  }
0x2daf   :  { %11326 = vmatprep.subr.bf16.mxu0 %v16994_v34 }
0x2db4   :  { %11307 = vmatpush3.bf16.xpose.msra.mxu1 %v17241_v33  ;;  %v12229_v33 = vld [vmem:[%s16721_s3 + $0x70] sm:$0xff]  }
0x2db5   :  { %11308 = vmatprep.subr.bf16.mxu1 %v16994_v34 }
0x2db6   :  { %11327 = vmatpush3.bf16.xpose.msra.mxu0 %v17242_v25  ;;  %v12230_v25 = vld [vmem:[%s16721_s3 + $0x38] sm:$0xff]  }
0x2db7   :  { %11328 = vmatprep.subr.bf16.mxu0 %v16994_v34 }
0x2dbc   :  { %11309 = vmatpush3.bf16.xpose.msra.mxu1 %v17243_v60  ;;  %v12231_v60 = vld [vmem:[%s16721_s3 + $0x78] sm:$0xff]  }
0x2dbd   :  { %11310 = vmatprep.subr.bf16.mxu1 %v16994_v34 }
0x2dbe   :  { %11329 = vmatpush3.bf16.xpose.msra.mxu0 %v17244_v18 }
0x2dbf   :  { %11330 = vmatprep.subr.bf16.mxu0 %v16994_v34 }
0x2dc4   :  { %11311 = vmatpush3.bf16.xpose.msra.mxu1 %v17245_v37 }
0x2dc5   :  { %11312 = vmatprep.subr.bf16.mxu1 %v16994_v34 }
0x2dc6   :  { %11331 = vmatpush3.bf16.xpose.msra.mxu0 %v17246_v35 }
0x2dc7   :  { %11332 = vmatprep.subr.bf16.mxu0 %v16994_v34 }
0x2dcc   :  { %11313 = vmatpush3.bf16.xpose.msra.mxu1 %v17247_v6 }
0x2dcd   :  { %11338 = vmatprep.subr.bf16.mxu1 %v16994_v34 }
0x2dce   :  { %11333 = vmatpush3.bf16.xpose.msra.mxu0 %v17248_v2 }
0x2dcf   :  { %11358 = vmatprep.subr.bf16.mxu0 %v16994_v34 }
0x2dd3   :  { %11315 = vmatmul.mubr.msk.bf16.vlgmr.msra.gmra.mrb[212].mxu1 %vm218_vm1, %v7449_v10 }
0x2dd4   :  { %11339 = vmatpush3.bf16.xpose.msra.mxu1 %v17249_v30  ;;  %11354 = vmatprep.mubr.msk.bf16.mxu1 %vm12379_vm0, %v16994_v34 }
0x2dd5   :  { %11340 = vmatprep.subr.bf16.mxu1 %v16994_v34  ;;  %11335 = vmatmul.mubr.msk.bf16.vlgmr.msra.gmra.mrb[216].mxu0 %vm218_vm1, %v7497_v5 }
0x2dd6   :  { %11359 = vmatpush3.bf16.xpose.msra.mxu0 %v17250_v29  ;;  %11374 = vmatprep.mubr.msk.bf16.mxu0 %vm12379_vm0, %v16994_v34 }
0x2dd7   :  { %11360 = vmatprep.subr.bf16.mxu0 %v16994_v34 }
0x2ddc   :  { %11341 = vmatpush3.bf16.xpose.msra.mxu1 %v17251_v23 }
0x2ddd   :  { %11342 = vmatprep.subr.bf16.mxu1 %v16994_v34 }
0x2dde   :  { %11361 = vmatpush3.bf16.xpose.msra.mxu0 %v17252_v27 }
0x2ddf   :  { %11362 = vmatprep.subr.bf16.mxu0 %v16994_v34 }
0x2de4   :  { %11343 = vmatpush3.bf16.xpose.msra.mxu1 %v17253_v36 }
0x2de5   :  { %11344 = vmatprep.subr.bf16.mxu1 %v16994_v34 }
0x2de6   :  { %11363 = vmatpush3.bf16.xpose.msra.mxu0 %v17254_v59  ;;  %v17265_v59 = vld [vmem:[#allocation97_spill] sm:$0xff] }
0x2de7   :  { %11364 = vmatprep.subr.bf16.mxu0 %v16994_v34 }
0x2dec   :  { %11345 = vmatpush3.bf16.xpose.msra.mxu1 %v17255_v52 }
0x2ded   :  { %11346 = vmatprep.subr.bf16.mxu1 %v16994_v34 }
0x2dee   :  { %11365 = vmatpush3.bf16.xpose.msra.mxu0 %v17256_v45  ;;  %v17266_v45 = vld [vmem:[#allocation98_spill] sm:$0xff] }
0x2def   :  { %11366 = vmatprep.subr.bf16.mxu0 %v16994_v34 }
0x2df4   :  { %11347 = vmatpush3.bf16.xpose.msra.mxu1 %v17257_v49 }
0x2df5   :  { %11348 = vmatprep.subr.bf16.mxu1 %v16994_v34 }
0x2df6   :  { %11367 = vmatpush3.bf16.xpose.msra.mxu0 %v17258_v56 }
0x2df7   :  { %11368 = vmatprep.subr.bf16.mxu0 %v16994_v34 }
0x2dfc   :  { %11349 = vmatpush3.bf16.xpose.msra.mxu1 %v17259_v61  ;;  %v17267_v61 = vld [vmem:[#allocation99_spill] sm:$0xff] }
0x2dfd   :  { %11350 = vmatprep.subr.bf16.mxu1 %v16994_v34 }
0x2dfe   :  { %11369 = vmatpush3.bf16.xpose.msra.mxu0 %v17260_v50 }
0x2dff   :  { %11370 = vmatprep.subr.bf16.mxu0 %v16994_v34 }
0x2e04   :  { %11351 = vmatpush3.bf16.xpose.msra.mxu1 %v17261_v12 }
0x2e05   :  { %11352 = vmatprep.subr.bf16.mxu1 %v16994_v34 }
0x2e06   :  { %11371 = vmatpush3.bf16.xpose.msra.mxu0 %v17262_v22  ;;  %v17268_v22 = vld [vmem:[#allocation100_spill] sm:$0xff] }
0x2e07   :  { %11372 = vmatprep.subr.bf16.mxu0 %v16994_v34 }
0x2e0c   :  { %11353 = vmatpush3.bf16.xpose.msra.mxu1 %v17263_v57 }
0x2e0d   :  { %11378 = vmatprep.subr.bf16.mxu1 %v16994_v34 }
0x2e0e   :  { %11373 = vmatpush3.bf16.xpose.msra.mxu0 %v17264_v55 }
0x2e0f   :  { %11398 = vmatprep.subr.bf16.mxu0 %v16994_v34 }
0x2e13   :  { %11355 = vmatmul.mubr.msk.bf16.vlgmr.msra.gmra.mrb[216].mxu1 %vm218_vm1, %v7545_v15 }
0x2e14   :  { %11379 = vmatpush3.bf16.msra.mxu1 %v12216_v17  ;;  %11394 = vmatprep.mubr.msk.bf16.mxu1 %vm12379_vm0, %v16994_v34 }
0x2e15   :  { %11380 = vmatprep.subr.bf16.mxu1 %v16994_v34  ;;  %11375 = vmatmul.mubr.msk.bf16.vlgmr.msra.gmra.mrb[220].mxu0 %vm218_vm1, %v7593_v20 }
0x2e16   :  { %11399 = vmatpush3.bf16.msra.mxu0 %v12217_v3  ;;  %11414 = vmatprep.mubr.msk.bf16.mxu0 %vm12379_vm0, %v16994_v34 }
0x2e17   :  { %11400 = vmatprep.subr.bf16.mxu0 %v16994_v34 }
0x2e18   :  { %11381 = vmatpush3.bf16.msra.mxu1 %v12218_v7 }
0x2e19   :  { %11382 = vmatprep.subr.bf16.mxu1 %v16994_v34 }
0x2e1a   :  { %11401 = vmatpush3.bf16.msra.mxu0 %v12219_v53 }
0x2e1b   :  { %11402 = vmatprep.subr.bf16.mxu0 %v16994_v34 }
0x2e1c   :  { %11383 = vmatpush3.bf16.msra.mxu1 %v12220_v1 }
0x2e1d   :  { %11384 = vmatprep.subr.bf16.mxu1 %v16994_v34 }
0x2e1e   :  { %11403 = vmatpush3.bf16.msra.mxu0 %v12221_v9  ;;  %v17270_v9 = vld [vmem:[#allocation102_spill] sm:$0xff] }
0x2e1f   :  { %11404 = vmatprep.subr.bf16.mxu0 %v16994_v34 }
0x2e20   :  { %11385 = vmatpush3.bf16.msra.mxu1 %v12222_v13 }
0x2e21   :  { %11386 = vmatprep.subr.bf16.mxu1 %v16994_v34 }
0x2e22   :  { %11405 = vmatpush3.bf16.msra.mxu0 %v12223_v51 }
0x2e23   :  { %11406 = vmatprep.subr.bf16.mxu0 %v16994_v34 }
0x2e24   :  { %11387 = vmatpush3.bf16.msra.mxu1 %v12224_v28 }
0x2e25   :  { %11388 = vmatprep.subr.bf16.mxu1 %v16994_v34 }
0x2e26   :  { %v7295_v32 = vpop.f32.mrb[204].mxu1  ;;  %11407 = vmatpush3.bf16.msra.mxu0 %v12225_v41 }
0x2e27   :  { %v11236_v19 = vpop.f32.mrb[205].mxu1  ;;  %11408 = vmatprep.subr.bf16.mxu0 %v16994_v34  ;;  %v7645_v57 = vadd.f32 %v12232_v42, %v7295_v32 }
0x2e28   :  { %v7298_v63 = vpop.f32.mrb[206].mxu1  ;;  %11389 = vmatpush3.bf16.msra.mxu1 %v12226_v16  ;;  %v7343_v46 = vpop.f32.mrb[208].mxu0 }
0x2e29   :  { %v11237_v44 = vpop.f32.mrb[207].mxu1  ;;  %11390 = vmatprep.subr.bf16.mxu1 %v16994_v34  ;;  %v11256_v48 = vpop.f32.mrb[209].mxu0  ;;  %v7646_v52 = vadd.f32 %v7343_v46, %v17265_v59  ;;  %v17271_v63 = vld [vmem:[#allocation103_spill] sm:$0xff] }
0x2e2a   :  { %v7346_v54 = vpop.f32.mrb[210].mxu0  ;;  %11409 = vmatpush3.bf16.msra.mxu0 %v12227_v58 }
0x2e2b   :  { %v11257_v62 = vpop.f32.mrb[211].mxu0  ;;  %11410 = vmatprep.subr.bf16.mxu0 %v16994_v34  ;;  %v7661_v56 = vrot.slane %v7646_v52, 7 }
0x2e2c   :  { %11391 = vmatpush3.bf16.msra.mxu1 %v12228_v38 }
0x2e2d   :  { %11392 = vmatprep.subr.bf16.mxu1 %v16994_v34  ;;  %v7662_v43 = vsel %vm1556_vm2, %v7661_v56, %v7645_v57 }
0x2e2e   :  { %11411 = vmatpush3.bf16.msra.mxu0 %v12229_v33 }
0x2e2f   :  { %11412 = vmatprep.subr.bf16.mxu0 %v16994_v34 }
0x2e30   :  { %11393 = vmatpush3.bf16.msra.mxu1 %v12230_v25 }
0x2e31   :  { %11418 = vmatprep.subr.bf16.mxu1 %v16994_v34 }
0x2e32   :  { %11413 = vmatpush3.bf16.msra.mxu0 %v12231_v60 }
0x2e33   :  { %11438 = vmatprep.subr.bf16.mxu0 %v16994_v34 }
0x2e66   :  { %v7391_v18 = vpop.f32.mrb[208].mxu1 }
0x2e67   :  { %v11276_v37 = vpop.f32.mrb[209].mxu1  ;;  %v7647_v49 = vadd.f32 %v7391_v18, %v17266_v45 }
0x2e68   :  { %v7394_v35 = vpop.f32.mrb[210].mxu1  ;;  %v7439_v21 = vpop.f32.mrb[212].mxu0 }
0x2e69   :  { %v11277_v24 = vpop.f32.mrb[211].mxu1  ;;  %v11296_v6 = vpop.f32.mrb[213].mxu0  ;;  %v7648_v50 = vadd.f32 %v7439_v21, %v17267_v61  ;;  %v7663_v12 = vrot.slane %v7647_v49, 6 }
0x2e6a   :  { %v7442_v39 = vpop.f32.mrb[214].mxu0 }
0x2e6b   :  { %v11297_v2 = vpop.f32.mrb[215].mxu0  ;;  %v7665_v55 = vrot.slane %v7648_v50, 5  ;;  %v7664_v20 = vsel %vm1559_vm3, %v7663_v12, %v7662_v43 }
0x2e6d   :  { %v7666_v3 = vsel %vm1562_vm4, %v7665_v55, %v7664_v20 }
0x2ea6   :  { %v7487_v0 = vpop.f32.mrb[212].mxu1 }
0x2ea7   :  { %v11316_v10 = vpop.f32.mrb[213].mxu1  ;;  %v7649_v47 = vadd.f32 %v7487_v0, %v17268_v22 }
0x2ea8   :  { %v7490_v30 = vpop.f32.mrb[214].mxu1  ;;  %v7535_v5 = vpop.f32.mrb[216].mxu0 }
0x2ea9   :  { %v11317_v29 = vpop.f32.mrb[215].mxu1  ;;  %v11336_v23 = vpop.f32.mrb[217].mxu0  ;;  %v7650_v15 = vadd.f32 %v7535_v5, %v17269_v26  ;;  %v7667_v17 = vrot.slane %v7649_v47, 4 }
0x2eaa   :  { %v7538_v27 = vpop.f32.mrb[218].mxu0 }
0x2eab   :  { %v11337_v36 = vpop.f32.mrb[219].mxu0  ;;  %v7669_v7 = vrot.slane %v7650_v15, 3  ;;  %v7668_v1 = vsel %vm1565_vm5, %v7667_v17, %v7666_v3 }
0x2ead   :  { %v7670_v44 = vsel %vm1568_vm6, %v7669_v7, %v7668_v1 }
0x2ee6   :  { %v7583_v53 = vpop.f32.mrb[216].mxu1 }
0x2ee7   :  { %v7651_v13 = vadd.f32 %v7583_v53, %v17270_v9  ;;  %v11356_v51 = vpop.f32.mrb[217].mxu1 }
0x2ee8   :  { %v7586_v28 = vpop.f32.mrb[218].mxu1  ;;  %v7631_v32 = vpop.f32.mrb[220].mxu0 }
0x2ee9   :  { %v7671_v19 = vrot.slane %v7651_v13, 2  ;;  %v11357_v41 = vpop.f32.mrb[219].mxu1  ;;  %v7652_v16 = vadd.f32 %v7631_v32, %v17271_v63  ;;  %v11376_v46 = vpop.f32.mrb[221].mxu0 }
0x2eea   :  { %v7634_v48 = vpop.f32.mrb[222].mxu0 }
0x2eeb   :  { %v7672_v54 = vsel %vm1571_vm7, %v7671_v19, %v7670_v44  ;;  %v7673_v58 = vrot.slane %v7652_v16, 1  ;;  %v11377_v62 = vpop.f32.mrb[223].mxu0 }
0x2eed   :  { %v7674_v38 = vsel %vm1574_vm8, %v7673_v58, %v7672_v54 }
0x2eee   :  { %7676 = vmax.xlane.f32.xlu0 %v7674_v38 }
0x2f04   :  { %11590 = vrot.lane.b32.xlu0 %v11589_v31, %s12381_s29 }
0x2f08   :  { %8233 = vrot.lane.b32.xlu0 %v16110_v8, %s12384_s11 }
0x2f7b   :  { %v7677_v33 = vpop.xlane.xlu0 %7676 }
0x2f7c   :  { %v7679_v25 = vrot.slane %v7677_v33, 1  ;;  %v7680_v60 = vrot.slane %v7677_v33, 2  ;;  %v7681_v18 = vrot.slane %v7677_v33, 3  ;;  %v7682_v37 = vrot.slane %v7677_v33, 4 }
0x2f7d   :  { %v7683_v35 = vrot.slane %v7677_v33, 5  ;;  %v7684_v21 = vrot.slane %v7677_v33, 6  ;;  %v7694_v24 = vsub.f32 %v7645_v57, %v7677_v33  ;;  %v7685_v6 = vrot.slane %v7677_v33, 7 }
0x2f7e   :  { %v7695_v39 = vsub.f32 %v7646_v52, %v7679_v25  ;;  %v7696_v2 = vsub.f32 %v7647_v49, %v7680_v60  ;;  %v7697_v0 = vsub.f32 %v7648_v50, %v7681_v18  ;;  %v7698_v10 = vsub.f32 %v7649_v47, %v7682_v37 }
0x2f7f   :  { %v7702_v30 = vmul.f32 1.442695, %v7694_v24  ;;  %v11591_v14 = vpop.permute.xlu0 %11590  ;;  %v7699_v11 = vsub.f32 %v7650_v15, %v7683_v35  ;;  %v7700_v31 = vsub.f32 %v7651_v13, %v7684_v21  ;;  %v7701_v5 = vsub.f32 %v7652_v16, %v7685_v6  ;;  %v12233_v6 = vld [vmem:[%s16721_s3 + $0x80] sm:$0xff]  }
0x2f80   :  { %v7704_v29 = vmul.f32 1.442695, %v7695_v39  ;;  %v7706_v8 = vmul.f32 1.442695, %v7696_v2  ;;  %v7708_v23 = vmul.f32 1.442695, %v7697_v0  ;;  %v11593_v27 = vunpack.i.h.bf16 %v11591_v14 }
0x2f81   :  { %11868 = vpow2.f32 %v7702_v30  ;;  %v7710_v36 = vmul.f32 1.442695, %v7698_v10  ;;  %v11592_v59 = vunpack.i.l.bf16 %v11591_v14  ;;  %v7712_v45 = vmul.f32 1.442695, %v7699_v11  ;;  %v12234_v30 = vld [vmem:[%s16721_s3 + $0xc0] sm:$0xff]  }
0x2f82   :  { %11870 = vpow2.f32 %v7704_v29  ;;  %8226 = vst.msk [vmem:[#allocation6 + $0x8] sm:$0xff] %vm218_vm1, %v11593_v27  ;;  %v7714_v49 = vmul.f32 1.442695, %v7700_v31  ;;  %v7716_v56 = vmul.f32 1.442695, %v7701_v5  ;;  %v12235_v29 = vld [vmem:[%s16721_s3 + $0x88] sm:$0xff]  }
0x2f83   :  { %11872 = vpow2.f32 %v7706_v8  ;;  %8219 = vst.msk [vmem:[#allocation6] sm:$0xff] %vm218_vm1, %v11592_v59  ;;  %v8234_v52 = vpop.permute.xlu0 %8233  ;;  %v12236_v59 = vld [vmem:[%s16721_s3 + $0xc8] sm:$0xff]  }
0x2f84   :  { %11874 = vpow2.f32 %v7708_v23  ;;  %8237 = vst.msk [vmem:[#allocation7 + $0x8] sm:$0xff] %vm218_vm1, %v8234_v52 }
0x2f85   :  { %11876 = vpow2.f32 %v7710_v36 }
0x2f86   :  { %11878 = vpow2.f32 %v7712_v45 }
0x2f87   :  { %11880 = vpow2.f32 %v7714_v49  ;;  %v12237_v49 = vld [vmem:[%s16721_s3 + $0x90] sm:$0xff]  }
0x2f88   :  { %11882 = vpow2.f32 %v7716_v56  ;;  %v12238_v56 = vld [vmem:[%s16721_s3 + $0xd0] sm:$0xff]  }
0x2f8b   :  { %v11869_v61 = vpop.eup %11868 }
0x2f8c   :  { %v11871_v50 = vpop.eup %11870 }
0x2f8d   :  { %v11873_v12 = vpop.eup %11872  ;;  %v7726_v22 = vrot.slane %v11871_v50, 7 }
0x2f8e   :  { %v11875_v47 = vpop.eup %11874  ;;  %v7728_v42 = vrot.slane %v11873_v12, 6 }
0x2f8f   :  { %v11877_v57 = vpop.eup %11876  ;;  %v7727_v43 = vsel %vm1556_vm2, %v7726_v22, %v11869_v61  ;;  %v7730_v55 = vrot.slane %v11875_v47, 5  ;;  %v12242_v22 = vld [vmem:[%s16721_s3 + $0xe0] sm:$0xff]  }
0x2f90   :  { %v11879_v26 = vpop.eup %11878  ;;  %v7729_v15 = vsel %vm1559_vm3, %v7728_v42, %v7727_v43  ;;  %v7732_v20 = vrot.slane %v11877_v57, 4  ;;  %v12244_v42 = vld [vmem:[%s16721_s3 + $0xe8] sm:$0xff]   ;;  %v12246_v43 = vld [vmem:[%s16721_s3 + $0xf0] sm:$0xff]  }
0x2f91   :  { %v11881_v17 = vpop.eup %11880  ;;  %v7731_v3 = vsel %vm1562_vm4, %v7730_v55, %v7729_v15  ;;  %v7734_v7 = vrot.slane %v11879_v26, 3  ;;  %v12247_v55 = vld [vmem:[%s16721_s3 + $0xb8] sm:$0xff]  }
0x2f92   :  { %v11883_v53 = vpop.eup %11882  ;;  %v7733_v1 = vsel %vm1565_vm5, %v7732_v20, %v7731_v3  ;;  %v7736_v9 = vrot.slane %v11881_v17, 2  ;;  %v12248_v15 = vld [vmem:[%s16721_s3 + $0xf8] sm:$0xff]   ;;  %v12250_v3 = vld [vmem:[%s16721_s3 + $0x140] sm:$0xff]  }
0x2f93   :  { %v7735_v13 = vsel %vm1568_vm6, %v7734_v7, %v7733_v1  ;;  %v7738_v51 = vrot.slane %v11883_v53, 1  ;;  %v12251_v7 = vld [vmem:[%s16721_s3 + $0x108] sm:$0xff]   ;;  %v12253_v1 = vld [vmem:[%s16721_s3 + $0x110] sm:$0xff]  }
0x2f94   :  { %v7737_v28 = vsel %vm1571_vm7, %v7736_v9, %v7735_v13  ;;  %v12254_v9 = vld [vmem:[%s16721_s3 + $0x150] sm:$0xff]   ;;  %v12255_v13 = vld [vmem:[%s16721_s3 + $0x118] sm:$0xff]  }
0x2f95   :  { %v7739_v19 = vsel %vm1574_vm8, %v7738_v51, %v7737_v28  ;;  %v12256_v51 = vld [vmem:[%s16721_s3 + $0x158] sm:$0xff]   ;;  %v12257_v28 = vld [vmem:[%s16721_s3 + $0x120] sm:$0xff]  }
0x2f96   :  { %7741 = vadd.xlane.f32.xlu1 %v7739_v19  ;;  %v12258_v19 = vld [vmem:[%s16721_s3 + $0x160] sm:$0xff]  }
0x2fa7   :  { %8228 = vrot.lane.b32.xlu1 %v15789_v4, %s12384_s11 }
0x3023   :  { %v7742_v32 = vpop.xlane.xlu1 %7741 }
0x3024   :  { %11884 = vrcp.f32 %v7742_v32  ;;  %v12259_v32 = vld [vmem:[%s16721_s3 + $0x128] sm:$0xff]  }
0x3027   :  { %v8229_v41 = vpop.permute.xlu1 %8228 }
0x3028   :  { %8231 = vst.msk [vmem:[#allocation7] sm:$0xff] %vm218_vm1, %v8229_v41  ;;  %v12260_v41 = vld [vmem:[%s16721_s3 + $0x168] sm:$0xff]  }
0x302e   :  { %v11885_v63 = vpop.eup %11884 }
0x302f   :  { %v7760_v16 = vmul.f32 %v11885_v63, %v11869_v61  ;;  %v7745_v46 = vrot.slane %v11885_v63, 1  ;;  %v7746_v44 = vrot.slane %v11885_v63, 2  ;;  %v7747_v48 = vrot.slane %v11885_v63, 3  ;;  %v12239_v61 = vld [vmem:[%s16721_s3 + $0x98] sm:$0xff]  }
0x3030   :  { %v7748_v54 = vrot.slane %v11885_v63, 4  ;;  %v7749_v58 = vrot.slane %v11885_v63, 5  ;;  %v7750_v62 = vrot.slane %v11885_v63, 6  ;;  %v7751_v38 = vrot.slane %v11885_v63, 7  ;;  %v12261_v63 = vld [vmem:[%s16721_s3 + $0x130] sm:$0xff]  }
0x3031   :  { %v7768_v33 = vpack.c.bf16 %v7760_v16, %v7760_v16  ;;  %v7761_v25 = vmul.f32 %v11871_v50, %v7745_v46  ;;  %v16390_v60 = vmul.f32 %v11873_v12, %v7746_v44  ;;  %v16392_v18 = vmul.f32 %v11875_v47, %v7747_v48  ;;  %v12240_v50 = vld [vmem:[%s16721_s3 + $0xd8] sm:$0xff]   ;;  %v12241_v12 = vld [vmem:[%s16721_s3 + $0xa0] sm:$0xff]   ;;  %v12243_v47 = vld [vmem:[%s16721_s3 + $0xa8] sm:$0xff]  }
0x3032   :  { %v16394_v4 = vmul.f32 %v11877_v57, %v7748_v54  ;;  %v16397_v24 = vmul.f32 %v11879_v26, %v7749_v58  ;;  %v16404_v39 = vmul.f32 %v11881_v17, %v7750_v62  ;;  %v16409_v10 = vmul.f32 %v11883_v53, %v7751_v38  ;;  %v12245_v57 = vld [vmem:[%s16721_s3 + $0xb0] sm:$0xff]   ;;  %v12249_v17 = vld [vmem:[%s16721_s3 + $0x100] sm:$0xff]   ;;  %v12252_v53 = vld [vmem:[%s16721_s3 + $0x148] sm:$0xff]  }
0x3033   :  { %11395 = vmatmul.mubr.bf16.vlgmr.msra.gmra.mrb[220].mxu1 %v7768_v33  ;;  %v7769_v37 = vpack.c.bf16 %v7761_v25, %v7761_v25  ;;  %v8197_v35 = vrot.slane %v7761_v25, 7  ;;  %v8199_v21 = vrot.slane %v16390_v60, 6  ;;  %v8201_v0 = vrot.slane %v16392_v18, 5  ;;  %v12263_v46 = vld [vmem:[%s16721_s3 + $0x138] sm:$0xff]   ;;  %v12265_v58 = vld [vmem:[%s16721_s3 + $0x180] sm:$0xff]   ;;  %v12267_v38 = vld [vmem:[%s16721_s3 + $0x188] sm:$0xff]  }
0x3034   :  { %11419 = vmatpush3.bf16.msra.mxu1 %v12233_v6  ;;  %11434 = vmatprep.mubr.msk.bf16.mxu1 %vm12379_vm0, %v16994_v34  ;;  %v8203_v11 = vrot.slane %v16394_v4, 4  ;;  %v8205_v5 = vrot.slane %v16397_v24, 3  ;;  %v8207_v23 = vrot.slane %v16404_v39, 2  ;;  %v8209_v36 = vrot.slane %v16409_v10, 1  ;;  %v12264_v48 = vld [vmem:[%s16721_s3 + $0x178] sm:$0xff]   ;;  %v12266_v62 = vld [vmem:[%s16721_s3 + $0x1c0] sm:$0xff]  }
0x3035   :  { %11415 = vmatmul.mubr.bf16.vlgmr.msra.gmra.mrb[224].mxu0 %v7769_v37  ;;  %v8198_v2 = vsel %vm1556_vm2, %v8197_v35, %v7760_v16  ;;  %11420 = vmatprep.subr.bf16.mxu1 %v16994_v34  ;;  %v7770_v26 = vpack.c.bf16 %v16390_v60, %v16390_v60  ;;  %v7771_v20 = vpack.c.bf16 %v16392_v18, %v16392_v18  ;;  %v12262_v16 = vld [vmem:[%s16721_s3 + $0x170] sm:$0xff]   ;;  %v12268_v33 = vld [vmem:[%s16721_s3 + $0x1c8] sm:$0xff]   ;;  %v12271_v18 = vld [vmem:[%s16721_s3 + $0x198] sm:$0xff]  }
0x3036   :  { %11439 = vmatpush3.bf16.msra.mxu0 %v12234_v30  ;;  %v8200_v14 = vsel %vm1559_vm3, %v8199_v21, %v8198_v2  ;;  %11454 = vmatprep.mubr.msk.bf16.mxu0 %vm12379_vm0, %v16994_v34  ;;  %v7772_v44 = vpack.c.bf16 %v16394_v4, %v16394_v4  ;;  %v7773_v54 = vpack.c.bf16 %v16397_v24, %v16397_v24  ;;  %v12269_v25 = vld [vmem:[%s16721_s3 + $0x190] sm:$0xff]   ;;  %v12272_v4 = vld [vmem:[%s16721_s3 + $0x1d8] sm:$0xff]   ;;  %v12273_v37 = vld [vmem:[%s16721_s3 + $0x1a0] sm:$0xff]  }
0x3037   :  { %11440 = vmatprep.subr.bf16.mxu0 %v16994_v34  ;;  %v8202_v31 = vsel %vm1562_vm4, %v8201_v0, %v8200_v14  ;;  %v12270_v60 = vld [vmem:[%s16721_s3 + $0x1d0] sm:$0xff]   ;;  %v12274_v35 = vld [vmem:[%s16721_s3 + $0x1e0] sm:$0xff]   ;;  %v12275_v21 = vld [vmem:[%s16721_s3 + $0x1a8] sm:$0xff]   ;;  %v7774_v30 = vpack.c.bf16 %v16404_v39, %v16404_v39 }
0x3038   :  { %11421 = vmatpush3.bf16.msra.mxu1 %v12235_v29  ;;  %v8204_v8 = vsel %vm1565_vm5, %v8203_v11, %v8202_v31  ;;  %v12276_v24 = vld [vmem:[%s16721_s3 + $0x1e8] sm:$0xff]   ;;  %v12277_v6 = vld [vmem:[%s16721_s3 + $0x1b0] sm:$0xff]   ;;  %v12279_v0 = vld [vmem:[%s16721_s3 + $0x1b8] sm:$0xff]   ;;  %v7775_v11 = vpack.c.bf16 %v16409_v10, %v16409_v10 }
0x3039   :  { %11422 = vmatprep.subr.bf16.mxu1 %v16994_v34  ;;  %v8206_v27 = vsel %vm1568_vm6, %v8205_v5, %v8204_v8  ;;  %v12278_v2 = vld [vmem:[%s16721_s3 + $0x1f0] sm:$0xff]   ;;  %v12280_v14 = vld [vmem:[%s16721_s3 + $0x1f8] sm:$0xff]   ;;  %v12281_v31 = vld [vmem:[%s16728_s10] sm:$0xff]   ;;  %s12385_s3 = smov [#allocation4]  }
0x303a   :  { %11441 = vmatpush3.bf16.msra.mxu0 %v12236_v59  ;;  %v8208_v45 = vsel %vm1571_vm7, %v8207_v23, %v8206_v27  ;;  %v12282_v39 = vld [vmem:[%s16728_s10 + $0x8] sm:$0xff]   ;;  %s8255_s10 = sshll.u32 %s12385_s3, 4  ;;  %s8256_s10 = int_to_ptr.vmem [resolvable:$true] %s8255_s10 }
0x303b   :  { %11442 = vmatprep.subr.bf16.mxu0 %v16994_v34  ;;  %v8210_v52 = vsel %vm1574_vm8, %v8209_v36, %v8208_v45  ;;  %s12284_s25 = scalar_lea.vmem %s8256_s10, 768  ;;  %p12289_p1 = scmp.lt.s32.totalorder %s8256_s10, %s8256_s10 }
0x303c   :  { %11423 = vmatpush3.bf16.msra.mxu1 %v12237_v49  ;;  %8213 = vst [vmem:[#allocation4 + $0x28] sm:$0xff] %v8210_v52  ;;  %p12285_p0 = scmp.ne.s32.totalorder %s8256_s10, %s12284_s25  ;;  %p12290_p2 = scmp.lt.s32.totalorder %s12284_s25, %s12284_s25 }
0x303d   :  { %11424 = vmatprep.subr.bf16.mxu1 %v16994_v34 }
0x303e   :  { %11443 = vmatpush3.bf16.msra.mxu0 %v12238_v56  ;;  %p12291_p3 = por %p12290_p2, %p12289_p1 }
0x303f   :  { %11444 = vmatprep.subr.bf16.mxu0 %v16994_v34 }
0x3040   :  { %11425 = vmatpush3.bf16.msra.mxu1 %v12239_v61  ;;  %p12292_p4 = pnand %p12291_p3, %p12285_p0 }
0x3041   :  { %11426 = vmatprep.subr.bf16.mxu1 %v16994_v34 }
0x3042   :  { %11445 = vmatpush3.bf16.msra.mxu0 %v12240_v50 }
0x3043   :  { %11446 = vmatprep.subr.bf16.mxu0 %v16994_v34 }
0x3044   :  { %11427 = vmatpush3.bf16.msra.mxu1 %v12241_v12 }
0x3045   :  { %11428 = vmatprep.subr.bf16.mxu1 %v16994_v34 }
0x3046   :  { %11447 = vmatpush3.bf16.msra.mxu0 %v12242_v22 }
0x3047   :  { %11448 = vmatprep.subr.bf16.mxu0 %v16994_v34 }
0x3048   :  { %11429 = vmatpush3.bf16.msra.mxu1 %v12243_v47 }
0x3049   :  { %11430 = vmatprep.subr.bf16.mxu1 %v16994_v34 }
0x304a   :  { %11449 = vmatpush3.bf16.msra.mxu0 %v12244_v42 }
0x304b   :  { %11450 = vmatprep.subr.bf16.mxu0 %v16994_v34 }
0x304c   :  { %11431 = vmatpush3.bf16.msra.mxu1 %v12245_v57 }
0x304d   :  { %11432 = vmatprep.subr.bf16.mxu1 %v16994_v34 }
0x304e   :  { %11451 = vmatpush3.bf16.msra.mxu0 %v12246_v43 }
0x304f   :  { %11452 = vmatprep.subr.bf16.mxu0 %v16994_v34 }
0x3050   :  { %11433 = vmatpush3.bf16.msra.mxu1 %v12247_v55 }
0x3051   :  { %11458 = vmatprep.subr.bf16.mxu1 %v16994_v34 }
0x3052   :  { %11453 = vmatpush3.bf16.msra.mxu0 %v12248_v15 }
0x3053   :  { %11435 = vmatmul.mubr.bf16.vlgmr.msra.gmra.mrb[224].mxu1 %v7770_v26  ;;  %11478 = vmatprep.subr.bf16.mxu0 %v16994_v34 }
0x3054   :  { %11459 = vmatpush3.bf16.msra.mxu1 %v12249_v17  ;;  %11474 = vmatprep.mubr.msk.bf16.mxu1 %vm12379_vm0, %v16994_v34 }
0x3055   :  { %11455 = vmatmul.mubr.bf16.vlgmr.msra.gmra.mrb[228].mxu0 %v7771_v20  ;;  %11460 = vmatprep.subr.bf16.mxu1 %v16994_v34 }
0x3056   :  { %11479 = vmatpush3.bf16.msra.mxu0 %v12250_v3  ;;  %11494 = vmatprep.mubr.msk.bf16.mxu0 %vm12379_vm0, %v16994_v34 }
0x3057   :  { %11480 = vmatprep.subr.bf16.mxu0 %v16994_v34 }
0x3058   :  { %11461 = vmatpush3.bf16.msra.mxu1 %v12251_v7 }
0x3059   :  { %11462 = vmatprep.subr.bf16.mxu1 %v16994_v34 }
0x305a   :  { %11481 = vmatpush3.bf16.msra.mxu0 %v12252_v53 }
0x305b   :  { %11482 = vmatprep.subr.bf16.mxu0 %v16994_v34 }
0x305c   :  { %11463 = vmatpush3.bf16.msra.mxu1 %v12253_v1 }
0x305d   :  { %11464 = vmatprep.subr.bf16.mxu1 %v16994_v34 }
0x305e   :  { %11483 = vmatpush3.bf16.msra.mxu0 %v12254_v9 }
0x305f   :  { %11484 = vmatprep.subr.bf16.mxu0 %v16994_v34 }
0x3060   :  { %11465 = vmatpush3.bf16.msra.mxu1 %v12255_v13 }
0x3061   :  { %11466 = vmatprep.subr.bf16.mxu1 %v16994_v34 }
0x3062   :  { %11485 = vmatpush3.bf16.msra.mxu0 %v12256_v51 }
0x3063   :  { %11486 = vmatprep.subr.bf16.mxu0 %v16994_v34 }
0x3064   :  { %11467 = vmatpush3.bf16.msra.mxu1 %v12257_v28 }
0x3065   :  { %11468 = vmatprep.subr.bf16.mxu1 %v16994_v34 }
0x3066   :  { %11487 = vmatpush3.bf16.msra.mxu0 %v12258_v19 }
0x3067   :  { %11488 = vmatprep.subr.bf16.mxu0 %v16994_v34 }
0x3068   :  { %11469 = vmatpush3.bf16.msra.mxu1 %v12259_v32 }
0x3069   :  { %11470 = vmatprep.subr.bf16.mxu1 %v16994_v34 }
0x306a   :  { %11489 = vmatpush3.bf16.msra.mxu0 %v12260_v41 }
0x306b   :  { %11490 = vmatprep.subr.bf16.mxu0 %v16994_v34 }
0x306c   :  { %11471 = vmatpush3.bf16.msra.mxu1 %v12261_v63 }
0x306d   :  { %11472 = vmatprep.subr.bf16.mxu1 %v16994_v34 }
0x306e   :  { %11491 = vmatpush3.bf16.msra.mxu0 %v12262_v16 }
0x306f   :  { %11492 = vmatprep.subr.bf16.mxu0 %v16994_v34 }
0x3070   :  { %11473 = vmatpush3.bf16.msra.mxu1 %v12263_v46 }
0x3071   :  { %11498 = vmatprep.subr.bf16.mxu1 %v16994_v34 }
0x3072   :  { %11493 = vmatpush3.bf16.msra.mxu0 %v12264_v48 }
0x3073   :  { %11475 = vmatmul.mubr.bf16.vlgmr.msra.gmra.mrb[228].mxu1 %v7772_v44  ;;  %11518 = vmatprep.subr.bf16.mxu0 %v16994_v34 }
0x3074   :  { %11499 = vmatpush3.bf16.msra.mxu1 %v12265_v58  ;;  %11514 = vmatprep.mubr.msk.bf16.mxu1 %vm12379_vm0, %v16994_v34 }
0x3075   :  { %11495 = vmatmul.mubr.bf16.vlgmr.msra.gmra.mrb[232].mxu0 %v7773_v54  ;;  %11500 = vmatprep.subr.bf16.mxu1 %v16994_v34 }
0x3076   :  { %11519 = vmatpush3.bf16.msra.mxu0 %v12266_v62  ;;  %11534 = vmatprep.mubr.msk.bf16.mxu0 %vm12379_vm0, %v16994_v34 }
0x3077   :  { %11520 = vmatprep.subr.bf16.mxu0 %v16994_v34 }
0x3078   :  { %11501 = vmatpush3.bf16.msra.mxu1 %v12267_v38 }
0x3079   :  { %11502 = vmatprep.subr.bf16.mxu1 %v16994_v34 }
0x307a   :  { %11521 = vmatpush3.bf16.msra.mxu0 %v12268_v33 }
0x307b   :  { %11522 = vmatprep.subr.bf16.mxu0 %v16994_v34 }
0x307c   :  { %11503 = vmatpush3.bf16.msra.mxu1 %v12269_v25 }
0x307d   :  { %11504 = vmatprep.subr.bf16.mxu1 %v16994_v34 }
0x307e   :  { %11523 = vmatpush3.bf16.msra.mxu0 %v12270_v60 }
0x307f   :  { %11524 = vmatprep.subr.bf16.mxu0 %v16994_v34 }
0x3080   :  { %11505 = vmatpush3.bf16.msra.mxu1 %v12271_v18 }
0x3081   :  { %11506 = vmatprep.subr.bf16.mxu1 %v16994_v34 }
0x3082   :  { %11525 = vmatpush3.bf16.msra.mxu0 %v12272_v4 }
0x3083   :  { %11526 = vmatprep.subr.bf16.mxu0 %v16994_v34 }
0x3084   :  { %11507 = vmatpush3.bf16.msra.mxu1 %v12273_v37 }
0x3085   :  { %11508 = vmatprep.subr.bf16.mxu1 %v16994_v34 }
0x3086   :  { %11527 = vmatpush3.bf16.msra.mxu0 %v12274_v35 }
0x3087   :  { %11528 = vmatprep.subr.bf16.mxu0 %v16994_v34 }
0x3088   :  { %11509 = vmatpush3.bf16.msra.mxu1 %v12275_v21 }
0x3089   :  { %11510 = vmatprep.subr.bf16.mxu1 %v16994_v34 }
0x308a   :  { %11529 = vmatpush3.bf16.msra.mxu0 %v12276_v24 }
0x308b   :  { %11530 = vmatprep.subr.bf16.mxu0 %v16994_v34 }
0x308c   :  { %11511 = vmatpush3.bf16.msra.mxu1 %v12277_v6 }
0x308d   :  { %11512 = vmatprep.subr.bf16.mxu1 %v16994_v34 }
0x308e   :  { %11531 = vmatpush3.bf16.msra.mxu0 %v12278_v2 }
0x308f   :  { %11532 = vmatprep.subr.bf16.mxu0 %v16994_v34 }
0x3090   :  { %11513 = vmatpush3.bf16.msra.mxu1 %v12279_v0 }
0x3091   :  { %11538 = vmatprep.subr.bf16.mxu1 %v16994_v34 }
0x3092   :  { %11533 = vmatpush3.bf16.msra.mxu0 %v12280_v14 }
0x3093   :  { %11515 = vmatmul.mubr.bf16.vlgmr.msra.gmra.mrb[232].mxu1 %v7774_v30 }
0x3094   :  { %11539 = vmatpush3.bf16.msra.mxu1 %v12281_v31  ;;  %11542 = vmatprep.mubr.msk.bf16.mxu1 %vm12379_vm0, %v16994_v34 }
0x3095   :  { %11535 = vmatmul.mubr.bf16.vlgmr.msra.gmra.mrb[236].mxu0 %v7775_v11  ;;  %11540 = vmatprep.subr.bf16.mxu1 %v16994_v34 }
0x3098   :  { %11541 = vmatpush3.bf16.msra.mxu1 %v12282_v39 }
0x3106   :  { %v7810_v5 = vpop.f32.mrb[220].mxu1 }
0x3107   :  { %v11396_v29 = vpop.f32.mrb[221].mxu1  ;;  %v8104_v23 = vpack.c.bf16 %v7810_v5, %v7810_v5 }
0x3108   :  { %v7813_v8 = vpop.f32.mrb[222].mxu1  ;;  %v7850_v10 = vpop.f32.mrb[224].mxu0 }
0x3109   :  { %v8105_v27 = vpack.c.bf16 %v7850_v10, %v7850_v10  ;;  %v11397_v36 = vpop.f32.mrb[223].mxu1  ;;  %v11416_v59 = vpop.f32.mrb[225].mxu0  ;;  %v8120_v56 = vunpack.c.l.b16 %v8104_v23 }
0x310a   :  { %v7853_v45 = vpop.f32.mrb[226].mxu0 }
0x310b   :  { %v8121_v52 = vunpack.c.l.b16 %v8105_v27  ;;  %v11417_v49 = vpop.f32.mrb[227].mxu0 }
0x310d   :  { %v8128_v61 = vrot.slane %v8121_v52, 7 }
0x310f   :  { %v8129_v34 = vsel %vm1556_vm2, %v8128_v61, %v8120_v56 }
0x3126   :  { %v7890_v50 = vpop.f32.mrb[224].mxu1 }
0x3127   :  { %v8106_v12 = vpack.c.bf16 %v7890_v50, %v7890_v50  ;;  %v11436_v22 = vpop.f32.mrb[225].mxu1 }
0x3128   :  { %v7893_v47 = vpop.f32.mrb[226].mxu1  ;;  %v7930_v42 = vpop.f32.mrb[228].mxu0 }
0x3129   :  { %v8122_v57 = vunpack.c.l.b16 %v8106_v12  ;;  %v8107_v43 = vpack.c.bf16 %v7930_v42, %v7930_v42  ;;  %v11437_v55 = vpop.f32.mrb[227].mxu1  ;;  %v11456_v26 = vpop.f32.mrb[229].mxu0 }
0x312a   :  { %v7933_v15 = vpop.f32.mrb[230].mxu0 }
0x312b   :  { %v8130_v20 = vrot.slane %v8122_v57, 6  ;;  %v8123_v17 = vunpack.c.l.b16 %v8107_v43  ;;  %v11457_v3 = vpop.f32.mrb[231].mxu0 }
0x312d   :  { %v8131_v7 = vsel %vm1559_vm3, %v8130_v20, %v8129_v34  ;;  %v8132_v53 = vrot.slane %v8123_v17, 5 }
0x312f   :  { %v8133_v1 = vsel %vm1562_vm4, %v8132_v53, %v8131_v7 }
0x3146   :  { %v7970_v9 = vpop.f32.mrb[228].mxu1 }
0x3147   :  { %v8108_v13 = vpack.c.bf16 %v7970_v9, %v7970_v9  ;;  %v11476_v51 = vpop.f32.mrb[229].mxu1 }
0x3148   :  { %v7973_v28 = vpop.f32.mrb[230].mxu1  ;;  %v8010_v19 = vpop.f32.mrb[232].mxu0 }
0x3149   :  { %v8124_v32 = vunpack.c.l.b16 %v8108_v13  ;;  %v8109_v41 = vpack.c.bf16 %v8010_v19, %v8010_v19  ;;  %v11477_v63 = vpop.f32.mrb[231].mxu1  ;;  %v11496_v16 = vpop.f32.mrb[233].mxu0 }
0x314a   :  { %v8013_v46 = vpop.f32.mrb[234].mxu0 }
0x314b   :  { %v8134_v44 = vrot.slane %v8124_v32, 4  ;;  %v8125_v48 = vunpack.c.l.b16 %v8109_v41  ;;  %v11497_v54 = vpop.f32.mrb[235].mxu0 }
0x314d   :  { %v8135_v58 = vsel %vm1565_vm5, %v8134_v44, %v8133_v1  ;;  %v8136_v62 = vrot.slane %v8125_v48, 3 }
0x314f   :  { %v8137_v38 = vsel %vm1568_vm6, %v8136_v62, %v8135_v58 }
0x3166   :  { %v8050_v33 = vpop.f32.mrb[232].mxu1 }
0x3167   :  { %v8110_v25 = vpack.c.bf16 %v8050_v33, %v8050_v33  ;;  %v11516_v60 = vpop.f32.mrb[233].mxu1 }
0x3168   :  { %v8053_v18 = vpop.f32.mrb[234].mxu1  ;;  %v8090_v4 = vpop.f32.mrb[236].mxu0 }
0x3169   :  { %v8126_v37 = vunpack.c.l.b16 %v8110_v25  ;;  %v8111_v35 = vpack.c.bf16 %v8090_v4, %v8090_v4  ;;  %v11517_v21 = vpop.f32.mrb[235].mxu1  ;;  %v11536_v24 = vpop.f32.mrb[237].mxu0 }
0x316a   :  { %v8093_v6 = vpop.f32.mrb[238].mxu0 }
0x316b   :  { %v8138_v2 = vrot.slane %v8126_v37, 2  ;;  %v8127_v0 = vunpack.c.l.b16 %v8111_v35  ;;  %v11537_v30 = vpop.f32.mrb[239].mxu0 }
0x316d   :  { %v8139_v14 = vsel %vm1571_vm7, %v8138_v2, %v8137_v38  ;;  %v8140_v11 = vrot.slane %v8127_v0, 1 }
0x316f   :  { %v8141_v31 = vsel %vm1574_vm8, %v8140_v11, %v8139_v14 }
0x3170   :  { %v8142_v39 = vpack.c.b16 %v8141_v31, %v8141_v31 }
0x3172   :  { %11543 = vmatmul.mubr.msk.bf16.vlgmr.msra.gmra.mrb[236].mxu1 %vm218_vm1, %v8142_v39 }
0x3173   :  { %12295 = shalt.err (!%p12292_p4)
}
0x3174   :  { %s12296_s28 = scalar_lea.hbm %s16731_s13, 768 }
0x3175   :  { %p12297_p5 = scmp.ne.s32.totalorder %s16731_s13, %s12296_s28  ;;  %p12300_p6 = scmp.lt.u32.totalorder %s12296_s28, %s16731_s13 }
0x3177   :  { %p12302_p7 = pnand %p12300_p6, %p12297_p5 }
0x3179   :  { %12305 = shalt.err (!%p12302_p7)
}
0x317a   :  { %s12386_s16 = smov 128   ;;  %s12387_s17 = smov 8  }
0x317b   :  { %8261 = dma.vmem_to_hbm [thread:$0]  %s8256_s10, 768, %s16731_s13, [#allocation5], %s12386_s16, %s12386_s16, %s12387_s17  }
0x317c   :  { %s12388_s4 = smov [#allocation6]   ;;  %s12389_s21 = smov [#allocation7]  }
0x317d   :  { %s8267_s20 = sshll.u32 %s12388_s4, 4  ;;  %s8279_s22 = sshll.u32 %s12389_s21, 4  ;;  %s8268_s20 = int_to_ptr.vmem [resolvable:$true] %s8267_s20  ;;  %s16662_s22 = int_to_ptr.vmem [resolvable:$true] %s8279_s22 }
0x317e   :  { %s12306_s6 = scalar_lea.vmem %s8268_s20, 256  ;;  %p12311_p9 = scmp.lt.s32.totalorder %s8268_s20, %s8268_s20 }
0x317f   :  { %p12307_p8 = scmp.ne.s32.totalorder %s8268_s20, %s12306_s6  ;;  %p12312_p10 = scmp.lt.s32.totalorder %s12306_s6, %s12306_s6 }
0x3181   :  { %p12313_p11 = por %p12312_p10, %p12311_p9 }
0x3183   :  { %p12314_p12 = pnand %p12313_p11, %p12307_p8 }
0x3185   :  { %12317 = shalt.err (!%p12314_p12)
}
0x3186   :  { %s12318_s11 = scalar_lea.hbm %s16732_s14, 256 }
0x3187   :  { %p12319_p13 = scmp.ne.s32.totalorder %s16732_s14, %s12318_s11  ;;  %p12322_p0 = scmp.lt.u32.totalorder %s12318_s11, %s16732_s14 }
0x3189   :  { %p12324_p1 = pnand %p12322_p0, %p12319_p13 }
0x318b   :  { %12327 = shalt.err (!%p12324_p1)
}
0x318c   :  { %8273 = dma.vmem_to_hbm [thread:$0]  %s8268_s20, 256, %s16732_s14, [#allocation5], %s12386_s16, %s12386_s16, %s12387_s17  }
0x318d   :  { %s12328_s10 = scalar_lea.vmem %s16662_s22, 256  ;;  %p12333_p3 = scmp.lt.s32.totalorder %s16662_s22, %s16662_s22 }
0x318e   :  { %p12329_p2 = scmp.ne.s32.totalorder %s16662_s22, %s12328_s10  ;;  %p12334_p4 = scmp.lt.s32.totalorder %s12328_s10, %s12328_s10 }
0x3190   :  { %p12335_p5 = por %p12334_p4, %p12333_p3 }
0x3192   :  { %p12336_p6 = pnand %p12335_p5, %p12329_p2 }
0x3194   :  { %12339 = shalt.err (!%p12336_p6)
}
0x3195   :  { %s12340_s27 = scalar_lea.hbm %s16733_s15, 256 }
0x3196   :  { %p12341_p7 = scmp.ne.s32.totalorder %s16733_s15, %s12340_s27  ;;  %p12344_p8 = scmp.lt.u32.totalorder %s12340_s27, %s16733_s15 }
0x3198   :  { %p12346_p9 = pnand %p12344_p8, %p12341_p7 }
0x319a   :  { %12349 = shalt.err (!%p12346_p9)
}
0x319b   :  { %8285 = dma.vmem_to_hbm [thread:$0]  %s16662_s22, 256, %s16733_s15, [#allocation8], %s12386_s16, %s12386_s16, %s12387_s17  }
0x319c   :  { %v12283_v5 = vld [vmem:[%s16727_s9] sm:$0xff]  ;;  %s12390_s4 = smov [#allocation2]  }
0x319d   :  { %v7213_v29 = vadd.f32 %v12283_v5, %v16140_v40  ;;  %s8243_s20 = sshll.u32 %s12390_s4, 4  ;;  %s8244_s20 = int_to_ptr.vmem [resolvable:$true] %s8243_s20 }
0x319e   :  { %s12350_s21 = scalar_lea.vmem %s8244_s20, 768  ;;  %p12355_p11 = scmp.lt.s32.totalorder %s8244_s20, %s8244_s20 }
0x319f   :  { %p12351_p10 = scmp.ne.s32.totalorder %s8244_s20, %s12350_s21  ;;  %p12356_p12 = scmp.lt.s32.totalorder %s12350_s21, %s12350_s21 }
0x31a1   :  { %p12357_p13 = por %p12356_p12, %p12355_p11 }
0x31a3   :  { %p12358_p0 = pnand %p12357_p13, %p12351_p10 }
0x3245   :  { %v8180_v8 = vpop.f32.mrb[236].mxu1 }
0x3246   :  { %v8181_v10 = vadd.f32 %v8180_v8, %v7213_v29  ;;  %v11544_v23 = vpop.f32.mrb[237].mxu1 }
0x3247   :  { %v8183_v27 = vpop.f32.mrb[238].mxu1 }
0x3248   :  { %11886 = vtanh.f32 %v8181_v10  ;;  %v11545_v36 = vpop.f32.mrb[239].mxu1 }
0x3252   :  { %v11887_v59 = vpop.eup %11886 }
0x3253   :  { %8188 = vst [vmem:[#allocation2 + $0x28] sm:$0xff] %v11887_v59 }
0x3254   :  { %12361 = shalt.err (!%p12358_p0)
}
0x3255   :  { %s12362_s22 = scalar_lea.hbm %s16730_s12, 768 }
0x3256   :  { %p12363_p1 = scmp.ne.s32.totalorder %s16730_s12, %s12362_s22  ;;  %p12366_p2 = scmp.lt.u32.totalorder %s12362_s22, %s16730_s12 }
0x3258   :  { %p12368_p3 = pnand %p12366_p2, %p12363_p1 }
0x325a   :  { %12371 = shalt.err (!%p12368_p3)
}
0x325b   :  { %8249 = dma.vmem_to_hbm [thread:$0]  %s8244_s20, 768, %s16730_s12, [#allocation3], %s12386_s16, %s12386_s16, %s12387_s17  }
0x325c   :  { %12372 = dma.done.wait [#allocation3], 768  }
0x325d   :  { %12373 = vsyncadd [#allocation3], 4294966528 }
0x325e   :  { %12374 = dma.done.wait [#allocation5], 1024  }
0x325f   :  { %12375 = vsyncadd [#allocation5], 4294966272 }
0x3260   :  { %12376 = dma.done.wait [#allocation8], 256  }
0x3261   :  { %12377 = vsyncadd [#allocation8], 4294967040 }
0x3262   :  { %8298 = vsyncpa [#allocation3], 1 }
0x3263   :  { %8299 = vsyncpa [#allocation5], 1 }
0x3264   :  { %8300 = vsyncpa [#allocation8], 1 }

</bundles_post_ra>
